<compile_context>
chip_gen: v5e
topology: v5e:2x2
jax: 0.10.0
libtpu: 0.0.40
codegen_flags: <defaults>
</compile_context>

<pallas_src>
import math
import functools

import jax
import jax.numpy as jnp
from jax import lax
from jax.experimental import pallas as pl
from jax.experimental.pallas import tpu as pltpu

NEG_INF = -1e9


def _ceil_to(x, m):
    return ((x + m - 1) // m) * m


# ----------------------------------------------------------------------------
# In-kernel helpers
# ----------------------------------------------------------------------------
def _layernorm(x, w, b, eps=1e-5):
    # x: (R, E); w, b: (1, E). PyTorch LayerNorm (biased variance, eps=1e-5).
    mu = jnp.mean(x, axis=-1, keepdims=True)
    xc = x - mu
    var = jnp.mean(xc * xc, axis=-1, keepdims=True)
    return xc * lax.rsqrt(var + eps) * w + b


# ----------------------------------------------------------------------------
# Pallas kernel: pre-LN transformer encoder stack + output head
# ----------------------------------------------------------------------------
def _encoder_head_kernel(n_heads, seq_p,
                         tokens_ref, kbias_ref, vecE_ref, vec128_ref,
                         w128_ref, wE_ref, headW_ref, headB_ref,
                         out_ref, ctx_ref, cls_ref):
    bf16 = jnp.bfloat16
    f32 = jnp.float32

    BtSp, E = tokens_ref.shape              # (Bt*Sp, E) token slab for this block
    Sp = seq_p
    Bt = BtSp // Sp
    nH = n_heads
    hd = E // nH
    L = vecE_ref.shape[0]
    nHSp = nH * Sp
    CN = wE_ref.shape[1] - E                # lane-padded QKV / FFN hidden width
    CW = headW_ref.shape[0] - E             # lane-padded head hidden width

    # ---- hoisted, layer-invariant prep (computed once, reused every layer) ---
    # Head selector hm[h, d] = 1.0 iff feature d belongs to head h; built
    # in-kernel from iota (no DMA, no integer division).
    col = lax.broadcasted_iota(jnp.int32, (nH, E), 1)
    row = lax.broadcasted_iota(jnp.int32, (nH, E), 0)
    hm = jnp.logical_and(col >= row * hd, col < (row + 1) * hd).astype(f32)
    hm_blk_f32 = [jnp.broadcast_to(hm[hh:hh + 1, :], (Sp, E)) for hh in range(nH)]
    hm_blk_bf = [m.astype(bf16) for m in hm_blk_f32]
    # Per-batch additive key bias, broadcast ONCE over all (head, query) rows.
    bias_rows = [jnp.broadcast_to(kbias_ref[b], (nHSp, Sp)) for b in range(Bt)]

    x = tokens_ref[...]                     # (Bt*Sp, E) f32 residual stream

    for l in range(L):                      # static loop over layers (L small)
        vl = vecE_ref[l]                    # (8, E) packed E-width vectors
        ln1w, ln1b = vl[0:1, :], vl[1:2, :]
        ln2w, ln2b = vl[2:3, :], vl[3:4, :]
        outb, ff2b = vl[4:5, :], vl[5:6, :]
        bl = vec128_ref[l]                  # (2, CN) packed wide biases
        qkvb, ff1b = bl[0:1, :], bl[1:2, :]

        # ---------------- pre-LN multi-head self-attention ----------------
        hln = _layernorm(x, ln1w, ln1b)
        qkv = jnp.dot(hln.astype(bf16), w128_ref[l, 0],
                      preferred_element_type=f32) + qkvb      # (Bt*Sp, CN)
        # 1/sqrt(hd) is already folded into the Q columns of w128 / vec128.

        for b in range(Bt):                 # static loop over batch block
            rows = slice(b * Sp, (b + 1) * Sp)   # 8/16-aligned sublane slice
            q_b = qkv[rows, 0:E].astype(bf16)
            k_b = qkv[rows, E:2 * E].astype(bf16)
            v_b = qkv[rows, 2 * E:3 * E].astype(bf16)

            # Head-flattened queries: rows ordered (head, query); masking each
            # tiled copy keeps only that head's feature columns (exact in bf16).
            q_t = jnp.concatenate([q_b * hm_blk_bf[hh] for hh in range(nH)],
                                  axis=0)                     # (nH*Sp, E)

            # All heads' scores in one matmul; only the small (Sp, E) k_b is
            # transposed by the contraction, never the large q_t operand.
            sc = lax.dot_general(q_t, k_b, (((1,), (1,)), ((), ())),
                                 preferred_element_type=f32) + bias_rows[b]

            # Row softmax over keys == exact per-(head, query) softmax.
            m = jnp.max(sc, axis=-1, keepdims=True)
            p = jnp.exp(sc - m)                               # (nH*Sp, Sp) f32
            inv = pl.reciprocal(jnp.sum(p, axis=-1, keepdims=True), approx=True)
            ctxh = jnp.dot(p.astype(bf16), v_b,
                           preferred_element_type=f32) * inv  # (nH*Sp, E)

            # Fold heads back to (Sp, E): keep head hh's columns of row-block hh.
            ctx_b = ctxh[0:Sp, :] * hm_blk_f32[0]
            for hh in range(1, nH):
                ctx_b = ctx_b + ctxh[hh * Sp:(hh + 1) * Sp, :] * hm_blk_f32[hh]
            ctx_ref[rows, :] = ctx_b                          # VMEM scratch slab

        # ONE K=E out-proj matmul per layer on the whole slab.
        x = x + jnp.dot(ctx_ref[...].astype(bf16), wE_ref[l, 0:E, :],
                        preferred_element_type=f32) + outb

        # ---------------- pre-LN feed-forward (slab level) -----------------
        hfn = _layernorm(x, ln2w, ln2b)
        f = jnp.maximum(jnp.dot(hfn.astype(bf16), w128_ref[l, 1],
                                preferred_element_type=f32) + ff1b, 0.0)
        x = x + jnp.dot(f.astype(bf16), wE_ref[l, E:E + CN, :],
                        preferred_element_type=f32) + ff2b

    # ---------------- output head on the Bt '[next]' tokens -----------------
    for b in range(Bt):
        cls_ref[b:b + 1, :] = x[b * Sp:b * Sp + 1, :]
    cls = cls_ref[...]                                        # (Bt, E)
    hdn = jnp.maximum(jnp.dot(cls.astype(bf16), headW_ref[0:E, :],
                              preferred_element_type=f32) + headB_ref[0:1, :],
                      0.0)
    pred = jnp.dot(hdn.astype(bf16), headW_ref[E:E + CW, :],
                   preferred_element_type=f32) + headB_ref[1:2, :]
    out_ref[...] = pred.reshape((1, Bt, CW))   # lane-dense (1, Bt, CW) store


# ----------------------------------------------------------------------------
# Glue: token construction (plain JAX)
# ----------------------------------------------------------------------------
def _build_tokens(params, state_hist, action_hist, mask_hist):
    """Unpadded tokens (B, S, E) and key-padding flags (B, S) (True = masked)."""
    B, H, D = state_hist.shape
    E = params["state_w"].shape[0]

    # state_fc: Linear(1, E)  ->  outer product with the weight column
    st_tok = state_hist[..., None] * params["state_w"] + params["state_b"]
    # action_fc: Linear(A, E)
    act_tok = action_hist @ params["action_w"] + params["action_b"]
    step_tok = jnp.concatenate([st_tok, act_tok[:, :, None, :]], axis=2)

    # role + (reversed) time embeddings
    step_tok = step_tok + params["role_enc"][None, None]
    step_tok = step_tok + params["time_pos"][::-1][None, :, None, :]

    if mask_hist is not None:
        rel = params["rel_enc"][mask_hist.astype(jnp.int32)]          # (B,H,D,E)
        rel_act = jnp.broadcast_to(params["rel_enc"][1][None, None, None, :],
                                   (B, H, 1, E))
        step_tok = step_tok + jnp.concatenate([rel, rel_act], axis=2)
        pad_state = jnp.logical_not(mask_hist)
        pad = jnp.concatenate(
            [pad_state, jnp.zeros((B, H, 1), jnp.bool_)], axis=2
        ).reshape(B, H * (D + 1))
    else:
        pad = jnp.zeros((B, H * (D + 1)), jnp.bool_)
    pad = jnp.concatenate([jnp.zeros((B, 1), jnp.bool_), pad], axis=1)  # (B, S)

    tokens = step_tok.reshape(B, H * (D + 1), E)
    next_tok = jnp.broadcast_to(params["next_token"], (B, 1, E))
    tokens = jnp.concatenate([next_tok, tokens], axis=1)                # (B,S,E)
    return tokens.astype(jnp.float32), pad


def _default_batch_block(B):
    # v7x has two TensorCores per chip: split the batch across them via the
    # parallel grid.  v5e/v6e have one TC: a single grid step avoids the
    # per-step overhead and keeps the slab-level matmuls as large as possible.
    try:
        kind = jax.devices()[0].device_kind.lower()
        if "v7" in kind and B % 2 == 0:
            return B // 2
    except Exception:
        pass
    return B


# ----------------------------------------------------------------------------
# Wrapper: padding, parameter packing, pallas_call
# ----------------------------------------------------------------------------
def masked_dynamics_forward(params, state_hist, action_hist, mask_hist=None,
                            *, batch_block=None):
    B, H, D = state_hist.shape
    nH = params["n_heads"]
    f32 = jnp.float32
    bf16 = jnp.bfloat16

    tokens, pad = _build_tokens(params, state_hist, action_hist, mask_hist)
    _, S, E = tokens.shape
    L = params["qkv_w"].shape[0]
    FF = params["ff1_w"].shape[-1]
    hd = E // nH

    if batch_block is None:
        batch_block = _default_batch_block(B)
    assert B % batch_block == 0
    Bt = batch_block
    nblk = B // Bt

    # ---- pad sequence to a multiple of 16 sublanes (f32 & bf16 friendly);
    # padded rows are masked out as keys and never read as queries.
    Sp = _ceil_to(S, 16)
    if Sp != S:
        tokens = jnp.pad(tokens, ((0, 0), (0, Sp - S), (0, 0)))
        pad = jnp.concatenate([pad, jnp.ones((B, Sp - S), jnp.bool_)], axis=1)
    tokens_flat = tokens.reshape(B * Sp, E).astype(f32)
    kbias = jnp.where(pad, NEG_INF, 0.0).astype(f32).reshape(B, 1, Sp)

    # ---- pack parameters into a handful of VMEM inputs (fewer tiny DMAs) ----
    scale = 1.0 / math.sqrt(hd)
    qscale = jnp.concatenate([jnp.full((E,), scale, f32),
                              jnp.ones((2 * E,), f32)])
    qkv_w = params["qkv_w"] * qscale          # fold attention scale into Q cols
    qkv_b = params["qkv_b"] * qscale

    CN = max(_ceil_to(3 * E, 128), _ceil_to(FF, 128))  # lane-padded hidden width
    CW = max(_ceil_to(4 * E, 128), _ceil_to(D, 128))   # lane-padded head width

    def pad_last(a, n):
        return jnp.pad(a, [(0, 0)] * (a.ndim - 1) + [(0, n - a.shape[-1])])

    vecE = jnp.concatenate(
        [params["ln1_w"], params["ln1_b"], params["ln2_w"], params["ln2_b"],
         params["out_b"], params["ff2_b"], jnp.zeros((L, 2, E), f32)], axis=1)
    vec128 = jnp.concatenate([pad_last(qkv_b, CN),
                              pad_last(params["ff1_b"], CN)], axis=1)
    w128 = jnp.stack([pad_last(qkv_w, CN),
                      pad_last(params["ff1_w"], CN)], axis=1).astype(bf16)
    ff2_wp = jnp.pad(params["ff2_w"], ((0, 0), (0, CN - FF), (0, 0)))
    wE = jnp.concatenate([params["out_w"], ff2_wp], axis=1).astype(bf16)

    headW = jnp.zeros((E + CW, CW), f32)
    headW = headW.at[:E, :4 * E].set(params["head_w1"])
    headW = headW.at[E:E + 4 * E, :D].set(params["head_w2"])
    headW = headW.astype(bf16)
    headB = jnp.zeros((2, CW), f32)
    headB = headB.at[0, :4 * E].set(params["head_b1"][0])
    headB = headB.at[1, :D].set(params["head_b2"][0])

    args = (tokens_flat, kbias, vecE, vec128, w128, wE, headW, headB)

    def _const_spec(a):
        nd = a.ndim
        return pl.BlockSpec(a.shape, lambda i, _nd=nd: (0,) * _nd)

    in_specs = [
        pl.BlockSpec((Bt * Sp, E), lambda i: (i, 0)),       # per-block tokens
        pl.BlockSpec((Bt, 1, Sp), lambda i: (i, 0, 0)),     # per-block key bias
        _const_spec(vecE), _const_spec(vec128), _const_spec(w128),
        _const_spec(wE), _const_spec(headW), _const_spec(headB),
    ]
    out_specs = pl.BlockSpec((1, Bt, CW), lambda i: (i, 0, 0))

    # Advisory cost estimate so XLA can overlap the call with the token glue.
    BSp, nHSp = B * Sp, nH * Sp
    flops = int(L * (2 * BSp * E * CN + B * 4 * nHSp * Sp * E
                     + 2 * BSp * E * E + 2 * BSp * E * CN + 2 * BSp * CN * E)
                + 2 * B * E * CW + 2 * B * CW * CW)
    transcendentals = int(L * B * nHSp * Sp + L * BSp + L * B * nHSp)
    bytes_accessed = int(sum(int(a.size) * a.dtype.itemsize for a in args)
                         + nblk * Bt * CW * 4)

    kernel = functools.partial(_encoder_head_kernel, nH, Sp)
    out = pl.pallas_call(
        kernel,
        grid=(nblk,),
        out_shape=jax.ShapeDtypeStruct((nblk, Bt, CW), f32),
        in_specs=in_specs,
        out_specs=out_specs,
        scratch_shapes=[pltpu.VMEM((Bt * Sp, E), f32),   # per-batch ctx slab
                        pltpu.VMEM((Bt, E), f32)],       # '[next]' token gather
        compiler_params=pltpu.CompilerParams(
            dimension_semantics=("parallel",)),
        cost_estimate=pl.CostEstimate(flops=flops,
                                      transcendentals=transcendentals,
                                      bytes_accessed=bytes_accessed),
    )(*args)

    pred = out.reshape(B, CW)[:, :D]
    return state_hist[:, -1] + pred


# ----------------------------------------------------------------------------
# Pure-JAX f32 reference (standard per-head attention, unpadded)
# ----------------------------------------------------------------------------
def _reference_forward(params, state_hist, action_hist, mask_hist):
    tokens, pad = _build_tokens(params, state_hist, action_hist, mask_hist)
    B, S, E = tokens.shape
    L = params["qkv_w"].shape[0]
    nH = params["n_heads"]
    hd = E // nH
    scale = 1.0 / math.sqrt(hd)
    key_bias = jnp.where(pad, NEG_INF, 0.0)[:, None, None, :]      # (B,1,1,S)

    def ln(x, w, b, eps=1e-5):
        mu = x.mean(-1, keepdims=True)
        xc = x - mu
        var = (xc * xc).mean(-1, keepdims=True)
        return xc / jnp.sqrt(var + eps) * w + b

    x = tokens
    for l in range(L):
        h = ln(x, params["ln1_w"][l, 0], params["ln1_b"][l, 0])
        qkv = h @ params["qkv_w"][l] + params["qkv_b"][l, 0]
        q, k, v = jnp.split(qkv, 3, axis=-1)
        q = q.reshape(B, S, nH, hd).transpose(0, 2, 1, 3)
        k = k.reshape(B, S, nH, hd).transpose(0, 2, 1, 3)
        v = v.reshape(B, S, nH, hd).transpose(0, 2, 1, 3)
        sc = jnp.einsum("bhqd,bhkd->bhqk", q, k) * scale + key_bias
        p = jax.nn.softmax(sc, axis=-1)
        a = jnp.einsum("bhqk,bhkd->bhqd", p, v).transpose(0, 2, 1, 3).reshape(B, S, E)
        x = x + a @ params["out_w"][l] + params["out_b"][l, 0]
        h2 = ln(x, params["ln2_w"][l, 0], params["ln2_b"][l, 0])
        f = jnp.maximum(h2 @ params["ff1_w"][l] + params["ff1_b"][l, 0], 0.0)
        x = x + f @ params["ff2_w"][l] + params["ff2_b"][l, 0]

    cls = x[:, 0]
    hdn = jnp.maximum(cls @ params["head_w1"] + params["head_b1"][0], 0.0)
    pred = hdn @ params["head_w2"] + params["head_b2"][0]
    return state_hist[:, -1] + pred


# ----------------------------------------------------------------------------
# Deterministic parameter init (shapes follow the PyTorch module's __init__).
# PyTorch Linear weights are stored pre-transposed as (in, out) so the kernel
# computes x @ W directly.
# ----------------------------------------------------------------------------
def init_params(key, D, A, E, FF, n_heads, n_layers, H, std=0.05):
    ks = iter(jax.random.split(key, 16))

    def nrm(shape):
        return (std * jax.random.normal(next(ks), shape)).astype(jnp.float32)

    z = lambda shape: jnp.zeros(shape, jnp.float32)
    o = lambda shape: jnp.ones(shape, jnp.float32)

    return dict(
        n_heads=n_heads,
        # token embedding
        state_w=nrm((E,)),               state_b=z((E,)),
        action_w=nrm((A, E)),            action_b=z((E,)),
        next_token=nrm((1, E)),
        time_pos=nrm((H, E)),
        role_enc=nrm((D + 1, E)),
        rel_enc=nrm((2, E)),
        # transformer layers (stacked over n_layers)
        ln1_w=o((n_layers, 1, E)),       ln1_b=z((n_layers, 1, E)),
        qkv_w=nrm((n_layers, E, 3 * E)), qkv_b=z((n_layers, 1, 3 * E)),
        out_w=nrm((n_layers, E, E)),     out_b=z((n_layers, 1, E)),
        ln2_w=o((n_layers, 1, E)),       ln2_b=z((n_layers, 1, E)),
        ff1_w=nrm((n_layers, E, FF)),    ff1_b=z((n_layers, 1, FF)),
        ff2_w=nrm((n_layers, FF, E)),    ff2_b=z((n_layers, 1, E)),
        # output head
        head_w1=nrm((E, 4 * E)),         head_b1=z((1, 4 * E)),
        head_w2=nrm((4 * E, D)),         head_b2=z((1, D)),
    )


# ----------------------------------------------------------------------------
if __name__ == "__main__":
    D, A, E, FF = 4, 3, 32, 64          # state_dim, action_dim, embed, ffn
    NH, NL, H, B = 4, 2, 8, 2           # heads, layers, window_H, batch

    key = jax.random.PRNGKey(0)
    kp, ks, ka, km = jax.random.split(key, 4)

    params = init_params(kp, D, A, E, FF, NH, NL, H)
    state_hist = jax.random.normal(ks, (B, H, D), jnp.float32)
    action_hist = jax.random.normal(ka, (B, H, A), jnp.float32)
    mask_hist = jax.random.bernoulli(km, 0.8, (B, H, D))

    ref = jax.block_until_ready(
        _reference_forward(params, state_hist, action_hist, mask_hist))

    # Path 1: single grid step (whole batch per step) -- recommended v5e/v6e.
    out1 = jax.block_until_ready(
        masked_dynamics_forward(params, state_hist, action_hist, mask_hist,
                                batch_block=B))
    assert out1.shape == (B, D)
    assert bool(jnp.all(jnp.isfinite(out1)))
    assert bool(jnp.allclose(out1, ref, atol=1e-2, rtol=2e-2)), (out1, ref)

    # Path 2: per-batch parallel grid -- shards across both TensorCores on v7x.
    out2 = jax.block_until_ready(
        masked_dynamics_forward(params, state_hist, action_hist, mask_hist,
                                batch_block=1))
    assert out2.shape == (B, D)
    assert bool(jnp.all(jnp.isfinite(out2)))
    assert bool(jnp.allclose(out2, ref, atol=1e-2, rtol=2e-2)), (out2, ref)

    print("KERNEL_OK")
</pallas_src>

<mosaic_0001>
module attributes {stable_mosaic.version = 11 : i64} {
  func.func @_encoder_head_kernel(%arg0: i32, %arg1: memref<96x32xf32, #tpu.memory_space<vmem>>, %arg2: memref<2x1x48xf32, #tpu.memory_space<vmem>>, %arg3: memref<2x8x32xf32, #tpu.memory_space<vmem>>, %arg4: memref<2x2x128xf32, #tpu.memory_space<vmem>>, %arg5: memref<2x2x32x128xbf16, #tpu.memory_space<vmem>>, %arg6: memref<2x160x32xbf16, #tpu.memory_space<vmem>>, %arg7: memref<160x128xbf16, #tpu.memory_space<vmem>>, %arg8: memref<2x128xf32, #tpu.memory_space<vmem>>, %arg9: memref<1x2x128xf32, #tpu.memory_space<vmem>>, %arg10: memref<96x32xf32, #tpu.memory_space<vmem>>, %arg11: memref<2x32xf32, #tpu.memory_space<vmem>>) attributes {dimension_semantics = [#tpu.dimension_semantics<parallel>], iteration_bounds = array<i64: 1>, scalar_prefetch = 0 : i64, scratch_operands = 2 : i64, tpu.core_type = #tpu.core_type<tc>, window_params = [{transform_indices = @transform_0, window_bounds = array<i64: 96, 32>}, {transform_indices = @transform_1, window_bounds = array<i64: 2, 1, 48>}, {pipeline_mode = #tpu.pipeline_mode<synchronous>, transform_indices = @transform_2, window_bounds = array<i64: 2, 8, 32>}, {pipeline_mode = #tpu.pipeline_mode<synchronous>, transform_indices = @transform_3, window_bounds = array<i64: 2, 2, 128>}, {pipeline_mode = #tpu.pipeline_mode<synchronous>, transform_indices = @transform_4, window_bounds = array<i64: 2, 2, 32, 128>}, {pipeline_mode = #tpu.pipeline_mode<synchronous>, transform_indices = @transform_5, window_bounds = array<i64: 2, 160, 32>}, {pipeline_mode = #tpu.pipeline_mode<synchronous>, transform_indices = @transform_6, window_bounds = array<i64: 160, 128>}, {pipeline_mode = #tpu.pipeline_mode<synchronous>, transform_indices = @transform_7, window_bounds = array<i64: 2, 128>}, {transform_indices = @transform_8, window_bounds = array<i64: 1, 2, 128>}]} {
    %0 = tpu.iota {dimensions = array<i32: 1>} : vector<4x32xi32>
    %1 = tpu.iota {dimensions = array<i32: 0>} : vector<4x32xi32>
    %c8_i32 = arith.constant 8 : i32
    %2 = vector.broadcast %c8_i32 : i32 to vector<4x32xi32>
    %3 = arith.muli %1, %2 : vector<4x32xi32>
    %4 = arith.cmpi sge, %0, %3 : vector<4x32xi32>
    %c1_i32 = arith.constant 1 : i32
    %5 = vector.broadcast %c1_i32 : i32 to vector<4x32xi32>
    %6 = arith.addi %1, %5 : vector<4x32xi32>
    %c8_i32_0 = arith.constant 8 : i32
    %7 = vector.broadcast %c8_i32_0 : i32 to vector<4x32xi32>
    %8 = arith.muli %6, %7 : vector<4x32xi32>
    %9 = arith.cmpi slt, %0, %8 : vector<4x32xi32>
    %10 = arith.andi %4, %9 : vector<4x32xi1>
    %11 = arith.extui %10 : vector<4x32xi1> to vector<4x32xi32>
    %12 = arith.sitofp %11 : vector<4x32xi32> to vector<4x32xf32>
    %13 = vector.extract_strided_slice %12 {offsets = [0, 0], sizes = [1, 32], strides = [1, 1]} : vector<4x32xf32> to vector<1x32xf32>
    %14 = vector.shape_cast %13 : vector<1x32xf32> to vector<1x32xf32>
    %15 = vector.broadcast %14 : vector<1x32xf32> to vector<48x32xf32>
    %16 = vector.extract_strided_slice %12 {offsets = [1, 0], sizes = [1, 32], strides = [1, 1]} : vector<4x32xf32> to vector<1x32xf32>
    %17 = vector.shape_cast %16 : vector<1x32xf32> to vector<1x32xf32>
    %18 = vector.broadcast %17 : vector<1x32xf32> to vector<48x32xf32>
    %19 = vector.extract_strided_slice %12 {offsets = [2, 0], sizes = [1, 32], strides = [1, 1]} : vector<4x32xf32> to vector<1x32xf32>
    %20 = vector.shape_cast %19 : vector<1x32xf32> to vector<1x32xf32>
    %21 = vector.broadcast %20 : vector<1x32xf32> to vector<48x32xf32>
    %22 = vector.extract_strided_slice %12 {offsets = [3, 0], sizes = [1, 32], strides = [1, 1]} : vector<4x32xf32> to vector<1x32xf32>
    %23 = vector.shape_cast %22 : vector<1x32xf32> to vector<1x32xf32>
    %24 = vector.broadcast %23 : vector<1x32xf32> to vector<48x32xf32>
    %25 = arith.truncf %15 : vector<48x32xf32> to vector<48x32xbf16>
    %26 = arith.truncf %18 : vector<48x32xf32> to vector<48x32xbf16>
    %27 = arith.truncf %21 : vector<48x32xf32> to vector<48x32xbf16>
    %28 = arith.truncf %24 : vector<48x32xf32> to vector<48x32xbf16>
    %c0 = arith.constant 0 : index
    %c0_1 = arith.constant 0 : index
    %c0_2 = arith.constant 0 : index
    %29 = vector.load %arg2[%c0, %c0_1, %c0_2] : memref<2x1x48xf32, #tpu.memory_space<vmem>>, vector<1x1x48xf32>
    %30 = vector.shape_cast %29 : vector<1x1x48xf32> to vector<1x48xf32>
    %31 = vector.shape_cast %30 : vector<1x48xf32> to vector<1x48xf32>
    %32 = vector.broadcast %31 : vector<1x48xf32> to vector<192x48xf32>
    %c1 = arith.constant 1 : index
    %c0_3 = arith.constant 0 : index
    %c0_4 = arith.constant 0 : index
    %33 = vector.load %arg2[%c1, %c0_3, %c0_4] : memref<2x1x48xf32, #tpu.memory_space<vmem>>, vector<1x1x48xf32>
    %34 = vector.shape_cast %33 : vector<1x1x48xf32> to vector<1x48xf32>
    %35 = vector.shape_cast %34 : vector<1x48xf32> to vector<1x48xf32>
    %36 = vector.broadcast %35 : vector<1x48xf32> to vector<192x48xf32>
    %c0_5 = arith.constant 0 : index
    %c0_6 = arith.constant 0 : index
    %37 = vector.load %arg1[%c0_5, %c0_6] : memref<96x32xf32, #tpu.memory_space<vmem>>, vector<96x32xf32>
    %c0_7 = arith.constant 0 : index
    %c0_8 = arith.constant 0 : index
    %c0_9 = arith.constant 0 : index
    %38 = vector.load %arg3[%c0_7, %c0_8, %c0_9] : memref<2x8x32xf32, #tpu.memory_space<vmem>>, vector<1x8x32xf32>
    %39 = vector.shape_cast %38 : vector<1x8x32xf32> to vector<8x32xf32>
    %40 = vector.extract_strided_slice %39 {offsets = [0, 0], sizes = [1, 32], strides = [1, 1]} : vector<8x32xf32> to vector<1x32xf32>
    %41 = vector.extract_strided_slice %39 {offsets = [1, 0], sizes = [1, 32], strides = [1, 1]} : vector<8x32xf32> to vector<1x32xf32>
    %42 = vector.extract_strided_slice %39 {offsets = [2, 0], sizes = [1, 32], strides = [1, 1]} : vector<8x32xf32> to vector<1x32xf32>
    %43 = vector.extract_strided_slice %39 {offsets = [3, 0], sizes = [1, 32], strides = [1, 1]} : vector<8x32xf32> to vector<1x32xf32>
    %44 = vector.extract_strided_slice %39 {offsets = [4, 0], sizes = [1, 32], strides = [1, 1]} : vector<8x32xf32> to vector<1x32xf32>
    %45 = vector.extract_strided_slice %39 {offsets = [5, 0], sizes = [1, 32], strides = [1, 1]} : vector<8x32xf32> to vector<1x32xf32>
    %c0_10 = arith.constant 0 : index
    %c0_11 = arith.constant 0 : index
    %c0_12 = arith.constant 0 : index
    %46 = vector.load %arg4[%c0_10, %c0_11, %c0_12] : memref<2x2x128xf32, #tpu.memory_space<vmem>>, vector<1x2x128xf32>
    %47 = vector.shape_cast %46 : vector<1x2x128xf32> to vector<2x128xf32>
    %48 = vector.extract_strided_slice %47 {offsets = [0, 0], sizes = [1, 128], strides = [1, 1]} : vector<2x128xf32> to vector<1x128xf32>
    %49 = vector.extract_strided_slice %47 {offsets = [1, 0], sizes = [1, 128], strides = [1, 1]} : vector<2x128xf32> to vector<1x128xf32>
    %cst = arith.constant dense<0.000000e+00> : vector<96xf32>
    %50 = vector.multi_reduction <add>, %37, %cst [1] : vector<96x32xf32> to vector<96xf32>
    %51 = vector.shape_cast %50 : vector<96xf32> to vector<96x1xf32>
    %cst_13 = arith.constant 3.200000e+01 : f32
    %52 = vector.broadcast %cst_13 : f32 to vector<96x1xf32>
    %53 = arith.divf %51, %52 : vector<96x1xf32>
    %54 = vector.broadcast %53 : vector<96x1xf32> to vector<96x32xf32>
    %55 = arith.subf %37, %54 : vector<96x32xf32>
    %56 = arith.mulf %55, %55 : vector<96x32xf32>
    %cst_14 = arith.constant dense<0.000000e+00> : vector<96xf32>
    %57 = vector.multi_reduction <add>, %56, %cst_14 [1] : vector<96x32xf32> to vector<96xf32>
    %58 = vector.shape_cast %57 : vector<96xf32> to vector<96x1xf32>
    %cst_15 = arith.constant 3.200000e+01 : f32
    %59 = vector.broadcast %cst_15 : f32 to vector<96x1xf32>
    %60 = arith.divf %58, %59 : vector<96x1xf32>
    %cst_16 = arith.constant 9.99999974E-6 : f32
    %61 = vector.broadcast %cst_16 : f32 to vector<96x1xf32>
    %62 = arith.addf %60, %61 : vector<96x1xf32>
    %63 = math.rsqrt %62 : vector<96x1xf32>
    %64 = vector.broadcast %63 : vector<96x1xf32> to vector<96x32xf32>
    %65 = arith.mulf %55, %64 : vector<96x32xf32>
    %66 = vector.broadcast %40 : vector<1x32xf32> to vector<96x32xf32>
    %67 = arith.mulf %65, %66 : vector<96x32xf32>
    %68 = vector.broadcast %41 : vector<1x32xf32> to vector<96x32xf32>
    %69 = arith.addf %67, %68 : vector<96x32xf32>
    %70 = arith.truncf %69 : vector<96x32xf32> to vector<96x32xbf16>
    %c0_17 = arith.constant 0 : index
    %c0_18 = arith.constant 0 : index
    %c0_19 = arith.constant 0 : index
    %c0_20 = arith.constant 0 : index
    %71 = vector.load %arg5[%c0_17, %c0_18, %c0_19, %c0_20] : memref<2x2x32x128xbf16, #tpu.memory_space<vmem>>, vector<1x1x32x128xbf16>
    %72 = vector.shape_cast %71 : vector<1x1x32x128xbf16> to vector<32x128xbf16>
    %cst_21 = arith.constant dense<0.000000e+00> : vector<96x128xf32>
    %73 = tpu.matmul %70, %72, %cst_21 {dimension_numbers = #tpu.dot_dimension_numbers<[1], [0], [0], [1], [0, 0, 1, 1], [], []>} : vector<96x32xbf16>, vector<32x128xbf16>, vector<96x128xf32> -> vector<96x128xf32>
    %74 = vector.broadcast %48 : vector<1x128xf32> to vector<96x128xf32>
    %75 = arith.addf %73, %74 : vector<96x128xf32>
    %76 = vector.extract_strided_slice %75 {offsets = [0, 0], sizes = [48, 32], strides = [1, 1]} : vector<96x128xf32> to vector<48x32xf32>
    %77 = arith.truncf %76 : vector<48x32xf32> to vector<48x32xbf16>
    %78 = vector.extract_strided_slice %75 {offsets = [0, 32], sizes = [48, 32], strides = [1, 1]} : vector<96x128xf32> to vector<48x32xf32>
    %79 = arith.truncf %78 : vector<48x32xf32> to vector<48x32xbf16>
    %80 = vector.extract_strided_slice %75 {offsets = [0, 64], sizes = [48, 32], strides = [1, 1]} : vector<96x128xf32> to vector<48x32xf32>
    %81 = arith.truncf %80 : vector<48x32xf32> to vector<48x32xbf16>
    %82 = arith.mulf %77, %25 : vector<48x32xbf16>
    %83 = arith.mulf %77, %26 : vector<48x32xbf16>
    %84 = arith.mulf %77, %27 : vector<48x32xbf16>
    %85 = arith.mulf %77, %28 : vector<48x32xbf16>
    %86 = tpu.concatenate %82, %83, %84, %85 in 0 : vector<48x32xbf16>, vector<48x32xbf16>, vector<48x32xbf16>, vector<48x32xbf16> -> vector<192x32xbf16>
    %cst_22 = arith.constant dense<0.000000e+00> : vector<192x48xf32>
    %87 = tpu.matmul %86, %79, %cst_22 {dimension_numbers = #tpu.dot_dimension_numbers<[1], [1], [0], [0], [0, 0, 1, 0], [], []>} : vector<192x32xbf16>, vector<48x32xbf16>, vector<192x48xf32> -> vector<192x48xf32>
    %88 = arith.addf %87, %32 : vector<192x48xf32>
    %cst_23 = arith.constant dense<0xFF800000> : vector<192xf32>
    %89 = vector.multi_reduction <maximumf>, %88, %cst_23 [1] : vector<192x48xf32> to vector<192xf32>
    %90 = vector.shape_cast %89 : vector<192xf32> to vector<192x1xf32>
    %91 = vector.broadcast %90 : vector<192x1xf32> to vector<192x48xf32>
    %92 = arith.subf %88, %91 : vector<192x48xf32>
    %93 = math.exp %92 : vector<192x48xf32>
    %cst_24 = arith.constant dense<0.000000e+00> : vector<192xf32>
    %94 = vector.multi_reduction <add>, %93, %cst_24 [1] : vector<192x48xf32> to vector<192xf32>
    %95 = vector.shape_cast %94 : vector<192xf32> to vector<192x1xf32>
    %96 = tpu.reciprocal %95 {approx = true} : vector<192x1xf32> -> vector<192x1xf32>
    %97 = arith.truncf %93 : vector<192x48xf32> to vector<192x48xbf16>
    %cst_25 = arith.constant dense<0.000000e+00> : vector<192x32xf32>
    %98 = tpu.matmul %97, %81, %cst_25 {dimension_numbers = #tpu.dot_dimension_numbers<[1], [0], [0], [1], [0, 0, 1, 1], [], []>} : vector<192x48xbf16>, vector<48x32xbf16>, vector<192x32xf32> -> vector<192x32xf32>
    %99 = vector.broadcast %96 : vector<192x1xf32> to vector<192x32xf32>
    %100 = arith.mulf %98, %99 : vector<192x32xf32>
    %101 = vector.extract_strided_slice %100 {offsets = [0, 0], sizes = [48, 32], strides = [1, 1]} : vector<192x32xf32> to vector<48x32xf32>
    %102 = arith.mulf %101, %15 : vector<48x32xf32>
    %103 = vector.extract_strided_slice %100 {offsets = [48, 0], sizes = [48, 32], strides = [1, 1]} : vector<192x32xf32> to vector<48x32xf32>
    %104 = arith.mulf %103, %18 : vector<48x32xf32>
    %105 = arith.addf %102, %104 : vector<48x32xf32>
    %106 = vector.extract_strided_slice %100 {offsets = [96, 0], sizes = [48, 32], strides = [1, 1]} : vector<192x32xf32> to vector<48x32xf32>
    %107 = arith.mulf %106, %21 : vector<48x32xf32>
    %108 = arith.addf %105, %107 : vector<48x32xf32>
    %109 = vector.extract_strided_slice %100 {offsets = [144, 0], sizes = [48, 32], strides = [1, 1]} : vector<192x32xf32> to vector<48x32xf32>
    %110 = arith.mulf %109, %24 : vector<48x32xf32>
    %111 = arith.addf %108, %110 : vector<48x32xf32>
    %c0_26 = arith.constant 0 : index
    %c0_27 = arith.constant 0 : index
    %112 = vector.load %arg10[%c0_26, %c0_27] : memref<96x32xf32, #tpu.memory_space<vmem>>, vector<48x32xf32>
    tpu.vector_store %arg10[%c0_26, %c0_27], %111 {strides = array<i32>} : memref<96x32xf32, #tpu.memory_space<vmem>>, vector<48x32xf32>,
    %113 = vector.extract_strided_slice %75 {offsets = [48, 0], sizes = [48, 32], strides = [1, 1]} : vector<96x128xf32> to vector<48x32xf32>
    %114 = arith.truncf %113 : vector<48x32xf32> to vector<48x32xbf16>
    %115 = vector.extract_strided_slice %75 {offsets = [48, 32], sizes = [48, 32], strides = [1, 1]} : vector<96x128xf32> to vector<48x32xf32>
    %116 = arith.truncf %115 : vector<48x32xf32> to vector<48x32xbf16>
    %117 = vector.extract_strided_slice %75 {offsets = [48, 64], sizes = [48, 32], strides = [1, 1]} : vector<96x128xf32> to vector<48x32xf32>
    %118 = arith.truncf %117 : vector<48x32xf32> to vector<48x32xbf16>
    %119 = arith.mulf %114, %25 : vector<48x32xbf16>
    %120 = arith.mulf %114, %26 : vector<48x32xbf16>
    %121 = arith.mulf %114, %27 : vector<48x32xbf16>
    %122 = arith.mulf %114, %28 : vector<48x32xbf16>
    %123 = tpu.concatenate %119, %120, %121, %122 in 0 : vector<48x32xbf16>, vector<48x32xbf16>, vector<48x32xbf16>, vector<48x32xbf16> -> vector<192x32xbf16>
    %cst_28 = arith.constant dense<0.000000e+00> : vector<192x48xf32>
    %124 = tpu.matmul %123, %116, %cst_28 {dimension_numbers = #tpu.dot_dimension_numbers<[1], [1], [0], [0], [0, 0, 1, 0], [], []>} : vector<192x32xbf16>, vector<48x32xbf16>, vector<192x48xf32> -> vector<192x48xf32>
    %125 = arith.addf %124, %36 : vector<192x48xf32>
    %cst_29 = arith.constant dense<0xFF800000> : vector<192xf32>
    %126 = vector.multi_reduction <maximumf>, %125, %cst_29 [1] : vector<192x48xf32> to vector<192xf32>
    %127 = vector.shape_cast %126 : vector<192xf32> to vector<192x1xf32>
    %128 = vector.broadcast %127 : vector<192x1xf32> to vector<192x48xf32>
    %129 = arith.subf %125, %128 : vector<192x48xf32>
    %130 = math.exp %129 : vector<192x48xf32>
    %cst_30 = arith.constant dense<0.000000e+00> : vector<192xf32>
    %131 = vector.multi_reduction <add>, %130, %cst_30 [1] : vector<192x48xf32> to vector<192xf32>
    %132 = vector.shape_cast %131 : vector<192xf32> to vector<192x1xf32>
    %133 = tpu.reciprocal %132 {approx = true} : vector<192x1xf32> -> vector<192x1xf32>
    %134 = arith.truncf %130 : vector<192x48xf32> to vector<192x48xbf16>
    %cst_31 = arith.constant dense<0.000000e+00> : vector<192x32xf32>
    %135 = tpu.matmul %134, %118, %cst_31 {dimension_numbers = #tpu.dot_dimension_numbers<[1], [0], [0], [1], [0, 0, 1, 1], [], []>} : vector<192x48xbf16>, vector<48x32xbf16>, vector<192x32xf32> -> vector<192x32xf32>
    %136 = vector.broadcast %133 : vector<192x1xf32> to vector<192x32xf32>
    %137 = arith.mulf %135, %136 : vector<192x32xf32>
    %138 = vector.extract_strided_slice %137 {offsets = [0, 0], sizes = [48, 32], strides = [1, 1]} : vector<192x32xf32> to vector<48x32xf32>
    %139 = arith.mulf %138, %15 : vector<48x32xf32>
    %140 = vector.extract_strided_slice %137 {offsets = [48, 0], sizes = [48, 32], strides = [1, 1]} : vector<192x32xf32> to vector<48x32xf32>
    %141 = arith.mulf %140, %18 : vector<48x32xf32>
    %142 = arith.addf %139, %141 : vector<48x32xf32>
    %143 = vector.extract_strided_slice %137 {offsets = [96, 0], sizes = [48, 32], strides = [1, 1]} : vector<192x32xf32> to vector<48x32xf32>
    %144 = arith.mulf %143, %21 : vector<48x32xf32>
    %145 = arith.addf %142, %144 : vector<48x32xf32>
    %146 = vector.extract_strided_slice %137 {offsets = [144, 0], sizes = [48, 32], strides = [1, 1]} : vector<192x32xf32> to vector<48x32xf32>
    %147 = arith.mulf %146, %24 : vector<48x32xf32>
    %148 = arith.addf %145, %147 : vector<48x32xf32>
    %c48 = arith.constant 48 : index
    %c0_32 = arith.constant 0 : index
    %149 = vector.load %arg10[%c48, %c0_32] : memref<96x32xf32, #tpu.memory_space<vmem>>, vector<48x32xf32>
    tpu.vector_store %arg10[%c48, %c0_32], %148 {strides = array<i32>} : memref<96x32xf32, #tpu.memory_space<vmem>>, vector<48x32xf32>,
    %c0_33 = arith.constant 0 : index
    %c0_34 = arith.constant 0 : index
    %150 = vector.load %arg10[%c0_33, %c0_34] : memref<96x32xf32, #tpu.memory_space<vmem>>, vector<96x32xf32>
    %151 = arith.truncf %150 : vector<96x32xf32> to vector<96x32xbf16>
    %c0_35 = arith.constant 0 : index
    %c0_36 = arith.constant 0 : index
    %c0_37 = arith.constant 0 : index
    %152 = vector.load %arg6[%c0_35, %c0_36, %c0_37] : memref<2x160x32xbf16, #tpu.memory_space<vmem>>, vector<1x32x32xbf16>
    %153 = vector.shape_cast %152 : vector<1x32x32xbf16> to vector<32x32xbf16>
    %cst_38 = arith.constant dense<0.000000e+00> : vector<96x32xf32>
    %154 = tpu.matmul %151, %153, %cst_38 {dimension_numbers = #tpu.dot_dimension_numbers<[1], [0], [0], [1], [0, 0, 1, 1], [], []>} : vector<96x32xbf16>, vector<32x32xbf16>, vector<96x32xf32> -> vector<96x32xf32>
    %155 = arith.addf %37, %154 : vector<96x32xf32>
    %156 = vector.broadcast %44 : vector<1x32xf32> to vector<96x32xf32>
    %157 = arith.addf %155, %156 : vector<96x32xf32>
    %cst_39 = arith.constant dense<0.000000e+00> : vector<96xf32>
    %158 = vector.multi_reduction <add>, %157, %cst_39 [1] : vector<96x32xf32> to vector<96xf32>
    %159 = vector.shape_cast %158 : vector<96xf32> to vector<96x1xf32>
    %cst_40 = arith.constant 3.200000e+01 : f32
    %160 = vector.broadcast %cst_40 : f32 to vector<96x1xf32>
    %161 = arith.divf %159, %160 : vector<96x1xf32>
    %162 = vector.broadcast %161 : vector<96x1xf32> to vector<96x32xf32>
    %163 = arith.subf %157, %162 : vector<96x32xf32>
    %164 = arith.mulf %163, %163 : vector<96x32xf32>
    %cst_41 = arith.constant dense<0.000000e+00> : vector<96xf32>
    %165 = vector.multi_reduction <add>, %164, %cst_41 [1] : vector<96x32xf32> to vector<96xf32>
    %166 = vector.shape_cast %165 : vector<96xf32> to vector<96x1xf32>
    %cst_42 = arith.constant 3.200000e+01 : f32
    %167 = vector.broadcast %cst_42 : f32 to vector<96x1xf32>
    %168 = arith.divf %166, %167 : vector<96x1xf32>
    %cst_43 = arith.constant 9.99999974E-6 : f32
    %169 = vector.broadcast %cst_43 : f32 to vector<96x1xf32>
    %170 = arith.addf %168, %169 : vector<96x1xf32>
    %171 = math.rsqrt %170 : vector<96x1xf32>
    %172 = vector.broadcast %171 : vector<96x1xf32> to vector<96x32xf32>
    %173 = arith.mulf %163, %172 : vector<96x32xf32>
    %174 = vector.broadcast %42 : vector<1x32xf32> to vector<96x32xf32>
    %175 = arith.mulf %173, %174 : vector<96x32xf32>
    %176 = vector.broadcast %43 : vector<1x32xf32> to vector<96x32xf32>
    %177 = arith.addf %175, %176 : vector<96x32xf32>
    %178 = arith.truncf %177 : vector<96x32xf32> to vector<96x32xbf16>
    %c0_44 = arith.constant 0 : index
    %c1_45 = arith.constant 1 : index
    %c0_46 = arith.constant 0 : index
    %c0_47 = arith.constant 0 : index
    %179 = vector.load %arg5[%c0_44, %c1_45, %c0_46, %c0_47] : memref<2x2x32x128xbf16, #tpu.memory_space<vmem>>, vector<1x1x32x128xbf16>
    %180 = vector.shape_cast %179 : vector<1x1x32x128xbf16> to vector<32x128xbf16>
    %cst_48 = arith.constant dense<0.000000e+00> : vector<96x128xf32>
    %181 = tpu.matmul %178, %180, %cst_48 {dimension_numbers = #tpu.dot_dimension_numbers<[1], [0], [0], [1], [0, 0, 1, 1], [], []>} : vector<96x32xbf16>, vector<32x128xbf16>, vector<96x128xf32> -> vector<96x128xf32>
    %182 = vector.broadcast %49 : vector<1x128xf32> to vector<96x128xf32>
    %183 = arith.addf %181, %182 : vector<96x128xf32>
    %cst_49 = arith.constant 0.000000e+00 : f32
    %184 = vector.broadcast %cst_49 : f32 to vector<96x128xf32>
    %185 = arith.maximumf %183, %184 : vector<96x128xf32>
    %186 = arith.truncf %185 : vector<96x128xf32> to vector<96x128xbf16>
    %c0_50 = arith.constant 0 : index
    %c32 = arith.constant 32 : index
    %c0_51 = arith.constant 0 : index
    %187 = vector.load %arg6[%c0_50, %c32, %c0_51] : memref<2x160x32xbf16, #tpu.memory_space<vmem>>, vector<1x128x32xbf16>
    %188 = vector.shape_cast %187 : vector<1x128x32xbf16> to vector<128x32xbf16>
    %cst_52 = arith.constant dense<0.000000e+00> : vector<96x32xf32>
    %189 = tpu.matmul %186, %188, %cst_52 {dimension_numbers = #tpu.dot_dimension_numbers<[1], [0], [0], [1], [0, 0, 1, 1], [], []>} : vector<96x128xbf16>, vector<128x32xbf16>, vector<96x32xf32> -> vector<96x32xf32>
    %190 = arith.addf %157, %189 : vector<96x32xf32>
    %191 = vector.broadcast %45 : vector<1x32xf32> to vector<96x32xf32>
    %192 = arith.addf %190, %191 : vector<96x32xf32>
    %c1_53 = arith.constant 1 : index
    %c0_54 = arith.constant 0 : index
    %c0_55 = arith.constant 0 : index
    %193 = vector.load %arg3[%c1_53, %c0_54, %c0_55] : memref<2x8x32xf32, #tpu.memory_space<vmem>>, vector<1x8x32xf32>
    %194 = vector.shape_cast %193 : vector<1x8x32xf32> to vector<8x32xf32>
    %195 = vector.extract_strided_slice %194 {offsets = [0, 0], sizes = [1, 32], strides = [1, 1]} : vector<8x32xf32> to vector<1x32xf32>
    %196 = vector.extract_strided_slice %194 {offsets = [1, 0], sizes = [1, 32], strides = [1, 1]} : vector<8x32xf32> to vector<1x32xf32>
    %197 = vector.extract_strided_slice %194 {offsets = [2, 0], sizes = [1, 32], strides = [1, 1]} : vector<8x32xf32> to vector<1x32xf32>
    %198 = vector.extract_strided_slice %194 {offsets = [3, 0], sizes = [1, 32], strides = [1, 1]} : vector<8x32xf32> to vector<1x32xf32>
    %199 = vector.extract_strided_slice %194 {offsets = [4, 0], sizes = [1, 32], strides = [1, 1]} : vector<8x32xf32> to vector<1x32xf32>
    %200 = vector.extract_strided_slice %194 {offsets = [5, 0], sizes = [1, 32], strides = [1, 1]} : vector<8x32xf32> to vector<1x32xf32>
    %c1_56 = arith.constant 1 : index
    %c0_57 = arith.constant 0 : index
    %c0_58 = arith.constant 0 : index
    %201 = vector.load %arg4[%c1_56, %c0_57, %c0_58] : memref<2x2x128xf32, #tpu.memory_space<vmem>>, vector<1x2x128xf32>
    %202 = vector.shape_cast %201 : vector<1x2x128xf32> to vector<2x128xf32>
    %203 = vector.extract_strided_slice %202 {offsets = [0, 0], sizes = [1, 128], strides = [1, 1]} : vector<2x128xf32> to vector<1x128xf32>
    %204 = vector.extract_strided_slice %202 {offsets = [1, 0], sizes = [1, 128], strides = [1, 1]} : vector<2x128xf32> to vector<1x128xf32>
    %cst_59 = arith.constant dense<0.000000e+00> : vector<96xf32>
    %205 = vector.multi_reduction <add>, %192, %cst_59 [1] : vector<96x32xf32> to vector<96xf32>
    %206 = vector.shape_cast %205 : vector<96xf32> to vector<96x1xf32>
    %cst_60 = arith.constant 3.200000e+01 : f32
    %207 = vector.broadcast %cst_60 : f32 to vector<96x1xf32>
    %208 = arith.divf %206, %207 : vector<96x1xf32>
    %209 = vector.broadcast %208 : vector<96x1xf32> to vector<96x32xf32>
    %210 = arith.subf %192, %209 : vector<96x32xf32>
    %211 = arith.mulf %210, %210 : vector<96x32xf32>
    %cst_61 = arith.constant dense<0.000000e+00> : vector<96xf32>
    %212 = vector.multi_reduction <add>, %211, %cst_61 [1] : vector<96x32xf32> to vector<96xf32>
    %213 = vector.shape_cast %212 : vector<96xf32> to vector<96x1xf32>
    %cst_62 = arith.constant 3.200000e+01 : f32
    %214 = vector.broadcast %cst_62 : f32 to vector<96x1xf32>
    %215 = arith.divf %213, %214 : vector<96x1xf32>
    %cst_63 = arith.constant 9.99999974E-6 : f32
    %216 = vector.broadcast %cst_63 : f32 to vector<96x1xf32>
    %217 = arith.addf %215, %216 : vector<96x1xf32>
    %218 = math.rsqrt %217 : vector<96x1xf32>
    %219 = vector.broadcast %218 : vector<96x1xf32> to vector<96x32xf32>
    %220 = arith.mulf %210, %219 : vector<96x32xf32>
    %221 = vector.broadcast %195 : vector<1x32xf32> to vector<96x32xf32>
    %222 = arith.mulf %220, %221 : vector<96x32xf32>
    %223 = vector.broadcast %196 : vector<1x32xf32> to vector<96x32xf32>
    %224 = arith.addf %222, %223 : vector<96x32xf32>
    %225 = arith.truncf %224 : vector<96x32xf32> to vector<96x32xbf16>
    %c1_64 = arith.constant 1 : index
    %c0_65 = arith.constant 0 : index
    %c0_66 = arith.constant 0 : index
    %c0_67 = arith.constant 0 : index
    %226 = vector.load %arg5[%c1_64, %c0_65, %c0_66, %c0_67] : memref<2x2x32x128xbf16, #tpu.memory_space<vmem>>, vector<1x1x32x128xbf16>
    %227 = vector.shape_cast %226 : vector<1x1x32x128xbf16> to vector<32x128xbf16>
    %cst_68 = arith.constant dense<0.000000e+00> : vector<96x128xf32>
    %228 = tpu.matmul %225, %227, %cst_68 {dimension_numbers = #tpu.dot_dimension_numbers<[1], [0], [0], [1], [0, 0, 1, 1], [], []>} : vector<96x32xbf16>, vector<32x128xbf16>, vector<96x128xf32> -> vector<96x128xf32>
    %229 = vector.broadcast %203 : vector<1x128xf32> to vector<96x128xf32>
    %230 = arith.addf %228, %229 : vector<96x128xf32>
    %231 = vector.extract_strided_slice %230 {offsets = [0, 0], sizes = [48, 32], strides = [1, 1]} : vector<96x128xf32> to vector<48x32xf32>
    %232 = arith.truncf %231 : vector<48x32xf32> to vector<48x32xbf16>
    %233 = vector.extract_strided_slice %230 {offsets = [0, 32], sizes = [48, 32], strides = [1, 1]} : vector<96x128xf32> to vector<48x32xf32>
    %234 = arith.truncf %233 : vector<48x32xf32> to vector<48x32xbf16>
    %235 = vector.extract_strided_slice %230 {offsets = [0, 64], sizes = [48, 32], strides = [1, 1]} : vector<96x128xf32> to vector<48x32xf32>
    %236 = arith.truncf %235 : vector<48x32xf32> to vector<48x32xbf16>
    %237 = arith.mulf %232, %25 : vector<48x32xbf16>
    %238 = arith.mulf %232, %26 : vector<48x32xbf16>
    %239 = arith.mulf %232, %27 : vector<48x32xbf16>
    %240 = arith.mulf %232, %28 : vector<48x32xbf16>
    %241 = tpu.concatenate %237, %238, %239, %240 in 0 : vector<48x32xbf16>, vector<48x32xbf16>, vector<48x32xbf16>, vector<48x32xbf16> -> vector<192x32xbf16>
    %cst_69 = arith.constant dense<0.000000e+00> : vector<192x48xf32>
    %242 = tpu.matmul %241, %234, %cst_69 {dimension_numbers = #tpu.dot_dimension_numbers<[1], [1], [0], [0], [0, 0, 1, 0], [], []>} : vector<192x32xbf16>, vector<48x32xbf16>, vector<192x48xf32> -> vector<192x48xf32>
    %243 = arith.addf %242, %32 : vector<192x48xf32>
    %cst_70 = arith.constant dense<0xFF800000> : vector<192xf32>
    %244 = vector.multi_reduction <maximumf>, %243, %cst_70 [1] : vector<192x48xf32> to vector<192xf32>
    %245 = vector.shape_cast %244 : vector<192xf32> to vector<192x1xf32>
    %246 = vector.broadcast %245 : vector<192x1xf32> to vector<192x48xf32>
    %247 = arith.subf %243, %246 : vector<192x48xf32>
    %248 = math.exp %247 : vector<192x48xf32>
    %cst_71 = arith.constant dense<0.000000e+00> : vector<192xf32>
    %249 = vector.multi_reduction <add>, %248, %cst_71 [1] : vector<192x48xf32> to vector<192xf32>
    %250 = vector.shape_cast %249 : vector<192xf32> to vector<192x1xf32>
    %251 = tpu.reciprocal %250 {approx = true} : vector<192x1xf32> -> vector<192x1xf32>
    %252 = arith.truncf %248 : vector<192x48xf32> to vector<192x48xbf16>
    %cst_72 = arith.constant dense<0.000000e+00> : vector<192x32xf32>
    %253 = tpu.matmul %252, %236, %cst_72 {dimension_numbers = #tpu.dot_dimension_numbers<[1], [0], [0], [1], [0, 0, 1, 1], [], []>} : vector<192x48xbf16>, vector<48x32xbf16>, vector<192x32xf32> -> vector<192x32xf32>
    %254 = vector.broadcast %251 : vector<192x1xf32> to vector<192x32xf32>
    %255 = arith.mulf %253, %254 : vector<192x32xf32>
    %256 = vector.extract_strided_slice %255 {offsets = [0, 0], sizes = [48, 32], strides = [1, 1]} : vector<192x32xf32> to vector<48x32xf32>
    %257 = arith.mulf %256, %15 : vector<48x32xf32>
    %258 = vector.extract_strided_slice %255 {offsets = [48, 0], sizes = [48, 32], strides = [1, 1]} : vector<192x32xf32> to vector<48x32xf32>
    %259 = arith.mulf %258, %18 : vector<48x32xf32>
    %260 = arith.addf %257, %259 : vector<48x32xf32>
    %261 = vector.extract_strided_slice %255 {offsets = [96, 0], sizes = [48, 32], strides = [1, 1]} : vector<192x32xf32> to vector<48x32xf32>
    %262 = arith.mulf %261, %21 : vector<48x32xf32>
    %263 = arith.addf %260, %262 : vector<48x32xf32>
    %264 = vector.extract_strided_slice %255 {offsets = [144, 0], sizes = [48, 32], strides = [1, 1]} : vector<192x32xf32> to vector<48x32xf32>
    %265 = arith.mulf %264, %24 : vector<48x32xf32>
    %266 = arith.addf %263, %265 : vector<48x32xf32>
    %c0_73 = arith.constant 0 : index
    %c0_74 = arith.constant 0 : index
    %267 = vector.load %arg10[%c0_73, %c0_74] : memref<96x32xf32, #tpu.memory_space<vmem>>, vector<48x32xf32>
    tpu.vector_store %arg10[%c0_73, %c0_74], %266 {strides = array<i32>} : memref<96x32xf32, #tpu.memory_space<vmem>>, vector<48x32xf32>,
    %268 = vector.extract_strided_slice %230 {offsets = [48, 0], sizes = [48, 32], strides = [1, 1]} : vector<96x128xf32> to vector<48x32xf32>
    %269 = arith.truncf %268 : vector<48x32xf32> to vector<48x32xbf16>
    %270 = vector.extract_strided_slice %230 {offsets = [48, 32], sizes = [48, 32], strides = [1, 1]} : vector<96x128xf32> to vector<48x32xf32>
    %271 = arith.truncf %270 : vector<48x32xf32> to vector<48x32xbf16>
    %272 = vector.extract_strided_slice %230 {offsets = [48, 64], sizes = [48, 32], strides = [1, 1]} : vector<96x128xf32> to vector<48x32xf32>
    %273 = arith.truncf %272 : vector<48x32xf32> to vector<48x32xbf16>
    %274 = arith.mulf %269, %25 : vector<48x32xbf16>
    %275 = arith.mulf %269, %26 : vector<48x32xbf16>
    %276 = arith.mulf %269, %27 : vector<48x32xbf16>
    %277 = arith.mulf %269, %28 : vector<48x32xbf16>
    %278 = tpu.concatenate %274, %275, %276, %277 in 0 : vector<48x32xbf16>, vector<48x32xbf16>, vector<48x32xbf16>, vector<48x32xbf16> -> vector<192x32xbf16>
    %cst_75 = arith.constant dense<0.000000e+00> : vector<192x48xf32>
    %279 = tpu.matmul %278, %271, %cst_75 {dimension_numbers = #tpu.dot_dimension_numbers<[1], [1], [0], [0], [0, 0, 1, 0], [], []>} : vector<192x32xbf16>, vector<48x32xbf16>, vector<192x48xf32> -> vector<192x48xf32>
    %280 = arith.addf %279, %36 : vector<192x48xf32>
    %cst_76 = arith.constant dense<0xFF800000> : vector<192xf32>
    %281 = vector.multi_reduction <maximumf>, %280, %cst_76 [1] : vector<192x48xf32> to vector<192xf32>
    %282 = vector.shape_cast %281 : vector<192xf32> to vector<192x1xf32>
    %283 = vector.broadcast %282 : vector<192x1xf32> to vector<192x48xf32>
    %284 = arith.subf %280, %283 : vector<192x48xf32>
    %285 = math.exp %284 : vector<192x48xf32>
    %cst_77 = arith.constant dense<0.000000e+00> : vector<192xf32>
    %286 = vector.multi_reduction <add>, %285, %cst_77 [1] : vector<192x48xf32> to vector<192xf32>
    %287 = vector.shape_cast %286 : vector<192xf32> to vector<192x1xf32>
    %288 = tpu.reciprocal %287 {approx = true} : vector<192x1xf32> -> vector<192x1xf32>
    %289 = arith.truncf %285 : vector<192x48xf32> to vector<192x48xbf16>
    %cst_78 = arith.constant dense<0.000000e+00> : vector<192x32xf32>
    %290 = tpu.matmul %289, %273, %cst_78 {dimension_numbers = #tpu.dot_dimension_numbers<[1], [0], [0], [1], [0, 0, 1, 1], [], []>} : vector<192x48xbf16>, vector<48x32xbf16>, vector<192x32xf32> -> vector<192x32xf32>
    %291 = vector.broadcast %288 : vector<192x1xf32> to vector<192x32xf32>
    %292 = arith.mulf %290, %291 : vector<192x32xf32>
    %293 = vector.extract_strided_slice %292 {offsets = [0, 0], sizes = [48, 32], strides = [1, 1]} : vector<192x32xf32> to vector<48x32xf32>
    %294 = arith.mulf %293, %15 : vector<48x32xf32>
    %295 = vector.extract_strided_slice %292 {offsets = [48, 0], sizes = [48, 32], strides = [1, 1]} : vector<192x32xf32> to vector<48x32xf32>
    %296 = arith.mulf %295, %18 : vector<48x32xf32>
    %297 = arith.addf %294, %296 : vector<48x32xf32>
    %298 = vector.extract_strided_slice %292 {offsets = [96, 0], sizes = [48, 32], strides = [1, 1]} : vector<192x32xf32> to vector<48x32xf32>
    %299 = arith.mulf %298, %21 : vector<48x32xf32>
    %300 = arith.addf %297, %299 : vector<48x32xf32>
    %301 = vector.extract_strided_slice %292 {offsets = [144, 0], sizes = [48, 32], strides = [1, 1]} : vector<192x32xf32> to vector<48x32xf32>
    %302 = arith.mulf %301, %24 : vector<48x32xf32>
    %303 = arith.addf %300, %302 : vector<48x32xf32>
    %c48_79 = arith.constant 48 : index
    %c0_80 = arith.constant 0 : index
    %304 = vector.load %arg10[%c48_79, %c0_80] : memref<96x32xf32, #tpu.memory_space<vmem>>, vector<48x32xf32>
    tpu.vector_store %arg10[%c48_79, %c0_80], %303 {strides = array<i32>} : memref<96x32xf32, #tpu.memory_space<vmem>>, vector<48x32xf32>,
    %c0_81 = arith.constant 0 : index
    %c0_82 = arith.constant 0 : index
    %305 = vector.load %arg10[%c0_81, %c0_82] : memref<96x32xf32, #tpu.memory_space<vmem>>, vector<96x32xf32>
    %306 = arith.truncf %305 : vector<96x32xf32> to vector<96x32xbf16>
    %c1_83 = arith.constant 1 : index
    %c0_84 = arith.constant 0 : index
    %c0_85 = arith.constant 0 : index
    %307 = vector.load %arg6[%c1_83, %c0_84, %c0_85] : memref<2x160x32xbf16, #tpu.memory_space<vmem>>, vector<1x32x32xbf16>
    %308 = vector.shape_cast %307 : vector<1x32x32xbf16> to vector<32x32xbf16>
    %cst_86 = arith.constant dense<0.000000e+00> : vector<96x32xf32>
    %309 = tpu.matmul %306, %308, %cst_86 {dimension_numbers = #tpu.dot_dimension_numbers<[1], [0], [0], [1], [0, 0, 1, 1], [], []>} : vector<96x32xbf16>, vector<32x32xbf16>, vector<96x32xf32> -> vector<96x32xf32>
    %310 = arith.addf %192, %309 : vector<96x32xf32>
    %311 = vector.broadcast %199 : vector<1x32xf32> to vector<96x32xf32>
    %312 = arith.addf %310, %311 : vector<96x32xf32>
    %cst_87 = arith.constant dense<0.000000e+00> : vector<96xf32>
    %313 = vector.multi_reduction <add>, %312, %cst_87 [1] : vector<96x32xf32> to vector<96xf32>
    %314 = vector.shape_cast %313 : vector<96xf32> to vector<96x1xf32>
    %cst_88 = arith.constant 3.200000e+01 : f32
    %315 = vector.broadcast %cst_88 : f32 to vector<96x1xf32>
    %316 = arith.divf %314, %315 : vector<96x1xf32>
    %317 = vector.broadcast %316 : vector<96x1xf32> to vector<96x32xf32>
    %318 = arith.subf %312, %317 : vector<96x32xf32>
    %319 = arith.mulf %318, %318 : vector<96x32xf32>
    %cst_89 = arith.constant dense<0.000000e+00> : vector<96xf32>
    %320 = vector.multi_reduction <add>, %319, %cst_89 [1] : vector<96x32xf32> to vector<96xf32>
    %321 = vector.shape_cast %320 : vector<96xf32> to vector<96x1xf32>
    %cst_90 = arith.constant 3.200000e+01 : f32
    %322 = vector.broadcast %cst_90 : f32 to vector<96x1xf32>
    %323 = arith.divf %321, %322 : vector<96x1xf32>
    %cst_91 = arith.constant 9.99999974E-6 : f32
    %324 = vector.broadcast %cst_91 : f32 to vector<96x1xf32>
    %325 = arith.addf %323, %324 : vector<96x1xf32>
    %326 = math.rsqrt %325 : vector<96x1xf32>
    %327 = vector.broadcast %326 : vector<96x1xf32> to vector<96x32xf32>
    %328 = arith.mulf %318, %327 : vector<96x32xf32>
    %329 = vector.broadcast %197 : vector<1x32xf32> to vector<96x32xf32>
    %330 = arith.mulf %328, %329 : vector<96x32xf32>
    %331 = vector.broadcast %198 : vector<1x32xf32> to vector<96x32xf32>
    %332 = arith.addf %330, %331 : vector<96x32xf32>
    %333 = arith.truncf %332 : vector<96x32xf32> to vector<96x32xbf16>
    %c1_92 = arith.constant 1 : index
    %c1_93 = arith.constant 1 : index
    %c0_94 = arith.constant 0 : index
    %c0_95 = arith.constant 0 : index
    %334 = vector.load %arg5[%c1_92, %c1_93, %c0_94, %c0_95] : memref<2x2x32x128xbf16, #tpu.memory_space<vmem>>, vector<1x1x32x128xbf16>
    %335 = vector.shape_cast %334 : vector<1x1x32x128xbf16> to vector<32x128xbf16>
    %cst_96 = arith.constant dense<0.000000e+00> : vector<96x128xf32>
    %336 = tpu.matmul %333, %335, %cst_96 {dimension_numbers = #tpu.dot_dimension_numbers<[1], [0], [0], [1], [0, 0, 1, 1], [], []>} : vector<96x32xbf16>, vector<32x128xbf16>, vector<96x128xf32> -> vector<96x128xf32>
    %337 = vector.broadcast %204 : vector<1x128xf32> to vector<96x128xf32>
    %338 = arith.addf %336, %337 : vector<96x128xf32>
    %cst_97 = arith.constant 0.000000e+00 : f32
    %339 = vector.broadcast %cst_97 : f32 to vector<96x128xf32>
    %340 = arith.maximumf %338, %339 : vector<96x128xf32>
    %341 = arith.truncf %340 : vector<96x128xf32> to vector<96x128xbf16>
    %c1_98 = arith.constant 1 : index
    %c32_99 = arith.constant 32 : index
    %c0_100 = arith.constant 0 : index
    %342 = vector.load %arg6[%c1_98, %c32_99, %c0_100] : memref<2x160x32xbf16, #tpu.memory_space<vmem>>, vector<1x128x32xbf16>
    %343 = vector.shape_cast %342 : vector<1x128x32xbf16> to vector<128x32xbf16>
    %cst_101 = arith.constant dense<0.000000e+00> : vector<96x32xf32>
    %344 = tpu.matmul %341, %343, %cst_101 {dimension_numbers = #tpu.dot_dimension_numbers<[1], [0], [0], [1], [0, 0, 1, 1], [], []>} : vector<96x128xbf16>, vector<128x32xbf16>, vector<96x32xf32> -> vector<96x32xf32>
    %345 = arith.addf %312, %344 : vector<96x32xf32>
    %346 = vector.broadcast %200 : vector<1x32xf32> to vector<96x32xf32>
    %347 = arith.addf %345, %346 : vector<96x32xf32>
    %348 = vector.extract_strided_slice %347 {offsets = [0, 0], sizes = [1, 32], strides = [1, 1]} : vector<96x32xf32> to vector<1x32xf32>
    %c0_102 = arith.constant 0 : index
    %c0_103 = arith.constant 0 : index
    %349 = vector.load %arg11[%c0_102, %c0_103] : memref<2x32xf32, #tpu.memory_space<vmem>>, vector<1x32xf32>
    tpu.vector_store %arg11[%c0_102, %c0_103], %348 {strides = array<i32>} : memref<2x32xf32, #tpu.memory_space<vmem>>, vector<1x32xf32>,
    %350 = vector.extract_strided_slice %347 {offsets = [48, 0], sizes = [1, 32], strides = [1, 1]} : vector<96x32xf32> to vector<1x32xf32>
    %c1_104 = arith.constant 1 : index
    %c0_105 = arith.constant 0 : index
    %351 = vector.load %arg11[%c1_104, %c0_105] : memref<2x32xf32, #tpu.memory_space<vmem>>, vector<1x32xf32>
    tpu.vector_store %arg11[%c1_104, %c0_105], %350 {strides = array<i32>} : memref<2x32xf32, #tpu.memory_space<vmem>>, vector<1x32xf32>,
    %c0_106 = arith.constant 0 : index
    %c0_107 = arith.constant 0 : index
    %352 = vector.load %arg11[%c0_106, %c0_107] : memref<2x32xf32, #tpu.memory_space<vmem>>, vector<2x32xf32>
    %353 = arith.truncf %352 : vector<2x32xf32> to vector<2x32xbf16>
    %c0_108 = arith.constant 0 : index
    %c0_109 = arith.constant 0 : index
    %354 = vector.load %arg7[%c0_108, %c0_109] : memref<160x128xbf16, #tpu.memory_space<vmem>>, vector<32x128xbf16>
    %cst_110 = arith.constant dense<0.000000e+00> : vector<2x128xf32>
    %355 = tpu.matmul %353, %354, %cst_110 {dimension_numbers = #tpu.dot_dimension_numbers<[1], [0], [0], [1], [0, 0, 1, 1], [], []>} : vector<2x32xbf16>, vector<32x128xbf16>, vector<2x128xf32> -> vector<2x128xf32>
    %c0_111 = arith.constant 0 : index
    %c0_112 = arith.constant 0 : index
    %356 = vector.load %arg8[%c0_111, %c0_112] : memref<2x128xf32, #tpu.memory_space<vmem>>, vector<1x128xf32>
    %357 = vector.broadcast %356 : vector<1x128xf32> to vector<2x128xf32>
    %358 = arith.addf %355, %357 : vector<2x128xf32>
    %cst_113 = arith.constant 0.000000e+00 : f32
    %359 = vector.broadcast %cst_113 : f32 to vector<2x128xf32>
    %360 = arith.maximumf %358, %359 : vector<2x128xf32>
    %361 = arith.truncf %360 : vector<2x128xf32> to vector<2x128xbf16>
    %c32_114 = arith.constant 32 : index
    %c0_115 = arith.constant 0 : index
    %362 = vector.load %arg7[%c32_114, %c0_115] : memref<160x128xbf16, #tpu.memory_space<vmem>>, vector<128x128xbf16>
    %cst_116 = arith.constant dense<0.000000e+00> : vector<2x128xf32>
    %363 = tpu.matmul %361, %362, %cst_116 {dimension_numbers = #tpu.dot_dimension_numbers<[1], [0], [0], [1], [0, 0, 1, 1], [], []>} : vector<2x128xbf16>, vector<128x128xbf16>, vector<2x128xf32> -> vector<2x128xf32>
    %c1_117 = arith.constant 1 : index
    %c0_118 = arith.constant 0 : index
    %364 = vector.load %arg8[%c1_117, %c0_118] : memref<2x128xf32, #tpu.memory_space<vmem>>, vector<1x128xf32>
    %365 = vector.broadcast %364 : vector<1x128xf32> to vector<2x128xf32>
    %366 = arith.addf %363, %365 : vector<2x128xf32>
    %367 = vector.shape_cast %366 : vector<2x128xf32> to vector<1x2x128xf32>
    %c0_119 = arith.constant 0 : index
    %c0_120 = arith.constant 0 : index
    %c0_121 = arith.constant 0 : index
    %368 = vector.load %arg9[%c0_119, %c0_120, %c0_121] : memref<1x2x128xf32, #tpu.memory_space<vmem>>, vector<1x2x128xf32>
    tpu.vector_store %arg9[%c0_119, %c0_120, %c0_121], %367 {strides = array<i32>} : memref<1x2x128xf32, #tpu.memory_space<vmem>>, vector<1x2x128xf32>,
    return
  }
  func.func @transform_0(%arg0: i32) -> (i32, i32) {
    %c0_i32 = arith.constant 0 : i32
    %c0_i32_0 = arith.constant 0 : i32
    return %arg0, %c0_i32 : i32, i32
  }
  func.func @transform_1(%arg0: i32) -> (i32, i32, i32) {
    %c0_i32 = arith.constant 0 : i32
    %c0_i32_0 = arith.constant 0 : i32
    %c0_i32_1 = arith.constant 0 : i32
    return %arg0, %c0_i32, %c0_i32_0 : i32, i32, i32
  }
  func.func @transform_2(%arg0: i32) -> (i32, i32, i32) {
    %c0_i32 = arith.constant 0 : i32
    %c0_i32_0 = arith.constant 0 : i32
    %c0_i32_1 = arith.constant 0 : i32
    %c0_i32_2 = arith.constant 0 : i32
    return %c0_i32, %c0_i32_0, %c0_i32_1 : i32, i32, i32
  }
  func.func @transform_3(%arg0: i32) -> (i32, i32, i32) {
    %c0_i32 = arith.constant 0 : i32
    %c0_i32_0 = arith.constant 0 : i32
    %c0_i32_1 = arith.constant 0 : i32
    %c0_i32_2 = arith.constant 0 : i32
    return %c0_i32, %c0_i32_0, %c0_i32_1 : i32, i32, i32
  }
  func.func @transform_4(%arg0: i32) -> (i32, i32, i32, i32) {
    %c0_i32 = arith.constant 0 : i32
    %c0_i32_0 = arith.constant 0 : i32
    %c0_i32_1 = arith.constant 0 : i32
    %c0_i32_2 = arith.constant 0 : i32
    %c0_i32_3 = arith.constant 0 : i32
    return %c0_i32, %c0_i32_0, %c0_i32_1, %c0_i32_2 : i32, i32, i32, i32
  }
  func.func @transform_5(%arg0: i32) -> (i32, i32, i32) {
    %c0_i32 = arith.constant 0 : i32
    %c0_i32_0 = arith.constant 0 : i32
    %c0_i32_1 = arith.constant 0 : i32
    %c0_i32_2 = arith.constant 0 : i32
    return %c0_i32, %c0_i32_0, %c0_i32_1 : i32, i32, i32
  }
  func.func @transform_6(%arg0: i32) -> (i32, i32) {
    %c0_i32 = arith.constant 0 : i32
    %c0_i32_0 = arith.constant 0 : i32
    %c0_i32_1 = arith.constant 0 : i32
    return %c0_i32, %c0_i32_0 : i32, i32
  }
  func.func @transform_7(%arg0: i32) -> (i32, i32) {
    %c0_i32 = arith.constant 0 : i32
    %c0_i32_0 = arith.constant 0 : i32
    %c0_i32_1 = arith.constant 0 : i32
    return %c0_i32, %c0_i32_0 : i32, i32
  }
  func.func @transform_8(%arg0: i32) -> (i32, i32, i32) {
    %c0_i32 = arith.constant 0 : i32
    %c0_i32_0 = arith.constant 0 : i32
    %c0_i32_1 = arith.constant 0 : i32
    return %arg0, %c0_i32, %c0_i32_0 : i32, i32, i32
  }
}

</mosaic_0001>

<bundles_post_ra>
// kernel: tpu_custom_call.1
= control target key start
LH: loop header
LB: loop body
LE: loop exit
PB: predicated region body
PF: predicated region fallthrough
CT: control target
= control target key end

     0   :  { %vm74_vm0 = vcmask 261120   ;;  %s9240_s0 = inlined_call_operand.vmem [shape: f32[96,32], index: 0, kind: input, shape index: {}]   ;;  %s9241_s1 = inlined_call_operand.vmem [shape: f32[2,1,48], index: 1, kind: input, shape index: {}]   ;;  %s9242_s2 = inlined_call_operand.vmem [shape: f32[2,8,32], index: 2, kind: input, shape index: {}]   ;;  %s9243_s3 = inlined_call_operand.vmem [shape: f32[2,2,128], index: 3, kind: input, shape index: {}]   ;;  %s9244_s4 = inlined_call_operand.vmem [shape: bf16[2,2,32,128], index: 4, kind: input, shape index: {}]   ;;  %s9245_s5 = inlined_call_operand.vmem [shape: bf16[2,160,32], index: 5, kind: input, shape index: {}]   ;;  %s9246_s6 = inlined_call_operand.vmem [shape: bf16[160,128], index: 6, kind: input, shape index: {}]   ;;  %s9247_s7 = inlined_call_operand.vmem [shape: f32[2,128], index: 7, kind: input, shape index: {}]   ;;  %s9248_s8 = inlined_call_operand.hbm [shape: f32[1,2,128], index: 8, kind: output, shape index: {}]  }
   0x1   :  { %v62_v0 = vld [vmem:[%s9240_s0 + $0x10] sm:$0xff]  ;;  %v60_v1 = vld [vmem:[%s9240_s0] sm:$0xff]  ;;  %v63_v6 = vld [vmem:[%s9240_s0 + $0x18] sm:$0xff] }
   0x2   :  { %v81_v2 = vsel %vm74_vm0, %v62_v0, 0.0  ;;  %v75_v3 = vsel %vm74_vm0, %v60_v1, 0.0  ;;  %v64_v4 = vld [vmem:[%s9240_s0 + $0x20] sm:$0xff]  ;;  %v61_v7 = vld [vmem:[%s9240_s0 + $0x8] sm:$0xff] }
   0x3   :  { %82 = vadd.xlane.f32.xlu1 %v81_v2  ;;  %76 = vadd.xlane.f32.xlu0 %v75_v3  ;;  %v87_v5 = vsel %vm74_vm0, %v64_v4, 0.0 }
   0x4   :  { %88 = vadd.xlane.f32.xlu2 %v87_v5 }
   0x5   :  { %13 = vsyncpa [#allocation5], 0  ;;  %v65_v8 = vld [vmem:[%s9240_s0 + $0x28] sm:$0xff]  ;;  %v84_v9 = vsel %vm74_vm0, %v63_v6, 0.0  ;;  %v78_v10 = vsel %vm74_vm0, %v61_v7, 0.0  ;;  %v66_v12 = vld [vmem:[%s9240_s0 + $0x30] sm:$0xff] }
   0x6   :  { %v90_v11 = vsel %vm74_vm0, %v65_v8, 0.0  ;;  %v93_v13 = vsel %vm74_vm0, %v66_v12, 0.0  ;;  %v5836_v14 = vmov 32.0   ;;  %v67_v34 = vld [vmem:[%s9240_s0 + $0x38] sm:$0xff]  ;;  %v68_v47 = vld [vmem:[%s9240_s0 + $0x40] sm:$0xff]  ;;  %v5968_v57 = vld [vmem:[%s9240_s0 + $0x48] sm:$0xff] }
   0x7   :  { %5310 = vrcp.f32 %v5836_v14  ;;  %v96_v40 = vsel %vm74_vm0, %v67_v34, 0.0  ;;  %v99_v51 = vsel %vm74_vm0, %v68_v47, 0.0  ;;  %v5963_v56 = vld [vmem:[%s9240_s0 + $0x58] sm:$0xff]  ;;  %v102_v61 = vsel %vm74_vm0, %v5968_v57, 0.0  ;;  %v5982_v63 = vld [vmem:[%s9240_s0 + $0x50] sm:$0xff]  ;;  %v5264_v3 = vld [vmem:[%s9244_s4 + $0x8] sm:$0xff] }
   0x8   :  { %v108_v59 = vsel %vm74_vm0, %v5963_v56, 0.0  ;;  %419 = vmatpush.bf16.msra.mxu0 %v5264_v3  ;;  %s5838_s15 = smov 96   ;;  %s5839_s16 = smov 64  }
   0x9   :  { %s5840_s19 = smov [#allocation4]  }
   0xa   :  { %s4931_s20 = sshll.u32 %s5840_s19, 4  ;;  %s4932_s20 = int_to_ptr.vmem [resolvable:$true] %s4931_s20 }
   0xb   :  { %85 = vadd.xlane.f32.xlu1 %v84_v9  ;;  %79 = vadd.xlane.f32.xlu0 %v78_v10 }
   0xc   :  { %91 = vadd.xlane.f32.xlu2 %v90_v11 }
   0xd   :  { %v5311_v15 = vpop.eup %5310 }
   0xe   :  { %v112_v16 = vmul.f32 32.0, %v5311_v15  ;;  %vm116_vm1 = vweird.f32 %v5311_v15 }
  0x10   :  { %v113_v17 = vsub.f32 1.0, %v112_v16 }
  0x12   :  { %v114_v18 = vmul.f32 %v5311_v15, %v113_v17 }
  0x14   :  { %94 = vadd.xlane.f32.xlu2 %v93_v13  ;;  %v115_v19 = vadd.f32 %v5311_v15, %v114_v18 }
  0x16   :  { %v5914_v20 = vsel %vm116_vm1, %v5311_v15, %v115_v19 }
  0x17   :  { %9303 = vst [vmem:[#allocation7_spill] sm:$0xff] %v5914_v20 }
  0x76   :  { %v83_v21 = vpop.xlane.xlu1 %82  ;;  %v77_v22 = vpop.xlane.xlu0 %76 }
  0x77   :  { %v118_v23 = vmul.f32 %v5914_v20, %v77_v22  ;;  %v89_v24 = vpop.xlane.xlu2 %88  ;;  %v120_v33 = vmul.f32 %v5914_v20, %v83_v21 }
  0x78   :  { %v122_v32 = vmul.f32 %v5914_v20, %v89_v24 }
  0x79   :  { %v5917_v25 = vsub.f32 %v60_v1, %v118_v23  ;;  %v5940_v42 = vsub.f32 %v62_v0, %v120_v33  ;;  %v105_v1 = vsel %vm74_vm0, %v5982_v63, 0.0 }
  0x7a   :  { %v5933_v38 = vsub.f32 %v64_v4, %v122_v32 }
  0x7b   :  { %v142_v26 = vmul.f32 %v5917_v25, %v5917_v25  ;;  %v144_v48 = vmul.f32 %v5940_v42, %v5940_v42 }
  0x7c   :  { %v146_v46 = vmul.f32 %v5933_v38, %v5933_v38 }
  0x7d   :  { %v154_v27 = vsel %vm74_vm0, %v142_v26, 0.0  ;;  %v160_v52 = vsel %vm74_vm0, %v144_v48, 0.0 }
  0x7e   :  { %v86_v28 = vpop.xlane.xlu1 %85  ;;  %155 = vadd.xlane.f32.xlu0 %v154_v27  ;;  %v80_v29 = vpop.xlane.xlu0 %79  ;;  %v166_v50 = vsel %vm74_vm0, %v146_v46, 0.0 }
  0x7f   :  { %v121_v30 = vmul.f32 %v5914_v20, %v86_v28  ;;  %v119_v31 = vmul.f32 %v5914_v20, %v80_v29  ;;  %v92_v37 = vpop.xlane.xlu2 %91 }
  0x80   :  { %v123_v45 = vmul.f32 %v5914_v20, %v92_v37 }
  0x81   :  { %v5929_v35 = vsub.f32 %v63_v6, %v121_v30  ;;  %v5931_v36 = vsub.f32 %v61_v7, %v119_v31  ;;  %v5263_v6 = vld [vmem:[%s9244_s4] sm:$0xff] }
  0x82   :  { %v5952_v49 = vsub.f32 %v65_v8, %v123_v45  ;;  %420 = vmatpush.bf16.msra.mxu0 %v5263_v6 }
  0x83   :  { %v145_v39 = vmul.f32 %v5929_v35, %v5929_v35  ;;  %v143_v41 = vmul.f32 %v5931_v36, %v5931_v36 }
  0x84   :  { %v147_v55 = vmul.f32 %v5952_v49, %v5952_v49 }
  0x85   :  { %v163_v43 = vsel %vm74_vm0, %v145_v39, 0.0  ;;  %v157_v44 = vsel %vm74_vm0, %v143_v41, 0.0 }
  0x86   :  { %164 = vadd.xlane.f32.xlu2 %v163_v43  ;;  %97 = vadd.xlane.f32.xlu0 %v96_v40  ;;  %v169_v60 = vsel %vm74_vm0, %v147_v55, 0.0 }
  0x87   :  { %158 = vadd.xlane.f32.xlu1 %v157_v44  ;;  %v95_v53 = vpop.xlane.xlu2 %94 }
  0x88   :  { %v124_v54 = vmul.f32 %v5914_v20, %v95_v53 }
  0x8a   :  { %v5970_v58 = vsub.f32 %v66_v12, %v124_v54  ;;  %v72_v54 = vld [vmem:[%s9242_s2] sm:$0xff] }
  0x8b   :  { %v6044_v3 = vperm.slane %v72_v54, 0 }
  0x8c   :  { %v148_v62 = vmul.f32 %v5970_v58, %v5970_v58 }
  0x8e   :  { %167 = vadd.xlane.f32.xlu2 %v166_v50  ;;  %100 = vadd.xlane.f32.xlu0 %v99_v51  ;;  %v172_v0 = vsel %vm74_vm0, %v148_v62, 0.0 }
  0x8f   :  { %161 = vadd.xlane.f32.xlu1 %v160_v52 }
  0x96   :  { %109 = vadd.xlane.f32.xlu2 %v108_v59  ;;  %170 = vadd.xlane.f32.xlu0 %v169_v60 }
  0x97   :  { %103 = vadd.xlane.f32.xlu1 %v102_v61 }
  0x9e   :  { %173 = vadd.xlane.f32.xlu0 %v172_v0 }
  0x9f   :  { %106 = vadd.xlane.f32.xlu1 %v105_v1 }
  0xf1   :  { %v156_v2 = vpop.xlane.xlu0 %155 }
  0xf2   :  { %v190_v4 = vmul.f32 %v156_v2, %v5914_v20 }
  0xf4   :  { %v202_v5 = vadd.f32 1e-05, %v190_v4 }
  0xf6   :  { %5312 = vrsqrt.f32 %v202_v5  ;;  %vm220_vm3 = vweird.f32 %v202_v5 }
  0xf9   :  { %v165_v7 = vpop.xlane.xlu2 %164  ;;  %v98_v8 = vpop.xlane.xlu0 %97 }
  0xfa   :  { %v193_v9 = vmul.f32 %v165_v7, %v5914_v20  ;;  %v159_v10 = vpop.xlane.xlu1 %158  ;;  %v125_v11 = vmul.f32 %v5914_v20, %v98_v8 }
  0xfb   :  { %v191_v12 = vmul.f32 %v159_v10, %v5914_v20 }
  0xfc   :  { %v5313_v13 = vpop.eup %5312  ;;  %v5997_v14 = vadd.f32 1e-05, %v193_v9  ;;  %v5999_v15 = vsub.f32 %v67_v34, %v125_v11 }
  0xfd   :  { %v215_v16 = vmul.f32 %v5313_v13, %v202_v5  ;;  %v203_v17 = vadd.f32 1e-05, %v191_v12  ;;  %vm221_vm2 = vweird.f32 %v5313_v13 }
  0xfe   :  { %5314 = vrsqrt.f32 %v5997_v14  ;;  %v149_v18 = vmul.f32 %v5999_v15, %v5999_v15  ;;  %vm6021_vm4 = vmor %vm220_vm3, %vm221_vm2  ;;  %vm250_vm8 = vweird.f32 %v5997_v14 }
  0xff   :  { %v216_v19 = vmul.f32 %v5313_v13, %v215_v16  ;;  %5316 = vrsqrt.f32 %v203_v17  ;;  %vm230_vm6 = vweird.f32 %v203_v17 }
 0x100   :  { %v175_v21 = vsel %vm74_vm0, %v149_v18, 0.0 }
 0x101   :  { %v217_v22 = vmul.f32 0.5, %v216_v19  ;;  %v168_v23 = vpop.xlane.xlu2 %167  ;;  %176 = vadd.xlane.f32.xlu1 %v175_v21  ;;  %v101_v24 = vpop.xlane.xlu0 %100 }
 0x102   :  { %v162_v26 = vpop.xlane.xlu1 %161  ;;  %v126_v27 = vmul.f32 %v5914_v20, %v101_v24  ;;  %v194_v33 = vmul.f32 %v168_v23, %v5914_v20 }
 0x103   :  { %v218_v28 = vsub.f32 1.5, %v217_v22  ;;  %v192_v29 = vmul.f32 %v162_v26, %v5914_v20 }
 0x104   :  { %v6007_v30 = vpop.eup %5314  ;;  %v6009_v31 = vsub.f32 %v68_v47, %v126_v27  ;;  %v6019_v44 = vadd.f32 1e-05, %v194_v33 }
 0x105   :  { %v5317_v32 = vpop.eup %5316  ;;  %v6012_v34 = vadd.f32 1e-05, %v192_v29  ;;  %v219_v39 = vmul.f32 %v5313_v13, %v218_v28  ;;  %v245_v40 = vmul.f32 %v6007_v30, %v5997_v14  ;;  %vm251_vm9 = vweird.f32 %v6007_v30 }
 0x106   :  { %v225_v37 = vmul.f32 %v5317_v32, %v203_v17  ;;  %v150_v43 = vmul.f32 %v6009_v31, %v6009_v31  ;;  %vm231_vm5 = vweird.f32 %v5317_v32  ;;  %v6057_v17 = vperm.slane %v72_v54, 1  ;;  %vm252_vm11 = vmor %vm250_vm8, %vm251_vm9 }
 0x107   :  { %5318 = vrsqrt.f32 %v6012_v34  ;;  %v223_v55 = vsel %vm6021_vm4, %v5313_v13, %v219_v39  ;;  %v246_v59 = vmul.f32 %v6007_v30, %v245_v40  ;;  %vm232_vm7 = vmor %vm230_vm6, %vm231_vm5  ;;  %vm240_vm12 = vweird.f32 %v6012_v34 }
 0x108   :  { %v226_v41 = vmul.f32 %v5317_v32, %v225_v37  ;;  %v178_v52 = vsel %vm74_vm0, %v150_v43, 0.0  ;;  %5320 = vrsqrt.f32 %v6019_v44  ;;  %v334_v6 = vmul.f32 %v223_v55, %v5917_v25 }
 0x109   :  { %v110_v45 = vpop.xlane.xlu2 %109  ;;  %v171_v46 = vpop.xlane.xlu0 %170  ;;  %179 = vadd.xlane.f32.xlu2 %v178_v52  ;;  %vm260_vm1 = vweird.f32 %v6019_v44 }
 0x10a   :  { %v227_v48 = vmul.f32 0.5, %v226_v41  ;;  %v129_v50 = vmul.f32 %v5914_v20, %v110_v45  ;;  %v104_v51 = vpop.xlane.xlu1 %103  ;;  %v195_v53 = vmul.f32 %v171_v46, %v5914_v20  ;;  %v347_v25 = vmul.f32 %v6044_v3, %v334_v6 }
 0x10b   :  { %v127_v60 = vmul.f32 %v5914_v20, %v104_v51 }
 0x10c   :  { %v228_v61 = vsub.f32 1.5, %v227_v48  ;;  %v6036_v62 = vsub.f32 %v5963_v56, %v129_v50  ;;  %v6038_v0 = vadd.f32 1e-05, %v195_v53  ;;  %v247_v56 = vmul.f32 0.5, %v246_v59 }
 0x10d   :  { %v5319_v1 = vpop.eup %5318  ;;  %v6042_v2 = vsub.f32 %v5968_v57, %v127_v60  ;;  %v360_v28 = vadd.f32 %v6057_v17, %v347_v25 }
 0x10e   :  { %v229_v4 = vmul.f32 %v5317_v32, %v228_v61  ;;  %v235_v5 = vmul.f32 %v5319_v1, %v6012_v34  ;;  %5322 = vrsqrt.f32 %v6038_v0  ;;  %v153_v57 = vmul.f32 %v6036_v62, %v6036_v62  ;;  %v5321_v18 = vpop.eup %5320 }
 0x10f   :  { %v151_v7 = vmul.f32 %v6042_v2, %v6042_v2  ;;  %v248_v19 = vsub.f32 1.5, %v247_v56  ;;  %vm241_vm10 = vweird.f32 %v5319_v1  ;;  %v255_v33 = vmul.f32 %v5321_v18, %v6019_v44 }
 0x110   :  { %v233_v8 = vsel %vm232_vm7, %v5317_v32, %v229_v4  ;;  %v236_v9 = vmul.f32 %v5319_v1, %v235_v5  ;;  %v187_v16 = vsel %vm74_vm0, %v153_v57, 0.0  ;;  %vm242_vm13 = vmor %vm240_vm12, %vm241_vm10  ;;  %vm270_vm14 = vweird.f32 %v6038_v0 }
 0x111   :  { %v181_v10 = vsel %vm74_vm0, %v151_v7, 0.0  ;;  %v335_v11 = vmul.f32 %v233_v8, %v5931_v36  ;;  %188 = vadd.xlane.f32.xlu2 %v187_v16  ;;  %v249_v32 = vmul.f32 %v6007_v30, %v248_v19  ;;  %v256_v43 = vmul.f32 %v5321_v18, %v255_v33  ;;  %v174_v6 = vpop.xlane.xlu0 %173 }
 0x112   :  { %v237_v12 = vmul.f32 0.5, %v236_v9  ;;  %182 = vadd.xlane.f32.xlu0 %v181_v10  ;;  %v107_v13 = vpop.xlane.xlu1 %106  ;;  %vm261_vm2 = vweird.f32 %v5321_v18  ;;  %v196_v56 = vmul.f32 %v174_v6, %v5914_v20 }
 0x113   :  { %v128_v21 = vmul.f32 %v5914_v20, %v107_v13  ;;  %v348_v22 = vmul.f32 %v6044_v3, %v335_v11  ;;  %v253_v41 = vsel %vm252_vm11, %v6007_v30, %v249_v32  ;;  %v257_v47 = vmul.f32 0.5, %v256_v43  ;;  %vm262_vm4 = vmor %vm260_vm1, %vm261_vm2 }
 0x114   :  { %v5323_v23 = vpop.eup %5322  ;;  %v238_v36 = vsub.f32 1.5, %v237_v12  ;;  %v337_v34 = vmul.f32 %v253_v41, %v5929_v35  ;;  %v208_v7 = vadd.f32 1e-05, %v196_v56  ;;  %v31_v12 = vlaneseq  ;;  %v73_v56 = vld [vmem:[%s9243_s3] sm:$0x3] }
 0x115   :  { %v265_v24 = vmul.f32 %v5323_v23, %v6038_v0  ;;  %v6065_v26 = vsub.f32 %v5982_v63, %v128_v21  ;;  %v361_v29 = vadd.f32 %v6057_v17, %v348_v22  ;;  %v258_v52 = vsub.f32 1.5, %v257_v47 }
 0x116   :  { %v239_v27 = vmul.f32 %v5319_v1, %v238_v36  ;;  %v350_v51 = vmul.f32 %v6044_v3, %v337_v34  ;;  %vm271_vm15 = vweird.f32 %v5323_v23  ;;  %5324 = vrsqrt.f32 %v208_v7 }
 0x117   :  { %v152_v14 = vmul.f32 %v6065_v26, %v6065_v26  ;;  %v372_v37 = vpack.c.bf16 %v361_v29, %v360_v28  ;;  %v266_v63 = vmul.f32 %v5323_v23, %v265_v24  ;;  %vm272_vm3 = vmor %vm270_vm14, %vm271_vm15  ;;  %v259_v35 = vmul.f32 %v5321_v18, %v258_v52 }
 0x118   :  { %v243_v39 = vsel %vm242_vm13, %v5319_v1, %v239_v27  ;;  %vm280_vm5 = vweird.f32 %v208_v7  ;;  %v34_v25 = vshrl.u32 %v31_v12, 7  ;;  %v32_v33 = vand.u32 127, %v31_v12 }
 0x119   :  { %v184_v40 = vsel %vm74_vm0, %v152_v14, 0.0  ;;  %4952 = vmatmul.msk.bf16.vlgmr.msra.gmra.mxu0 %vm74_vm0, %v372_v37  ;;  %v336_v45 = vmul.f32 %v243_v39, %v5940_v42  ;;  %v267_v46 = vmul.f32 0.5, %v266_v63  ;;  %v363_v42 = vadd.f32 %v6057_v17, %v350_v51 }
 0x11a   :  { %185 = vadd.xlane.f32.xlu1 %v184_v40  ;;  %v263_v59 = vsel %vm262_vm4, %v5321_v18, %v259_v35  ;;  %v37_v27 = vadd.s32 1, %v34_v25  ;;  %v35_v14 = vmul.u32 8, %v34_v25 }
 0x11b   :  { %v349_v48 = vmul.f32 %v6044_v3, %v336_v45  ;;  %v268_v50 = vsub.f32 1.5, %v267_v46  ;;  %v338_v61 = vmul.f32 %v263_v59, %v5933_v38 }
 0x11c   :  { %v5325_v8 = vpop.eup %5324  ;;  %v38_v40 = vmul.u32 8, %v37_v27  ;;  %vm6107_vm11 = vcmp.ge.s32.totalorder %v32_v33, %v35_v14 }
 0x11d   :  { %v362_v53 = vadd.f32 %v6057_v17, %v349_v48  ;;  %v269_v30 = vmul.f32 %v5323_v23, %v268_v50  ;;  %v351_v44 = vmul.f32 %v6044_v3, %v338_v61  ;;  %vm281_vm6 = vweird.f32 %v5325_v8 }
 0x11e   :  { %vm6096_vm7 = vmor %vm280_vm5, %vm281_vm6  ;;  %vm6111_vm12 = vcmp.lt.s32.totalorder %v32_v33, %v38_v40 }
 0x11f   :  { %v373_v54 = vpack.c.bf16 %v363_v42, %v362_v53  ;;  %v273_v55 = vsel %vm272_vm3, %v5323_v23, %v269_v30  ;;  %v364_v4 = vadd.f32 %v6057_v17, %v351_v44  ;;  %vm40_vm13 = vmand %vm6107_vm11, %vm6111_vm12  ;;  %v5837_v44 = vmov 0.0  }
 0x120   :  { %v339_v60 = vmul.f32 %v273_v55, %v5952_v49  ;;  %v275_v49 = vmul.f32 %v5325_v8, %v208_v7  ;;  %vm702_vm11 = vcmask 392192  }
 0x122   :  { %v352_v0 = vmul.f32 %v6044_v3, %v339_v60  ;;  %v276_v9 = vmul.f32 %v5325_v8, %v275_v49 }
 0x124   :  { %v365_v1 = vadd.f32 %v6057_v17, %v352_v0  ;;  %v277_v11 = vmul.f32 0.5, %v276_v9  ;;  %v6137_v9 = vperm.slane %v73_v56, 0 }
 0x126   :  { %v374_v5 = vpack.c.bf16 %v365_v1, %v364_v4  ;;  %v278_v13 = vsub.f32 1.5, %v277_v11  ;;  %v4942_v1 = vsel %vm40_vm13, 1.0, %v5837_v44 }
 0x128   :  { %v279_v21 = vmul.f32 %v5325_v8, %v278_v13  ;;  %v6144_v13 = vperm.slane %v4942_v1, 2 }
 0x129   :  { %4953 = vmatmul.msk.bf16.gmra.mxu0 %vm74_vm0, %v373_v54 }
 0x12a   :  { %v283_v28 = vsel %vm6096_vm7, %v5325_v8, %v279_v21  ;;  %9314 = vst [vmem:[#allocation10_spill] sm:$0xff] %v6144_v13 }
 0x12b   :  { %v340_v43 = vmul.f32 %v283_v28, %v5970_v58 }
 0x12d   :  { %v353_v53 = vmul.f32 %v6044_v3, %v340_v43 }
 0x12f   :  { %v366_v59 = vadd.f32 %v6057_v17, %v353_v53 }
 0x139   :  { %4954 = vmatmul.msk.bf16.gmra.mxu0 %vm74_vm0, %v374_v5 }
 0x174   :  { %v177_v38 = vpop.xlane.xlu1 %176 }
 0x175   :  { %v197_v57 = vmul.f32 %v177_v38, %v5914_v20  ;;  %v6139_v38 = vperm.slane %v4942_v1, 0 }
 0x177   :  { %v209_v10 = vadd.f32 1e-05, %v197_v57  ;;  %9312 = vst [vmem:[#allocation8_spill] sm:$0xff] %v6139_v38  ;;  %v6141_v57 = vperm.slane %v4942_v1, 1  ;;  %v47_v23 = vpack.c.bf16 %v6139_v38, %v6139_v38 }
 0x179   :  { %5326 = vrsqrt.f32 %v209_v10  ;;  %vm290_vm9 = vweird.f32 %v209_v10  ;;  %9313 = vst [vmem:[#allocation9_spill] sm:$0xff] %v6141_v57 }
 0x17c   :  { %v180_v16 = vpop.xlane.xlu2 %179 }
 0x17d   :  { %v198_v19 = vmul.f32 %v180_v16, %v5914_v20 }
 0x17f   :  { %v5327_v18 = vpop.eup %5326  ;;  %v210_v36 = vadd.f32 1e-05, %v198_v19 }
 0x180   :  { %v285_v22 = vmul.f32 %v5327_v18, %v209_v10  ;;  %vm291_vm8 = vweird.f32 %v5327_v18 }
 0x181   :  { %5328 = vrsqrt.f32 %v210_v36  ;;  %vm292_vm10 = vmor %vm290_vm9, %vm291_vm8  ;;  %vm300_vm14 = vweird.f32 %v210_v36 }
 0x182   :  { %v286_v24 = vmul.f32 %v5327_v18, %v285_v22 }
 0x184   :  { %v287_v29 = vmul.f32 0.5, %v286_v24  ;;  %v189_v39 = vpop.xlane.xlu2 %188 }
 0x185   :  { %v183_v32 = vpop.xlane.xlu0 %182  ;;  %v201_v41 = vmul.f32 %v189_v39, %v5914_v20 }
 0x186   :  { %v288_v37 = vsub.f32 1.5, %v287_v29  ;;  %v199_v63 = vmul.f32 %v183_v32, %v5914_v20  ;;  %v49_v32 = vpack.c.bf16 %v6144_v13, %v6144_v13 }
 0x187   :  { %v5329_v34 = vpop.eup %5328  ;;  %v6105_v47 = vadd.f32 1e-05, %v201_v41 }
 0x188   :  { %v289_v45 = vmul.f32 %v5327_v18, %v288_v37  ;;  %v211_v46 = vadd.f32 1e-05, %v199_v63  ;;  %v295_v51 = vmul.f32 %v5329_v34, %v210_v36  ;;  %vm301_vm15 = vweird.f32 %v5329_v34 }
 0x189   :  { %vm302_vm1 = vmor %vm300_vm14, %vm301_vm15  ;;  %v48_v36 = vpack.c.bf16 %v6141_v57, %v6141_v57  ;;  %v6161_v63 = vunpack.c.l.bf16 %v47_v23  ;;  %vm330_vm5 = vweird.f32 %v6105_v47 }
 0x18a   :  { %v293_v50 = vsel %vm292_vm10, %v5327_v18, %v289_v45  ;;  %5330 = vrsqrt.f32 %v211_v46  ;;  %v296_v30 = vmul.f32 %v5329_v34, %v295_v51  ;;  %v6146_v18 = vperm.slane %v4942_v1, 3 }
 0x18b   :  { %5332 = vrsqrt.f32 %v6105_v47  ;;  %v341_v58 = vmul.f32 %v293_v50, %v5999_v15  ;;  %vm310_vm3 = vweird.f32 %v211_v46  ;;  %9316 = vst [vmem:[#allocation12_spill] sm:$0xff] %v6161_v63  ;;  %v6163_v45 = vunpack.c.l.bf16 %v48_v36 }
 0x18c   :  { %v297_v54 = vmul.f32 0.5, %v296_v30  ;;  %9315 = vst [vmem:[#allocation11_spill] sm:$0xff] %v6146_v18 }
 0x18d   :  { %v186_v42 = vpop.xlane.xlu1 %185  ;;  %v354_v35 = vmul.f32 %v6044_v3, %v341_v58  ;;  %9317 = vst [vmem:[#allocation13_spill] sm:$0xff] %v6163_v45 }
 0x18e   :  { %v200_v55 = vmul.f32 %v186_v42, %v5914_v20  ;;  %v298_v15 = vsub.f32 1.5, %v297_v54 }
 0x18f   :  { %v367_v60 = vadd.f32 %v6057_v17, %v354_v35 }
 0x190   :  { %v5331_v61 = vpop.eup %5330  ;;  %v6126_v0 = vadd.f32 1e-05, %v200_v55  ;;  %v299_v7 = vmul.f32 %v5329_v34, %v298_v15 }
 0x191   :  { %v6128_v4 = vpop.eup %5332  ;;  %v305_v5 = vmul.f32 %v5331_v61, %v211_v46  ;;  %v375_v6 = vpack.c.bf16 %v367_v60, %v366_v59  ;;  %vm311_vm2 = vweird.f32 %v5331_v61 }
 0x192   :  { %v325_v8 = vmul.f32 %v6128_v4, %v6105_v47  ;;  %5334 = vrsqrt.f32 %v6126_v0  ;;  %v303_v10 = vsel %vm302_vm1, %v5329_v34, %v299_v7  ;;  %vm312_vm4 = vmor %vm310_vm3, %vm311_vm2  ;;  %vm331_vm6 = vweird.f32 %v6128_v4 }
 0x193   :  { %v306_v49 = vmul.f32 %v5331_v61, %v305_v5  ;;  %4955 = vmatmul.msk.bf16.gmra.mxu0 %vm74_vm0, %v375_v6  ;;  %v342_v22 = vmul.f32 %v303_v10, %v6009_v31  ;;  %v50_v31 = vpack.c.bf16 %v6146_v18, %v6146_v18  ;;  %v6168_v34 = vunpack.c.l.bf16 %v49_v32  ;;  %vm6177_vm9 = vmor %vm330_vm5, %vm331_vm6 }
 0x194   :  { %v326_v11 = vmul.f32 %v6128_v4, %v325_v8  ;;  %vm320_vm7 = vweird.f32 %v6126_v0 }
 0x195   :  { %v307_v12 = vmul.f32 0.5, %v306_v49  ;;  %v355_v39 = vmul.f32 %v6044_v3, %v342_v22  ;;  %9318 = vst [vmem:[#allocation14_spill] sm:$0xff] %v6168_v34  ;;  %v6171_v50 = vunpack.c.l.bf16 %v50_v31 }
 0x196   :  { %v422_v25 = vpop.f32.mrf.mxu0  ;;  %v327_v24 = vmul.f32 0.5, %v326_v11 }
 0x197   :  { %v308_v16 = vsub.f32 1.5, %v307_v12  ;;  %v423_v21 = vadd.f32 %v422_v25, %v6137_v9  ;;  %9319 = vst [vmem:[#allocation15_spill] sm:$0xff] %v6171_v50  ;;  %v368_v52 = vadd.f32 %v6057_v17, %v355_v39 }
 0x198   :  { %v5335_v19 = vpop.eup %5334  ;;  %v328_v40 = vsub.f32 1.5, %v327_v24 }
 0x199   :  { %v309_v27 = vmul.f32 %v5331_v61, %v308_v16  ;;  %v315_v28 = vmul.f32 %v5335_v19, %v6126_v0  ;;  %v452_v29 = vpack.c.bf16 %v423_v21, %v423_v21  ;;  %vm321_vm8 = vweird.f32 %v5335_v19 }
 0x19a   :  { %v329_v47 = vmul.f32 %v6128_v4, %v328_v40  ;;  %vm322_vm10 = vmor %vm320_vm7, %vm321_vm8 }
 0x19b   :  { %v313_v33 = vsel %vm312_vm4, %v5331_v61, %v309_v27  ;;  %v316_v14 = vmul.f32 %v5335_v19, %v315_v28  ;;  %v461_v43 = vunpack.c.l.bf16 %v452_v29 }
 0x19c   :  { %v343_v37 = vmul.f32 %v313_v33, %v6042_v2  ;;  %v333_v44 = vsel %vm6177_vm9, %v6128_v4, %v329_v47 }
 0x19d   :  { %v317_v41 = vmul.f32 0.5, %v316_v14  ;;  %v468_v42 = vmul.f32 %v6161_v63, %v461_v43  ;;  %v481_v35 = vmul.f32 %v6163_v45, %v461_v43  ;;  %v494_v61 = vmul.f32 %v6168_v34, %v461_v43 }
 0x19e   :  { %v356_v46 = vmul.f32 %v6044_v3, %v343_v37  ;;  %v424_v2 = vpop.f32.mrf.mxu0  ;;  %v507_v15 = vmul.f32 %v6171_v50, %v461_v43  ;;  %v345_v25 = vmul.f32 %v333_v44, %v6036_v62 }
 0x19f   :  { %v318_v48 = vsub.f32 1.5, %v317_v41  ;;  %v425_v51 = vadd.f32 %v424_v2, %v6137_v9  ;;  %v474_v1 = vpack.c.bf16 %v468_v42, %v468_v42  ;;  %v487_v5 = vpack.c.bf16 %v481_v35, %v481_v35 }
 0x1a0   :  { %v369_v58 = vadd.f32 %v6057_v17, %v356_v46  ;;  %v500_v10 = vpack.c.bf16 %v494_v61, %v494_v61  ;;  %v513_v12 = vpack.c.bf16 %v507_v15, %v507_v15  ;;  %v358_v14 = vmul.f32 %v6044_v3, %v345_v25 }
 0x1a1   :  { %v319_v30 = vmul.f32 %v5335_v19, %v318_v48  ;;  %v453_v54 = vpack.c.bf16 %v425_v51, %v425_v51  ;;  %v6183_v55 = vpack.c.bf16 %v425_v51, %v423_v21  ;;  %v6200_v21 = vunpack.c.l.b16 %v474_v1 }
 0x1a2   :  { %v376_v59 = vpack.c.bf16 %v369_v58, %v368_v52  ;;  %v6209_v29 = vunpack.c.l.b16 %v500_v10  ;;  %v6213_v62 = vunpack.c.l.b16 %v513_v12 }
 0x1a3   :  { %v323_v60 = vsel %vm322_vm10, %v5335_v19, %v319_v30  ;;  %v462_v0 = vunpack.c.l.bf16 %v453_v54  ;;  %582 = vrot.lane.b32.xlu2 %v6183_v55, %s5838_s15 }
 0x1a4   :  { %4956 = vmatmul.msk.bf16.gmra.mxu0 %vm74_vm0, %v376_v59  ;;  %v344_v6 = vmul.f32 %v323_v60, %v6065_v26  ;;  %v6202_v26 = vunpack.c.l.b16 %v487_v5 }
 0x1a5   :  { %v469_v56 = vmul.f32 %v6161_v63, %v462_v0  ;;  %v482_v7 = vmul.f32 %v6163_v45, %v462_v0  ;;  %v495_v8 = vmul.f32 %v6168_v34, %v462_v0  ;;  %v508_v11 = vmul.f32 %v6171_v50, %v462_v0 }
 0x1a6   :  { %v427_v49 = vpop.f32.mrf.mxu0  ;;  %v357_v24 = vmul.f32 %v6044_v3, %v344_v6  ;;  %v371_v3 = vadd.f32 %v6057_v17, %v358_v14 }
 0x1a7   :  { %v428_v16 = vadd.f32 %v427_v49, %v6137_v9  ;;  %v475_v4 = vpack.c.bf16 %v469_v56, %v469_v56  ;;  %v488_v19 = vpack.c.bf16 %v482_v7, %v482_v7  ;;  %v501_v22 = vpack.c.bf16 %v495_v8, %v495_v8 }
 0x1a8   :  { %v514_v23 = vpack.c.bf16 %v508_v11, %v508_v11  ;;  %v370_v43 = vadd.f32 %v6057_v17, %v357_v24 }
 0x1a9   :  { %v454_v36 = vpack.c.bf16 %v428_v16, %v428_v16  ;;  %v6205_v27 = vunpack.c.l.b16 %v475_v4  ;;  %v6207_v28 = vunpack.c.l.b16 %v488_v19  ;;  %v6211_v32 = vunpack.c.l.b16 %v501_v22 }
 0x1aa   :  { %v6215_v33 = vunpack.c.l.b16 %v514_v23  ;;  %v377_v53 = vpack.c.bf16 %v371_v3, %v370_v43 }
 0x1ab   :  { %v463_v39 = vunpack.c.l.bf16 %v454_v36 }
 0x1ad   :  { %v470_v2 = vmul.f32 %v6161_v63, %v463_v39  ;;  %v483_v51 = vmul.f32 %v6163_v45, %v463_v39  ;;  %v496_v52 = vmul.f32 %v6168_v34, %v463_v39  ;;  %v509_v30 = vmul.f32 %v6171_v50, %v463_v39 }
 0x1ae   :  { %v429_v46 = vpop.f32.mrf.mxu0 }
 0x1af   :  { %v430_v48 = vadd.f32 %v429_v46, %v6137_v9  ;;  %v476_v35 = vpack.c.bf16 %v470_v2, %v470_v2  ;;  %v489_v17 = vpack.c.bf16 %v483_v51, %v483_v51  ;;  %v502_v54 = vpack.c.bf16 %v496_v52, %v496_v52 }
 0x1b0   :  { %v515_v44 = vpack.c.bf16 %v509_v30, %v509_v30 }
 0x1b1   :  { %v455_v58 = vpack.c.bf16 %v430_v48, %v430_v48  ;;  %v6232_v47 = vpack.c.bf16 %v430_v48, %v428_v16  ;;  %v6243_v7 = vunpack.c.l.b16 %v476_v35  ;;  %v6245_v8 = vunpack.c.l.b16 %v489_v17 }
 0x1b2   :  { %v6247_v49 = vunpack.c.l.b16 %v502_v54  ;;  %v6255_v4 = vunpack.c.l.b16 %v515_v44 }
 0x1b3   :  { %v464_v42 = vunpack.c.l.bf16 %v455_v58  ;;  %584 = vrot.lane.b32.xlu1 %v6232_v47, %s5838_s15 }
 0x1b4   :  { %4957 = vmatmul.msk.bf16.gmra.mxu0 %vm74_vm0, %v377_v53 }
 0x1b5   :  { %v471_v59 = vmul.f32 %v6161_v63, %v464_v42  ;;  %v484_v60 = vmul.f32 %v6163_v45, %v464_v42  ;;  %v497_v61 = vmul.f32 %v6168_v34, %v464_v42  ;;  %v510_v15 = vmul.f32 %v6171_v50, %v464_v42 }
 0x1b6   :  { %v432_v0 = vpop.f32.mrf.mxu0 }
 0x1b7   :  { %v433_v1 = vadd.f32 %v432_v0, %v6137_v9  ;;  %v477_v5 = vpack.c.bf16 %v471_v59, %v471_v59  ;;  %v490_v6 = vpack.c.bf16 %v484_v60, %v484_v60  ;;  %v503_v56 = vpack.c.bf16 %v497_v61, %v497_v61 }
 0x1b8   :  { %v516_v10 = vpack.c.bf16 %v510_v15, %v510_v15 }
 0x1b9   :  { %v456_v11 = vpack.c.bf16 %v433_v1, %v433_v1  ;;  %v6249_v12 = vunpack.c.l.b16 %v477_v5  ;;  %v6251_v16 = vunpack.c.l.b16 %v490_v6  ;;  %v6253_v25 = vunpack.c.l.b16 %v503_v56 }
 0x1ba   :  { %v6257_v19 = vunpack.c.l.b16 %v516_v10 }
 0x1bb   :  { %v465_v24 = vunpack.c.l.bf16 %v456_v11 }
 0x1bd   :  { %v472_v46 = vmul.f32 %v6161_v63, %v465_v24  ;;  %v485_v48 = vmul.f32 %v6163_v45, %v465_v24  ;;  %v498_v3 = vmul.f32 %v6168_v34, %v465_v24  ;;  %v511_v2 = vmul.f32 %v6171_v50, %v465_v24 }
 0x1be   :  { %v434_v39 = vpop.f32.mrf.mxu0 }
 0x1bf   :  { %v435_v43 = vadd.f32 %v434_v39, %v6137_v9  ;;  %v478_v53 = vpack.c.bf16 %v472_v46, %v472_v46  ;;  %v491_v30 = vpack.c.bf16 %v485_v48, %v485_v48  ;;  %v504_v42 = vpack.c.bf16 %v498_v3, %v498_v3 }
 0x1c0   :  { %v517_v35 = vpack.c.bf16 %v511_v2, %v511_v2 }
 0x1c1   :  { %v457_v51 = vpack.c.bf16 %v435_v43, %v435_v43  ;;  %v6272_v52 = vpack.c.bf16 %v435_v43, %v433_v1  ;;  %v6280_v1 = vunpack.c.l.b16 %v478_v53  ;;  %v6282_v5 = vunpack.c.l.b16 %v491_v30 }
 0x1c2   :  { %v6284_v6 = vunpack.c.l.b16 %v504_v42  ;;  %v6286_v56 = vunpack.c.l.b16 %v517_v35 }
 0x1c3   :  { %v466_v58 = vunpack.c.l.bf16 %v457_v51  ;;  %586 = vrot.lane.b32.xlu0 %v6272_v52, %s5838_s15 }
 0x1c5   :  { %v473_v17 = vmul.f32 %v6161_v63, %v466_v58  ;;  %v486_v54 = vmul.f32 %v6163_v45, %v466_v58  ;;  %v499_v59 = vmul.f32 %v6168_v34, %v466_v58  ;;  %v512_v60 = vmul.f32 %v6171_v50, %v466_v58 }
 0x1c7   :  { %v479_v61 = vpack.c.bf16 %v473_v17, %v473_v17  ;;  %v492_v15 = vpack.c.bf16 %v486_v54, %v486_v54  ;;  %v505_v0 = vpack.c.bf16 %v499_v59, %v499_v59  ;;  %v518_v44 = vpack.c.bf16 %v512_v60, %v512_v60 }
 0x1c9   :  { %v6288_v10 = vunpack.c.l.b16 %v479_v61  ;;  %v6290_v11 = vunpack.c.l.b16 %v492_v15  ;;  %v6292_v24 = vunpack.c.l.b16 %v505_v0  ;;  %v6294_v39 = vunpack.c.l.b16 %v518_v44 }
 0x210   :  { %v437_v2 = vpop.f32.mrf.mxu0 }
 0x211   :  { %v438_v51 = vadd.f32 %v437_v2, %v6137_v9 }
 0x213   :  { %v1141_v58 = vpack.c.bf16 %v438_v51, %v438_v51 }
 0x215   :  { %v1150_v53 = vunpack.c.l.bf16 %v1141_v58 }
 0x217   :  { %v1156_v42 = vmul.f32 %v1150_v53, %v6161_v63  ;;  %v1168_v17 = vmul.f32 %v1150_v53, %v6163_v45  ;;  %v1180_v54 = vmul.f32 %v1150_v53, %v6168_v34  ;;  %v1192_v59 = vmul.f32 %v1150_v53, %v6171_v50 }
 0x218   :  { %v439_v30 = vpop.f32.mrf.mxu0 }
 0x219   :  { %v440_v35 = vadd.f32 %v439_v30, %v6137_v9  ;;  %v1162_v15 = vpack.c.bf16 %v1156_v42, %v1156_v42  ;;  %v1174_v44 = vpack.c.bf16 %v1168_v17, %v1168_v17  ;;  %v1186_v2 = vpack.c.bf16 %v1180_v54, %v1180_v54 }
 0x21a   :  { %v1198_v58 = vpack.c.bf16 %v1192_v59, %v1192_v59 }
 0x21b   :  { %v1142_v60 = vpack.c.bf16 %v440_v35, %v440_v35  ;;  %v6310_v61 = vpack.c.bf16 %v440_v35, %v438_v51  ;;  %v6318_v53 = vunpack.c.l.b16 %v1162_v15  ;;  %v6321_v17 = vunpack.c.l.b16 %v1174_v44 }
 0x21c   :  { %v6323_v54 = vunpack.c.l.b16 %v1186_v2  ;;  %v6325_v59 = vunpack.c.l.b16 %v1198_v58 }
 0x21d   :  { %9322 = vst [vmem:[#allocation16_spill] sm:$0xff] %v6310_v61  ;;  %v1151_v0 = vunpack.c.l.bf16 %v1142_v60  ;;  %1267 = vrot.lane.b32.xlu1 %v6310_v61, %s5838_s15 }
 0x21f   :  { %v1157_v3 = vmul.f32 %v1151_v0, %v6161_v63  ;;  %v1169_v30 = vmul.f32 %v1151_v0, %v6163_v45  ;;  %v1181_v14 = vmul.f32 %v1151_v0, %v6168_v34  ;;  %v1193_v41 = vmul.f32 %v1151_v0, %v6171_v50 }
 0x221   :  { %v442_v51 = vpop.f32.mrf.mxu0  ;;  %v1163_v35 = vpack.c.bf16 %v1157_v3, %v1157_v3  ;;  %v1175_v42 = vpack.c.bf16 %v1169_v30, %v1169_v30  ;;  %v1187_v60 = vpack.c.bf16 %v1181_v14, %v1181_v14  ;;  %v1199_v48 = vpack.c.bf16 %v1193_v41, %v1193_v41 }
 0x222   :  { %v443_v36 = vadd.f32 %v442_v51, %v6137_v9 }
 0x223   :  { %v6327_v40 = vunpack.c.l.b16 %v1163_v35  ;;  %v6329_v46 = vunpack.c.l.b16 %v1175_v42  ;;  %v6331_v0 = vunpack.c.l.b16 %v1187_v60  ;;  %v6333_v15 = vunpack.c.l.b16 %v1199_v48 }
 0x224   :  { %v1143_v3 = vpack.c.bf16 %v443_v36, %v443_v36 }
 0x225   :  { %959 = vrot.lane.b32.xlu1 %v6272_v52, %s5839_s16 }
 0x226   :  { %v1152_v58 = vunpack.c.l.bf16 %v1143_v3 }
 0x228   :  { %v1158_v51 = vmul.f32 %v1152_v58, %v6161_v63  ;;  %v1170_v52 = vmul.f32 %v1152_v58, %v6163_v45  ;;  %v1182_v35 = vmul.f32 %v1152_v58, %v6168_v34  ;;  %v1194_v44 = vmul.f32 %v1152_v58, %v6171_v50 }
 0x229   :  { %v444_v48 = vpop.f32.mrf.mxu0 }
 0x22a   :  { %v445_v30 = vadd.f32 %v444_v48, %v6137_v9  ;;  %v1164_v3 = vpack.c.bf16 %v1158_v51, %v1158_v51  ;;  %v1176_v48 = vpack.c.bf16 %v1170_v52, %v1170_v52  ;;  %v1188_v2 = vpack.c.bf16 %v1182_v35, %v1182_v35 }
 0x22b   :  { %v1200_v43 = vpack.c.bf16 %v1194_v44, %v1194_v44 }
 0x22c   :  { %v1144_v42 = vpack.c.bf16 %v445_v30, %v445_v30  ;;  %v6349_v60 = vpack.c.bf16 %v445_v30, %v443_v36  ;;  %v6361_v31 = vunpack.c.l.b16 %v1164_v3  ;;  %v6363_v51 = vunpack.c.l.b16 %v1176_v48 }
 0x22d   :  { %957 = vrot.lane.b32.xlu1 %v6232_v47, %s5839_s16  ;;  %v6365_v52 = vunpack.c.l.b16 %v1188_v2 }
 0x22e   :  { %v1153_v14 = vunpack.c.l.bf16 %v1144_v42  ;;  %1269 = vrot.lane.b32.xlu2 %v6349_v60, %s5838_s15 }
 0x230   :  { %v1159_v41 = vmul.f32 %v1153_v14, %v6161_v63  ;;  %v1171_v23 = vmul.f32 %v1153_v14, %v6163_v45  ;;  %v1183_v37 = vmul.f32 %v1153_v14, %v6168_v34  ;;  %v1195_v36 = vmul.f32 %v1153_v14, %v6171_v50 }
 0x231   :  { %v447_v30 = vpop.f32.mrf.mxu0 }
 0x232   :  { %v448_v47 = vadd.f32 %v447_v30, %v6137_v9  ;;  %v1165_v58 = vpack.c.bf16 %v1159_v41, %v1159_v41  ;;  %v1177_v42 = vpack.c.bf16 %v1171_v23, %v1171_v23  ;;  %v1189_v22 = vpack.c.bf16 %v1183_v37, %v1183_v37  ;;  %v585_v30 = vpop.permute.xlu1 %584 }
 0x233   :  { %v1201_v35 = vpack.c.bf16 %v1195_v36, %v1195_v36  ;;  %v6375_v41 = vunpack.c.l.b16 %v1200_v43 }
 0x234   :  { %v1145_v20 = vpack.c.bf16 %v448_v47, %v448_v47  ;;  %v6367_v18 = vunpack.c.l.b16 %v1165_v58  ;;  %v6369_v13 = vunpack.c.l.b16 %v1177_v42  ;;  %v6371_v14 = vunpack.c.l.b16 %v1189_v22 }
 0x235   :  { %955 = vrot.lane.b32.xlu1 %v6183_v55, %s5839_s16  ;;  %9323 = vst [vmem:[#allocation17_spill] sm:$0xff] %v6375_v41  ;;  %v6377_v37 = vunpack.c.l.b16 %v1201_v35  ;;  %v587_v23 = vpop.permute.xlu0 %586 }
 0x236   :  { %v1154_v48 = vunpack.c.l.bf16 %v1145_v20  ;;  %v631_v22 = vsel %vm74_vm0, %v587_v23, 0 }
 0x237   :  { %9324 = vst [vmem:[#allocation18_spill] sm:$0xff] %v6377_v37  ;;  %638 = vmatpush.bf16.xpose.msra.mxu1 %v631_v22  ;;  %v628_v22 = vsel %vm74_vm0, %v585_v30, 0 }
 0x238   :  { %v1160_v58 = vmul.f32 %v1154_v48, %v6161_v63  ;;  %v1172_v42 = vmul.f32 %v1154_v48, %v6163_v45  ;;  %v1184_v35 = vmul.f32 %v1154_v48, %v6168_v34  ;;  %v1196_v2 = vmul.f32 %v1154_v48, %v6171_v50 }
 0x239   :  { %v449_v43 = vpop.f32.mrf.mxu0 }
 0x23a   :  { %v450_v36 = vadd.f32 %v449_v43, %v6137_v9  ;;  %v1166_v55 = vpack.c.bf16 %v1160_v58, %v1160_v58  ;;  %v1178_v9 = vpack.c.bf16 %v1172_v42, %v1172_v42  ;;  %v1190_v43 = vpack.c.bf16 %v1184_v35, %v1184_v35 }
 0x23b   :  { %v1202_v44 = vpack.c.bf16 %v1196_v2, %v1196_v2  ;;  %v583_v2 = vpop.permute.xlu2 %582 }
 0x23c   :  { %v1146_v3 = vpack.c.bf16 %v450_v36, %v450_v36  ;;  %v6393_v20 = vpack.c.bf16 %v450_v36, %v448_v47  ;;  %v1214_v37 = vunpack.c.l.b16 %v1166_v55  ;;  %v6404_v30 = vunpack.c.l.b16 %v1190_v43 }
 0x23d   :  { %v6406_v58 = vunpack.c.l.b16 %v1202_v44  ;;  %v625_v44 = vsel %vm74_vm0, %v583_v2, 0 }
 0x23e   :  { %9325 = vst [vmem:[#allocation19_spill] sm:$0xff] %v6393_v20  ;;  %v1155_v23 = vunpack.c.l.bf16 %v1146_v3  ;;  %1271 = vrot.lane.b32.xlu0 %v6393_v20, %s5838_s15  ;;  %v6402_v20 = vunpack.c.l.b16 %v1178_v9  ;;  %v9326_v9 = vpack.c.b16 %v6205_v27, %v6200_v21  ;;  %v9330_v21 = vpack.c.b16 %v6251_v16, %v6245_v8 }
 0x23f   :  { %639 = vmatpush.bf16.xpose.msra.mxu1 %v628_v22 }
 0x240   :  { %v1161_v38 = vmul.f32 %v1155_v23, %v6161_v63  ;;  %v1173_v57 = vmul.f32 %v1155_v23, %v6163_v45  ;;  %v1185_v48 = vmul.f32 %v1155_v23, %v6168_v34  ;;  %v1197_v47 = vmul.f32 %v1155_v23, %v6171_v50  ;;  %v9357_v63 = vld [vmem:[#allocation9_spill] sm:$0xff] }
 0x242   :  { %v1167_v36 = vpack.c.bf16 %v1161_v38, %v1161_v38  ;;  %v1179_v3 = vpack.c.bf16 %v1173_v57, %v1173_v57  ;;  %v1191_v61 = vpack.c.bf16 %v1185_v48, %v1185_v48  ;;  %v1203_v41 = vpack.c.bf16 %v1197_v47, %v1197_v47 }
 0x244   :  { %v1215_v42 = vunpack.c.l.b16 %v1167_v36  ;;  %v6408_v35 = vunpack.c.l.b16 %v1179_v3  ;;  %v6410_v22 = vunpack.c.l.b16 %v1191_v61  ;;  %v6412_v34 = vunpack.c.l.b16 %v1203_v41 }
 0x245   :  { %v9327_v61 = vpack.c.b16 %v6249_v12, %v6243_v7  ;;  %v9328_v41 = vpack.c.b16 %v6288_v10, %v6280_v1  ;;  %v9331_v7 = vpack.c.b16 %v6290_v11, %v6282_v5  ;;  %v9333_v5 = vpack.c.b16 %v6253_v25, %v6247_v49 }
 0x246   :  { %v1218_v23 = vpack.c.b16 %v1215_v42, %v1214_v37  ;;  %v1233_v38 = vpack.c.b16 %v6408_v35, %v6402_v20  ;;  %v1248_v57 = vpack.c.b16 %v6410_v22, %v6404_v30  ;;  %v1263_v55 = vpack.c.b16 %v6412_v34, %v6406_v58 }
 0x247   :  { %640 = vmatpush.bf16.xpose.msra.mxu1 %v625_v44  ;;  %v9329_v37 = vpack.c.b16 %v6207_v28, %v6202_v26  ;;  %v9332_v26 = vpack.c.b16 %v6211_v32, %v6209_v29  ;;  %v9334_v29 = vpack.c.b16 %v6327_v40, %v6318_v53  ;;  %v6463_v32 = vld [vmem:[%s9241_s1] ss:$0 sm:$0xff]  ;;  %v9335_v49 = vpack.c.b16 %v6292_v24, %v6284_v6 }
 0x248   :  { %v9336_v3 = vpack.c.b16 %v6367_v18, %v6361_v31  ;;  %v9337_v6 = vpack.c.b16 %v6215_v33, %v6213_v62  ;;  %v9338_v62 = vpack.c.b16 %v6257_v19, %v6255_v4  ;;  %v9339_v4 = vpack.c.b16 %v6329_v46, %v6321_v17 }
 0x249   :  { %v9341_v17 = vpack.c.b16 %v6369_v13, %v6363_v51 }
 0x24e   :  { %4958 = vmatmul.msk.bf16.vlgmr.msra.gmra.mxu1 %vm74_vm0, %v9326_v9 }
 0x25e   :  { %4959 = vmatmul.msk.bf16.gmra.mxu1 %vm74_vm0, %v9327_v61 }
 0x26e   :  { %4960 = vmatmul.msk.bf16.gmra.mxu1 %vm74_vm0, %v9328_v41 }
 0x27e   :  { %4961 = vmatmul.msk.bf16.gmra.mxu1 %vm74_vm0, %v9329_v37 }
 0x288   :  { %v1270_v16 = vpop.permute.xlu2 %1269 }
 0x289   :  { %v1313_v10 = vsel %vm74_vm0, %v1270_v16, 0 }
 0x28e   :  { %4962 = vmatmul.msk.bf16.gmra.mxu1 %vm74_vm0, %v9330_v21 }
 0x28f   :  { %v1268_v27 = vpop.permute.xlu1 %1267 }
 0x290   :  { %v1310_v11 = vsel %vm74_vm0, %v1268_v27, 0  ;;  %v9340_v27 = vpack.c.b16 %v6294_v39, %v6286_v56  ;;  %v9342_v56 = vpack.c.b16 %v6331_v0, %v6323_v54  ;;  %v6553_v54 = vld [vmem:[%s9241_s1 + $0x1] ss:$0 sm:$0xff] }
 0x297   :  { %v960_v43 = vpop.permute.xlu1 %959 }
 0x298   :  { %1005 = vmatpush.bf16.msra.mxu2 %v960_v43 }
 0x29e   :  { %4963 = vmatmul.msk.bf16.gmra.mxu1 %vm74_vm0, %v9331_v7 }
 0x29f   :  { %v958_v12 = vpop.permute.xlu1 %957 }
 0x2a0   :  { %1006 = vmatpush.bf16.msra.mxu2 %v958_v12 }
 0x2a7   :  { %v956_v1 = vpop.permute.xlu1 %955 }
 0x2a8   :  { %1007 = vmatpush.bf16.msra.mxu2 %v956_v1  ;;  %v9343_v1 = vpack.c.b16 %v6371_v14, %v6365_v52 }
 0x2ae   :  { %4964 = vmatmul.msk.bf16.gmra.mxu1 %vm74_vm0, %v9332_v26 }
 0x2b0   :  { %v1272_v28 = vpop.permute.xlu0 %1271 }
 0x2b1   :  { %v1316_v8 = vsel %vm74_vm0, %v1272_v28, 0 }
 0x2b2   :  { %1323 = vmatpush.bf16.xpose.msra.mxu3 %v1316_v8 }
 0x2ba   :  { %1324 = vmatpush.bf16.xpose.msra.mxu3 %v1313_v10 }
 0x2be   :  { %4965 = vmatmul.msk.bf16.gmra.mxu1 %vm74_vm0, %v9333_v5 }
 0x2c2   :  { %1325 = vmatpush.bf16.xpose.msra.mxu3 %v1310_v11 }
 0x2c9   :  { %4982 = vmatmul.msk.bf16.vlgmr.msra.gmra.mxu3 %vm74_vm0, %v9334_v29 }
 0x2cb   :  { %v642_v48 = vpop.f32.mrf.mxu1 }
 0x2cc   :  { %v643_v47 = vadd.f32 %v6463_v32, %v642_v48 }
 0x2ce   :  { %4966 = vmatmul.msk.bf16.gmra.mxu1 %vm74_vm0, %v9335_v49  ;;  %v703_v25 = vsel %vm702_vm11, %v643_v47, -inf }
 0x2cf   :  { %704 = vmax.xlane.f32.xlu0 %v703_v25 }
 0x2d3   :  { %v644_v40 = vpop.f32.mrf.mxu1 }
 0x2d4   :  { %v645_v53 = vadd.f32 %v6463_v32, %v644_v40 }
 0x2d6   :  { %v706_v36 = vsel %vm702_vm11, %v645_v53, -inf }
 0x2d7   :  { %707 = vmax.xlane.f32.xlu2 %v706_v36 }
 0x2d9   :  { %4983 = vmatmul.msk.bf16.gmra.mxu3 %vm74_vm0, %v9336_v3 }
 0x2db   :  { %v647_v2 = vpop.f32.mrf.mxu1 }
 0x2dc   :  { %v6478_v42 = vadd.f32 %v6463_v32, %v647_v2 }
 0x2de   :  { %4967 = vmatmul.msk.bf16.gmra.mxu1 %vm74_vm0, %v9337_v6  ;;  %v709_v24 = vsel %vm702_vm11, %v6478_v42, -inf }
 0x2df   :  { %710 = vmax.xlane.f32.xlu1 %v709_v24 }
 0x2e3   :  { %v649_v44 = vpop.f32.mrf.mxu1 }
 0x2e4   :  { %v6487_v9 = vadd.f32 %v6463_v32, %v649_v44 }
 0x2e6   :  { %v712_v18 = vsel %vm702_vm11, %v6487_v9, -inf }
 0x2e7   :  { %713 = vmax.xlane.f32.xlu0 %v712_v18 }
 0x2e9   :  { %4984 = vmatmul.msk.bf16.gmra.mxu3 %vm74_vm0, %v1218_v23 }
 0x2eb   :  { %v652_v31 = vpop.f32.mrf.mxu1 }
 0x2ec   :  { %v6493_v61 = vadd.f32 %v6463_v32, %v652_v31 }
 0x2ee   :  { %4968 = vmatmul.msk.bf16.gmra.mxu1 %vm74_vm0, %v9338_v62  ;;  %v715_v33 = vsel %vm702_vm11, %v6493_v61, -inf }
 0x2ef   :  { %716 = vmax.xlane.f32.xlu2 %v715_v33 }
 0x2f3   :  { %v654_v41 = vpop.f32.mrf.mxu1 }
 0x2f4   :  { %v6502_v37 = vadd.f32 %v6463_v32, %v654_v41  ;;  %v9345_v41 = vld [vmem:[#allocation19_spill] sm:$0xff] }
 0x2f6   :  { %v718_v23 = vsel %vm702_vm11, %v6502_v37, -inf }
 0x2f7   :  { %719 = vmax.xlane.f32.xlu0 %v718_v23 }
 0x2f8   :  { %1641 = vrot.lane.b32.xlu1 %v6349_v60, %s5839_s16 }
 0x2f9   :  { %4985 = vmatmul.msk.bf16.gmra.mxu3 %vm74_vm0, %v9339_v4  ;;  %v9346_v4 = vld [vmem:[#allocation18_spill] sm:$0xff] }
 0x2fb   :  { %v657_v19 = vpop.f32.mrf.mxu1 }
 0x2fc   :  { %v6513_v21 = vadd.f32 %v6463_v32, %v657_v19  ;;  %v9347_v19 = vld [vmem:[#allocation17_spill] sm:$0xff] }
 0x2fe   :  { %4969 = vmatmul.msk.bf16.gmra.mxu1 %vm74_vm0, %v9340_v27  ;;  %v721_v43 = vsel %vm702_vm11, %v6513_v21, -inf  ;;  %v9348_v27 = vpack.c.b16 %v9346_v4, %v9347_v19 }
 0x2ff   :  { %722 = vmax.xlane.f32.xlu2 %v721_v43 }
 0x303   :  { %v659_v7 = vpop.f32.mrf.mxu1 }
 0x304   :  { %v6522_v60 = vadd.f32 %v6463_v32, %v659_v7 }
 0x306   :  { %v724_v46 = vsel %vm702_vm11, %v6522_v60, -inf }
 0x307   :  { %725 = vmax.xlane.f32.xlu0 %v724_v46 }
 0x309   :  { %4986 = vmatmul.msk.bf16.gmra.mxu3 %vm74_vm0, %v9341_v17 }
 0x30b   :  { %v662_v39 = vpop.f32.mrf.mxu1 }
 0x30c   :  { %v6578_v49 = vadd.f32 %v6463_v32, %v662_v39 }
 0x313   :  { %v664_v12 = vpop.f32.mrf.mxu1 }
 0x319   :  { %4987 = vmatmul.msk.bf16.gmra.mxu3 %vm74_vm0, %v1233_v38 }
 0x31b   :  { %v6542_v13 = vpop.f32.mrf.mxu1 }
 0x323   :  { %v6544_v28 = vpop.f32.mrf.mxu1 }
 0x329   :  { %4988 = vmatmul.msk.bf16.gmra.mxu3 %vm74_vm0, %v9342_v56 }
 0x32b   :  { %v672_v30 = vpop.f32.mrf.mxu1 }
 0x339   :  { %4989 = vmatmul.msk.bf16.gmra.mxu3 %vm74_vm0, %v9343_v1  ;;  %v6620_v1 = vadd.f32 %v6463_v32, %v672_v30 }
 0x342   :  { %v705_v51 = vpop.xlane.xlu0 %704 }
 0x343   :  { %v775_v26 = vsub.f32 %v643_v47, %v705_v51  ;;  %v9344_v47 = vpack.c.b16 %v6333_v15, %v6325_v59  ;;  %v6586_v59 = vadd.f32 %v6463_v32, %v664_v12 }
 0x345   :  { %v799_v0 = vmul.f32 1.442695, %v775_v26  ;;  %v730_v23 = vsel %vm702_vm11, %v6586_v59, -inf }
 0x347   :  { %5336 = vpow2.f32 %v799_v0 }
 0x349   :  { %4990 = vmatmul.msk.bf16.gmra.mxu3 %vm74_vm0, %v1248_v57 }
 0x34a   :  { %v708_v52 = vpop.xlane.xlu2 %707 }
 0x34b   :  { %v776_v14 = vsub.f32 %v645_v53, %v708_v52  ;;  %v6580_v53 = vpop.f32.mrf.mxu1 }
 0x34c   :  { %v1327_v20 = vpop.f32.mrf.mxu3 }
 0x34d   :  { %v6556_v35 = vadd.f32 %v6553_v54, %v1327_v20  ;;  %v801_v38 = vmul.f32 1.442695, %v776_v14  ;;  %v6560_v16 = vpop.eup %5336  ;;  %v739_v14 = vsel %vm702_vm11, %v6620_v1, -inf }
 0x34f   :  { %v1387_v8 = vsel %vm702_vm11, %v6556_v35, -inf  ;;  %5338 = vpow2.f32 %v801_v38 }
 0x350   :  { %1388 = vmax.xlane.f32.xlu2 %v1387_v8 }
 0x352   :  { %v711_v22 = vpop.xlane.xlu1 %710 }
 0x353   :  { %v777_v11 = vsub.f32 %v6478_v42, %v711_v22  ;;  %v727_v42 = vsel %vm702_vm11, %v6578_v49, -inf }
 0x354   :  { %v1329_v57 = vpop.f32.mrf.mxu3 }
 0x355   :  { %v6563_v10 = vadd.f32 %v6553_v54, %v1329_v57  ;;  %v6565_v5 = vpop.eup %5338  ;;  %v803_v25 = vmul.f32 1.442695, %v777_v11  ;;  %v9349_v57 = vld [vmem:[#allocation16_spill] sm:$0xff] }
 0x356   :  { %v943_v48 = vpack.c.bf16 %v6565_v5, %v6560_v16 }
 0x357   :  { %v1390_v29 = vsel %vm702_vm11, %v6563_v10, -inf  ;;  %5340 = vpow2.f32 %v803_v25 }
 0x358   :  { %1391 = vmax.xlane.f32.xlu0 %v1390_v29  ;;  %4970 = vmatmul.msk.bf16.vlgmr.msra.gmra.mxu2 %vm702_vm11, %v943_v48 }
 0x359   :  { %4991 = vmatmul.msk.bf16.gmra.mxu3 %vm74_vm0, %v9344_v47 }
 0x35a   :  { %v714_v40 = vpop.xlane.xlu0 %713 }
 0x35b   :  { %v778_v36 = vsub.f32 %v6487_v9, %v714_v40  ;;  %v6595_v9 = vpop.f32.mrf.mxu1 }
 0x35c   :  { %v1332_v3 = vpop.f32.mrf.mxu3 }
 0x35d   :  { %v805_v2 = vmul.f32 1.442695, %v778_v36  ;;  %v6588_v24 = vpop.eup %5340 }
 0x35f   :  { %5342 = vpow2.f32 %v805_v2 }
 0x360   :  { %728 = vmax.xlane.f32.xlu0 %v727_v42 }
 0x362   :  { %v717_v15 = vpop.xlane.xlu2 %716 }
 0x363   :  { %v779_v31 = vsub.f32 %v6493_v61, %v717_v15  ;;  %v6617_v12 = vpop.f32.mrf.mxu1 }
 0x364   :  { %v1334_v6 = vpop.f32.mrf.mxu3 }
 0x365   :  { %v6591_v44 = vadd.f32 %v6553_v54, %v1334_v6  ;;  %v6593_v18 = vpop.eup %5342  ;;  %v807_v61 = vmul.f32 1.442695, %v779_v31 }
 0x366   :  { %v944_v33 = vpack.c.bf16 %v6593_v18, %v6588_v24 }
 0x367   :  { %v1396_v62 = vsel %vm702_vm11, %v6591_v44, -inf  ;;  %5344 = vpow2.f32 %v807_v61  ;;  %v6686_v61 = vadd.f32 %v6463_v32, %v6542_v13  ;;  %v6701_v13 = vadd.f32 %v6463_v32, %v6595_v9 }
 0x368   :  { %1397 = vmax.xlane.f32.xlu1 %v1396_v62  ;;  %1643 = vrot.lane.b32.xlu2 %v9345_v41, %s5839_s16 }
 0x369   :  { %731 = vmax.xlane.f32.xlu0 %v730_v23  ;;  %4971 = vmatmul.msk.bf16.gmra.mxu2 %vm702_vm11, %v944_v33 }
 0x36a   :  { %4992 = vmatmul.msk.bf16.gmra.mxu3 %vm74_vm0, %v9348_v27  ;;  %v720_v43 = vpop.xlane.xlu0 %719 }
 0x36b   :  { %v780_v7 = vsub.f32 %v6502_v37, %v720_v43  ;;  %v6632_v38 = vpop.f32.mrf.mxu1 }
 0x36c   :  { %v1337_v46 = vpop.f32.mrf.mxu3 }
 0x36d   :  { %v6613_v17 = vadd.f32 %v6553_v54, %v1337_v46  ;;  %v809_v56 = vmul.f32 1.442695, %v780_v7  ;;  %v6622_v0 = vpop.eup %5344  ;;  %v6690_v7 = vadd.f32 %v6463_v32, %v6580_v53 }
 0x36f   :  { %v1399_v39 = vsel %vm702_vm11, %v6613_v17, -inf  ;;  %5346 = vpow2.f32 %v809_v56  ;;  %v733_v56 = vsel %vm702_vm11, %v6686_v61, -inf }
 0x370   :  { %1400 = vmax.xlane.f32.xlu1 %v1399_v39  ;;  %v742_v39 = vsel %vm702_vm11, %v6690_v7, -inf }
 0x372   :  { %v723_v51 = vpop.xlane.xlu2 %722 }
 0x373   :  { %v781_v52 = vsub.f32 %v6513_v21, %v723_v51  ;;  %v684_v29 = vpop.f32.mrf.mxu1 }
 0x374   :  { %v1339_v26 = vpop.f32.mrf.mxu3  ;;  %v6664_v6 = vadd.f32 %v6463_v32, %v684_v29 }
 0x375   :  { %v6624_v37 = vpop.eup %5346  ;;  %v811_v8 = vmul.f32 1.442695, %v781_v52  ;;  %v6678_v4 = vadd.f32 %v6553_v54, %v1339_v26 }
 0x376   :  { %v945_v20 = vpack.c.bf16 %v6624_v37, %v6622_v0  ;;  %v754_v62 = vsel %vm702_vm11, %v6664_v6, -inf }
 0x377   :  { %5348 = vpow2.f32 %v811_v8  ;;  %v1402_v27 = vsel %vm702_vm11, %v6678_v4, -inf }
 0x378   :  { %740 = vmax.xlane.f32.xlu1 %v739_v14  ;;  %v745_v14 = vsel %vm702_vm11, %v6701_v13, -inf }
 0x379   :  { %4972 = vmatmul.msk.bf16.gmra.mxu2 %vm702_vm11, %v945_v20  ;;  %v6709_v20 = vadd.f32 %v6463_v32, %v6617_v12 }
 0x37a   :  { %4993 = vmatmul.msk.bf16.gmra.mxu3 %vm74_vm0, %v1263_v55  ;;  %v726_v30 = vpop.xlane.xlu0 %725 }
 0x37b   :  { %v782_v21 = vsub.f32 %v6522_v60, %v726_v30  ;;  %v6654_v60 = vadd.f32 %v6553_v54, %v1332_v3  ;;  %v687_v2 = vpop.f32.mrf.mxu1  ;;  %v6668_v3 = vadd.f32 %v6463_v32, %v6544_v28 }
 0x37c   :  { %v1342_v22 = vpop.f32.mrf.mxu3  ;;  %v6675_v23 = vadd.f32 %v6463_v32, %v687_v2 }
 0x37d   :  { %1639 = vrot.lane.b32.xlu0 %v9349_v57, %s5839_s16  ;;  %v813_v11 = vmul.f32 1.442695, %v782_v21  ;;  %v6641_v47 = vpop.eup %5348  ;;  %v1393_v15 = vsel %vm702_vm11, %v6654_v60, -inf  ;;  %v736_v41 = vsel %vm702_vm11, %v6668_v3, -inf  ;;  %v6697_v51 = vadd.f32 %v6553_v54, %v1342_v22 }
 0x37e   :  { %v757_v28 = vsel %vm702_vm11, %v6675_v23, -inf  ;;  %v748_v22 = vsel %vm702_vm11, %v6709_v20, -inf }
 0x37f   :  { %5350 = vpow2.f32 %v813_v11  ;;  %v1405_v53 = vsel %vm702_vm11, %v6697_v51, -inf  ;;  %v6725_v11 = vadd.f32 %v6463_v32, %v6632_v38 }
 0x383   :  { %v689_v33 = vpop.f32.mrf.mxu1 }
 0x384   :  { %v1344_v48 = vpop.f32.mrf.mxu3 }
 0x385   :  { %v6644_v25 = vadd.f32 %v6553_v54, %v1344_v48  ;;  %v6646_v34 = vpop.eup %5350 }
 0x386   :  { %v946_v55 = vpack.c.bf16 %v6646_v34, %v6641_v47 }
 0x387   :  { %v1408_v58 = vsel %vm702_vm11, %v6644_v25, -inf }
 0x388   :  { %1409 = vmax.xlane.f32.xlu1 %v1408_v58 }
 0x389   :  { %4973 = vmatmul.msk.bf16.gmra.mxu2 %vm702_vm11, %v946_v55  ;;  %v751_v55 = vsel %vm702_vm11, %v6725_v11, -inf }
 0x38b   :  { %v692_v43 = vpop.f32.mrf.mxu1 }
 0x38c   :  { %v1347_v40 = vpop.f32.mrf.mxu3 }
 0x38d   :  { %v6657_v36 = vadd.f32 %v6553_v54, %v1347_v40 }
 0x38f   :  { %v1411_v42 = vsel %vm702_vm11, %v6657_v36, -inf }
 0x390   :  { %1412 = vmax.xlane.f32.xlu1 %v1411_v42 }
 0x391   :  { %1394 = vmax.xlane.f32.xlu2 %v1393_v15 }
 0x393   :  { %v694_v26 = vpop.f32.mrf.mxu1 }
 0x394   :  { %v1349_v31 = vpop.f32.mrf.mxu3 }
 0x395   :  { %v6712_v8 = vadd.f32 %v6553_v54, %v1349_v31 }
 0x397   :  { %v1414_v12 = vsel %vm702_vm11, %v6712_v8, -inf }
 0x398   :  { %755 = vmax.xlane.f32.xlu1 %v754_v62  ;;  %v6746_v62 = vadd.f32 %v6463_v32, %v689_v33  ;;  %v6758_v33 = vadd.f32 %v6463_v32, %v692_v43 }
 0x399   :  { %737 = vmax.xlane.f32.xlu2 %v736_v41 }
 0x39b   :  { %v697_v21 = vpop.f32.mrf.mxu1 }
 0x39c   :  { %v1352_v19 = vpop.f32.mrf.mxu3 }
 0x39d   :  { %v6728_v29 = vadd.f32 %v6553_v54, %v1352_v19 }
 0x39f   :  { %v1417_v38 = vsel %vm702_vm11, %v6728_v29, -inf }
 0x3a0   :  { %758 = vmax.xlane.f32.xlu1 %v757_v28 }
 0x3a1   :  { %1403 = vmax.xlane.f32.xlu2 %v1402_v27  ;;  %v760_v27 = vsel %vm702_vm11, %v6746_v62, -inf }
 0x3a3   :  { %v699_v2 = vpop.f32.mrf.mxu1 }
 0x3a4   :  { %v1354_v46 = vpop.f32.mrf.mxu3  ;;  %v6743_v15 = vadd.f32 %v6463_v32, %v699_v2  ;;  %v6776_v2 = vadd.f32 %v6463_v32, %v697_v21 }
 0x3a5   :  { %v6740_v42 = vadd.f32 %v6553_v54, %v1354_v46 }
 0x3a6   :  { %v772_v28 = vsel %vm702_vm11, %v6743_v15, -inf }
 0x3a7   :  { %734 = vmax.xlane.f32.xlu0 %v733_v56  ;;  %v1420_v19 = vsel %vm702_vm11, %v6740_v42, -inf }
 0x3a9   :  { %743 = vmax.xlane.f32.xlu2 %v742_v39 }
 0x3ac   :  { %v1357_v52 = vpop.f32.mrf.mxu3 }
 0x3ad   :  { %v6755_v46 = vadd.f32 %v6553_v54, %v1357_v52  ;;  %v6765_v52 = vadd.f32 %v6463_v32, %v694_v26 }
 0x3af   :  { %1406 = vmax.xlane.f32.xlu0 %v1405_v53 }
 0x3b1   :  { %746 = vmax.xlane.f32.xlu2 %v745_v14  ;;  %v1423_v14 = vsel %vm702_vm11, %v6755_v46, -inf }
 0x3b4   :  { %v1359_v30 = vpop.f32.mrf.mxu3 }
 0x3b5   :  { %v6715_v9 = vadd.f32 %v6553_v54, %v1359_v30  ;;  %v1642_v30 = vpop.permute.xlu1 %1641 }
 0x3b7   :  { %749 = vmax.xlane.f32.xlu0 %v748_v22  ;;  %v1426_v57 = vsel %vm702_vm11, %v6715_v9, -inf  ;;  %v763_v22 = vsel %vm702_vm11, %v6758_v33, -inf }
 0x3b8   :  { %1427 = vmax.xlane.f32.xlu1 %v1426_v57 }
 0x3b9   :  { %1415 = vmax.xlane.f32.xlu2 %v1414_v12 }
 0x3bc   :  { %v1362_v48 = vpop.f32.mrf.mxu3 }
 0x3bd   :  { %v6731_v58 = vadd.f32 %v6553_v54, %v1362_v48  ;;  %v766_v48 = vsel %vm702_vm11, %v6765_v52, -inf }
 0x3bf   :  { %752 = vmax.xlane.f32.xlu0 %v751_v55  ;;  %v1429_v40 = vsel %vm702_vm11, %v6731_v58, -inf }
 0x3c0   :  { %1430 = vmax.xlane.f32.xlu1 %v1429_v40 }
 0x3c1   :  { %1418 = vmax.xlane.f32.xlu2 %v1417_v38 }
 0x3c3   :  { %v1389_v31 = vpop.xlane.xlu2 %1388 }
 0x3c4   :  { %v1364_v41 = vpop.f32.mrf.mxu3 }
 0x3c5   :  { %v6768_v12 = vadd.f32 %v6553_v54, %v1364_v41 }
 0x3c7   :  { %1421 = vmax.xlane.f32.xlu0 %v1420_v19  ;;  %v1432_v40 = vsel %vm702_vm11, %v6768_v12, -inf }
 0x3c8   :  { %773 = vmax.xlane.f32.xlu1 %v772_v28 }
 0x3c9   :  { %761 = vmax.xlane.f32.xlu2 %v760_v27 }
 0x3cb   :  { %v1644_v56 = vpop.permute.xlu2 %1643  ;;  %v1392_v39 = vpop.xlane.xlu0 %1391 }
 0x3cc   :  { %v1367_v53 = vpop.f32.mrf.mxu3  ;;  %1689 = vmatpush.bf16.msrb.mxu0 %v1644_v56 }
 0x3cd   :  { %v6779_v26 = vadd.f32 %v6553_v54, %v1367_v53 }
 0x3cf   :  { %1424 = vmax.xlane.f32.xlu0 %v1423_v14  ;;  %v1460_v14 = vsub.f32 %v6563_v10, %v1392_v39  ;;  %v1435_v21 = vsel %vm702_vm11, %v6779_v26, -inf }
 0x3d0   :  { %1690 = vmatpush.bf16.msrb.mxu0 %v1642_v30 }
 0x3d1   :  { %764 = vmax.xlane.f32.xlu2 %v763_v22  ;;  %v1485_v30 = vmul.f32 1.442695, %v1460_v14 }
 0x3d3   :  { %v729_v57 = vpop.xlane.xlu0 %728 }
 0x3d4   :  { %v1369_v43 = vpop.f32.mrf.mxu3  ;;  %v783_v55 = vsub.f32 %v6578_v49, %v729_v57  ;;  %v769_v49 = vsel %vm702_vm11, %v6776_v2, -inf }
 0x3d5   :  { %v6794_v53 = vadd.f32 %v6553_v54, %v1369_v43 }
 0x3d6   :  { %v815_v38 = vmul.f32 1.442695, %v783_v55 }
 0x3d7   :  { %767 = vmax.xlane.f32.xlu0 %v766_v48  ;;  %v1438_v48 = vsel %vm702_vm11, %v6794_v53, -inf }
 0x3d8   :  { %5352 = vpow2.f32 %v815_v38 }
 0x3d9   :  { %1433 = vmax.xlane.f32.xlu2 %v1432_v40 }
 0x3db   :  { %v1398_v40 = vpop.xlane.xlu1 %1397 }
 0x3dc   :  { %v732_v41 = vpop.xlane.xlu0 %731  ;;  %v1372_v28 = vpop.f32.mrf.mxu3 }
 0x3dd   :  { %v784_v19 = vsub.f32 %v6586_v59, %v732_v41  ;;  %v6783_v27 = vadd.f32 %v6553_v54, %v1372_v28  ;;  %v1459_v59 = vsub.f32 %v6556_v35, %v1389_v31 }
 0x3de   :  { %v6796_v57 = vpop.eup %5352 }
 0x3df   :  { %v817_v56 = vmul.f32 1.442695, %v784_v19  ;;  %770 = vmax.xlane.f32.xlu0 %v769_v49  ;;  %v1441_v32 = vsel %vm702_vm11, %v6783_v27, -inf  ;;  %v1483_v10 = vmul.f32 1.442695, %v1459_v59 }
 0x3e0   :  { %1442 = vmax.xlane.f32.xlu1 %v1441_v32 }
 0x3e1   :  { %5354 = vpow2.f32 %v817_v56  ;;  %1436 = vmax.xlane.f32.xlu2 %v1435_v21 }
 0x3e2   :  { %5356 = vpow2.f32 %v1485_v30 }
 0x3e3   :  { %5358 = vpow2.f32 %v1483_v10  ;;  %v1401_v14 = vpop.xlane.xlu1 %1400 }
 0x3e4   :  { %v1374_v22 = vpop.f32.mrf.mxu3 }
 0x3e5   :  { %v6799_v39 = vadd.f32 %v6553_v54, %v1374_v22 }
 0x3e7   :  { %v6803_v55 = vpop.eup %5354  ;;  %1439 = vmax.xlane.f32.xlu0 %v1438_v48  ;;  %v1444_v35 = vsel %vm702_vm11, %v6799_v39, -inf }
 0x3e8   :  { %v947_v31 = vpack.c.bf16 %v6803_v55, %v6796_v57  ;;  %v6810_v38 = vpop.eup %5356 }
 0x3e9   :  { %1445 = vmax.xlane.f32.xlu2 %v1444_v35  ;;  %v6815_v28 = vpop.eup %5358  ;;  %v1462_v35 = vsub.f32 %v6591_v44, %v1398_v40  ;;  %v868_v40 = vsel %vm702_vm11, %v6646_v34, 0.0 }
 0x3ea   :  { %4974 = vmatmul.msk.bf16.gmra.mxu2 %vm702_vm11, %v947_v31  ;;  %v1627_v56 = vpack.c.bf16 %v6810_v38, %v6815_v28 }
 0x3eb   :  { %v741_v30 = vpop.xlane.xlu1 %740 }
 0x3ec   :  { %v787_v48 = vsub.f32 %v6620_v1, %v741_v30  ;;  %v850_v1 = vsel %vm702_vm11, %v6565_v5, 0.0  ;;  %v1463_v5 = vsub.f32 %v6613_v17, %v1401_v14 }
 0x3ed   :  { %v1377_v43 = vpop.f32.mrf.mxu3 }
 0x3ee   :  { %v6813_v41 = vadd.f32 %v6553_v54, %v1377_v43  ;;  %v847_v43 = vsel %vm702_vm11, %v6560_v16, 0.0 }
 0x3ef   :  { %v1640_v19 = vpop.permute.xlu0 %1639 }
 0x3f0   :  { %1691 = vmatpush.bf16.msrb.mxu0 %v1640_v19  ;;  %v1447_v49 = vsel %vm702_vm11, %v6813_v41, -inf  ;;  %v823_v19 = vmul.f32 1.442695, %v787_v48 }
 0x3f1   :  { %1448 = vmax.xlane.f32.xlu0 %v1447_v49  ;;  %v1489_v49 = vmul.f32 1.442695, %v1462_v35 }
 0x3f2   :  { %5360 = vpow2.f32 %v823_v19  ;;  %v856_v19 = vsel %vm702_vm11, %v6593_v18, 0.0 }
 0x3f3   :  { %4994 = vmatmul.msk.bf16.vlgmr.msrb.gmra.mxu0 %vm702_vm11, %v1627_v56  ;;  %5362 = vpow2.f32 %v1489_v49  ;;  %v1491_v49 = vmul.f32 1.442695, %v1463_v5 }
 0x3f5   :  { %v1379_v32 = vpop.f32.mrf.mxu3 }
 0x3f6   :  { %v6823_v21 = vadd.f32 %v6553_v54, %v1379_v32 }
 0x3f8   :  { %v1450_v59 = vsel %vm702_vm11, %v6823_v21, -inf  ;;  %v6846_v30 = vpop.eup %5360 }
 0x3f9   :  { %1451 = vmax.xlane.f32.xlu1 %v1450_v59 }
 0x3fb   :  { %v1410_v32 = vpop.xlane.xlu1 %1409 }
 0x3fd   :  { %v1382_v22 = vpop.f32.mrf.mxu3 }
 0x3fe   :  { %v6828_v10 = vadd.f32 %v6553_v54, %v1382_v22 }
 0x400   :  { %v1453_v31 = vsel %vm702_vm11, %v6828_v10, -inf }
 0x401   :  { %1454 = vmax.xlane.f32.xlu2 %v1453_v31  ;;  %848 = vadd.xlane.f32.xlu1 %v847_v43  ;;  %v883_v31 = vsel %vm702_vm11, %v6846_v30, 0.0  ;;  %v865_v43 = vsel %vm702_vm11, %v6641_v47, 0.0  ;;  %v871_v47 = vsel %vm702_vm11, %v6796_v57, 0.0  ;;  %v1466_v57 = vsub.f32 %v6644_v25, %v1410_v32 }
 0x403   :  { %v6852_v35 = vpop.xlane.xlu1 %1412 }
 0x404   :  { %v1395_v56 = vpop.xlane.xlu2 %1394 }
 0x405   :  { %v1384_v59 = vpop.f32.mrf.mxu3  ;;  %v1461_v22 = vsub.f32 %v6654_v60, %v1395_v56 }
 0x406   :  { %v6838_v50 = vadd.f32 %v6553_v54, %v1384_v59  ;;  %v6848_v54 = vpop.eup %5362 }
 0x407   :  { %v1487_v44 = vmul.f32 1.442695, %v1461_v22 }
 0x408   :  { %v1456_v16 = vsel %vm702_vm11, %v6838_v50, -inf }
 0x409   :  { %5364 = vpow2.f32 %v1487_v44  ;;  %851 = vadd.xlane.f32.xlu2 %v850_v1  ;;  %1457 = vmax.xlane.f32.xlu0 %v1456_v16 }
 0x40a   :  { %869 = vadd.xlane.f32.xlu1 %v868_v40  ;;  %5366 = vpow2.f32 %v1491_v49  ;;  %v1497_v49 = vmul.f32 1.442695, %v1466_v57 }
 0x40b   :  { %v756_v22 = vpop.xlane.xlu1 %755 }
 0x40c   :  { %v738_v60 = vpop.xlane.xlu2 %737 }
 0x40d   :  { %v786_v14 = vsub.f32 %v6668_v3, %v738_v60  ;;  %v859_v60 = vsel %vm702_vm11, %v6622_v0, 0.0 }
 0x40f   :  { %v6850_v48 = vpop.eup %5364  ;;  %v821_v44 = vmul.f32 1.442695, %v786_v14 }
 0x410   :  { %v1628_v34 = vpack.c.bf16 %v6848_v54, %v6850_v48 }
 0x411   :  { %884 = vadd.xlane.f32.xlu2 %v883_v31  ;;  %866 = vadd.xlane.f32.xlu0 %v865_v43  ;;  %v6870_v31 = vpop.eup %5366 }
 0x412   :  { %857 = vadd.xlane.f32.xlu1 %v856_v19  ;;  %4995 = vmatmul.msk.bf16.gmra.mxu0 %vm702_vm11, %v1628_v34 }
 0x414   :  { %v1404_v56 = vpop.xlane.xlu2 %1403 }
 0x415   :  { %v1464_v17 = vsub.f32 %v6678_v4, %v1404_v56 }
 0x417   :  { %v1493_v59 = vmul.f32 1.442695, %v1464_v17 }
 0x419   :  { %5368 = vpow2.f32 %v1493_v59  ;;  %872 = vadd.xlane.f32.xlu2 %v871_v47 }
 0x41a   :  { %v735_v1 = vpop.xlane.xlu0 %734  ;;  %5370 = vpow2.f32 %v821_v44 }
 0x41b   :  { %v785_v18 = vsub.f32 %v6686_v61, %v735_v1 }
 0x41c   :  { %v744_v16 = vpop.xlane.xlu2 %743 }
 0x41d   :  { %v819_v40 = vmul.f32 1.442695, %v785_v18  ;;  %v788_v5 = vsub.f32 %v6690_v7, %v744_v16  ;;  %v759_v7 = vpop.xlane.xlu1 %758 }
 0x41e   :  { %v793_v0 = vsub.f32 %v6675_v23, %v759_v7  ;;  %v1467_v7 = vsub.f32 %v6657_v36, %v6852_v35  ;;  %v874_v35 = vsel %vm702_vm11, %v6803_v55, 0.0 }
 0x41f   :  { %v6872_v3 = vpop.eup %5368  ;;  %5372 = vpow2.f32 %v819_v40  ;;  %v825_v4 = vmul.f32 1.442695, %v788_v5 }
 0x420   :  { %v1629_v43 = vpack.c.bf16 %v6872_v3, %v6870_v31  ;;  %v6881_v19 = vpop.eup %5370  ;;  %v835_v1 = vmul.f32 1.442695, %v793_v0 }
 0x421   :  { %5374 = vpow2.f32 %v825_v4  ;;  %860 = vadd.xlane.f32.xlu2 %v859_v60  ;;  %v792_v4 = vsub.f32 %v6664_v6, %v756_v22 }
 0x422   :  { %v1407_v61 = vpop.xlane.xlu0 %1406  ;;  %4996 = vmatmul.msk.bf16.gmra.mxu0 %vm702_vm11, %v1629_v43  ;;  %v853_v43 = vsel %vm702_vm11, %v6588_v24, 0.0  ;;  %v1499_v24 = vmul.f32 1.442695, %v1467_v7 }
 0x423   :  { %v1465_v34 = vsub.f32 %v6697_v51, %v1407_v61 }
 0x424   :  { %v747_v56 = vpop.xlane.xlu2 %746 }
 0x425   :  { %v5373_v17 = vpop.eup %5372  ;;  %v1495_v25 = vmul.f32 1.442695, %v1465_v34  ;;  %v789_v32 = vsub.f32 %v6701_v13, %v747_v56  ;;  %v833_v34 = vmul.f32 1.442695, %v792_v4 }
 0x426   :  { %v877_v14 = vsel %vm702_vm11, %v5373_v17, 0.0  ;;  %v948_v59 = vpack.c.bf16 %v6881_v19, %v5373_v17 }
 0x427   :  { %v5375_v47 = vpop.eup %5374  ;;  %5376 = vpow2.f32 %v1495_v25  ;;  %v827_v44 = vmul.f32 1.442695, %v789_v32  ;;  %878 = vadd.xlane.f32.xlu1 %v877_v14 }
 0x428   :  { %5378 = vpow2.f32 %v1497_v49  ;;  %4975 = vmatmul.msk.bf16.gmra.mxu2 %vm702_vm11, %v948_v59  ;;  %v886_v51 = vsel %vm702_vm11, %v5375_v47, 0.0  ;;  %v949_v25 = vpack.c.bf16 %v5375_v47, %v6846_v30 }
 0x429   :  { %5380 = vpow2.f32 %v827_v44  ;;  %887 = vadd.xlane.f32.xlu0 %v886_v51 }
 0x42a   :  { %v750_v18 = vpop.xlane.xlu0 %749  ;;  %5382 = vpow2.f32 %v835_v1 }
 0x42b   :  { %v790_v13 = vsub.f32 %v6709_v20, %v750_v18  ;;  %v1428_v51 = vpop.xlane.xlu1 %1427 }
 0x42c   :  { %v1416_v23 = vpop.xlane.xlu2 %1415 }
 0x42d   :  { %v6890_v16 = vpop.eup %5376  ;;  %v829_v40 = vmul.f32 1.442695, %v790_v13  ;;  %v1468_v60 = vsub.f32 %v6712_v8, %v1416_v23  ;;  %v862_v13 = vsel %vm702_vm11, %v6624_v37, 0.0 }
 0x42e   :  { %v6892_v5 = vpop.eup %5378 }
 0x42f   :  { %v5381_v57 = vpop.eup %5380  ;;  %5384 = vpow2.f32 %v829_v40  ;;  %v1630_v20 = vpack.c.bf16 %v6892_v5, %v6890_v16  ;;  %v1501_v22 = vmul.f32 1.442695, %v1468_v60 }
 0x430   :  { %v889_v61 = vsel %vm702_vm11, %v5381_v57, 0.0  ;;  %v6904_v49 = vpop.eup %5382  ;;  %5386 = vpow2.f32 %v833_v34 }
 0x431   :  { %854 = vadd.xlane.f32.xlu0 %v853_v43  ;;  %890 = vadd.xlane.f32.xlu1 %v889_v61  ;;  %5388 = vpow2.f32 %v1501_v22  ;;  %v901_v32 = vsel %vm702_vm11, %v6904_v49, 0.0 }
 0x432   :  { %v753_v6 = vpop.xlane.xlu0 %752  ;;  %4997 = vmatmul.msk.bf16.gmra.mxu0 %vm702_vm11, %v1630_v20  ;;  %5390 = vpow2.f32 %v1499_v24 }
 0x433   :  { %v791_v36 = vsub.f32 %v6725_v11, %v753_v6  ;;  %v1431_v6 = vpop.xlane.xlu1 %1430 }
 0x434   :  { %v1419_v8 = vpop.xlane.xlu2 %1418 }
 0x435   :  { %v5385_v56 = vpop.eup %5384  ;;  %v831_v14 = vmul.f32 1.442695, %v791_v36  ;;  %v1469_v18 = vsub.f32 %v6728_v29, %v1419_v8  ;;  %v6937_v8 = vpop.f32.mrf.mxu2 }
 0x436   :  { %v892_v17 = vsel %vm702_vm11, %v5385_v56, 0.0  ;;  %v6914_v59 = vpop.eup %5386  ;;  %v950_v61 = vpack.c.bf16 %v5385_v56, %v5381_v57 }
 0x437   :  { %893 = vadd.xlane.f32.xlu2 %v892_v17  ;;  %v6916_v47 = vpop.eup %5388  ;;  %5392 = vpow2.f32 %v831_v14  ;;  %v898_v23 = vsel %vm702_vm11, %v6914_v59, 0.0  ;;  %v1472_v17 = vsub.f32 %v6715_v9, %v1428_v51 }
 0x438   :  { %4976 = vmatmul.msk.bf16.gmra.mxu2 %vm702_vm11, %v949_v25  ;;  %v6919_v44 = vpop.eup %5390 }
 0x439   :  { %875 = vadd.xlane.f32.xlu0 %v874_v35  ;;  %902 = vadd.xlane.f32.xlu1 %v901_v32  ;;  %v1631_v40 = vpack.c.bf16 %v6916_v47, %v6919_v44  ;;  %v880_v32 = vsel %vm702_vm11, %v6881_v19, 0.0  ;;  %v1509_v14 = vmul.f32 1.442695, %v1472_v17 }
 0x43a   :  { %v1422_v0 = vpop.xlane.xlu0 %1421 }
 0x43b   :  { %v1470_v55 = vsub.f32 %v6740_v42, %v1422_v0  ;;  %v1503_v42 = vmul.f32 1.442695, %v1469_v18  ;;  %v774_v9 = vpop.xlane.xlu1 %773 }
 0x43c   :  { %v762_v30 = vpop.xlane.xlu2 %761  ;;  %v798_v19 = vsub.f32 %v6743_v15, %v774_v9 }
 0x43d   :  { %v794_v11 = vsub.f32 %v6746_v62, %v762_v30  ;;  %v1505_v4 = vmul.f32 1.442695, %v1470_v55  ;;  %v5393_v43 = vpop.eup %5392  ;;  %v6957_v51 = vpop.f32.mrf.mxu2 }
 0x43e   :  { %v895_v34 = vsel %vm702_vm11, %v5393_v43, 0.0  ;;  %v845_v15 = vmul.f32 1.442695, %v798_v19 }
 0x43f   :  { %v837_v1 = vmul.f32 1.442695, %v794_v11 }
 0x441   :  { %5394 = vpow2.f32 %v837_v1  ;;  %863 = vadd.xlane.f32.xlu0 %v862_v13  ;;  %899 = vadd.xlane.f32.xlu1 %v898_v23  ;;  %v951_v1 = vpack.c.bf16 %v6914_v59, %v5393_v43  ;;  %v1534_v13 = vsel %vm702_vm11, %v6810_v38, 0.0  ;;  %v1549_v23 = vsel %vm702_vm11, %v6890_v16, 0.0 }
 0x442   :  { %v1425_v62 = vpop.xlane.xlu0 %1424  ;;  %4998 = vmatmul.msk.bf16.gmra.mxu0 %vm702_vm11, %v1631_v40  ;;  %5396 = vpow2.f32 %v1505_v4 }
 0x443   :  { %5398 = vpow2.f32 %v1503_v42  ;;  %v1471_v36 = vsub.f32 %v6755_v46, %v1425_v62 }
 0x444   :  { %v765_v60 = vpop.xlane.xlu2 %764 }
 0x445   :  { %v795_v29 = vsub.f32 %v6758_v33, %v765_v60  ;;  %v1507_v30 = vmul.f32 1.442695, %v1471_v36  ;;  %v6971_v59 = vpop.f32.mrf.mxu2 }
 0x447   :  { %v6931_v37 = vpop.eup %5394  ;;  %v839_v20 = vmul.f32 1.442695, %v795_v29  ;;  %v1473_v29 = vsub.f32 %v6731_v58, %v1431_v6 }
 0x448   :  { %4977 = vmatmul.msk.bf16.gmra.mxu2 %vm702_vm11, %v950_v61  ;;  %v904_v7 = vsel %vm702_vm11, %v6931_v37, 0.0  ;;  %v6940_v57 = vpop.eup %5396  ;;  %v952_v58 = vpack.c.bf16 %v6931_v37, %v6904_v49 }
 0x449   :  { %5400 = vpow2.f32 %v839_v20  ;;  %905 = vadd.xlane.f32.xlu2 %v904_v7  ;;  %896 = vadd.xlane.f32.xlu0 %v895_v34  ;;  %v6942_v24 = vpop.eup %5398 }
 0x44a   :  { %v768_v22 = vpop.xlane.xlu0 %767 }
 0x44b   :  { %v796_v33 = vsub.f32 %v6765_v52, %v768_v22  ;;  %v1632_v52 = vpack.c.bf16 %v6940_v57, %v6942_v24 }
 0x44c   :  { %v1434_v35 = vpop.xlane.xlu2 %1433 }
 0x44d   :  { %v841_v56 = vmul.f32 1.442695, %v796_v33  ;;  %v1474_v60 = vsub.f32 %v6768_v12, %v1434_v35  ;;  %v1511_v12 = vmul.f32 1.442695, %v1473_v29  ;;  %v1552_v33 = vsel %vm702_vm11, %v6892_v5, 0.0  ;;  %v6993_v36 = vpop.f32.mrf.mxu2 }
 0x44f   :  { %v6945_v25 = vpop.eup %5400  ;;  %5402 = vpow2.f32 %v841_v56  ;;  %v1513_v20 = vmul.f32 1.442695, %v1474_v60 }
 0x450   :  { %v907_v0 = vsel %vm702_vm11, %v6945_v25, 0.0  ;;  %5404 = vpow2.f32 %v1509_v14 }
 0x451   :  { %881 = vadd.xlane.f32.xlu2 %v880_v32  ;;  %908 = vadd.xlane.f32.xlu0 %v907_v0  ;;  %5406 = vpow2.f32 %v1507_v30  ;;  %v1537_v0 = vsel %vm702_vm11, %v6850_v48, 0.0  ;;  %v5266_v48 = vld [vmem:[%s9245_s5 + $0x8] sm:$0xff] }
 0x452   :  { %4999 = vmatmul.msk.bf16.gmra.mxu0 %vm702_vm11, %v1632_v52  ;;  %v771_v11 = vpop.xlane.xlu0 %770  ;;  %5408 = vpow2.f32 %v845_v15  ;;  %v1555_v52 = vsel %vm702_vm11, %v6919_v44, 0.0  ;;  %1883 = vmatpush.bf16.msrb.mxu2 %v5266_v48 }
 0x453   :  { %v797_v18 = vsub.f32 %v6776_v2, %v771_v11  ;;  %v1531_v2 = vsel %vm702_vm11, %v6815_v28, 0.0  ;;  %v1443_v61 = vpop.xlane.xlu1 %1442 }
 0x454   :  { %v1437_v40 = vpop.xlane.xlu2 %1436  ;;  %v1477_v22 = vsub.f32 %v6783_v27, %v1443_v61 }
 0x455   :  { %v6955_v46 = vpop.eup %5402  ;;  %v843_v62 = vmul.f32 1.442695, %v797_v18  ;;  %v1475_v9 = vsub.f32 %v6779_v26, %v1437_v40  ;;  %v7006_v11 = vpop.f32.mrf.mxu2 }
 0x456   :  { %v910_v55 = vsel %vm702_vm11, %v6955_v46, 0.0  ;;  %v5405_v4 = vpop.eup %5404  ;;  %v1519_v27 = vmul.f32 1.442695, %v1477_v22  ;;  %v953_v18 = vpack.c.bf16 %v6955_v46, %v6945_v25  ;;  %v1543_v22 = vsel %vm702_vm11, %v6870_v31, 0.0 }
 0x457   :  { %911 = vadd.xlane.f32.xlu1 %v910_v55  ;;  %v5407_v42 = vpop.eup %5406  ;;  %5410 = vpow2.f32 %v843_v62  ;;  %v1570_v38 = vsel %vm702_vm11, %v5405_v4, 0.0  ;;  %v1515_v44 = vmul.f32 1.442695, %v1475_v9 }
 0x458   :  { %4978 = vmatmul.msk.bf16.gmra.mxu2 %vm702_vm11, %v951_v1  ;;  %v1567_v16 = vsel %vm702_vm11, %v5407_v42, 0.0  ;;  %v1633_v43 = vpack.c.bf16 %v5405_v4, %v5407_v42  ;;  %v6978_v28 = vpop.eup %5408  ;;  %5412 = vpow2.f32 %v1513_v20 }
 0x459   :  { %1535 = vadd.xlane.f32.xlu2 %v1534_v13  ;;  %1550 = vadd.xlane.f32.xlu0 %v1549_v23  ;;  %v916_v56 = vsel %vm702_vm11, %v6978_v28, 0.0  ;;  %5414 = vpow2.f32 %v1511_v12  ;;  %v1558_v23 = vsel %vm702_vm11, %v6916_v47, 0.0  ;;  %v1546_v47 = vsel %vm702_vm11, %v6872_v3, 0.0 }
 0x45a   :  { %v1440_v49 = vpop.xlane.xlu0 %1439  ;;  %5416 = vpow2.f32 %v1519_v27 }
 0x45b   :  { %v1476_v32 = vsub.f32 %v6794_v53, %v1440_v49 }
 0x45c   :  { %v1446_v7 = vpop.xlane.xlu2 %1445 }
 0x45d   :  { %v6980_v34 = vpop.eup %5410  ;;  %v1478_v6 = vsub.f32 %v6799_v39, %v1446_v7  ;;  %v1540_v39 = vsel %vm702_vm11, %v6848_v54, 0.0  ;;  %v1517_v53 = vmul.f32 1.442695, %v1476_v32  ;;  %v7021_v4 = vpop.f32.mrf.mxu2 }
 0x45e   :  { %v913_v17 = vsel %vm702_vm11, %v6980_v34, 0.0  ;;  %v5413_v37 = vpop.eup %5412  ;;  %v954_v20 = vpack.c.bf16 %v6978_v28, %v6980_v34  ;;  %v1561_v28 = vsel %vm702_vm11, %v6942_v24, 0.0 }
 0x45f   :  { %1532 = vadd.xlane.f32.xlu1 %v1531_v2  ;;  %v1521_v5 = vmul.f32 1.442695, %v1478_v6  ;;  %v5415_v35 = vpop.eup %5414  ;;  %v1576_v42 = vsel %vm702_vm11, %v5413_v37, 0.0 }
 0x460   :  { %v1634_v14 = vpack.c.bf16 %v5413_v37, %v5415_v35  ;;  %v7004_v54 = vpop.eup %5416 }
 0x461   :  { %1571 = vadd.xlane.f32.xlu0 %v1570_v38  ;;  %1568 = vadd.xlane.f32.xlu2 %v1567_v16  ;;  %5418 = vpow2.f32 %v1521_v5  ;;  %v1585_v26 = vsel %vm702_vm11, %v7004_v54, 0.0 }
 0x462   :  { %5000 = vmatmul.msk.bf16.gmra.mxu0 %vm702_vm11, %v1633_v43  ;;  %5420 = vpow2.f32 %v1517_v53 }
 0x463   :  { %5422 = vpow2.f32 %v1515_v44 }
 0x464   :  { %v1449_v19 = vpop.xlane.xlu0 %1448 }
 0x465   :  { %v1479_v13 = vsub.f32 %v6813_v41, %v1449_v19  ;;  %v1573_v41 = vsel %vm702_vm11, %v5415_v35, 0.0  ;;  %v7034_v7 = vpop.f32.mrf.mxu2 }
 0x467   :  { %1553 = vadd.xlane.f32.xlu1 %v1552_v33  ;;  %v5419_v55 = vpop.eup %5418  ;;  %v1523_v40 = vmul.f32 1.442695, %v1479_v13 }
 0x468   :  { %4979 = vmatmul.msk.bf16.gmra.mxu2 %vm702_vm11, %v952_v58  ;;  %v1588_v15 = vsel %vm702_vm11, %v5419_v55, 0.0  ;;  %v5421_v62 = vpop.eup %5420  ;;  %v1636_v31 = vpack.c.bf16 %v5419_v55, %v7004_v54 }
 0x469   :  { %917 = vadd.xlane.f32.xlu0 %v916_v56  ;;  %914 = vadd.xlane.f32.xlu2 %v913_v17  ;;  %v5423_v46 = vpop.eup %5422  ;;  %v1582_v37 = vsel %vm702_vm11, %v5421_v62, 0.0 }
 0x46a   :  { %v1635_v2 = vpack.c.bf16 %v5421_v62, %v5423_v46  ;;  %v1579_v6 = vsel %vm702_vm11, %v5423_v46, 0.0 }
 0x46c   :  { %v1452_v30 = vpop.xlane.xlu1 %1451 }
 0x46d   :  { %v1480_v1 = vsub.f32 %v6823_v21, %v1452_v30  ;;  %v7051_v56 = vpop.f32.mrf.mxu2 }
 0x46f   :  { %1541 = vadd.xlane.f32.xlu1 %v1540_v39  ;;  %v1525_v21 = vmul.f32 1.442695, %v1480_v1 }
 0x470   :  { %v7023_v25 = vpop.f32.mrf.mxu0 }
 0x471   :  { %1538 = vadd.xlane.f32.xlu0 %v1537_v0  ;;  %1556 = vadd.xlane.f32.xlu2 %v1555_v52  ;;  %5424 = vpow2.f32 %v1525_v21 }
 0x472   :  { %5001 = vmatmul.msk.bf16.gmra.mxu0 %vm702_vm11, %v1634_v14  ;;  %5426 = vpow2.f32 %v1523_v40 }
 0x474   :  { %v1455_v38 = vpop.xlane.xlu2 %1454  ;;  %v849_v17 = vpop.xlane.xlu1 %848 }
 0x475   :  { %v1481_v29 = vsub.f32 %v6828_v10, %v1455_v38  ;;  %v7059_v32 = vpop.f32.mrf.mxu2 }
 0x477   :  { %1586 = vadd.xlane.f32.xlu1 %v1585_v26  ;;  %v5425_v60 = vpop.eup %5424  ;;  %v1527_v10 = vmul.f32 1.442695, %v1481_v29 }
 0x478   :  { %4980 = vmatmul.msk.bf16.gmra.mxu2 %vm702_vm11, %v953_v18  ;;  %v5427_v43 = vpop.eup %5426  ;;  %v1594_v61 = vsel %vm702_vm11, %v5425_v60, 0.0  ;;  %v7036_v3 = vpop.f32.mrf.mxu0 }
 0x479   :  { %1559 = vadd.xlane.f32.xlu0 %v1558_v23  ;;  %1589 = vadd.xlane.f32.xlu2 %v1588_v15  ;;  %v1591_v33 = vsel %vm702_vm11, %v5427_v43, 0.0  ;;  %5428 = vpow2.f32 %v1527_v10  ;;  %v1637_v30 = vpack.c.bf16 %v5425_v60, %v5427_v43 }
 0x47c   :  { %v1458_v16 = vpop.xlane.xlu0 %1457  ;;  %v852_v24 = vpop.xlane.xlu2 %851 }
 0x47d   :  { %v1482_v12 = vsub.f32 %v6838_v50, %v1458_v16  ;;  %v1564_v50 = vsel %vm702_vm11, %v6940_v57, 0.0  ;;  %v870_v52 = vpop.xlane.xlu1 %869  ;;  %v7064_v54 = vpop.f32.mrf.mxu2 }
 0x47f   :  { %1574 = vadd.xlane.f32.xlu1 %v1573_v41  ;;  %v1529_v58 = vmul.f32 1.442695, %v1482_v12  ;;  %v5429_v27 = vpop.eup %5428 }
 0x480   :  { %v1597_v57 = vsel %vm702_vm11, %v5429_v27, 0.0 }
 0x481   :  { %1547 = vadd.xlane.f32.xlu0 %v1546_v47  ;;  %1577 = vadd.xlane.f32.xlu2 %v1576_v42  ;;  %5430 = vpow2.f32 %v1529_v58 }
 0x482   :  { %5002 = vmatmul.msk.bf16.gmra.mxu0 %vm702_vm11, %v1635_v2 }
 0x484   :  { %v867_v5 = vpop.xlane.xlu0 %866  ;;  %v885_v14 = vpop.xlane.xlu2 %884 }
 0x485   :  { %v7070_v48 = vpop.xlane.xlu1 %857  ;;  %5432 = vrcp.f32 %v867_v5 }
 0x486   :  { %5434 = vrcp.f32 %v849_v17 }
 0x487   :  { %1595 = vadd.xlane.f32.xlu1 %v1594_v61  ;;  %v5431_v49 = vpop.eup %5430  ;;  %5436 = vrcp.f32 %v885_v14 }
 0x488   :  { %4981 = vmatmul.msk.bf16.gmra.mxu2 %vm702_vm11, %v954_v20  ;;  %v1600_v35 = vsel %vm702_vm11, %v5431_v49, 0.0  ;;  %v1638_v13 = vpack.c.bf16 %v5431_v49, %v5429_v27  ;;  %5438 = vrcp.f32 %v852_v24 }
 0x489   :  { %1544 = vadd.xlane.f32.xlu2 %v1543_v22  ;;  %1592 = vadd.xlane.f32.xlu0 %v1591_v33  ;;  %v5265_v22 = vld [vmem:[%s9245_s5] sm:$0xff]  ;;  %5440 = vrcp.f32 %v870_v52 }
 0x48a   :  { %1884 = vmatpush.bf16.msrb.mxu2 %v5265_v22 }
 0x48c   :  { %v7072_v55 = vpop.xlane.xlu2 %872 }
 0x48f   :  { %1562 = vadd.xlane.f32.xlu1 %v1561_v28  ;;  %v7045_v34 = vpop.f32.mrf.mxu0 }
 0x490   :  { %9350 = vst [vmem:[#allocation19_spill] sm:$0xff] %v7045_v34 }
 0x491   :  { %1565 = vadd.xlane.f32.xlu2 %v1564_v50  ;;  %1580 = vadd.xlane.f32.xlu0 %v1579_v6 }
 0x492   :  { %5003 = vmatmul.msk.bf16.gmra.mxu0 %vm702_vm11, %v1636_v31 }
 0x494   :  { %v7082_v23 = vpop.xlane.xlu2 %860 }
 0x497   :  { %1583 = vadd.xlane.f32.xlu1 %v1582_v37  ;;  %v7055_v39 = vpop.f32.mrf.mxu0  ;;  %v5433_v37 = vpop.eup %5432 }
 0x498   :  { %9351 = vst [vmem:[#allocation18_spill] sm:$0xff] %v7055_v39  ;;  %v1075_v5 = vmul.f32 %v5433_v37, %v7034_v7 }
 0x499   :  { %1598 = vadd.xlane.f32.xlu2 %v1597_v57  ;;  %1601 = vadd.xlane.f32.xlu0 %v1600_v35  ;;  %v5435_v35 = vpop.eup %5434 }
 0x49a   :  { %v7078_v26 = vpop.xlane.xlu1 %878  ;;  %v1069_v17 = vmul.f32 %v5435_v35, %v6937_v8 }
 0x49c   :  { %v888_v0 = vpop.xlane.xlu0 %887 }
 0x49f   :  { %v7061_v9 = vpop.f32.mrf.mxu0 }
 0x4a0   :  { %9352 = vst [vmem:[#allocation17_spill] sm:$0xff] %v7061_v9  ;;  %v9358_v9 = vld [vmem:[#allocation8_spill] sm:$0xff] }
 0x4a1   :  { %v1093_v52 = vmul.f32 %v1069_v17, %v9358_v9 }
 0x4a2   :  { %5004 = vmatmul.msk.bf16.gmra.mxu0 %vm702_vm11, %v1637_v30 }
 0x4a4   :  { %v7066_v53 = vpop.xlane.xlu0 %854  ;;  %v7089_v40 = vpop.xlane.xlu1 %890 }
 0x4a7   :  { %v7068_v19 = vpop.f32.mrf.mxu0 }
 0x4a8   :  { %9353 = vst [vmem:[#allocation16_spill] sm:$0xff] %v7068_v19  ;;  %v1099_v19 = vmul.f32 %v1075_v5, %v9357_v63 }
 0x4aa   :  { %v7091_v62 = vpop.xlane.xlu2 %893 }
 0x4ab   :  { %v7074_v44 = vpop.f32.mrf.mxu2 }
 0x4ac   :  { %v7080_v18 = vpop.xlane.xlu0 %875  ;;  %v903_v42 = vpop.xlane.xlu1 %902 }
 0x4ad   :  { %5442 = vrcp.f32 %v903_v42 }
 0x4ae   :  { %5444 = vrcp.f32 %v888_v0 }
 0x4af   :  { %v7076_v1 = vpop.f32.mrf.mxu0  ;;  %5446 = vrcp.f32 %v7066_v53 }
 0x4b0   :  { %5448 = vrcp.f32 %v7072_v55 }
 0x4b2   :  { %5005 = vmatmul.msk.bf16.gmra.mxu0 %vm702_vm11, %v1638_v13  ;;  %v5437_v13 = vpop.eup %5436 }
 0x4b3   :  { %v7085_v15 = vpop.f32.mrf.mxu2  ;;  %v5439_v45 = vpop.eup %5438 }
 0x4b4   :  { %v7093_v41 = vpop.xlane.xlu0 %863  ;;  %v7103_v29 = vpop.xlane.xlu1 %899  ;;  %v1070_v42 = vmul.f32 %v5439_v45, %v6957_v51 }
 0x4b6   :  { %v1094_v51 = vmul.f32 %v1070_v42, %v9358_v9 }
 0x4b7   :  { %v7087_v21 = vpop.f32.mrf.mxu0 }
 0x4bb   :  { %v1039_v46 = vpop.f32.mrf.mxu2 }
 0x4bc   :  { %v906_v2 = vpop.xlane.xlu2 %905  ;;  %v7097_v38 = vpop.xlane.xlu0 %896  ;;  %v1081_v22 = vmul.f32 %v5437_v13, %v1039_v46  ;;  %v1105_v46 = vadd.f32 %v1099_v19, %v1093_v52 }
 0x4bd   :  { %5450 = vrcp.f32 %v906_v2 }
 0x4be   :  { %5452 = vrcp.f32 %v7089_v40 }
 0x4bf   :  { %v7095_v47 = vpop.f32.mrf.mxu0  ;;  %5454 = vrcp.f32 %v7080_v18 }
 0x4c0   :  { %5456 = vrcp.f32 %v7070_v48 }
 0x4c3   :  { %v1041_v60 = vpop.f32.mrf.mxu2 }
 0x4c4   :  { %v7105_v61 = vpop.xlane.xlu2 %881  ;;  %v7107_v20 = vpop.xlane.xlu0 %908 }
 0x4c5   :  { %5458 = vrcp.f32 %v7107_v20 }
 0x4c6   :  { %5460 = vrcp.f32 %v7091_v62 }
 0x4c7   :  { %v7099_v16 = vpop.f32.mrf.mxu0  ;;  %5462 = vrcp.f32 %v7082_v23 }
 0x4c8   :  { %9354 = vst [vmem:[#allocation20_spill] sm:$0xff] %v7099_v16  ;;  %5464 = vrcp.f32 %v7078_v26 }
 0x4ca   :  { %v7116_v10 = vpop.xlane.xlu1 %911 }
 0x4cb   :  { %v7101_v43 = vpop.f32.mrf.mxu2  ;;  %5466 = vrcp.f32 %v7116_v10 }
 0x4cc   :  { %v7118_v58 = vpop.xlane.xlu2 %1535  ;;  %v7122_v50 = vpop.xlane.xlu0 %1550 }
 0x4cf   :  { %v7109_v12 = vpop.f32.mrf.mxu0 }
 0x4d0   :  { %9355 = vst [vmem:[#allocation21_spill] sm:$0xff] %v7109_v12  ;;  %v9359_v12 = vld [vmem:[#allocation10_spill] sm:$0xff] }
 0x4d1   :  { %v1111_v39 = vmul.f32 %v1081_v22, %v9359_v12  ;;  %v9360_v22 = vld [vmem:[#allocation11_spill] sm:$0xff] }
 0x4d2   :  { %v7126_v31 = vpop.xlane.xlu1 %1532 }
 0x4d3   :  { %v7114_v33 = vpop.f32.mrf.mxu2  ;;  %v1117_v13 = vadd.f32 %v1111_v39, %v1105_v46  ;;  %5468 = vrcp.f32 %v7126_v31 }
 0x4d4   :  { %v7130_v49 = vpop.xlane.xlu2 %1568  ;;  %v7132_v57 = vpop.xlane.xlu0 %1571  ;;  %5470 = vrcp.f32 %v7097_v38 }
 0x4d7   :  { %v7120_v28 = vpop.f32.mrf.mxu0 }
 0x4d8   :  { %9356 = vst [vmem:[#allocation22_spill] sm:$0xff] %v7120_v28  ;;  %v5441_v28 = vpop.eup %5440  ;;  %5472 = vrcp.f32 %v7122_v50 }
 0x4d9   :  { %v5443_v7 = vpop.eup %5442  ;;  %v1076_v0 = vmul.f32 %v5441_v28, %v7051_v56  ;;  %5474 = vrcp.f32 %v7130_v49 }
 0x4da   :  { %v7141_v24 = vpop.xlane.xlu1 %1553  ;;  %v5445_v5 = vpop.eup %5444  ;;  %5476 = vrcp.f32 %v7105_v61 }
 0x4db   :  { %v7124_v6 = vpop.f32.mrf.mxu2  ;;  %v1082_v17 = vmul.f32 %v5445_v5, %v1041_v60  ;;  %v1100_v56 = vmul.f32 %v1076_v0, %v9357_v63  ;;  %v5447_v55 = vpop.eup %5446  ;;  %5478 = vrcp.f32 %v7093_v41 }
 0x4dc   :  { %v7145_v16 = vpop.xlane.xlu2 %914  ;;  %v7151_v37 = vpop.xlane.xlu0 %917  ;;  %v1071_v40 = vmul.f32 %v5447_v55, %v6971_v59 }
 0x4dd   :  { %v5449_v19 = vpop.eup %5448  ;;  %v1112_v28 = vmul.f32 %v1082_v17, %v9359_v12  ;;  %v1106_v60 = vadd.f32 %v1100_v56, %v1094_v51  ;;  %5480 = vrcp.f32 %v7145_v16 }
 0x4de   :  { %v5451_v39 = vpop.eup %5450  ;;  %v1095_v59 = vmul.f32 %v1071_v40, %v9358_v9  ;;  %5482 = vrcp.f32 %v7141_v24 }
 0x4df   :  { %v7128_v27 = vpop.f32.mrf.mxu0  ;;  %v5453_v42 = vpop.eup %5452  ;;  %v1118_v0 = vadd.f32 %v1112_v28, %v1106_v60  ;;  %5484 = vrcp.f32 %v7103_v29 }
 0x4e0   :  { %v1083_v46 = vmul.f32 %v5453_v42, %v7101_v43 }
 0x4e2   :  { %v7160_v52 = vpop.xlane.xlu1 %1541 }
 0x4e3   :  { %v7134_v30 = vpop.f32.mrf.mxu2 }
 0x4e7   :  { %v7138_v14 = vpop.f32.mrf.mxu0 }
 0x4eb   :  { %v1054_v8 = vpop.f32.mrf.mxu2 }
 0x4ec   :  { %v1087_v35 = vmul.f32 %v5443_v7, %v1054_v8  ;;  %v7166_v7 = vpop.xlane.xlu2 %1556  ;;  %v1077_v8 = vmul.f32 %v5449_v19, %v7059_v32  ;;  %v1113_v32 = vmul.f32 %v1083_v46, %v9359_v12 }
 0x4ee   :  { %v1123_v34 = vmul.f32 %v1087_v35, %v9360_v22  ;;  %v7171_v35 = vpop.xlane.xlu0 %1538  ;;  %v1101_v20 = vmul.f32 %v1077_v8, %v9357_v63 }
 0x4ef   :  { %v7155_v45 = vpop.f32.mrf.mxu0 }
 0x4f0   :  { %v1129_v53 = vadd.f32 %v1123_v34, %v1117_v13  ;;  %v5455_v13 = vpop.eup %5454  ;;  %v1107_v56 = vadd.f32 %v1101_v20, %v1095_v59  ;;  %5486 = vrcp.f32 %v7118_v58 }
 0x4f1   :  { %v5457_v17 = vpop.eup %5456  ;;  %v1078_v62 = vmul.f32 %v5455_v13, %v7064_v54 }
 0x4f2   :  { %1135 = vst.msk [vmem:[#allocation2] sm:$0xff] %vm74_vm0, %v1129_v53  ;;  %v5459_v43 = vpop.eup %5458  ;;  %v1587_v53 = vpop.xlane.xlu1 %1586  ;;  %v1072_v28 = vmul.f32 %v5457_v17, %v6993_v36 }
 0x4f3   :  { %v1056_v2 = vpop.f32.mrf.mxu2  ;;  %v5461_v19 = vpop.eup %5460  ;;  %v1102_v26 = vmul.f32 %v1078_v62, %v9357_v63  ;;  %5488 = vrcp.f32 %v1587_v53 }
 0x4f4   :  { %v1088_v34 = vmul.f32 %v5451_v39, %v1056_v2  ;;  %v1119_v39 = vadd.f32 %v1113_v32, %v1107_v56  ;;  %v1084_v2 = vmul.f32 %v5461_v19, %v7114_v33  ;;  %v7188_v40 = vpop.xlane.xlu2 %1589  ;;  %v5463_v60 = vpop.eup %5462  ;;  %v1096_v33 = vmul.f32 %v1072_v28, %v9358_v9 }
 0x4f5   :  { %v5465_v42 = vpop.eup %5464  ;;  %v1073_v17 = vmul.f32 %v5463_v60, %v7006_v11  ;;  %5490 = vrcp.f32 %v7132_v57 }
 0x4f6   :  { %v1124_v18 = vmul.f32 %v1088_v34, %v9360_v22  ;;  %v7196_v36 = vpop.xlane.xlu0 %1559  ;;  %v1114_v8 = vmul.f32 %v1084_v2, %v9359_v12  ;;  %v1108_v59 = vadd.f32 %v1102_v26, %v1096_v33  ;;  %5492 = vrcp.f32 %v7151_v37 }
 0x4f7   :  { %v7175_v48 = vpop.f32.mrf.mxu0  ;;  %v1097_v29 = vmul.f32 %v1073_v17, %v9358_v9  ;;  %5494 = vrcp.f32 %v7166_v7 }
 0x4f8   :  { %v1130_v5 = vadd.f32 %v1124_v18, %v1118_v0  ;;  %v5467_v0 = vpop.eup %5466  ;;  %v1079_v18 = vmul.f32 %v5465_v42, %v7074_v44  ;;  %v1120_v20 = vadd.f32 %v1114_v8, %v1108_v59  ;;  %5496 = vrcp.f32 %v7171_v35 }
 0x4f9   :  { %v1825_v34 = vld [vmem:[#allocation2] sm:$0xff]  ;;  %v5469_v46 = vpop.eup %5468  ;;  %5498 = vrcp.f32 %v7188_v40 }
 0x4fa   :  { %1136 = vst.msk [vmem:[#allocation2 + $0x8] sm:$0xff] %vm74_vm0, %v1130_v5  ;;  %v5471_v13 = vpop.eup %5470  ;;  %v1575_v32 = vpop.xlane.xlu1 %1574  ;;  %v1753_v41 = vmul.f32 %v5469_v46, %v7023_v25  ;;  %v1103_v11 = vmul.f32 %v1079_v18, %v9357_v63 }
 0x4fb   :  { %v1059_v51 = vpop.f32.mrf.mxu2  ;;  %v5473_v49 = vpop.eup %5472  ;;  %v1085_v61 = vmul.f32 %v5471_v13, %v7124_v6  ;;  %5500 = vrcp.f32 %v1575_v32 }
 0x4fc   :  { %v1089_v55 = vmul.f32 %v5459_v43, %v1059_v51  ;;  %v5475_v51 = vpop.eup %5474  ;;  %v7217_v16 = vpop.xlane.xlu2 %1577  ;;  %v1759_v6 = vmul.f32 %v5473_v49, %v7076_v1  ;;  %v1777_v58 = vmul.f32 %v1753_v41, %v9358_v9  ;;  %v1109_v1 = vadd.f32 %v1103_v11, %v1097_v29 }
 0x4fd   :  { %v5477_v24 = vpop.eup %5476  ;;  %v1765_v56 = vmul.f32 %v5475_v51, %v7128_v27  ;;  %v1115_v25 = vmul.f32 %v1085_v61, %v9359_v12  ;;  %5502 = vrcp.f32 %v7160_v52 }
 0x4fe   :  { %v1125_v23 = vmul.f32 %v1089_v55, %v9360_v22  ;;  %v5479_v55 = vpop.eup %5478  ;;  %v7223_v19 = vpop.xlane.xlu0 %1547  ;;  %v1080_v27 = vmul.f32 %v5477_v24, %v7085_v15  ;;  %5504 = vrcp.f32 %v7196_v36 }
 0x4ff   :  { %v7192_v54 = vpop.f32.mrf.mxu0  ;;  %v5481_v28 = vpop.eup %5480  ;;  %v1074_v26 = vmul.f32 %v5479_v55, %v7021_v4  ;;  %v1795_v60 = vmul.f32 %v1765_v56, %v9359_v12  ;;  %5506 = vrcp.f32 %v7217_v16 }
 0x500   :  { %v1131_v10 = vadd.f32 %v1125_v23, %v1119_v39  ;;  %v5483_v2 = vpop.eup %5482  ;;  %v1104_v37 = vmul.f32 %v1080_v27, %v9357_v63 }
 0x501   :  { %v1826_v31 = vld [vmem:[#allocation2 + $0x8] sm:$0xff]  ;;  %v5485_v23 = vpop.eup %5484  ;;  %v1760_v15 = vmul.f32 %v5483_v2, %v7087_v21  ;;  %v1098_v18 = vmul.f32 %v1074_v26, %v9358_v9 }
 0x502   :  { %1137 = vst.msk [vmem:[#allocation2 + $0x10] sm:$0xff] %vm74_vm0, %v1131_v10  ;;  %v1837_v38 = vpack.c.bf16 %v1826_v31, %v1825_v34  ;;  %v1783_v10 = vmul.f32 %v1759_v6, %v9357_v63  ;;  %v5487_v34 = vpop.eup %5486  ;;  %v1121_v31 = vadd.f32 %v1115_v25, %v1109_v1  ;;  %v1086_v57 = vmul.f32 %v5485_v23, %v7134_v30 }
 0x503   :  { %v1061_v50 = vpop.f32.mrf.mxu2  ;;  %v5489_v33 = vpop.eup %5488  ;;  %v1754_v7 = vmul.f32 %v5487_v34, %v7036_v3 }
 0x504   :  { %v1090_v5 = vmul.f32 %v5467_v0, %v1061_v50  ;;  %5014 = vmatmul.msk.bf16.vlgmr.msrb.gmra.mxu2 %vm74_vm0, %v1837_v38  ;;  %v1789_v8 = vadd.f32 %v1783_v10, %v1777_v58  ;;  %v7240_v38 = vpop.xlane.xlu1 %1595  ;;  %v5491_v30 = vpop.eup %5490  ;;  %v1116_v35 = vmul.f32 %v1086_v57, %v9359_v12  ;;  %v9361_v58 = vld [vmem:[#allocation19_spill] sm:$0xff] }
 0x505   :  { %v1545_v13 = vpop.xlane.xlu2 %1544  ;;  %v5493_v49 = vpop.eup %5492 }
 0x506   :  { %v1126_v44 = vmul.f32 %v1090_v5, %v9360_v22  ;;  %v1801_v46 = vadd.f32 %v1795_v60, %v1789_v8  ;;  %v1766_v5 = vmul.f32 %v5491_v30, %v7138_v14  ;;  %v5495_v61 = vpop.eup %5494  ;;  %v1593_v41 = vpop.xlane.xlu0 %1592  ;;  %v1778_v14 = vmul.f32 %v1754_v7, %v9358_v9 }
 0x507   :  { %v7213_v43 = vpop.f32.mrf.mxu0  ;;  %v5497_v11 = vpop.eup %5496  ;;  %v1761_v29 = vmul.f32 %v5495_v61, %v7095_v47  ;;  %5508 = vrcp.f32 %v1593_v41 }
 0x508   :  { %v1132_v62 = vadd.f32 %v1126_v44, %v1120_v20  ;;  %v1784_v20 = vmul.f32 %v1760_v15, %v9357_v63  ;;  %v1110_v44 = vadd.f32 %v1104_v37, %v1098_v18  ;;  %v1796_v6 = vmul.f32 %v1766_v5, %v9359_v12  ;;  %v9363_v37 = vld [vmem:[#allocation18_spill] sm:$0xff] }
 0x509   :  { %v1827_v21 = vld [vmem:[#allocation2 + $0x10] sm:$0xff]  ;;  %v1785_v60 = vmul.f32 %v1761_v29, %v9357_v63 }
 0x50a   :  { %1138 = vst.msk [vmem:[#allocation2 + $0x18] sm:$0xff] %vm74_vm0, %v1132_v62  ;;  %v5499_v62 = vpop.eup %5498  ;;  %v1122_v24 = vadd.f32 %v1116_v35, %v1110_v44  ;;  %v1790_v25 = vadd.f32 %v1784_v20, %v1778_v14 }
 0x50b   :  { %v1064_v39 = vpop.f32.mrf.mxu2  ;;  %v5501_v55 = vpop.eup %5500 }
 0x50c   :  { %v1091_v53 = vmul.f32 %v5481_v28, %v1064_v39  ;;  %v1755_v39 = vmul.f32 %v5497_v11, %v9361_v58  ;;  %v1802_v1 = vadd.f32 %v1796_v6, %v1790_v25  ;;  %v1767_v27 = vmul.f32 %v5501_v55, %v7155_v45  ;;  %v5503_v47 = vpop.eup %5502 }
 0x50d   :  { %v1566_v26 = vpop.xlane.xlu2 %1565  ;;  %v5505_v34 = vpop.eup %5504 }
 0x50e   :  { %v1127_v42 = vmul.f32 %v1091_v53, %v9360_v22  ;;  %v1563_v53 = vpop.xlane.xlu1 %1562  ;;  %v1779_v36 = vmul.f32 %v1755_v39, %v9358_v9  ;;  %v5507_v16 = vpop.eup %5506  ;;  %v1797_v45 = vmul.f32 %v1767_v27, %v9359_v12 }
 0x50f   :  { %v1738_v4 = vpop.f32.mrf.mxu0  ;;  %5510 = vrcp.f32 %v1563_v53  ;;  %v5509_v57 = vpop.eup %5508  ;;  %v1768_v7 = vmul.f32 %v5507_v16, %v7175_v48  ;;  %v9364_v48 = vld [vmem:[#allocation21_spill] sm:$0xff] }
 0x510   :  { %v1133_v0 = vadd.f32 %v1127_v42, %v1121_v31  ;;  %v1771_v50 = vmul.f32 %v5489_v33, %v1738_v4  ;;  %v1581_v31 = vpop.xlane.xlu0 %1580  ;;  %5512 = vrcp.f32 %v1545_v13  ;;  %v9362_v33 = vld [vmem:[#allocation20_spill] sm:$0xff]  ;;  %v1791_v4 = vadd.f32 %v1785_v60, %v1779_v36 }
 0x511   :  { %v1828_v59 = vld [vmem:[#allocation2 + $0x18] sm:$0xff]  ;;  %v1762_v15 = vmul.f32 %v5505_v34, %v9362_v33  ;;  %5514 = vrcp.f32 %v7240_v38 }
 0x512   :  { %1139 = vst.msk [vmem:[#allocation2 + $0x20] sm:$0xff] %vm74_vm0, %v1133_v0  ;;  %v1807_v40 = vmul.f32 %v1771_v50, %v9360_v22  ;;  %v1838_v17 = vpack.c.bf16 %v1828_v59, %v1827_v21  ;;  %v1756_v0 = vmul.f32 %v5503_v47, %v9363_v37  ;;  %5516 = vrcp.f32 %v1581_v31 }
 0x513   :  { %v1066_v3 = vpop.f32.mrf.mxu2  ;;  %v1786_v35 = vmul.f32 %v1762_v15, %v9357_v63  ;;  %5518 = vrcp.f32 %v7223_v19 }
 0x514   :  { %v1813_v32 = vadd.f32 %v1807_v40, %v1801_v46  ;;  %v1092_v51 = vmul.f32 %v5493_v49, %v1066_v3  ;;  %5015 = vmatmul.msk.bf16.gmra.mxu2 %vm74_vm0, %v1838_v17  ;;  %v1803_v46 = vadd.f32 %v1797_v45, %v1791_v4  ;;  %v1780_v17 = vmul.f32 %v1756_v0, %v9358_v9 }
 0x515   :  { %v5511_v59 = vpop.eup %5510  ;;  %v1798_v49 = vmul.f32 %v1768_v7, %v9359_v12  ;;  %v1599_v3 = vpop.xlane.xlu2 %1598  ;;  %5520 = vrcp.f32 %v1566_v26 }
 0x516   :  { %1819 = vst.msk [vmem:[#allocation2 + $0x30] sm:$0xff] %vm74_vm0, %v1813_v32  ;;  %v1128_v56 = vmul.f32 %v1092_v51, %v9360_v22  ;;  %v5513_v38 = vpop.eup %5512  ;;  %v1584_v13 = vpop.xlane.xlu1 %1583  ;;  %v1763_v20 = vmul.f32 %v5511_v59, %v9364_v48  ;;  %v1792_v41 = vadd.f32 %v1786_v35, %v1780_v17  ;;  %v9365_v32 = vld [vmem:[#allocation17_spill] sm:$0xff] }
 0x517   :  { %v1740_v28 = vpop.f32.mrf.mxu0  ;;  %v5515_v40 = vpop.eup %5514  ;;  %v1757_v51 = vmul.f32 %v5513_v38, %v9365_v32  ;;  %5522 = vrcp.f32 %v1584_v13 }
 0x518   :  { %v1134_v2 = vadd.f32 %v1128_v56, %v1122_v24  ;;  %v1772_v52 = vmul.f32 %v5499_v62, %v1740_v28  ;;  %v5517_v61 = vpop.eup %5516  ;;  %5524 = vrcp.f32 %v1599_v3  ;;  %v1804_v14 = vadd.f32 %v1798_v49, %v1792_v41  ;;  %v1602_v28 = vpop.xlane.xlu0 %1601  ;;  %v5794_v49 = vld [vmem:[%s9240_s0 + $0x8] sm:$0xff] }
 0x519   :  { %v1829_v50 = vld [vmem:[#allocation2 + $0x20] sm:$0xff]  ;;  %v1769_v19 = vmul.f32 %v5517_v61, %v7192_v54  ;;  %v1787_v24 = vmul.f32 %v1763_v20, %v9357_v63  ;;  %v5519_v6 = vpop.eup %5518  ;;  %v1781_v55 = vmul.f32 %v1757_v51, %v9358_v9  ;;  %5526 = vrcp.f32 %v1602_v28 }
 0x51a   :  { %1140 = vst.msk [vmem:[#allocation2 + $0x28] sm:$0xff] %vm74_vm0, %v1134_v2  ;;  %v1808_v23 = vmul.f32 %v1772_v52, %v9360_v22  ;;  %v9366_v54 = vld [vmem:[#allocation22_spill] sm:$0xff] }
 0x51b   :  { %v5521_v29 = vpop.eup %5520  ;;  %v1793_v58 = vadd.f32 %v1787_v24, %v1781_v55  ;;  %v1799_v39 = vmul.f32 %v1769_v19, %v9359_v12 }
 0x51c   :  { %v1814_v10 = vadd.f32 %v1808_v23, %v1802_v1  ;;  %v1764_v27 = vmul.f32 %v5521_v29, %v9366_v54  ;;  %v9367_v23 = vld [vmem:[#allocation16_spill] sm:$0xff] }
 0x51d   :  { %v5523_v25 = vpop.eup %5522  ;;  %v1758_v47 = vmul.f32 %v5519_v6, %v9367_v23  ;;  %v1831_v26 = vld [vmem:[#allocation2 + $0x30] sm:$0xff]  ;;  %v1805_v36 = vadd.f32 %v1799_v39, %v1793_v58  ;;  %v5798_v58 = vld [vmem:[%s9240_s0 + $0x28] sm:$0xff] }
 0x51e   :  { %1820 = vst.msk [vmem:[#allocation2 + $0x38] sm:$0xff] %vm74_vm0, %v1814_v10  ;;  %v5525_v2 = vpop.eup %5524  ;;  %v1770_v10 = vmul.f32 %v5523_v25, %v7213_v43  ;;  %v1788_v16 = vmul.f32 %v1764_v27, %v9357_v63  ;;  %v5799_v54 = vld [vmem:[%s9240_s0 + $0x30] sm:$0xff] }
 0x51f   :  { %v1743_v42 = vpop.f32.mrf.mxu0  ;;  %v1782_v45 = vmul.f32 %v1758_v47, %v9358_v9 }
 0x520   :  { %v1773_v8 = vmul.f32 %v5509_v57, %v1743_v42  ;;  %v1800_v57 = vmul.f32 %v1770_v10, %v9359_v12  ;;  %v5527_v42 = vpop.eup %5526  ;;  %v9368_v10 = vld [vmem:[#allocation7_spill] sm:$0xff] }
 0x521   :  { %v1830_v30 = vld [vmem:[#allocation2 + $0x28] sm:$0xff] }
 0x522   :  { %v1809_v18 = vmul.f32 %v1773_v8, %v9360_v22  ;;  %v1839_v21 = vpack.c.bf16 %v1830_v30, %v1829_v50  ;;  %v1794_v8 = vadd.f32 %v1788_v16, %v1782_v45 }
 0x524   :  { %v1815_v5 = vadd.f32 %v1809_v18, %v1803_v46  ;;  %5016 = vmatmul.msk.bf16.gmra.mxu2 %vm74_vm0, %v1839_v21  ;;  %v1806_v43 = vadd.f32 %v1800_v57, %v1794_v8  ;;  %v7301_v21 = vld [vmem:[%s9242_s2] sm:$0xff] }
 0x525   :  { %v1832_v1 = vld [vmem:[#allocation2 + $0x38] sm:$0xff]  ;;  %v7304_v59 = vperm.slane %v7301_v21, 4 }
 0x526   :  { %1821 = vst.msk [vmem:[#allocation2 + $0x40] sm:$0xff] %vm74_vm0, %v1815_v5  ;;  %v1840_v34 = vpack.c.bf16 %v1832_v1, %v1831_v26  ;;  %v5793_v5 = vld [vmem:[%s9240_s0] sm:$0xff] }
 0x527   :  { %v1745_v44 = vpop.f32.mrf.mxu0 }
 0x528   :  { %v1774_v11 = vmul.f32 %v5515_v40, %v1745_v44  ;;  %v5795_v44 = vld [vmem:[%s9240_s0 + $0x10] sm:$0xff] }
 0x52a   :  { %v1810_v62 = vmul.f32 %v1774_v11, %v9360_v22 }
 0x52c   :  { %v1816_v56 = vadd.f32 %v1810_v62, %v1804_v14  ;;  %v5796_v14 = vld [vmem:[%s9240_s0 + $0x18] sm:$0xff] }
 0x52d   :  { %v1833_v50 = vld [vmem:[#allocation2 + $0x40] sm:$0xff] }
 0x52e   :  { %1822 = vst.msk [vmem:[#allocation2 + $0x48] sm:$0xff] %vm74_vm0, %v1816_v56  ;;  %v5797_v56 = vld [vmem:[%s9240_s0 + $0x20] sm:$0xff] }
 0x52f   :  { %v1748_v52 = vpop.f32.mrf.mxu0 }
 0x530   :  { %v1775_v53 = vmul.f32 %v5525_v2, %v1748_v52 }
 0x532   :  { %v1811_v60 = vmul.f32 %v1775_v53, %v9360_v22 }
 0x534   :  { %v1817_v31 = vadd.f32 %v1811_v60, %v1805_v36  ;;  %5017 = vmatmul.msk.bf16.gmra.mxu2 %vm74_vm0, %v1840_v34 }
 0x535   :  { %v1834_v0 = vld [vmem:[#allocation2 + $0x48] sm:$0xff] }
 0x536   :  { %1823 = vst.msk [vmem:[#allocation2 + $0x50] sm:$0xff] %vm74_vm0, %v1817_v31  ;;  %v1841_v30 = vpack.c.bf16 %v1834_v0, %v1833_v50  ;;  %v5800_v31 = vld [vmem:[%s9240_s0 + $0x38] sm:$0xff] }
 0x537   :  { %v1750_v33 = vpop.f32.mrf.mxu0 }
 0x538   :  { %v1776_v15 = vmul.f32 %v5527_v42, %v1750_v33 }
 0x53a   :  { %v1812_v4 = vmul.f32 %v1776_v15, %v9360_v22 }
 0x53c   :  { %v1818_v37 = vadd.f32 %v1812_v4, %v1806_v43  ;;  %v5268_v43 = vld [vmem:[%s9244_s4 + $0x18] sm:$0xff] }
 0x53d   :  { %v1835_v46 = vld [vmem:[#allocation2 + $0x50] sm:$0xff]  ;;  %2279 = vmatpush.bf16.msrb.mxu1 %v5268_v43 }
 0x53e   :  { %1824 = vst.msk [vmem:[#allocation2 + $0x58] sm:$0xff] %vm74_vm0, %v1818_v37  ;;  %v5801_v37 = vld [vmem:[%s9240_s0 + $0x40] sm:$0xff] }
 0x544   :  { %5018 = vmatmul.msk.bf16.gmra.mxu2 %vm74_vm0, %v1841_v30 }
 0x545   :  { %v1836_v7 = vld [vmem:[#allocation2 + $0x58] sm:$0xff] }
 0x546   :  { %v1842_v18 = vpack.c.bf16 %v1836_v7, %v1835_v46 }
 0x554   :  { %5019 = vmatmul.msk.bf16.gmra.mxu2 %vm74_vm0, %v1842_v18 }
 0x587   :  { %v1886_v35 = vpop.f32.mrf.mxu2 }
 0x588   :  { %v1916_v38 = vadd.f32 %v5793_v5, %v1886_v35 }
 0x58a   :  { %v7310_v13 = vadd.f32 %v7304_v59, %v1916_v38 }
 0x58c   :  { %v1941_v40 = vsel %vm74_vm0, %v7310_v13, 0.0 }
 0x58d   :  { %1942 = vadd.xlane.f32.xlu1 %v1941_v40  ;;  %v5802_v40 = vld [vmem:[%s9240_s0 + $0x48] sm:$0xff] }
 0x58f   :  { %v1888_v17 = vpop.f32.mrf.mxu2 }
 0x590   :  { %v1917_v48 = vadd.f32 %v5794_v49, %v1888_v17 }
 0x592   :  { %v7318_v20 = vadd.f32 %v7304_v59, %v1917_v48 }
 0x594   :  { %v1944_v3 = vsel %vm74_vm0, %v7318_v20, 0.0 }
 0x595   :  { %1945 = vadd.xlane.f32.xlu2 %v1944_v3 }
 0x597   :  { %v1891_v61 = vpop.f32.mrf.mxu2 }
 0x598   :  { %v1918_v41 = vadd.f32 %v5795_v44, %v1891_v61 }
 0x59a   :  { %v7326_v32 = vadd.f32 %v7304_v59, %v1918_v41 }
 0x59c   :  { %v1947_v51 = vsel %vm74_vm0, %v7326_v32, 0.0 }
 0x59d   :  { %1948 = vadd.xlane.f32.xlu0 %v1947_v51 }
 0x59f   :  { %v1893_v11 = vpop.f32.mrf.mxu2 }
 0x5a0   :  { %v1919_v19 = vadd.f32 %v5796_v14, %v1893_v11  ;;  %v5803_v14 = vld [vmem:[%s9240_s0 + $0x50] sm:$0xff] }
 0x5a2   :  { %v7334_v62 = vadd.f32 %v7304_v59, %v1919_v19 }
 0x5a4   :  { %v1950_v24 = vsel %vm74_vm0, %v7334_v62, 0.0 }
 0x5a5   :  { %1951 = vadd.xlane.f32.xlu1 %v1950_v24 }
 0x5a7   :  { %v1896_v6 = vpop.f32.mrf.mxu2 }
 0x5a8   :  { %v1920_v55 = vadd.f32 %v5797_v56, %v1896_v6 }
 0x5aa   :  { %v7342_v29 = vadd.f32 %v7304_v59, %v1920_v55 }
 0x5ac   :  { %v1953_v25 = vsel %vm74_vm0, %v7342_v29, 0.0 }
 0x5ad   :  { %1954 = vadd.xlane.f32.xlu2 %v1953_v25 }
 0x5af   :  { %v1898_v28 = vpop.f32.mrf.mxu2 }
 0x5b0   :  { %v1921_v39 = vadd.f32 %v5798_v58, %v1898_v28 }
 0x5b2   :  { %v7350_v2 = vadd.f32 %v7304_v59, %v1921_v39 }
 0x5b4   :  { %v1956_v52 = vsel %vm74_vm0, %v7350_v2, 0.0 }
 0x5b5   :  { %1957 = vadd.xlane.f32.xlu0 %v1956_v52  ;;  %v5804_v52 = vld [vmem:[%s9240_s0 + $0x58] sm:$0xff] }
 0x5b7   :  { %v1901_v1 = vpop.f32.mrf.mxu2 }
 0x5b8   :  { %v1922_v27 = vadd.f32 %v5799_v54, %v1901_v1 }
 0x5ba   :  { %v7358_v53 = vadd.f32 %v7304_v59, %v1922_v27 }
 0x5bc   :  { %v1959_v23 = vsel %vm74_vm0, %v7358_v53, 0.0 }
 0x5bd   :  { %1960 = vadd.xlane.f32.xlu0 %v1959_v23 }
 0x5bf   :  { %v1903_v47 = vpop.f32.mrf.mxu2 }
 0x5c0   :  { %v1923_v45 = vadd.f32 %v5800_v31, %v1903_v47 }
 0x5c2   :  { %v7374_v15 = vadd.f32 %v7304_v59, %v1923_v45 }
 0x5c4   :  { %v1962_v30 = vsel %vm74_vm0, %v7374_v15, 0.0 }
 0x5c7   :  { %v1906_v16 = vpop.f32.mrf.mxu2 }
 0x5c8   :  { %v1924_v0 = vadd.f32 %v5801_v37, %v1906_v16  ;;  %v5267_v37 = vld [vmem:[%s9244_s4 + $0x10] sm:$0xff] }
 0x5c9   :  { %2280 = vmatpush.bf16.msrb.mxu1 %v5267_v37 }
 0x5ca   :  { %v7392_v35 = vadd.f32 %v7304_v59, %v1924_v0 }
 0x5cc   :  { %v1965_v49 = vsel %vm74_vm0, %v7392_v35, 0.0 }
 0x5cf   :  { %v1908_v7 = vpop.f32.mrf.mxu2 }
 0x5d0   :  { %v1925_v17 = vadd.f32 %v5802_v40, %v1908_v7 }
 0x5d2   :  { %v7407_v41 = vadd.f32 %v7304_v59, %v1925_v17 }
 0x5d4   :  { %v1968_v6 = vsel %vm74_vm0, %v7407_v41, 0.0 }
 0x5d7   :  { %v1911_v44 = vpop.f32.mrf.mxu2 }
 0x5d8   :  { %v1926_v19 = vadd.f32 %v5803_v14, %v1911_v44 }
 0x5da   :  { %v7422_v25 = vadd.f32 %v7304_v59, %v1926_v19 }
 0x5dc   :  { %v1971_v27 = vsel %vm74_vm0, %v7422_v25, 0.0 }
 0x5df   :  { %v1913_v58 = vpop.f32.mrf.mxu2 }
 0x5e0   :  { %v1927_v1 = vadd.f32 %v5804_v52, %v1913_v58 }
 0x600   :  { %v1943_v26 = vpop.xlane.xlu1 %1942 }
 0x601   :  { %v1977_v36 = vmul.f32 %v1943_v26, %v9368_v10  ;;  %v7437_v26 = vadd.f32 %v7304_v59, %v1927_v1 }
 0x603   :  { %v7364_v60 = vsub.f32 %v7310_v13, %v1977_v36  ;;  %v1974_v16 = vsel %vm74_vm0, %v7437_v26, 0.0 }
 0x605   :  { %v2001_v34 = vmul.f32 %v7364_v60, %v7364_v60 }
 0x607   :  { %v2013_v57 = vsel %vm74_vm0, %v2001_v34, 0.0 }
 0x608   :  { %v1946_v42 = vpop.xlane.xlu2 %1945  ;;  %2014 = vadd.xlane.f32.xlu1 %v2013_v57 }
 0x609   :  { %v1978_v33 = vmul.f32 %v1946_v42, %v9368_v10 }
 0x60b   :  { %v7377_v8 = vsub.f32 %v7318_v20, %v1978_v33 }
 0x60d   :  { %v2002_v4 = vmul.f32 %v7377_v8, %v7377_v8 }
 0x60f   :  { %v2016_v50 = vsel %vm74_vm0, %v2002_v4, 0.0 }
 0x610   :  { %2017 = vadd.xlane.f32.xlu2 %v2016_v50  ;;  %1963 = vadd.xlane.f32.xlu1 %v1962_v30  ;;  %v1949_v46 = vpop.xlane.xlu0 %1948 }
 0x611   :  { %v1979_v18 = vmul.f32 %v1949_v46, %v9368_v10 }
 0x613   :  { %v7395_v5 = vsub.f32 %v7326_v32, %v1979_v18 }
 0x615   :  { %v2003_v38 = vmul.f32 %v7395_v5, %v7395_v5 }
 0x617   :  { %v2019_v48 = vsel %vm74_vm0, %v2003_v38, 0.0 }
 0x618   :  { %v1952_v3 = vpop.xlane.xlu1 %1951  ;;  %1966 = vadd.xlane.f32.xlu1 %v1965_v49  ;;  %2020 = vadd.xlane.f32.xlu2 %v2019_v48 }
 0x619   :  { %v1980_v61 = vmul.f32 %v1952_v3, %v9368_v10 }
 0x61b   :  { %v7410_v51 = vsub.f32 %v7334_v62, %v1980_v61 }
 0x61d   :  { %v2004_v11 = vmul.f32 %v7410_v51, %v7410_v51 }
 0x61f   :  { %v2022_v24 = vsel %vm74_vm0, %v2004_v11, 0.0 }
 0x620   :  { %v1955_v56 = vpop.xlane.xlu2 %1954  ;;  %2023 = vadd.xlane.f32.xlu0 %v2022_v24  ;;  %1969 = vadd.xlane.f32.xlu2 %v1968_v6 }
 0x621   :  { %v1981_v55 = vmul.f32 %v1955_v56, %v9368_v10 }
 0x623   :  { %v7425_v28 = vsub.f32 %v7342_v29, %v1981_v55 }
 0x625   :  { %v2005_v39 = vmul.f32 %v7425_v28, %v7425_v28 }
 0x627   :  { %v2025_v54 = vsel %vm74_vm0, %v2005_v39, 0.0 }
 0x628   :  { %2026 = vadd.xlane.f32.xlu0 %v2025_v54  ;;  %1972 = vadd.xlane.f32.xlu2 %v1971_v27  ;;  %v1958_v23 = vpop.xlane.xlu0 %1957 }
 0x629   :  { %v1982_v47 = vmul.f32 %v1958_v23, %v9368_v10 }
 0x62b   :  { %v7440_v36 = vsub.f32 %v7350_v2, %v1982_v47 }
 0x62d   :  { %v2006_v34 = vmul.f32 %v7440_v36, %v7440_v36 }
 0x62f   :  { %v2028_v31 = vsel %vm74_vm0, %v2006_v34, 0.0 }
 0x630   :  { %1975 = vadd.xlane.f32.xlu0 %v1974_v16  ;;  %2029 = vadd.xlane.f32.xlu1 %v2028_v31  ;;  %v1961_v45 = vpop.xlane.xlu0 %1960 }
 0x631   :  { %v1983_v57 = vmul.f32 %v1961_v45, %v9368_v10 }
 0x633   :  { %v7449_v42 = vsub.f32 %v7358_v53, %v1983_v57 }
 0x635   :  { %v2007_v59 = vmul.f32 %v7449_v42, %v7449_v42 }
 0x637   :  { %v2031_v33 = vsel %vm74_vm0, %v2007_v59, 0.0  ;;  %v7477_v59 = vperm.slane %v7301_v21, 2 }
 0x638   :  { %2032 = vadd.xlane.f32.xlu1 %v2031_v33 }
 0x67b   :  { %v2015_v43 = vpop.xlane.xlu1 %2014 }
 0x67c   :  { %v2049_v4 = vmul.f32 %v2015_v43, %v9368_v10 }
 0x67e   :  { %v2061_v0 = vadd.f32 1e-05, %v2049_v4 }
 0x680   :  { %5528 = vrsqrt.f32 %v2061_v0  ;;  %vm2079_vm13 = vweird.f32 %v2061_v0 }
 0x683   :  { %v2018_v50 = vpop.xlane.xlu2 %2017  ;;  %v1964_v30 = vpop.xlane.xlu1 %1963 }
 0x684   :  { %v2050_v7 = vmul.f32 %v2018_v50, %v9368_v10  ;;  %v1984_v46 = vmul.f32 %v1964_v30, %v9368_v10 }
 0x686   :  { %v5529_v18 = vpop.eup %5528  ;;  %v2062_v38 = vadd.f32 1e-05, %v2050_v7  ;;  %v7461_v40 = vsub.f32 %v7374_v15, %v1984_v46 }
 0x687   :  { %v2074_v17 = vmul.f32 %v5529_v18, %v2061_v0  ;;  %vm2080_vm12 = vweird.f32 %v5529_v18 }
 0x688   :  { %5530 = vrsqrt.f32 %v2062_v38  ;;  %v2008_v49 = vmul.f32 %v7461_v40, %v7461_v40  ;;  %vm2081_vm14 = vmor %vm2079_vm13, %vm2080_vm12  ;;  %vm2089_vm1 = vweird.f32 %v2062_v38 }
 0x689   :  { %v2075_v48 = vmul.f32 %v5529_v18, %v2074_v17  ;;  %v7489_v17 = vperm.slane %v7301_v21, 3 }
 0x68a   :  { %v2034_v3 = vsel %vm74_vm0, %v2008_v49, 0.0 }
 0x68b   :  { %v2076_v61 = vmul.f32 0.5, %v2075_v48  ;;  %v1967_v44 = vpop.xlane.xlu1 %1966  ;;  %2035 = vadd.xlane.f32.xlu2 %v2034_v3  ;;  %v2021_v11 = vpop.xlane.xlu2 %2020 }
 0x68c   :  { %v1985_v14 = vmul.f32 %v1967_v44, %v9368_v10  ;;  %v2051_v19 = vmul.f32 %v2021_v11, %v9368_v10 }
 0x68d   :  { %v2077_v24 = vsub.f32 1.5, %v2076_v61 }
 0x68e   :  { %v5531_v6 = vpop.eup %5530  ;;  %v7469_v56 = vsub.f32 %v7392_v35, %v1985_v14  ;;  %v2063_v55 = vadd.f32 1e-05, %v2051_v19 }
 0x68f   :  { %v2078_v58 = vmul.f32 %v5529_v18, %v2077_v24  ;;  %v2084_v39 = vmul.f32 %v5531_v6, %v2062_v38  ;;  %vm2090_vm15 = vweird.f32 %v5531_v6 }
 0x690   :  { %5532 = vrsqrt.f32 %v2063_v55  ;;  %v2009_v52 = vmul.f32 %v7469_v56, %v7469_v56  ;;  %vm2091_vm2 = vmor %vm2089_vm1, %vm2090_vm15  ;;  %vm2099_vm4 = vweird.f32 %v2063_v55 }
 0x691   :  { %v2085_v1 = vmul.f32 %v5531_v6, %v2084_v39  ;;  %v2082_v27 = vsel %vm2081_vm14, %v5529_v18, %v2078_v58 }
 0x692   :  { %v2037_v54 = vsel %vm74_vm0, %v2009_v52, 0.0  ;;  %v2193_v33 = vmul.f32 %v2082_v27, %v7364_v60 }
 0x693   :  { %v2086_v23 = vmul.f32 0.5, %v2085_v1  ;;  %2038 = vadd.xlane.f32.xlu0 %v2037_v54  ;;  %v1970_v47 = vpop.xlane.xlu2 %1969  ;;  %v2024_v34 = vpop.xlane.xlu0 %2023 }
 0x694   :  { %v1986_v16 = vmul.f32 %v1970_v47, %v9368_v10  ;;  %v2052_v31 = vmul.f32 %v2024_v34, %v9368_v10  ;;  %v2206_v46 = vmul.f32 %v7477_v59, %v2193_v33  ;;  %v5276_v47 = vld [vmem:[%s9245_s5 + $0x48] sm:$0xff] }
 0x695   :  { %v2087_v45 = vsub.f32 1.5, %v2086_v23  ;;  %2394 = vmatpush.bf16.msrb.mxu3 %v5276_v47 }
 0x696   :  { %v5533_v57 = vpop.eup %5532  ;;  %v7481_v43 = vsub.f32 %v7407_v41, %v1986_v16  ;;  %v2064_v4 = vadd.f32 1e-05, %v2052_v31  ;;  %v2219_v24 = vadd.f32 %v7489_v17, %v2206_v46 }
 0x697   :  { %v2088_v37 = vmul.f32 %v5531_v6, %v2087_v45  ;;  %v2094_v0 = vmul.f32 %v5533_v57, %v2063_v55  ;;  %vm2100_vm3 = vweird.f32 %v5533_v57 }
 0x698   :  { %5534 = vrsqrt.f32 %v2064_v4  ;;  %v2010_v50 = vmul.f32 %v7481_v43, %v7481_v43  ;;  %vm7501_vm5 = vmor %vm2099_vm4, %vm2100_vm3  ;;  %vm2109_vm7 = vweird.f32 %v2064_v4 }
 0x699   :  { %v2092_v30 = vsel %vm2091_vm2, %v5531_v6, %v2088_v37  ;;  %v2095_v7 = vmul.f32 %v5533_v57, %v2094_v0  ;;  %v5275_v37 = vld [vmem:[%s9245_s5 + $0x40] sm:$0xff] }
 0x69a   :  { %v2194_v18 = vmul.f32 %v2092_v30, %v7377_v8  ;;  %v2040_v60 = vsel %vm74_vm0, %v2010_v50, 0.0  ;;  %2395 = vmatpush.bf16.msrb.mxu3 %v5275_v37 }
 0x69b   :  { %v2096_v49 = vmul.f32 0.5, %v2095_v7  ;;  %v1973_v48 = vpop.xlane.xlu2 %1972  ;;  %2041 = vadd.xlane.f32.xlu1 %v2040_v60  ;;  %v2027_v38 = vpop.xlane.xlu0 %2026 }
 0x69c   :  { %v2207_v3 = vmul.f32 %v7477_v59, %v2194_v18  ;;  %v1987_v61 = vmul.f32 %v1973_v48, %v9368_v10  ;;  %v2053_v44 = vmul.f32 %v2027_v38, %v9368_v10 }
 0x69d   :  { %v2097_v11 = vsub.f32 1.5, %v2096_v49  ;;  %v5274_v49 = vld [vmem:[%s9245_s5 + $0x38] sm:$0xff] }
 0x69e   :  { %v5535_v14 = vpop.eup %5534  ;;  %v7495_v19 = vsub.f32 %v7422_v25, %v1987_v61  ;;  %v2065_v8 = vadd.f32 1e-05, %v2053_v44  ;;  %v2220_v6 = vadd.f32 %v7489_v17, %v2207_v3  ;;  %2396 = vmatpush.bf16.msrb.mxu3 %v5274_v49 }
 0x69f   :  { %v2098_v58 = vmul.f32 %v5533_v57, %v2097_v11  ;;  %v2104_v39 = vmul.f32 %v5535_v14, %v2064_v4  ;;  %vm2110_vm6 = vweird.f32 %v5535_v14 }
 0x6a0   :  { %5536 = vrsqrt.f32 %v2065_v8  ;;  %v2231_v52 = vpack.c.bf16 %v2220_v6, %v2219_v24  ;;  %v2011_v1 = vmul.f32 %v7495_v19, %v7495_v19  ;;  %vm2111_vm8 = vmor %vm2109_vm7, %vm2110_vm6  ;;  %vm2119_vm10 = vweird.f32 %v2065_v8 }
 0x6a1   :  { %v2105_v54 = vmul.f32 %v5535_v14, %v2104_v39  ;;  %v2102_v34 = vsel %vm7501_vm5, %v5533_v57, %v2098_v58 }
 0x6a2   :  { %5032 = vmatmul.msk.bf16.vlgmr.msrb.gmra.mxu1 %vm74_vm0, %v2231_v52  ;;  %v2043_v23 = vsel %vm74_vm0, %v2011_v1, 0.0  ;;  %v2195_v30 = vmul.f32 %v2102_v34, %v7395_v5 }
 0x6a3   :  { %v2106_v16 = vmul.f32 0.5, %v2105_v54  ;;  %2044 = vadd.xlane.f32.xlu2 %v2043_v23  ;;  %v2030_v31 = vpop.xlane.xlu1 %2029  ;;  %v1976_v55 = vpop.xlane.xlu0 %1975 }
 0x6a4   :  { %v2054_v45 = vmul.f32 %v2030_v31, %v9368_v10  ;;  %v1988_v33 = vmul.f32 %v1976_v55, %v9368_v10  ;;  %v2208_v61 = vmul.f32 %v7477_v59, %v2195_v30 }
 0x6a5   :  { %v2107_v0 = vsub.f32 1.5, %v2106_v16 }
 0x6a6   :  { %v5537_v50 = vpop.eup %5536  ;;  %v2066_v7 = vadd.f32 1e-05, %v2054_v45  ;;  %v7519_v57 = vsub.f32 %v7437_v26, %v1988_v33  ;;  %v2221_v6 = vadd.f32 %v7489_v17, %v2208_v61 }
 0x6a7   :  { %v2108_v46 = vmul.f32 %v5535_v14, %v2107_v0  ;;  %v2114_v18 = vmul.f32 %v5537_v50, %v2065_v8  ;;  %vm2120_vm9 = vweird.f32 %v5537_v50 }
 0x6a8   :  { %5538 = vrsqrt.f32 %v2066_v7  ;;  %v2012_v60 = vmul.f32 %v7519_v57, %v7519_v57  ;;  %vm2121_vm12 = vmor %vm2119_vm10, %vm2120_vm9  ;;  %vm2129_vm14 = vweird.f32 %v2066_v7 }
 0x6a9   :  { %v2112_v48 = vsel %vm2111_vm8, %v5535_v14, %v2108_v46  ;;  %v2115_v38 = vmul.f32 %v5537_v50, %v2114_v18 }
 0x6aa   :  { %v2196_v5 = vmul.f32 %v2112_v48, %v7410_v51  ;;  %v2046_v3 = vsel %vm74_vm0, %v2012_v60, 0.0  ;;  %v5272_v60 = vld [vmem:[%s9245_s5 + $0x28] sm:$0xff] }
 0x6ab   :  { %v2116_v4 = vmul.f32 0.5, %v2115_v38  ;;  %2047 = vadd.xlane.f32.xlu0 %v2046_v3  ;;  %v2033_v37 = vpop.xlane.xlu1 %2032  ;;  %v5271_v38 = vld [vmem:[%s9245_s5 + $0x20] sm:$0xff] }
 0x6ac   :  { %v2209_v44 = vmul.f32 %v7477_v59, %v2196_v5 }
 0x6ad   :  { %v2117_v11 = vsub.f32 1.5, %v2116_v4  ;;  %v5270_v4 = vld [vmem:[%s9245_s5 + $0x18] sm:$0xff] }
 0x6ae   :  { %v5539_v24 = vpop.eup %5538  ;;  %v2222_v58 = vadd.f32 %v7489_v17, %v2209_v44 }
 0x6af   :  { %v2118_v39 = vmul.f32 %v5537_v50, %v2117_v11  ;;  %v2124_v14 = vmul.f32 %v5539_v24, %v2066_v7  ;;  %vm2130_vm13 = vweird.f32 %v5539_v24 }
 0x6b0   :  { %v2232_v52 = vpack.c.bf16 %v2222_v58, %v2221_v6  ;;  %vm2131_vm15 = vmor %vm2129_vm14, %vm2130_vm13  ;;  %v5269_v58 = vld [vmem:[%s9245_s5 + $0x10] sm:$0xff] }
 0x6b1   :  { %v2125_v51 = vmul.f32 %v5539_v24, %v2124_v14  ;;  %v2122_v1 = vsel %vm2121_vm12, %v5537_v50, %v2118_v39 }
 0x6b2   :  { %5033 = vmatmul.msk.bf16.gmra.mxu1 %vm74_vm0, %v2232_v52  ;;  %v2197_v23 = vmul.f32 %v2122_v1, %v7425_v28  ;;  %v2055_v28 = vmul.f32 %v2033_v37, %v9368_v10 }
 0x6b3   :  { %v2126_v54 = vmul.f32 0.5, %v2125_v51 }
 0x6b4   :  { %v2210_v31 = vmul.f32 %v7477_v59, %v2197_v23  ;;  %v2067_v0 = vadd.f32 1e-05, %v2055_v28 }
 0x6b5   :  { %v2127_v27 = vsub.f32 1.5, %v2126_v54 }
 0x6b6   :  { %v2223_v55 = vadd.f32 %v7489_v17, %v2210_v31  ;;  %5540 = vrsqrt.f32 %v2067_v0  ;;  %vm2139_vm2 = vweird.f32 %v2067_v0 }
 0x6b7   :  { %v2128_v47 = vmul.f32 %v5539_v24, %v2127_v27 }
 0x6b9   :  { %v2132_v34 = vsel %vm2131_vm15, %v5539_v24, %v2128_v47 }
 0x6ba   :  { %v2198_v16 = vmul.f32 %v2132_v34, %v7440_v36  ;;  %v5273_v36 = vld [vmem:[%s9245_s5 + $0x30] sm:$0xff] }
 0x6bb   :  { %2397 = vmatpush.bf16.msrb.mxu3 %v5273_v36 }
 0x6bc   :  { %v2211_v8 = vmul.f32 %v7477_v59, %v2198_v16  ;;  %v5541_v50 = vpop.eup %5540 }
 0x6bd   :  { %v2134_v30 = vmul.f32 %v5541_v50, %v2067_v0  ;;  %vm2140_vm1 = vweird.f32 %v5541_v50 }
 0x6be   :  { %v2224_v45 = vadd.f32 %v7489_v17, %v2211_v8  ;;  %vm2141_vm3 = vmor %vm2139_vm2, %vm2140_vm1 }
 0x6bf   :  { %v2135_v7 = vmul.f32 %v5541_v50, %v2134_v30  ;;  %2398 = vmatpush.bf16.msrb.mxu3 %v5272_v60 }
 0x6c0   :  { %v2233_v33 = vpack.c.bf16 %v2224_v45, %v2223_v55 }
 0x6c1   :  { %v2136_v48 = vmul.f32 0.5, %v2135_v7 }
 0x6c2   :  { %5034 = vmatmul.msk.bf16.gmra.mxu1 %vm74_vm0, %v2233_v33 }
 0x6c3   :  { %2399 = vmatpush.bf16.msrb.mxu3 %v5271_v38  ;;  %v2137_v5 = vsub.f32 1.5, %v2136_v48 }
 0x6c5   :  { %v2138_v24 = vmul.f32 %v5541_v50, %v2137_v5 }
 0x6c7   :  { %2400 = vmatpush.bf16.msrb.mxu3 %v5270_v4  ;;  %v2142_v14 = vsel %vm2141_vm3, %v5541_v50, %v2138_v24 }
 0x6c8   :  { %v2199_v23 = vmul.f32 %v2142_v14, %v7449_v42 }
 0x6ca   :  { %v2212_v45 = vmul.f32 %v7477_v59, %v2199_v23 }
 0x6cb   :  { %2401 = vmatpush.bf16.msrb.mxu3 %v5269_v58 }
 0x6cc   :  { %v2225_v30 = vadd.f32 %v7489_v17, %v2212_v45 }
 0x6fe   :  { %v2036_v46 = vpop.xlane.xlu2 %2035 }
 0x6ff   :  { %v2056_v18 = vmul.f32 %v2036_v46, %v9368_v10 }
 0x701   :  { %v2068_v49 = vadd.f32 1e-05, %v2056_v18 }
 0x703   :  { %5542 = vrsqrt.f32 %v2068_v49  ;;  %vm2149_vm5 = vweird.f32 %v2068_v49 }
 0x706   :  { %v2039_v3 = vpop.xlane.xlu0 %2038 }
 0x707   :  { %v2057_v61 = vmul.f32 %v2039_v3, %v9368_v10 }
 0x709   :  { %v5543_v44 = vpop.eup %5542  ;;  %v2069_v11 = vadd.f32 1e-05, %v2057_v61 }
 0x70a   :  { %v2144_v6 = vmul.f32 %v5543_v44, %v2068_v49  ;;  %vm2150_vm4 = vweird.f32 %v5543_v44 }
 0x70b   :  { %5544 = vrsqrt.f32 %v2069_v11  ;;  %vm2151_vm6 = vmor %vm2149_vm5, %vm2150_vm4  ;;  %vm2159_vm8 = vweird.f32 %v2069_v11 }
 0x70c   :  { %v2145_v39 = vmul.f32 %v5543_v44, %v2144_v6 }
 0x70e   :  { %v2146_v52 = vmul.f32 0.5, %v2145_v39  ;;  %v2042_v51 = vpop.xlane.xlu1 %2041 }
 0x70f   :  { %v2058_v1 = vmul.f32 %v2042_v51, %v9368_v10 }
 0x710   :  { %v2147_v54 = vsub.f32 1.5, %v2146_v52 }
 0x711   :  { %v5545_v27 = vpop.eup %5544  ;;  %v2070_v47 = vadd.f32 1e-05, %v2058_v1 }
 0x712   :  { %v2148_v34 = vmul.f32 %v5543_v44, %v2147_v54  ;;  %v2154_v16 = vmul.f32 %v5545_v27, %v2069_v11  ;;  %vm2160_vm7 = vweird.f32 %v5545_v27  ;;  %v5805_v11 = vld [vmem:[%s9243_s3] sm:$0x3] }
 0x713   :  { %5546 = vrsqrt.f32 %v2070_v47  ;;  %vm2161_vm9 = vmor %vm2159_vm8, %vm2160_vm7  ;;  %vm2169_vm12 = vweird.f32 %v2070_v47  ;;  %v7572_v39 = vperm.slane %v5805_v11, 1 }
 0x714   :  { %v2152_v31 = vsel %vm2151_vm6, %v5543_v44, %v2148_v34  ;;  %v2155_v8 = vmul.f32 %v5545_v27, %v2154_v16 }
 0x715   :  { %v2200_v55 = vmul.f32 %v2152_v31, %v7461_v40 }
 0x716   :  { %v2156_v33 = vmul.f32 0.5, %v2155_v8  ;;  %v2045_v37 = vpop.xlane.xlu2 %2044 }
 0x717   :  { %v2059_v28 = vmul.f32 %v2045_v37, %v9368_v10  ;;  %v2213_v0 = vmul.f32 %v7477_v59, %v2200_v55 }
 0x718   :  { %v2157_v36 = vsub.f32 1.5, %v2156_v33 }
 0x719   :  { %v5547_v42 = vpop.eup %5546  ;;  %v2071_v50 = vadd.f32 1e-05, %v2059_v28  ;;  %v2226_v7 = vadd.f32 %v7489_v17, %v2213_v0 }
 0x71a   :  { %v2158_v46 = vmul.f32 %v5545_v27, %v2157_v36  ;;  %v2164_v18 = vmul.f32 %v5547_v42, %v2070_v47  ;;  %vm2170_vm10 = vweird.f32 %v5547_v42 }
 0x71b   :  { %5548 = vrsqrt.f32 %v2071_v50  ;;  %v2234_v40 = vpack.c.bf16 %v2226_v7, %v2225_v30  ;;  %vm2171_vm13 = vmor %vm2169_vm12, %vm2170_vm10  ;;  %vm2179_vm15 = vweird.f32 %v2071_v50 }
 0x71c   :  { %v2165_v60 = vmul.f32 %v5547_v42, %v2164_v18  ;;  %v2162_v49 = vsel %vm2161_vm9, %v5545_v27, %v2158_v46 }
 0x71d   :  { %5035 = vmatmul.msk.bf16.gmra.mxu1 %vm74_vm0, %v2234_v40  ;;  %v2201_v44 = vmul.f32 %v2162_v49, %v7469_v56 }
 0x71e   :  { %v2166_v48 = vmul.f32 0.5, %v2165_v60  ;;  %v2048_v38 = vpop.xlane.xlu0 %2047 }
 0x71f   :  { %v2060_v5 = vmul.f32 %v2048_v38, %v9368_v10  ;;  %v2282_v3 = vpop.f32.mrf.mxu1  ;;  %v2214_v1 = vmul.f32 %v7477_v59, %v2201_v44 }
 0x720   :  { %v2167_v61 = vsub.f32 1.5, %v2166_v48  ;;  %v2283_v56 = vadd.f32 %v2282_v3, %v7572_v39 }
 0x721   :  { %v5549_v4 = vpop.eup %5548  ;;  %v2072_v24 = vadd.f32 1e-05, %v2060_v5  ;;  %v2227_v31 = vadd.f32 %v7489_v17, %v2214_v1 }
 0x722   :  { %v2168_v6 = vmul.f32 %v5547_v42, %v2167_v61  ;;  %v2174_v58 = vmul.f32 %v5549_v4, %v2071_v50  ;;  %vm2180_vm14 = vweird.f32 %v5549_v4 }
 0x723   :  { %5550 = vrsqrt.f32 %v2072_v24  ;;  %vm2181_vm1 = vmor %vm2179_vm15, %vm2180_vm14  ;;  %vm2189_vm3 = vweird.f32 %v2072_v24 }
 0x724   :  { %v2172_v14 = vsel %vm2171_vm13, %v5547_v42, %v2168_v6  ;;  %v2175_v52 = vmul.f32 %v5549_v4, %v2174_v58 }
 0x725   :  { %v2202_v51 = vmul.f32 %v2172_v14, %v7481_v43  ;;  %v2312_v43 = vmax.f32 %v2283_v56, 0.0 }
 0x726   :  { %v2176_v54 = vmul.f32 0.5, %v2175_v52 }
 0x727   :  { %v2284_v27 = vpop.f32.mrf.mxu1  ;;  %v2215_v23 = vmul.f32 %v7477_v59, %v2202_v51 }
 0x728   :  { %v2177_v47 = vsub.f32 1.5, %v2176_v54  ;;  %v2285_v34 = vadd.f32 %v2284_v27, %v7572_v39 }
 0x729   :  { %v5551_v16 = vpop.eup %5550  ;;  %v2228_v8 = vadd.f32 %v7489_v17, %v2215_v23 }
 0x72a   :  { %v2178_v55 = vmul.f32 %v5549_v4, %v2177_v47  ;;  %v2184_v45 = vmul.f32 %v5551_v16, %v2072_v24  ;;  %v2313_v33 = vmax.f32 %v2285_v34, 0.0  ;;  %vm2190_vm2 = vweird.f32 %v5551_v16 }
 0x72b   :  { %v2235_v37 = vpack.c.bf16 %v2228_v8, %v2227_v31  ;;  %vm2191_vm4 = vmor %vm2189_vm3, %vm2190_vm2  ;;  %v7596_v34 = vperm.slane %v7301_v21, 5 }
 0x72c   :  { %v2185_v28 = vmul.f32 %v5551_v16, %v2184_v45  ;;  %v2324_v0 = vpack.c.bf16 %v2313_v33, %v2312_v43  ;;  %v2182_v36 = vsel %vm2181_vm1, %v5549_v4, %v2178_v55 }
 0x72d   :  { %5036 = vmatmul.msk.bf16.gmra.mxu1 %vm74_vm0, %v2235_v37  ;;  %v2203_v46 = vmul.f32 %v2182_v36, %v7495_v19 }
 0x72e   :  { %v2186_v42 = vmul.f32 0.5, %v2185_v28  ;;  %2402 = vmatmul.bf16.vlgmr.msrb.gmra.mxu3 %v2324_v0 }
 0x72f   :  { %v2287_v30 = vpop.f32.mrf.mxu1  ;;  %v2216_v50 = vmul.f32 %v7477_v59, %v2203_v46 }
 0x730   :  { %v2187_v7 = vsub.f32 1.5, %v2186_v42  ;;  %v2288_v49 = vadd.f32 %v2287_v30, %v7572_v39 }
 0x731   :  { %v2229_v3 = vadd.f32 %v7489_v17, %v2216_v50 }
 0x732   :  { %v2188_v18 = vmul.f32 %v5551_v16, %v2187_v7  ;;  %v2314_v19 = vmax.f32 %v2288_v49, 0.0 }
 0x734   :  { %v2192_v40 = vsel %vm2191_vm4, %v5551_v16, %v2188_v18 }
 0x735   :  { %v2204_v60 = vmul.f32 %v2192_v40, %v7519_v57 }
 0x737   :  { %v2289_v48 = vpop.f32.mrf.mxu1  ;;  %v2217_v38 = vmul.f32 %v7477_v59, %v2204_v60 }
 0x738   :  { %v2290_v5 = vadd.f32 %v2289_v48, %v7572_v39 }
 0x739   :  { %v2230_v61 = vadd.f32 %v7489_v17, %v2217_v38 }
 0x73a   :  { %v2315_v4 = vmax.f32 %v2290_v5, 0.0 }
 0x73b   :  { %v2236_v44 = vpack.c.bf16 %v2230_v61, %v2229_v3 }
 0x73c   :  { %v2325_v24 = vpack.c.bf16 %v2315_v4, %v2314_v19 }
 0x73d   :  { %5037 = vmatmul.msk.bf16.gmra.mxu1 %vm74_vm0, %v2236_v44 }
 0x73e   :  { %2407 = vmatmul.bf16.gmra.mxu3 %v2325_v24 }
 0x73f   :  { %v2292_v57 = vpop.f32.mrf.mxu1 }
 0x740   :  { %v2293_v6 = vadd.f32 %v2292_v57, %v7572_v39 }
 0x742   :  { %v2316_v59 = vmax.f32 %v2293_v6, 0.0 }
 0x747   :  { %v2294_v58 = vpop.f32.mrf.mxu1 }
 0x748   :  { %v2295_v11 = vadd.f32 %v2294_v58, %v7572_v39 }
 0x74a   :  { %v2317_v14 = vmax.f32 %v2295_v11, 0.0 }
 0x74c   :  { %v2326_v52 = vpack.c.bf16 %v2317_v14, %v2316_v59 }
 0x74e   :  { %2412 = vmatmul.bf16.gmra.mxu3 %v2326_v52 }
 0x79a   :  { %v2297_v51 = vpop.f32.mrf.mxu1 }
 0x79b   :  { %v2298_v17 = vadd.f32 %v2297_v51, %v7572_v39 }
 0x79d   :  { %v2318_v56 = vmax.f32 %v2298_v17, 0.0 }
 0x7a2   :  { %v2299_v1 = vpop.f32.mrf.mxu1 }
 0x7a3   :  { %v2300_v54 = vadd.f32 %v2299_v1, %v7572_v39 }
 0x7a5   :  { %v2319_v27 = vmax.f32 %v2300_v54, 0.0 }
 0x7a7   :  { %v2327_v23 = vpack.c.bf16 %v2319_v27, %v2318_v56 }
 0x7a9   :  { %2417 = vmatmul.bf16.gmra.mxu3 %v2327_v23 }
 0x7aa   :  { %v2302_v47 = vpop.f32.mrf.mxu1 }
 0x7ab   :  { %v2303_v16 = vadd.f32 %v2302_v47, %v7572_v39 }
 0x7ad   :  { %v2320_v33 = vmax.f32 %v2303_v16, 0.0 }
 0x7b1   :  { %v2403_v31 = vpop.f32.mrf.mxu3 }
 0x7b2   :  { %v2433_v8 = vadd.f32 %v2403_v31, %v7310_v13  ;;  %v2304_v55 = vpop.f32.mrf.mxu1 }
 0x7b3   :  { %v2305_v45 = vadd.f32 %v2304_v55, %v7572_v39  ;;  %v5278_v55 = vld [vmem:[%s9244_s4 + $0x28] sm:$0xff] }
 0x7b4   :  { %v7602_v43 = vadd.f32 %v7596_v34, %v2433_v8  ;;  %2800 = vmatpush.bf16.msra.mxu0 %v5278_v55 }
 0x7b5   :  { %v2321_v37 = vmax.f32 %v2305_v45, 0.0 }
 0x7b6   :  { %9371 = vst [vmem:[#allocation19_spill] sm:$0xff] %v7602_v43  ;;  %v2462_v28 = vsel %vm74_vm0, %v7602_v43, 0.0 }
 0x7b7   :  { %2463 = vadd.xlane.f32.xlu1 %v2462_v28  ;;  %v2328_v0 = vpack.c.bf16 %v2321_v37, %v2320_v33 }
 0x7b9   :  { %v2405_v21 = vpop.f32.mrf.mxu3  ;;  %2422 = vmatmul.bf16.gmra.mxu3 %v2328_v0 }
 0x7ba   :  { %v2434_v36 = vadd.f32 %v2405_v21, %v7318_v20  ;;  %v2307_v42 = vpop.f32.mrf.mxu1 }
 0x7bb   :  { %v2308_v7 = vadd.f32 %v2307_v42, %v7572_v39 }
 0x7bc   :  { %v7608_v13 = vadd.f32 %v7596_v34, %v2434_v36 }
 0x7bd   :  { %v2322_v20 = vmax.f32 %v2308_v7, 0.0 }
 0x7be   :  { %9372 = vst [vmem:[#allocation20_spill] sm:$0xff] %v7608_v13  ;;  %v2465_v30 = vsel %vm74_vm0, %v7608_v13, 0.0 }
 0x7bf   :  { %2466 = vadd.xlane.f32.xlu2 %v2465_v30 }
 0x7c1   :  { %v2408_v46 = vpop.f32.mrf.mxu3 }
 0x7c2   :  { %v2435_v18 = vadd.f32 %v2408_v46, %v7326_v32  ;;  %v2309_v40 = vpop.f32.mrf.mxu1 }
 0x7c3   :  { %v2310_v60 = vadd.f32 %v2309_v40, %v7572_v39 }
 0x7c4   :  { %v7616_v50 = vadd.f32 %v7596_v34, %v2435_v18 }
 0x7c5   :  { %v2323_v49 = vmax.f32 %v2310_v60, 0.0 }
 0x7c6   :  { %9373 = vst [vmem:[#allocation18_spill] sm:$0xff] %v7616_v50  ;;  %v2468_v48 = vsel %vm74_vm0, %v7616_v50, 0.0 }
 0x7c7   :  { %2469 = vadd.xlane.f32.xlu0 %v2468_v48  ;;  %v2329_v38 = vpack.c.bf16 %v2323_v49, %v2322_v20 }
 0x7c9   :  { %v2410_v5 = vpop.f32.mrf.mxu3  ;;  %2427 = vmatmul.bf16.gmra.mxu3 %v2329_v38 }
 0x7ca   :  { %v2436_v3 = vadd.f32 %v2410_v5, %v7334_v62 }
 0x7cc   :  { %v7622_v61 = vadd.f32 %v7596_v34, %v2436_v3 }
 0x7ce   :  { %9374 = vst [vmem:[#allocation21_spill] sm:$0xff] %v7622_v61  ;;  %v2471_v32 = vsel %vm74_vm0, %v7622_v61, 0.0 }
 0x7cf   :  { %2472 = vadd.xlane.f32.xlu1 %v2471_v32 }
 0x7d1   :  { %v2413_v39 = vpop.f32.mrf.mxu3 }
 0x7d2   :  { %v2437_v19 = vadd.f32 %v2413_v39, %v7342_v29 }
 0x7d4   :  { %v7628_v4 = vadd.f32 %v7596_v34, %v2437_v19 }
 0x7d6   :  { %9375 = vst [vmem:[#allocation17_spill] sm:$0xff] %v7628_v4  ;;  %v2474_v44 = vsel %vm74_vm0, %v7628_v4, 0.0 }
 0x7d7   :  { %2475 = vadd.xlane.f32.xlu2 %v2474_v44 }
 0x7d9   :  { %v2415_v24 = vpop.f32.mrf.mxu3 }
 0x7da   :  { %v2438_v62 = vadd.f32 %v2415_v24, %v7350_v2 }
 0x7dc   :  { %v7634_v57 = vadd.f32 %v7596_v34, %v2438_v62 }
 0x7de   :  { %9376 = vst [vmem:[#allocation22_spill] sm:$0xff] %v7634_v57  ;;  %v2477_v6 = vsel %vm74_vm0, %v7634_v57, 0.0 }
 0x7df   :  { %2478 = vadd.xlane.f32.xlu0 %v2477_v6 }
 0x82a   :  { %v2464_v58 = vpop.xlane.xlu1 %2463 }
 0x82b   :  { %v2498_v29 = vmul.f32 %v2464_v58, %v9368_v10 }
 0x82c   :  { %v2418_v11 = vpop.f32.mrf.mxu3 }
 0x82d   :  { %v7640_v59 = vsub.f32 %v7602_v43, %v2498_v29  ;;  %v2439_v14 = vadd.f32 %v2418_v11, %v7358_v53 }
 0x82f   :  { %v7644_v52 = vadd.f32 %v7596_v34, %v2439_v14  ;;  %v2522_v2 = vmul.f32 %v7640_v59, %v7640_v59 }
 0x831   :  { %9377 = vst [vmem:[#allocation16_spill] sm:$0xff] %v7644_v52  ;;  %v2534_v51 = vsel %vm74_vm0, %v2522_v2, 0.0  ;;  %v2480_v17 = vsel %vm74_vm0, %v7644_v52, 0.0 }
 0x832   :  { %v2467_v1 = vpop.xlane.xlu2 %2466  ;;  %2535 = vadd.xlane.f32.xlu1 %v2534_v51  ;;  %2481 = vadd.xlane.f32.xlu0 %v2480_v17 }
 0x833   :  { %v2499_v54 = vmul.f32 %v2467_v1, %v9368_v10 }
 0x834   :  { %v2420_v56 = vpop.f32.mrf.mxu3 }
 0x835   :  { %v7653_v27 = vsub.f32 %v7608_v13, %v2499_v54  ;;  %v2440_v53 = vadd.f32 %v2420_v56, %v7374_v15  ;;  %v5277_v54 = vld [vmem:[%s9244_s4 + $0x20] sm:$0xff] }
 0x836   :  { %2801 = vmatpush.bf16.msra.mxu0 %v5277_v54 }
 0x837   :  { %v7657_v23 = vadd.f32 %v7596_v34, %v2440_v53  ;;  %v2523_v47 = vmul.f32 %v7653_v27, %v7653_v27 }
 0x839   :  { %9378 = vst [vmem:[#allocation23_spill] sm:$0xff] %v7657_v23  ;;  %v2537_v16 = vsel %vm74_vm0, %v2523_v47, 0.0  ;;  %v2483_v31 = vsel %vm74_vm0, %v7657_v23, 0.0 }
 0x83a   :  { %2538 = vadd.xlane.f32.xlu2 %v2537_v16  ;;  %2484 = vadd.xlane.f32.xlu1 %v2483_v31  ;;  %v2470_v8 = vpop.xlane.xlu0 %2469 }
 0x83b   :  { %v2500_v15 = vmul.f32 %v2470_v8, %v9368_v10 }
 0x83c   :  { %v2423_v45 = vpop.f32.mrf.mxu3 }
 0x83d   :  { %v7669_v33 = vsub.f32 %v7616_v50, %v2500_v15  ;;  %v2441_v37 = vadd.f32 %v2423_v45, %v7392_v35 }
 0x83f   :  { %v7673_v28 = vadd.f32 %v7596_v34, %v2441_v37  ;;  %v2524_v0 = vmul.f32 %v7669_v33, %v7669_v33 }
 0x841   :  { %9379 = vst [vmem:[#allocation24_spill] sm:$0xff] %v7673_v28  ;;  %v2486_v21 = vsel %vm74_vm0, %v7673_v28, 0.0  ;;  %v2540_v36 = vsel %vm74_vm0, %v2524_v0, 0.0 }
 0x842   :  { %v2473_v42 = vpop.xlane.xlu1 %2472  ;;  %2487 = vadd.xlane.f32.xlu1 %v2486_v21  ;;  %2541 = vadd.xlane.f32.xlu2 %v2540_v36 }
 0x843   :  { %v2501_v30 = vmul.f32 %v2473_v42, %v9368_v10 }
 0x844   :  { %v2425_v7 = vpop.f32.mrf.mxu3 }
 0x845   :  { %v7682_v46 = vsub.f32 %v7622_v61, %v2501_v30  ;;  %v2442_v35 = vadd.f32 %v2425_v7, %v7407_v41 }
 0x847   :  { %v7686_v18 = vadd.f32 %v7596_v34, %v2442_v35  ;;  %v2525_v40 = vmul.f32 %v7682_v46, %v7682_v46 }
 0x849   :  { %9380 = vst [vmem:[#allocation25_spill] sm:$0xff] %v7686_v18  ;;  %v2543_v60 = vsel %vm74_vm0, %v2525_v40, 0.0  ;;  %v2489_v20 = vsel %vm74_vm0, %v7686_v18, 0.0 }
 0x84a   :  { %v2476_v49 = vpop.xlane.xlu2 %2475  ;;  %2544 = vadd.xlane.f32.xlu0 %v2543_v60  ;;  %2490 = vadd.xlane.f32.xlu2 %v2489_v20 }
 0x84b   :  { %v2502_v48 = vmul.f32 %v2476_v49, %v9368_v10 }
 0x84c   :  { %v2428_v38 = vpop.f32.mrf.mxu3 }
 0x84d   :  { %v7695_v5 = vsub.f32 %v7628_v4, %v2502_v48  ;;  %v2443_v41 = vadd.f32 %v2428_v38, %v7422_v25 }
 0x84f   :  { %v7699_v3 = vadd.f32 %v7596_v34, %v2443_v41  ;;  %v2526_v32 = vmul.f32 %v7695_v5, %v7695_v5 }
 0x851   :  { %9381 = vst [vmem:[#allocation26_spill] sm:$0xff] %v7699_v3  ;;  %v2546_v39 = vsel %vm74_vm0, %v2526_v32, 0.0  ;;  %v2492_v19 = vsel %vm74_vm0, %v7699_v3, 0.0 }
 0x852   :  { %2547 = vadd.xlane.f32.xlu0 %v2546_v39  ;;  %2493 = vadd.xlane.f32.xlu2 %v2492_v19  ;;  %v2479_v44 = vpop.xlane.xlu0 %2478 }
 0x853   :  { %v2503_v24 = vmul.f32 %v2479_v44, %v9368_v10  ;;  %v5070_v44 = vld [vmem:[%s9242_s2 + $0x8] sm:$0xff] }
 0x854   :  { %v2430_v62 = vpop.f32.mrf.mxu3 }
 0x855   :  { %v7708_v6 = vsub.f32 %v7634_v57, %v2503_v24  ;;  %v2444_v25 = vadd.f32 %v2430_v62, %v7437_v26 }
 0x857   :  { %v7712_v58 = vadd.f32 %v7596_v34, %v2444_v25  ;;  %v2527_v29 = vmul.f32 %v7708_v6, %v7708_v6 }
 0x859   :  { %9382 = vst [vmem:[#allocation27_spill] sm:$0xff] %v7712_v58  ;;  %v2495_v11 = vsel %vm74_vm0, %v7712_v58, 0.0  ;;  %v2549_v14 = vsel %vm74_vm0, %v2527_v29, 0.0 }
 0x85a   :  { %2496 = vadd.xlane.f32.xlu0 %v2495_v11  ;;  %2550 = vadd.xlane.f32.xlu1 %v2549_v14 }
 0x8a5   :  { %v2536_v2 = vpop.xlane.xlu1 %2535  ;;  %v2482_v51 = vpop.xlane.xlu0 %2481 }
 0x8a6   :  { %v2570_v17 = vmul.f32 %v2536_v2, %v9368_v10  ;;  %v2504_v1 = vmul.f32 %v2482_v51, %v9368_v10 }
 0x8a8   :  { %v2582_v26 = vadd.f32 1e-05, %v2570_v17  ;;  %v7722_v34 = vsub.f32 %v7644_v52, %v2504_v1  ;;  %v7751_v17 = vperm.slane %v5070_v44, 0 }
 0x8aa   :  { %5552 = vrsqrt.f32 %v2582_v26  ;;  %v2528_v56 = vmul.f32 %v7722_v34, %v7722_v34  ;;  %vm2600_vm6 = vweird.f32 %v2582_v26 }
 0x8ac   :  { %v2552_v53 = vsel %vm74_vm0, %v2528_v56, 0.0 }
 0x8ad   :  { %v2539_v47 = vpop.xlane.xlu2 %2538  ;;  %v2485_v16 = vpop.xlane.xlu1 %2484  ;;  %2553 = vadd.xlane.f32.xlu1 %v2552_v53 }
 0x8ae   :  { %v2571_v31 = vmul.f32 %v2539_v47, %v9368_v10  ;;  %v2505_v8 = vmul.f32 %v2485_v16, %v9368_v10 }
 0x8b0   :  { %v5553_v55 = vpop.eup %5552  ;;  %v2583_v15 = vadd.f32 1e-05, %v2571_v31  ;;  %v7733_v45 = vsub.f32 %v7657_v23, %v2505_v8  ;;  %v7759_v8 = vperm.slane %v5070_v44, 1 }
 0x8b1   :  { %v2595_v37 = vmul.f32 %v5553_v55, %v2582_v26  ;;  %vm2601_vm5 = vweird.f32 %v5553_v55 }
 0x8b2   :  { %5554 = vrsqrt.f32 %v2583_v15  ;;  %v2529_v0 = vmul.f32 %v7733_v45, %v7733_v45  ;;  %vm2602_vm7 = vmor %vm2600_vm6, %vm2601_vm5  ;;  %vm2610_vm9 = vweird.f32 %v2583_v15 }
 0x8b3   :  { %v2596_v21 = vmul.f32 %v5553_v55, %v2595_v37 }
 0x8b4   :  { %v2555_v36 = vsel %vm74_vm0, %v2529_v0, 0.0 }
 0x8b5   :  { %v2597_v42 = vmul.f32 0.5, %v2596_v21  ;;  %v2488_v30 = vpop.xlane.xlu1 %2487  ;;  %2556 = vadd.xlane.f32.xlu2 %v2555_v36  ;;  %v2542_v7 = vpop.xlane.xlu2 %2541 }
 0x8b6   :  { %v2506_v35 = vmul.f32 %v2488_v30, %v9368_v10  ;;  %v2572_v40 = vmul.f32 %v2542_v7, %v9368_v10 }
 0x8b7   :  { %v2598_v60 = vsub.f32 1.5, %v2597_v42 }
 0x8b8   :  { %v5555_v20 = vpop.eup %5554  ;;  %v7741_v49 = vsub.f32 %v7673_v28, %v2506_v35  ;;  %v2584_v48 = vadd.f32 1e-05, %v2572_v40 }
 0x8b9   :  { %v2599_v38 = vmul.f32 %v5553_v55, %v2598_v60  ;;  %v2605_v41 = vmul.f32 %v5555_v20, %v2583_v15  ;;  %vm2611_vm8 = vweird.f32 %v5555_v20 }
 0x8ba   :  { %5556 = vrsqrt.f32 %v2584_v48  ;;  %v2530_v32 = vmul.f32 %v7741_v49, %v7741_v49  ;;  %vm2612_vm10 = vmor %vm2610_vm9, %vm2611_vm8  ;;  %vm2620_vm13 = vweird.f32 %v2584_v48 }
 0x8bb   :  { %v2606_v39 = vmul.f32 %v5555_v20, %v2605_v41  ;;  %v2603_v24 = vsel %vm2602_vm7, %v5553_v55, %v2599_v38 }
 0x8bc   :  { %v2558_v19 = vsel %vm74_vm0, %v2530_v32, 0.0  ;;  %v2714_v1 = vmul.f32 %v2603_v24, %v7640_v59 }
 0x8bd   :  { %v2607_v62 = vmul.f32 0.5, %v2606_v39  ;;  %2559 = vadd.xlane.f32.xlu0 %v2558_v19  ;;  %v2491_v25 = vpop.xlane.xlu2 %2490  ;;  %v2545_v29 = vpop.xlane.xlu0 %2544 }
 0x8be   :  { %v2507_v11 = vmul.f32 %v2491_v25, %v9368_v10  ;;  %v2573_v14 = vmul.f32 %v2545_v29, %v9368_v10  ;;  %v2727_v55 = vmul.f32 %v7751_v17, %v2714_v1 }
 0x8bf   :  { %v2608_v2 = vsub.f32 1.5, %v2607_v62 }
 0x8c0   :  { %v5557_v51 = vpop.eup %5556  ;;  %v7755_v26 = vsub.f32 %v7686_v18, %v2507_v11  ;;  %v2585_v54 = vadd.f32 1e-05, %v2573_v14  ;;  %v2740_v40 = vadd.f32 %v7759_v8, %v2727_v55 }
 0x8c1   :  { %v2609_v56 = vmul.f32 %v5555_v20, %v2608_v2  ;;  %v2615_v53 = vmul.f32 %v5557_v51, %v2584_v48  ;;  %vm2621_vm12 = vweird.f32 %v5557_v51 }
 0x8c2   :  { %5558 = vrsqrt.f32 %v2585_v54  ;;  %v2531_v47 = vmul.f32 %v7755_v26, %v7755_v26  ;;  %vm2622_vm14 = vmor %vm2620_vm13, %vm2621_vm12  ;;  %vm2630_vm1 = vweird.f32 %v2585_v54 }
 0x8c3   :  { %v2613_v16 = vsel %vm2612_vm10, %v5555_v20, %v2609_v56  ;;  %v2616_v31 = vmul.f32 %v5557_v51, %v2615_v53 }
 0x8c4   :  { %v2715_v59 = vmul.f32 %v2613_v16, %v7653_v27  ;;  %v2561_v37 = vsel %vm74_vm0, %v2531_v47, 0.0 }
 0x8c5   :  { %v2617_v0 = vmul.f32 0.5, %v2616_v31  ;;  %v2494_v21 = vpop.xlane.xlu2 %2493  ;;  %2562 = vadd.xlane.f32.xlu1 %v2561_v37  ;;  %v2548_v15 = vpop.xlane.xlu0 %2547 }
 0x8c6   :  { %v2728_v36 = vmul.f32 %v7751_v17, %v2715_v59  ;;  %v2508_v42 = vmul.f32 %v2494_v21, %v9368_v10  ;;  %v2574_v30 = vmul.f32 %v2548_v15, %v9368_v10 }
 0x8c7   :  { %v2618_v7 = vsub.f32 1.5, %v2617_v0 }
 0x8c8   :  { %v5559_v35 = vpop.eup %5558  ;;  %v2741_v60 = vadd.f32 %v7759_v8, %v2728_v36  ;;  %v7770_v27 = vsub.f32 %v7699_v3, %v2508_v42  ;;  %v2586_v20 = vadd.f32 1e-05, %v2574_v30 }
 0x8c9   :  { %v2619_v38 = vmul.f32 %v5557_v51, %v2618_v7  ;;  %v2625_v41 = vmul.f32 %v5559_v35, %v2585_v54  ;;  %vm2631_vm15 = vweird.f32 %v5559_v35 }
 0x8ca   :  { %v2752_v32 = vpack.c.bf16 %v2741_v60, %v2740_v40  ;;  %5560 = vrsqrt.f32 %v2586_v20  ;;  %v2532_v39 = vmul.f32 %v7770_v27, %v7770_v27  ;;  %vm2632_vm2 = vmor %vm2630_vm1, %vm2631_vm15  ;;  %vm2640_vm4 = vweird.f32 %v2586_v20 }
 0x8cb   :  { %v2626_v19 = vmul.f32 %v5559_v35, %v2625_v41  ;;  %v2623_v24 = vsel %vm2622_vm14, %v5557_v51, %v2619_v38 }
 0x8cc   :  { %5084 = vmatmul.msk.bf16.vlgmr.msra.gmra.mxu0 %vm74_vm0, %v2752_v32  ;;  %v2564_v44 = vsel %vm74_vm0, %v2532_v39, 0.0  ;;  %v2716_v48 = vmul.f32 %v2623_v24, %v7669_v33 }
 0x8cd   :  { %v2627_v62 = vmul.f32 0.5, %v2626_v19  ;;  %2565 = vadd.xlane.f32.xlu2 %v2564_v44  ;;  %v2551_v25 = vpop.xlane.xlu1 %2550  ;;  %v2497_v29 = vpop.xlane.xlu0 %2496 }
 0x8ce   :  { %v2575_v11 = vmul.f32 %v2551_v25, %v9368_v10  ;;  %v2509_v14 = vmul.f32 %v2497_v29, %v9368_v10  ;;  %v2729_v33 = vmul.f32 %v7751_v17, %v2716_v48 }
 0x8cf   :  { %v2628_v2 = vsub.f32 1.5, %v2627_v62 }
 0x8d0   :  { %v5561_v1 = vpop.eup %5560  ;;  %v2587_v56 = vadd.f32 1e-05, %v2575_v11  ;;  %v7780_v53 = vsub.f32 %v7712_v58, %v2509_v14  ;;  %v2742_v36 = vadd.f32 %v7759_v8, %v2729_v33 }
 0x8d1   :  { %v2629_v47 = vmul.f32 %v5559_v35, %v2628_v2  ;;  %v2635_v51 = vmul.f32 %v5561_v1, %v2586_v20  ;;  %vm2641_vm3 = vweird.f32 %v5561_v1 }
 0x8d2   :  { %5562 = vrsqrt.f32 %v2587_v56  ;;  %v2533_v16 = vmul.f32 %v7780_v53, %v7780_v53  ;;  %vm2642_vm5 = vmor %vm2640_vm4, %vm2641_vm3  ;;  %vm2650_vm7 = vweird.f32 %v2587_v56 }
 0x8d3   :  { %v2633_v31 = vsel %vm2632_vm2, %v5559_v35, %v2629_v47  ;;  %v2636_v55 = vmul.f32 %v5561_v1, %v2635_v51 }
 0x8d4   :  { %v2717_v59 = vmul.f32 %v2633_v31, %v7682_v46  ;;  %v2567_v37 = vsel %vm74_vm0, %v2533_v16, 0.0 }
 0x8d5   :  { %v2637_v0 = vmul.f32 0.5, %v2636_v55  ;;  %2568 = vadd.xlane.f32.xlu0 %v2567_v37 }
 0x8d6   :  { %v2730_v21 = vmul.f32 %v7751_v17, %v2717_v59 }
 0x8d7   :  { %v2638_v15 = vsub.f32 1.5, %v2637_v0 }
 0x8d8   :  { %v5563_v54 = vpop.eup %5562  ;;  %v2743_v42 = vadd.f32 %v7759_v8, %v2730_v21 }
 0x8d9   :  { %v2639_v30 = vmul.f32 %v5561_v1, %v2638_v15  ;;  %v2645_v7 = vmul.f32 %v5563_v54, %v2587_v56  ;;  %vm2651_vm6 = vweird.f32 %v5563_v54 }
 0x8da   :  { %v2753_v35 = vpack.c.bf16 %v2743_v42, %v2742_v36  ;;  %vm2652_vm8 = vmor %vm2650_vm7, %vm2651_vm6 }
 0x8db   :  { %v2646_v46 = vmul.f32 %v5563_v54, %v2645_v7  ;;  %v2643_v40 = vsel %vm2642_vm5, %v5561_v1, %v2639_v30 }
 0x8dc   :  { %5085 = vmatmul.msk.bf16.gmra.mxu0 %vm74_vm0, %v2753_v35  ;;  %v2718_v41 = vmul.f32 %v2643_v40, %v7695_v5 }
 0x8dd   :  { %v2647_v60 = vmul.f32 0.5, %v2646_v46 }
 0x8de   :  { %v2731_v44 = vmul.f32 %v7751_v17, %v2718_v41 }
 0x8df   :  { %v2648_v38 = vsub.f32 1.5, %v2647_v60 }
 0x8e0   :  { %v2744_v24 = vadd.f32 %v7759_v8, %v2731_v44 }
 0x8e1   :  { %v2649_v32 = vmul.f32 %v5563_v54, %v2648_v38 }
 0x8e3   :  { %v2653_v39 = vsel %vm2652_vm8, %v5563_v54, %v2649_v32 }
 0x8e4   :  { %v2719_v19 = vmul.f32 %v2653_v39, %v7708_v6 }
 0x8e6   :  { %v2732_v20 = vmul.f32 %v7751_v17, %v2719_v19 }
 0x8e8   :  { %v2745_v62 = vadd.f32 %v7759_v8, %v2732_v20 }
 0x8ea   :  { %v2754_v25 = vpack.c.bf16 %v2745_v62, %v2744_v24 }
 0x8ec   :  { %5086 = vmatmul.msk.bf16.gmra.mxu0 %vm74_vm0, %v2754_v25 }
 0x920   :  { %v2554_v29 = vpop.xlane.xlu1 %2553 }
 0x921   :  { %v2576_v5 = vmul.f32 %v2554_v29, %v9368_v10 }
 0x923   :  { %v2588_v11 = vadd.f32 1e-05, %v2576_v5  ;;  %v5071_v5 = vld [vmem:[%s9243_s3 + $0x2] sm:$0x3] }
 0x925   :  { %5564 = vrsqrt.f32 %v2588_v11  ;;  %vm2660_vm10 = vweird.f32 %v2588_v11 }
 0x928   :  { %v2557_v14 = vpop.xlane.xlu2 %2556 }
 0x929   :  { %v2577_v2 = vmul.f32 %v2557_v14, %v9368_v10 }
 0x92b   :  { %v5565_v6 = vpop.eup %5564  ;;  %v2589_v1 = vadd.f32 1e-05, %v2577_v2 }
 0x92c   :  { %v2655_v48 = vmul.f32 %v5565_v6, %v2588_v11  ;;  %vm2661_vm9 = vweird.f32 %v5565_v6 }
 0x92d   :  { %5566 = vrsqrt.f32 %v2589_v1  ;;  %vm2662_vm12 = vmor %vm2660_vm10, %vm2661_vm9  ;;  %vm2670_vm14 = vweird.f32 %v2589_v1 }
 0x92e   :  { %v2656_v56 = vmul.f32 %v5565_v6, %v2655_v48 }
 0x930   :  { %v2657_v47 = vmul.f32 0.5, %v2656_v56  ;;  %v2560_v51 = vpop.xlane.xlu0 %2559 }
 0x931   :  { %v2578_v16 = vmul.f32 %v2560_v51, %v9368_v10 }
 0x932   :  { %v2658_v31 = vsub.f32 1.5, %v2657_v47 }
 0x933   :  { %v5567_v55 = vpop.eup %5566  ;;  %v2590_v59 = vadd.f32 1e-05, %v2578_v16 }
 0x934   :  { %v2659_v37 = vmul.f32 %v5565_v6, %v2658_v31  ;;  %v2665_v33 = vmul.f32 %v5567_v55, %v2589_v1  ;;  %vm2671_vm13 = vweird.f32 %v5567_v55 }
 0x935   :  { %5568 = vrsqrt.f32 %v2590_v59  ;;  %vm2672_vm15 = vmor %vm2670_vm14, %vm2671_vm13  ;;  %vm2680_vm2 = vweird.f32 %v2590_v59 }
 0x936   :  { %v2666_v0 = vmul.f32 %v5567_v55, %v2665_v33  ;;  %v2663_v21 = vsel %vm2662_vm12, %v5565_v6, %v2659_v37  ;;  %v7812_v6 = vperm.slane %v5071_v5, 0 }
 0x937   :  { %v2720_v7 = vmul.f32 %v2663_v21, %v7722_v34 }
 0x938   :  { %v2667_v15 = vmul.f32 0.5, %v2666_v0  ;;  %v2563_v54 = vpop.xlane.xlu1 %2562 }
 0x939   :  { %v2579_v36 = vmul.f32 %v2563_v54, %v9368_v10  ;;  %v2733_v32 = vmul.f32 %v7751_v17, %v2720_v7 }
 0x93a   :  { %v2668_v42 = vsub.f32 1.5, %v2667_v15 }
 0x93b   :  { %v5569_v30 = vpop.eup %5568  ;;  %v2591_v35 = vadd.f32 1e-05, %v2579_v36  ;;  %v2746_v25 = vadd.f32 %v7759_v8, %v2733_v32 }
 0x93c   :  { %v2669_v46 = vmul.f32 %v5567_v55, %v2668_v42  ;;  %v2675_v40 = vmul.f32 %v5569_v30, %v2590_v59  ;;  %vm2681_vm1 = vweird.f32 %v5569_v30 }
 0x93d   :  { %5570 = vrsqrt.f32 %v2591_v35  ;;  %vm2682_vm3 = vmor %vm2680_vm2, %vm2681_vm1  ;;  %vm2690_vm5 = vweird.f32 %v2591_v35 }
 0x93e   :  { %v2673_v60 = vsel %vm2672_vm15, %v5567_v55, %v2669_v46  ;;  %v2676_v38 = vmul.f32 %v5569_v30, %v2675_v40  ;;  %v9383_v46 = vld [vmem:[#allocation12_spill] sm:$0xff] }
 0x93f   :  { %v2721_v41 = vmul.f32 %v2673_v60, %v7733_v45 }
 0x940   :  { %v2677_v39 = vmul.f32 0.5, %v2676_v38  ;;  %v2566_v19 = vpop.xlane.xlu2 %2565 }
 0x941   :  { %v2580_v44 = vmul.f32 %v2566_v19, %v9368_v10  ;;  %v2734_v20 = vmul.f32 %v7751_v17, %v2721_v41  ;;  %v9384_v19 = vld [vmem:[#allocation13_spill] sm:$0xff] }
 0x942   :  { %v2678_v24 = vsub.f32 1.5, %v2677_v39 }
 0x943   :  { %v5571_v34 = vpop.eup %5570  ;;  %v2592_v62 = vadd.f32 1e-05, %v2580_v44  ;;  %v2747_v29 = vadd.f32 %v7759_v8, %v2734_v20 }
 0x944   :  { %v2679_v45 = vmul.f32 %v5569_v30, %v2678_v24  ;;  %v2685_v11 = vmul.f32 %v5571_v34, %v2591_v35  ;;  %vm2691_vm4 = vweird.f32 %v5571_v34  ;;  %v9385_v24 = vld [vmem:[#allocation14_spill] sm:$0xff] }
 0x945   :  { %5572 = vrsqrt.f32 %v2592_v62  ;;  %v2755_v14 = vpack.c.bf16 %v2747_v29, %v2746_v25  ;;  %vm2692_vm6 = vmor %vm2690_vm5, %vm2691_vm4  ;;  %vm2700_vm7 = vweird.f32 %v2592_v62  ;;  %v9386_v25 = vld [vmem:[#allocation15_spill] sm:$0xff] }
 0x946   :  { %v2686_v2 = vmul.f32 %v5571_v34, %v2685_v11  ;;  %v2683_v1 = vsel %vm2682_vm3, %v5569_v30, %v2679_v45 }
 0x947   :  { %5087 = vmatmul.msk.bf16.gmra.mxu0 %vm74_vm0, %v2755_v14  ;;  %v2722_v37 = vmul.f32 %v2683_v1, %v7741_v49 }
 0x948   :  { %v2687_v48 = vmul.f32 0.5, %v2686_v2  ;;  %v2569_v56 = vpop.xlane.xlu0 %2568 }
 0x949   :  { %v2581_v47 = vmul.f32 %v2569_v56, %v9368_v10  ;;  %v2803_v51 = vpop.f32.mrf.mxu0  ;;  %v2735_v30 = vmul.f32 %v7751_v17, %v2722_v37 }
 0x94a   :  { %v2688_v16 = vsub.f32 1.5, %v2687_v48  ;;  %v2804_v31 = vadd.f32 %v2803_v51, %v7812_v6 }
 0x94b   :  { %v5573_v55 = vpop.eup %5572  ;;  %v2593_v59 = vadd.f32 1e-05, %v2581_v47  ;;  %v2748_v32 = vadd.f32 %v7759_v8, %v2735_v30 }
 0x94c   :  { %v2689_v33 = vmul.f32 %v5571_v34, %v2688_v16  ;;  %v2695_v0 = vmul.f32 %v5573_v55, %v2592_v62  ;;  %v2833_v21 = vpack.c.bf16 %v2804_v31, %v2804_v31  ;;  %vm2701_vm8 = vweird.f32 %v5573_v55 }
 0x94d   :  { %5574 = vrsqrt.f32 %v2593_v59  ;;  %vm7831_vm9 = vmor %vm2700_vm7, %vm2701_vm8  ;;  %vm2710_vm10 = vweird.f32 %v2593_v59 }
 0x94e   :  { %v2693_v15 = vsel %vm2692_vm6, %v5571_v34, %v2689_v33  ;;  %v2696_v54 = vmul.f32 %v5573_v55, %v2695_v0  ;;  %v2842_v36 = vunpack.c.l.bf16 %v2833_v21 }
 0x94f   :  { %v2723_v42 = vmul.f32 %v2693_v15, %v7755_v26 }
 0x950   :  { %v2697_v7 = vmul.f32 0.5, %v2696_v54  ;;  %v2848_v40 = vmul.f32 %v2842_v36, %v9383_v46  ;;  %v2860_v26 = vmul.f32 %v2842_v36, %v9384_v19  ;;  %v2872_v34 = vmul.f32 %v2842_v36, %v9385_v24 }
 0x951   :  { %v2805_v60 = vpop.f32.mrf.mxu0  ;;  %v2736_v49 = vmul.f32 %v7751_v17, %v2723_v42  ;;  %v2884_v29 = vmul.f32 %v2842_v36, %v9386_v25 }
 0x952   :  { %v2698_v38 = vsub.f32 1.5, %v2697_v7  ;;  %v2806_v35 = vadd.f32 %v2805_v60, %v7812_v6  ;;  %v2854_v5 = vpack.c.bf16 %v2848_v40, %v2848_v40  ;;  %v2866_v47 = vpack.c.bf16 %v2860_v26, %v2860_v26 }
 0x953   :  { %v5575_v41 = vpop.eup %5574  ;;  %v2749_v39 = vadd.f32 %v7759_v8, %v2736_v49  ;;  %v2878_v16 = vpack.c.bf16 %v2872_v34, %v2872_v34  ;;  %v2890_v62 = vpack.c.bf16 %v2884_v29, %v2884_v29 }
 0x954   :  { %v2699_v44 = vmul.f32 %v5573_v55, %v2698_v38  ;;  %v2705_v20 = vmul.f32 %v5575_v41, %v2593_v59  ;;  %v2834_v45 = vpack.c.bf16 %v2806_v35, %v2806_v35  ;;  %v7828_v11 = vpack.c.bf16 %v2806_v35, %v2804_v31 }
 0x955   :  { %v2756_v14 = vpack.c.bf16 %v2749_v39, %v2748_v32  ;;  %vm2711_vm12 = vweird.f32 %v5575_v41  ;;  %v7840_v31 = vunpack.c.l.b16 %v2854_v5  ;;  %v7848_v7 = vunpack.c.l.b16 %v2866_v47 }
 0x956   :  { %v2706_v1 = vmul.f32 %v5575_v41, %v2705_v20  ;;  %v2703_v48 = vsel %vm7831_vm9, %v5573_v55, %v2699_v44  ;;  %v2843_v56 = vunpack.c.l.bf16 %v2834_v45  ;;  %2959 = vrot.lane.b32.xlu0 %v7828_v11, %s5838_s15  ;;  %v7850_v38 = vunpack.c.l.b16 %v2878_v16  ;;  %vm2712_vm13 = vmor %vm2710_vm10, %vm2711_vm12 }
 0x957   :  { %5088 = vmatmul.msk.bf16.gmra.mxu0 %vm74_vm0, %v2756_v14  ;;  %v2724_v21 = vmul.f32 %v2703_v48, %v7770_v27  ;;  %v7860_v26 = vunpack.c.l.b16 %v2890_v62 }
 0x958   :  { %v2707_v51 = vmul.f32 0.5, %v2706_v1  ;;  %v2849_v37 = vmul.f32 %v2843_v56, %v9383_v46  ;;  %v2861_v0 = vmul.f32 %v2843_v56, %v9384_v19  ;;  %v2873_v55 = vmul.f32 %v2843_v56, %v9385_v24 }
 0x959   :  { %v2808_v33 = vpop.f32.mrf.mxu0  ;;  %v2885_v36 = vmul.f32 %v2843_v56, %v9386_v25  ;;  %v2737_v34 = vmul.f32 %v7751_v17, %v2724_v21 }
 0x95a   :  { %v2708_v15 = vsub.f32 1.5, %v2707_v51  ;;  %v2809_v54 = vadd.f32 %v2808_v33, %v7812_v6  ;;  %v2855_v42 = vpack.c.bf16 %v2849_v37, %v2849_v37  ;;  %v2867_v30 = vpack.c.bf16 %v2861_v0, %v2861_v0 }
 0x95b   :  { %v2879_v40 = vpack.c.bf16 %v2873_v55, %v2873_v55  ;;  %v2891_v35 = vpack.c.bf16 %v2885_v36, %v2885_v36  ;;  %v2750_v56 = vadd.f32 %v7759_v8, %v2737_v34 }
 0x95c   :  { %v2709_v60 = vmul.f32 %v5575_v41, %v2708_v15  ;;  %v2835_v49 = vpack.c.bf16 %v2809_v54, %v2809_v54  ;;  %v7854_v32 = vunpack.c.l.b16 %v2855_v42  ;;  %v7856_v27 = vunpack.c.l.b16 %v2867_v30 }
 0x95d   :  { %v7858_v39 = vunpack.c.l.b16 %v2879_v40  ;;  %v7863_v29 = vunpack.c.l.b16 %v2891_v35 }
 0x95e   :  { %v2713_v44 = vsel %vm2712_vm13, %v5575_v41, %v2709_v60  ;;  %v2844_v20 = vunpack.c.l.bf16 %v2835_v49 }
 0x95f   :  { %v2725_v5 = vmul.f32 %v2713_v44, %v7780_v53 }
 0x960   :  { %v2850_v47 = vmul.f32 %v2844_v20, %v9383_v46  ;;  %v2862_v51 = vmul.f32 %v2844_v20, %v9384_v19  ;;  %v2874_v16 = vmul.f32 %v2844_v20, %v9385_v24  ;;  %v2886_v0 = vmul.f32 %v2844_v20, %v9386_v25 }
 0x961   :  { %v2810_v41 = vpop.f32.mrf.mxu0  ;;  %v2738_v1 = vmul.f32 %v7751_v17, %v2725_v5 }
 0x962   :  { %v2811_v48 = vadd.f32 %v2810_v41, %v7812_v6  ;;  %v2856_v17 = vpack.c.bf16 %v2850_v47, %v2850_v47  ;;  %v2880_v21 = vpack.c.bf16 %v2874_v16, %v2874_v16  ;;  %v2892_v40 = vpack.c.bf16 %v2886_v0, %v2886_v0 }
 0x963   :  { %v2751_v53 = vadd.f32 %v7759_v8, %v2738_v1  ;;  %v2868_v8 = vpack.c.bf16 %v2862_v51, %v2862_v51 }
 0x964   :  { %v2836_v62 = vpack.c.bf16 %v2811_v48, %v2811_v48  ;;  %v7881_v37 = vpack.c.bf16 %v2811_v48, %v2809_v54  ;;  %v7892_v20 = vunpack.c.l.b16 %v2856_v17  ;;  %v7896_v5 = vunpack.c.l.b16 %v2880_v21 }
 0x965   :  { %v2757_v33 = vpack.c.bf16 %v2751_v53, %v2750_v56  ;;  %v7894_v34 = vunpack.c.l.b16 %v2868_v8  ;;  %v7904_v47 = vunpack.c.l.b16 %v2892_v40 }
 0x966   :  { %v2845_v55 = vunpack.c.l.bf16 %v2836_v62  ;;  %2961 = vrot.lane.b32.xlu2 %v7881_v37, %s5838_s15 }
 0x967   :  { %5089 = vmatmul.msk.bf16.gmra.mxu0 %vm74_vm0, %v2757_v33 }
 0x968   :  { %v2851_v15 = vmul.f32 %v2845_v55, %v9383_v46  ;;  %v2863_v36 = vmul.f32 %v2845_v55, %v9384_v19  ;;  %v2875_v42 = vmul.f32 %v2845_v55, %v9385_v24  ;;  %v2887_v54 = vmul.f32 %v2845_v55, %v9386_v25 }
 0x969   :  { %v2813_v30 = vpop.f32.mrf.mxu0 }
 0x96a   :  { %v2814_v60 = vadd.f32 %v2813_v30, %v7812_v6  ;;  %v2857_v49 = vpack.c.bf16 %v2851_v15, %v2851_v15  ;;  %v2869_v35 = vpack.c.bf16 %v2863_v36, %v2863_v36  ;;  %v2881_v44 = vpack.c.bf16 %v2875_v42, %v2875_v42 }
 0x96b   :  { %v2893_v41 = vpack.c.bf16 %v2887_v54, %v2887_v54 }
 0x96c   :  { %v2837_v1 = vpack.c.bf16 %v2814_v60, %v2814_v60  ;;  %v7898_v48 = vunpack.c.l.b16 %v2857_v49  ;;  %v7900_v56 = vunpack.c.l.b16 %v2869_v35  ;;  %v7902_v53 = vunpack.c.l.b16 %v2881_v44 }
 0x96d   :  { %v7906_v51 = vunpack.c.l.b16 %v2893_v41 }
 0x96e   :  { %v2846_v0 = vunpack.c.l.bf16 %v2837_v1 }
 0x970   :  { %v2852_v21 = vmul.f32 %v2846_v0, %v9383_v46  ;;  %v2864_v15 = vmul.f32 %v2846_v0, %v9384_v19  ;;  %v2876_v36 = vmul.f32 %v2846_v0, %v9385_v24  ;;  %v2888_v42 = vmul.f32 %v2846_v0, %v9386_v25 }
 0x971   :  { %v2815_v17 = vpop.f32.mrf.mxu0 }
 0x972   :  { %v2816_v8 = vadd.f32 %v2815_v17, %v7812_v6  ;;  %v2858_v49 = vpack.c.bf16 %v2852_v21, %v2852_v21  ;;  %v2870_v35 = vpack.c.bf16 %v2864_v15, %v2864_v15  ;;  %v2882_v44 = vpack.c.bf16 %v2876_v36, %v2876_v36 }
 0x973   :  { %v2894_v41 = vpack.c.bf16 %v2888_v42, %v2888_v42 }
 0x974   :  { %v2838_v54 = vpack.c.bf16 %v2816_v8, %v2816_v8  ;;  %v7921_v30 = vpack.c.bf16 %v2816_v8, %v2814_v60  ;;  %v7931_v14 = vunpack.c.l.b16 %v2870_v35  ;;  %v7933_v21 = vunpack.c.l.b16 %v2882_v44 }
 0x975   :  { %v7935_v15 = vunpack.c.l.b16 %v2894_v41 }
 0x976   :  { %v2847_v40 = vunpack.c.l.bf16 %v2838_v54  ;;  %2963 = vrot.lane.b32.xlu1 %v7921_v30, %s5838_s15  ;;  %v7929_v54 = vunpack.c.l.b16 %v2858_v49 }
 0x978   :  { %v2853_v1 = vmul.f32 %v2847_v40, %v9383_v46  ;;  %v2865_v17 = vmul.f32 %v2847_v40, %v9384_v19  ;;  %v2877_v55 = vmul.f32 %v2847_v40, %v9385_v24  ;;  %v2889_v2 = vmul.f32 %v2847_v40, %v9386_v25 }
 0x97a   :  { %v2859_v0 = vpack.c.bf16 %v2853_v1, %v2853_v1  ;;  %v2871_v33 = vpack.c.bf16 %v2865_v17, %v2865_v17  ;;  %v2883_v60 = vpack.c.bf16 %v2877_v55, %v2877_v55  ;;  %v2895_v8 = vpack.c.bf16 %v2889_v2, %v2889_v2 }
 0x97c   :  { %v7937_v36 = vunpack.c.l.b16 %v2859_v0  ;;  %v7939_v42 = vunpack.c.l.b16 %v2871_v33  ;;  %v7941_v62 = vunpack.c.l.b16 %v2883_v60  ;;  %v7943_v45 = vunpack.c.l.b16 %v2895_v8 }
 0x9c4   :  { %v2818_v35 = vpop.f32.mrf.mxu0 }
 0x9c5   :  { %v2819_v33 = vadd.f32 %v2818_v35, %v7812_v6 }
 0x9c7   :  { %v3517_v44 = vpack.c.bf16 %v2819_v33, %v2819_v33 }
 0x9c9   :  { %v3526_v41 = vunpack.c.l.bf16 %v3517_v44 }
 0x9cb   :  { %v3532_v0 = vmul.f32 %v3526_v41, %v9383_v46  ;;  %v3544_v60 = vmul.f32 %v3526_v41, %v9384_v19  ;;  %v3556_v8 = vmul.f32 %v3526_v41, %v9385_v24  ;;  %v3568_v40 = vmul.f32 %v3526_v41, %v9386_v25 }
 0x9cc   :  { %v2820_v1 = vpop.f32.mrf.mxu0 }
 0x9cd   :  { %v2821_v17 = vadd.f32 %v2820_v1, %v7812_v6  ;;  %v3538_v35 = vpack.c.bf16 %v3532_v0, %v3532_v0  ;;  %v3550_v44 = vpack.c.bf16 %v3544_v60, %v3544_v60  ;;  %v3562_v16 = vpack.c.bf16 %v3556_v8, %v3556_v8 }
 0x9cf   :  { %v3518_v2 = vpack.c.bf16 %v2821_v17, %v2821_v17  ;;  %v7958_v55 = vpack.c.bf16 %v2821_v17, %v2819_v33  ;;  %v3574_v33 = vpack.c.bf16 %v3568_v40, %v3568_v40  ;;  %v7968_v23 = vunpack.c.l.b16 %v3538_v35 }
 0x9d0   :  { %v7970_v0 = vunpack.c.l.b16 %v3550_v44  ;;  %v7972_v60 = vunpack.c.l.b16 %v3562_v16 }
 0x9d1   :  { %9389 = vst [vmem:[#allocation12_spill] sm:$0xff] %v7958_v55  ;;  %v3527_v49 = vunpack.c.l.bf16 %v3518_v2  ;;  %3643 = vrot.lane.b32.xlu2 %v7958_v55, %s5838_s15  ;;  %v7980_v40 = vunpack.c.l.b16 %v3574_v33 }
 0x9d3   :  { %v3533_v1 = vmul.f32 %v3527_v49, %v9383_v46  ;;  %v3545_v59 = vmul.f32 %v3527_v49, %v9384_v19  ;;  %v3557_v58 = vmul.f32 %v3527_v49, %v9385_v24  ;;  %v3569_v3 = vmul.f32 %v3527_v49, %v9386_v25  ;;  %9390 = vst [vmem:[#allocation13_spill] sm:$0xff] %v7980_v40 }
 0x9d4   :  { %v2823_v18 = vpop.f32.mrf.mxu0 }
 0x9d5   :  { %v3539_v17 = vpack.c.bf16 %v3533_v1, %v3533_v1  ;;  %v2824_v41 = vadd.f32 %v2823_v18, %v7812_v6  ;;  %v3551_v2 = vpack.c.bf16 %v3545_v59, %v3545_v59  ;;  %v3563_v28 = vpack.c.bf16 %v3557_v58, %v3557_v58 }
 0x9d6   :  { %v3575_v8 = vpack.c.bf16 %v3569_v3, %v3569_v3 }
 0x9d7   :  { %v7974_v10 = vunpack.c.l.b16 %v3539_v17  ;;  %v3519_v52 = vpack.c.bf16 %v2824_v41, %v2824_v41  ;;  %v7976_v57 = vunpack.c.l.b16 %v3551_v2  ;;  %v7978_v49 = vunpack.c.l.b16 %v3563_v28 }
 0x9d8   :  { %v7982_v1 = vunpack.c.l.b16 %v3575_v8 }
 0x9d9   :  { %3335 = vrot.lane.b32.xlu2 %v7921_v30, %s5839_s16  ;;  %v3528_v59 = vunpack.c.l.bf16 %v3519_v52 }
 0x9db   :  { %v3534_v44 = vmul.f32 %v3528_v59, %v9383_v46  ;;  %v3546_v33 = vmul.f32 %v3528_v59, %v9384_v19  ;;  %v3558_v30 = vmul.f32 %v3528_v59, %v9385_v24  ;;  %v3570_v8 = vmul.f32 %v3528_v59, %v9386_v25 }
 0x9dc   :  { %v2825_v16 = vpop.f32.mrf.mxu0 }
 0x9dd   :  { %v2826_v35 = vadd.f32 %v2825_v16, %v7812_v6  ;;  %v3540_v52 = vpack.c.bf16 %v3534_v44, %v3534_v44  ;;  %v3552_v16 = vpack.c.bf16 %v3546_v33, %v3546_v33  ;;  %v3564_v4 = vpack.c.bf16 %v3558_v30, %v3558_v30 }
 0x9de   :  { %v3576_v59 = vpack.c.bf16 %v3570_v8, %v3570_v8 }
 0x9df   :  { %v3520_v17 = vpack.c.bf16 %v2826_v35, %v2826_v35  ;;  %v7997_v2 = vpack.c.bf16 %v2826_v35, %v2824_v41  ;;  %v8010_v13 = vunpack.c.l.b16 %v3540_v52  ;;  %v8012_v44 = vunpack.c.l.b16 %v3552_v16 }
 0x9e0   :  { %v8020_v30 = vunpack.c.l.b16 %v3564_v4  ;;  %v8022_v8 = vunpack.c.l.b16 %v3576_v59 }
 0x9e1   :  { %v3529_v3 = vunpack.c.l.bf16 %v3520_v17  ;;  %3333 = vrot.lane.b32.xlu2 %v7881_v37, %s5839_s16  ;;  %3645 = vrot.lane.b32.xlu0 %v7997_v2, %s5838_s15 }
 0x9e2   :  { %9391 = vst [vmem:[#allocation14_spill] sm:$0xff] %v8022_v8 }
 0x9e3   :  { %v3535_v28 = vmul.f32 %v3529_v3, %v9383_v46  ;;  %v3547_v58 = vmul.f32 %v3529_v3, %v9384_v19  ;;  %v3559_v41 = vmul.f32 %v3529_v3, %v9385_v24  ;;  %v3571_v35 = vmul.f32 %v3529_v3, %v9386_v25 }
 0x9e4   :  { %v2828_v18 = vpop.f32.mrf.mxu0 }
 0x9e5   :  { %v2829_v17 = vadd.f32 %v2828_v18, %v7812_v6  ;;  %v3541_v61 = vpack.c.bf16 %v3535_v28, %v3535_v28  ;;  %v3553_v37 = vpack.c.bf16 %v3547_v58, %v3547_v58  ;;  %v3565_v50 = vpack.c.bf16 %v3559_v41, %v3559_v41 }
 0x9e6   :  { %v3577_v33 = vpack.c.bf16 %v3571_v35, %v3571_v35  ;;  %v2962_v35 = vpop.permute.xlu2 %2961 }
 0x9e7   :  { %v3521_v43 = vpack.c.bf16 %v2829_v17, %v2829_v17  ;;  %v8014_v22 = vunpack.c.l.b16 %v3541_v61  ;;  %v8016_v12 = vunpack.c.l.b16 %v3553_v37  ;;  %v8018_v9 = vunpack.c.l.b16 %v3565_v50 }
 0x9e8   :  { %v2964_v3 = vpop.permute.xlu1 %2963  ;;  %v8024_v18 = vunpack.c.l.b16 %v3577_v33 }
 0x9e9   :  { %v3008_v58 = vsel %vm74_vm0, %v2964_v3, 0  ;;  %3331 = vrot.lane.b32.xlu2 %v7828_v11, %s5839_s16  ;;  %v3530_v50 = vunpack.c.l.bf16 %v3521_v43 }
 0x9ea   :  { %9392 = vst [vmem:[#allocation15_spill] sm:$0xff] %v8024_v18  ;;  %3015 = vmatpush.bf16.xpose.msra.mxu2 %v3008_v58  ;;  %v3005_v58 = vsel %vm74_vm0, %v2962_v35, 0 }
 0x9eb   :  { %v3536_v11 = vmul.f32 %v3530_v50, %v9383_v46  ;;  %v3548_v59 = vmul.f32 %v3530_v50, %v9384_v19  ;;  %v3560_v37 = vmul.f32 %v3530_v50, %v9385_v24  ;;  %v3572_v33 = vmul.f32 %v3530_v50, %v9386_v25 }
 0x9ec   :  { %v2830_v16 = vpop.f32.mrf.mxu0 }
 0x9ed   :  { %v2831_v41 = vadd.f32 %v2830_v16, %v7812_v6  ;;  %v3542_v6 = vpack.c.bf16 %v3536_v11, %v3536_v11  ;;  %v3554_v16 = vpack.c.bf16 %v3548_v59, %v3548_v59  ;;  %v3566_v52 = vpack.c.bf16 %v3560_v37, %v3560_v37 }
 0x9ee   :  { %v3578_v28 = vpack.c.bf16 %v3572_v33, %v3572_v33  ;;  %v9396_v33 = vpack.c.b16 %v7856_v27, %v7848_v7  ;;  %v9399_v7 = vpack.c.b16 %v7858_v39, %v7850_v38  ;;  %v9401_v38 = vpack.c.b16 %v7974_v10, %v7968_v23 }
 0x9ef   :  { %v3522_v43 = vpack.c.bf16 %v2831_v41, %v2831_v41  ;;  %v8042_v3 = vpack.c.bf16 %v2831_v41, %v2829_v17  ;;  %v2960_v41 = vpop.permute.xlu0 %2959  ;;  %v3590_v18 = vunpack.c.l.b16 %v3542_v6  ;;  %v8051_v40 = vunpack.c.l.b16 %v3554_v16 }
 0x9f0   :  { %v8053_v11 = vunpack.c.l.b16 %v3566_v52  ;;  %v8055_v59 = vunpack.c.l.b16 %v3578_v28  ;;  %v9402_v39 = vpack.c.b16 %v7941_v62, %v7933_v21  ;;  %v9403_v10 = vpack.c.b16 %v8014_v22, %v8010_v13 }
 0x9f1   :  { %v3531_v4 = vunpack.c.l.bf16 %v3522_v43  ;;  %3647 = vrot.lane.b32.xlu1 %v8042_v3, %s5838_s15  ;;  %v9404_v21 = vpack.c.b16 %v7863_v29, %v7860_v26  ;;  %v9405_v26 = vpack.c.b16 %v7906_v51, %v7904_v47  ;;  %v9407_v47 = vpack.c.b16 %v7943_v45, %v7935_v15 }
 0x9f2   :  { %3016 = vmatpush.bf16.xpose.msra.mxu2 %v3005_v58 }
 0x9f3   :  { %v3537_v61 = vmul.f32 %v3531_v4, %v9383_v46  ;;  %v3549_v63 = vmul.f32 %v3531_v4, %v9384_v19  ;;  %v3561_v50 = vmul.f32 %v3531_v4, %v9385_v24  ;;  %v3573_v17 = vmul.f32 %v3531_v4, %v9386_v25 }
 0x9f4   :  { %v3002_v25 = vsel %vm74_vm0, %v2960_v41, 0 }
 0x9f5   :  { %v3543_v55 = vpack.c.bf16 %v3537_v61, %v3537_v61  ;;  %v3555_v35 = vpack.c.bf16 %v3549_v63, %v3549_v63  ;;  %v3567_v43 = vpack.c.bf16 %v3561_v50, %v3561_v50  ;;  %v3579_v8 = vpack.c.bf16 %v3573_v17, %v3573_v17 }
 0x9f7   :  { %v3591_v37 = vunpack.c.l.b16 %v3543_v55  ;;  %v8057_v46 = vunpack.c.l.b16 %v3555_v35  ;;  %v8059_v19 = vunpack.c.l.b16 %v3567_v43  ;;  %v8061_v24 = vunpack.c.l.b16 %v3579_v8 }
 0x9f8   :  { %v9393_v55 = vpack.c.b16 %v7854_v32, %v7840_v31  ;;  %v9394_v8 = vpack.c.b16 %v7898_v48, %v7892_v20  ;;  %v9397_v32 = vpack.c.b16 %v7900_v56, %v7894_v34  ;;  %v9398_v48 = vpack.c.b16 %v7939_v42, %v7931_v14 }
 0x9f9   :  { %v3594_v61 = vpack.c.b16 %v3591_v37, %v3590_v18  ;;  %v3609_v63 = vpack.c.b16 %v8057_v46, %v8051_v40  ;;  %v3624_v4 = vpack.c.b16 %v8059_v19, %v8053_v11  ;;  %v3639_v28 = vpack.c.b16 %v8061_v24, %v8055_v59 }
 0x9fa   :  { %3017 = vmatpush.bf16.xpose.msra.mxu2 %v3002_v25  ;;  %v9395_v18 = vpack.c.b16 %v7937_v36, %v7929_v54  ;;  %v9400_v56 = vpack.c.b16 %v7902_v53, %v7896_v5  ;;  %v8116_v5 = vld [vmem:[%s9241_s1] ss:$0 sm:$0xff]  ;;  %v9406_v37 = vpack.c.b16 %v7976_v57, %v7970_v0  ;;  %v9408_v57 = vpack.c.b16 %v8016_v12, %v8012_v44 }
 0xa01   :  { %5090 = vmatmul.msk.bf16.vlgmr.msra.gmra.mxu2 %vm74_vm0, %v9393_v55 }
 0xa11   :  { %5091 = vmatmul.msk.bf16.gmra.mxu2 %vm74_vm0, %v9394_v8 }
 0xa21   :  { %5092 = vmatmul.msk.bf16.gmra.mxu2 %vm74_vm0, %v9395_v18 }
 0xa2b   :  { %v3644_v52 = vpop.permute.xlu2 %3643 }
 0xa2c   :  { %v3686_v14 = vsel %vm74_vm0, %v3644_v52, 0  ;;  %v9409_v52 = vpack.c.b16 %v7978_v49, %v7972_v60  ;;  %v8210_v49 = vld [vmem:[%s9241_s1 + $0x1] ss:$0 sm:$0xff] }
 0xa31   :  { %5093 = vmatmul.msk.bf16.gmra.mxu2 %vm74_vm0, %v9396_v33 }
 0xa33   :  { %v3336_v58 = vpop.permute.xlu2 %3335 }
 0xa34   :  { %3381 = vmatpush.bf16.msra.mxu1 %v3336_v58  ;;  %v9410_v58 = vpack.c.b16 %v8018_v9, %v8020_v30 }
 0xa3b   :  { %v3334_v31 = vpop.permute.xlu2 %3333 }
 0xa3c   :  { %3382 = vmatpush.bf16.msra.mxu1 %v3334_v31 }
 0xa41   :  { %5094 = vmatmul.msk.bf16.gmra.mxu2 %vm74_vm0, %v9397_v32 }
 0xa43   :  { %v3332_v20 = vpop.permute.xlu2 %3331 }
 0xa44   :  { %3383 = vmatpush.bf16.msra.mxu1 %v3332_v20 }
 0xa51   :  { %5095 = vmatmul.msk.bf16.gmra.mxu2 %vm74_vm0, %v9398_v48 }
 0xa53   :  { %v3646_v36 = vpop.permute.xlu0 %3645 }
 0xa54   :  { %v3689_v34 = vsel %vm74_vm0, %v3646_v36, 0 }
 0xa61   :  { %5096 = vmatmul.msk.bf16.gmra.mxu2 %vm74_vm0, %v9399_v7 }
 0xa63   :  { %v3648_v27 = vpop.permute.xlu1 %3647 }
 0xa64   :  { %v3692_v54 = vsel %vm74_vm0, %v3648_v27, 0 }
 0xa65   :  { %3699 = vmatpush.bf16.xpose.msra.mxu3 %v3692_v54 }
 0xa6d   :  { %3700 = vmatpush.bf16.xpose.msra.mxu3 %v3689_v34 }
 0xa71   :  { %5097 = vmatmul.msk.bf16.gmra.mxu2 %vm74_vm0, %v9400_v56 }
 0xa75   :  { %3701 = vmatpush.bf16.xpose.msra.mxu3 %v3686_v14 }
 0xa7c   :  { %5114 = vmatmul.msk.bf16.vlgmr.msra.gmra.mxu3 %vm74_vm0, %v9401_v38  ;;  %v9411_v38 = vld [vmem:[#allocation13_spill] sm:$0xff] }
 0xa81   :  { %5098 = vmatmul.msk.bf16.gmra.mxu2 %vm74_vm0, %v9402_v39  ;;  %v9412_v39 = vpack.c.b16 %v7982_v1, %v9411_v38 }
 0xa84   :  { %v3019_v42 = vpop.f32.mrf.mxu2 }
 0xa85   :  { %v3020_v53 = vadd.f32 %v8116_v5, %v3019_v42 }
 0xa87   :  { %v3079_v6 = vsel %vm702_vm11, %v3020_v53, -inf }
 0xa88   :  { %3080 = vmax.xlane.f32.xlu1 %v3079_v6 }
 0xa8c   :  { %v3021_v16 = vpop.f32.mrf.mxu2  ;;  %5115 = vmatmul.msk.bf16.gmra.mxu3 %vm74_vm0, %v9403_v10 }
 0xa8d   :  { %v3022_v23 = vadd.f32 %v8116_v5, %v3021_v16 }
 0xa8f   :  { %v3082_v62 = vsel %vm702_vm11, %v3022_v23, -inf }
 0xa90   :  { %3083 = vmax.xlane.f32.xlu0 %v3082_v62 }
 0xa91   :  { %5099 = vmatmul.msk.bf16.gmra.mxu2 %vm74_vm0, %v9404_v21 }
 0xa94   :  { %v3024_v50 = vpop.f32.mrf.mxu2 }
 0xa95   :  { %v8131_v17 = vadd.f32 %v8116_v5, %v3024_v50 }
 0xa97   :  { %v3085_v41 = vsel %vm702_vm11, %v8131_v17, -inf }
 0xa98   :  { %3086 = vmax.xlane.f32.xlu2 %v3085_v41 }
 0xa9c   :  { %v3026_v22 = vpop.f32.mrf.mxu2  ;;  %5116 = vmatmul.msk.bf16.gmra.mxu3 %vm74_vm0, %v3594_v61 }
 0xa9d   :  { %v8137_v13 = vadd.f32 %v8116_v5, %v3026_v22 }
 0xa9f   :  { %v3088_v35 = vsel %vm702_vm11, %v8137_v13, -inf }
 0xaa0   :  { %3089 = vmax.xlane.f32.xlu1 %v3088_v35 }
 0xaa1   :  { %5100 = vmatmul.msk.bf16.gmra.mxu2 %vm74_vm0, %v9405_v26 }
 0xaa4   :  { %v3029_v29 = vpop.f32.mrf.mxu2  ;;  %4019 = vrot.lane.b32.xlu0 %v8042_v3, %s5839_s16 }
 0xaa5   :  { %v8172_v8 = vadd.f32 %v8116_v5, %v3029_v29 }
 0xaa7   :  { %v3091_v12 = vsel %vm702_vm11, %v8172_v8, -inf }
 0xaac   :  { %v3031_v43 = vpop.f32.mrf.mxu2  ;;  %5117 = vmatmul.msk.bf16.gmra.mxu3 %vm74_vm0, %v9406_v37  ;;  %v9414_v37 = vld [vmem:[#allocation14_spill] sm:$0xff] }
 0xaad   :  { %v8152_v25 = vadd.f32 %v8116_v5, %v3031_v43  ;;  %v9413_v43 = vld [vmem:[#allocation15_spill] sm:$0xff] }
 0xaaf   :  { %v3094_v61 = vsel %vm702_vm11, %v8152_v25, -inf }
 0xab0   :  { %4017 = vrot.lane.b32.xlu2 %v7997_v2, %s5839_s16  ;;  %3095 = vmax.xlane.f32.xlu1 %v3094_v61 }
 0xab1   :  { %5101 = vmatmul.msk.bf16.gmra.mxu2 %vm74_vm0, %v9407_v47 }
 0xab4   :  { %v3034_v51 = vpop.f32.mrf.mxu2 }
 0xab5   :  { %v8181_v15 = vadd.f32 %v8116_v5, %v3034_v51 }
 0xab7   :  { %v3097_v18 = vsel %vm702_vm11, %v8181_v15, -inf }
 0xabc   :  { %v3036_v3 = vpop.f32.mrf.mxu2  ;;  %5118 = vmatmul.msk.bf16.gmra.mxu3 %vm74_vm0, %v9408_v57 }
 0xabd   :  { %v8167_v0 = vadd.f32 %v8116_v5, %v3036_v3 }
 0xabf   :  { %v3100_v55 = vsel %vm702_vm11, %v8167_v0, -inf }
 0xac0   :  { %3101 = vmax.xlane.f32.xlu1 %v3100_v55 }
 0xac4   :  { %v3039_v2 = vpop.f32.mrf.mxu2 }
 0xac5   :  { %v8218_v19 = vadd.f32 %v8116_v5, %v3039_v2 }
 0xac7   :  { %v3103_v56 = vsel %vm702_vm11, %v8218_v19, -inf }
 0xacc   :  { %5119 = vmatmul.msk.bf16.gmra.mxu3 %vm74_vm0, %v3609_v63  ;;  %v3041_v45 = vpop.f32.mrf.mxu2 }
 0xacd   :  { %v8184_v44 = vadd.f32 %v8116_v5, %v3041_v45 }
 0xace   :  { %3092 = vmax.xlane.f32.xlu0 %v3091_v12  ;;  %v9416_v12 = vld [vmem:[#allocation12_spill] sm:$0xff] }
 0xacf   :  { %v3106_v40 = vsel %vm702_vm11, %v8184_v44, -inf }
 0xad4   :  { %v3044_v46 = vpop.f32.mrf.mxu2 }
 0xad5   :  { %v8191_v63 = vadd.f32 %v8116_v5, %v3044_v46 }
 0xad6   :  { %3098 = vmax.xlane.f32.xlu0 %v3097_v18 }
 0xad7   :  { %v3109_v33 = vsel %vm702_vm11, %v8191_v63, -inf }
 0xad9   :  { %3107 = vmax.xlane.f32.xlu2 %v3106_v40 }
 0xadc   :  { %5120 = vmatmul.msk.bf16.gmra.mxu3 %vm74_vm0, %v9409_v52  ;;  %v3046_v31 = vpop.f32.mrf.mxu2 }
 0xadd   :  { %v8260_v51 = vadd.f32 %v8116_v5, %v3046_v31 }
 0xadf   :  { %v3112_v55 = vsel %vm702_vm11, %v8260_v51, -inf }
 0xae1   :  { %3110 = vmax.xlane.f32.xlu2 %v3109_v33 }
 0xae4   :  { %v3049_v11 = vpop.f32.mrf.mxu2 }
 0xae5   :  { %v8272_v45 = vadd.f32 %v8116_v5, %v3049_v11 }
 0xae7   :  { %v3115_v52 = vsel %vm702_vm11, %v8272_v45, -inf }
 0xaec   :  { %5121 = vmatmul.msk.bf16.gmra.mxu3 %vm74_vm0, %v9410_v58  ;;  %v8235_v6 = vpop.f32.mrf.mxu2 }
 0xaf4   :  { %v8247_v26 = vpop.f32.mrf.mxu2 }
 0xafb   :  { %v3081_v32 = vpop.xlane.xlu1 %3080 }
 0xafc   :  { %5122 = vmatmul.msk.bf16.gmra.mxu3 %vm74_vm0, %v3624_v4  ;;  %v3151_v20 = vsub.f32 %v3020_v53, %v3081_v32  ;;  %v3056_v2 = vpop.f32.mrf.mxu2 }
 0xafe   :  { %v3175_v30 = vmul.f32 1.442695, %v3151_v20  ;;  %v8291_v20 = vadd.f32 %v8116_v5, %v3056_v2 }
 0xaff   :  { %v3703_v60 = vpop.f32.mrf.mxu3 }
 0xb00   :  { %v8213_v48 = vadd.f32 %v8210_v49, %v3703_v60  ;;  %5576 = vpow2.f32 %v3175_v30  ;;  %v3124_v24 = vsel %vm702_vm11, %v8291_v20, -inf }
 0xb02   :  { %v3763_v9 = vsel %vm702_vm11, %v8213_v48, -inf }
 0xb03   :  { %3764 = vmax.xlane.f32.xlu0 %v3763_v9  ;;  %v3084_v7 = vpop.xlane.xlu0 %3083 }
 0xb04   :  { %v3152_v27 = vsub.f32 %v3022_v23, %v3084_v7  ;;  %v3059_v33 = vpop.f32.mrf.mxu2 }
 0xb06   :  { %v3177_v4 = vmul.f32 1.442695, %v3152_v27  ;;  %v8231_v42 = vpop.eup %5576  ;;  %v8302_v27 = vadd.f32 %v8116_v5, %v3059_v33 }
 0xb07   :  { %v3705_v54 = vpop.f32.mrf.mxu3 }
 0xb08   :  { %5578 = vpow2.f32 %v3177_v4  ;;  %v8221_v36 = vadd.f32 %v8210_v49, %v3705_v54  ;;  %v3127_v38 = vsel %vm702_vm11, %v8302_v27, -inf }
 0xb0a   :  { %v3766_v34 = vsel %vm702_vm11, %v8221_v36, -inf }
 0xb0b   :  { %3767 = vmax.xlane.f32.xlu1 %v3766_v34  ;;  %3104 = vmax.xlane.f32.xlu0 %v3103_v56  ;;  %v3087_v14 = vpop.xlane.xlu2 %3086 }
 0xb0c   :  { %5123 = vmatmul.msk.bf16.gmra.mxu3 %vm74_vm0, %v9412_v39  ;;  %v3153_v10 = vsub.f32 %v8131_v17, %v3087_v14  ;;  %v3061_v60 = vpop.f32.mrf.mxu2 }
 0xb0e   :  { %v8233_v53 = vpop.eup %5578  ;;  %v3179_v62 = vmul.f32 1.442695, %v3153_v10 }
 0xb0f   :  { %v3319_v16 = vpack.c.bf16 %v8233_v53, %v8231_v42  ;;  %v8240_v23 = vpop.f32.mrf.mxu3 }
 0xb10   :  { %5580 = vpow2.f32 %v3179_v62  ;;  %v8317_v62 = vadd.f32 %v8210_v49, %v8240_v23 }
 0xb11   :  { %5102 = vmatmul.msk.bf16.vlgmr.msra.gmra.mxu1 %vm702_vm11, %v3319_v16  ;;  %v8313_v16 = vadd.f32 %v8116_v5, %v3061_v60 }
 0xb13   :  { %v3090_v21 = vpop.xlane.xlu1 %3089  ;;  %v4018_v17 = vpop.permute.xlu2 %4017 }
 0xb14   :  { %v3154_v1 = vsub.f32 %v8137_v13, %v3090_v21  ;;  %v9415_v13 = vpack.c.b16 %v9413_v43, %v9414_v37  ;;  %v3064_v54 = vpop.f32.mrf.mxu2  ;;  %v3130_v21 = vsel %vm702_vm11, %v8313_v16, -inf }
 0xb15   :  { %v8333_v43 = vadd.f32 %v8116_v5, %v3064_v54 }
 0xb16   :  { %v3181_v50 = vmul.f32 1.442695, %v3154_v1  ;;  %v4020_v41 = vpop.permute.xlu0 %4019  ;;  %v8255_v61 = vpop.eup %5580 }
 0xb17   :  { %v3710_v22 = vpop.f32.mrf.mxu3  ;;  %4065 = vmatpush.bf16.msrb.mxu0 %v4020_v41  ;;  %v3133_v2 = vsel %vm702_vm11, %v8333_v43, -inf }
 0xb18   :  { %5582 = vpow2.f32 %v3181_v50  ;;  %v8245_v35 = vadd.f32 %v8210_v49, %v3710_v22 }
 0xb1a   :  { %v3772_v29 = vsel %vm702_vm11, %v8245_v35, -inf }
 0xb1b   :  { %3773 = vmax.xlane.f32.xlu0 %v3772_v29  ;;  %4066 = vmatpush.bf16.msrb.mxu0 %v4018_v17  ;;  %v3769_v29 = vsel %vm702_vm11, %v8317_v62, -inf }
 0xb1c   :  { %5124 = vmatmul.msk.bf16.gmra.mxu3 %vm74_vm0, %v9415_v13  ;;  %v8323_v50 = vpop.f32.mrf.mxu2 }
 0xb1e   :  { %v8257_v47 = vpop.eup %5582 }
 0xb1f   :  { %v8262_v3 = vpop.f32.mrf.mxu3  ;;  %v3320_v57 = vpack.c.bf16 %v8257_v47, %v8255_v61 }
 0xb21   :  { %5103 = vmatmul.msk.bf16.gmra.mxu1 %vm702_vm11, %v3320_v57 }
 0xb23   :  { %3113 = vmax.xlane.f32.xlu0 %v3112_v55  ;;  %v3096_v59 = vpop.xlane.xlu1 %3095  ;;  %v8339_v55 = vadd.f32 %v8210_v49, %v8262_v3  ;;  %v8350_v3 = vadd.f32 %v8116_v5, %v8235_v6 }
 0xb24   :  { %4015 = vrot.lane.b32.xlu1 %v9416_v12, %s5839_s16  ;;  %v3156_v7 = vsub.f32 %v8152_v25, %v3096_v59  ;;  %v3069_v12 = vpop.f32.mrf.mxu2 }
 0xb26   :  { %v3185_v34 = vmul.f32 1.442695, %v3156_v7 }
 0xb27   :  { %v3715_v18 = vpop.f32.mrf.mxu3 }
 0xb28   :  { %v8275_v40 = vadd.f32 %v8210_v49, %v3715_v18  ;;  %5584 = vpow2.f32 %v3185_v34  ;;  %v3775_v18 = vsel %vm702_vm11, %v8339_v55, -inf }
 0xb2a   :  { %v3778_v46 = vsel %vm702_vm11, %v8275_v40, -inf }
 0xb2b   :  { %3779 = vmax.xlane.f32.xlu2 %v3778_v46  ;;  %3116 = vmax.xlane.f32.xlu0 %v3115_v52 }
 0xb2c   :  { %5125 = vmatmul.msk.bf16.gmra.mxu3 %vm74_vm0, %v3639_v28 }
 0xb2e   :  { %v8321_v1 = vpop.eup %5584 }
 0xb2f   :  { %v3718_v58 = vpop.f32.mrf.mxu3 }
 0xb30   :  { %v8286_v31 = vadd.f32 %v8210_v49, %v3718_v58 }
 0xb32   :  { %v3781_v32 = vsel %vm702_vm11, %v8286_v31, -inf }
 0xb33   :  { %3782 = vmax.xlane.f32.xlu2 %v3781_v32  ;;  %v3102_v41 = vpop.xlane.xlu1 %3101  ;;  %v3118_v32 = vsel %vm702_vm11, %v8350_v3, -inf }
 0xb34   :  { %v3158_v37 = vsub.f32 %v8167_v0, %v3102_v41 }
 0xb37   :  { %v3720_v9 = vpop.f32.mrf.mxu3 }
 0xb38   :  { %v8294_v30 = vadd.f32 %v8210_v49, %v3720_v9  ;;  %v3071_v9 = vpop.f32.mrf.mxu2 }
 0xb3a   :  { %v3784_v28 = vsel %vm702_vm11, %v8294_v30, -inf }
 0xb3b   :  { %3125 = vmax.xlane.f32.xlu2 %v3124_v24  ;;  %3785 = vmax.xlane.f32.xlu0 %v3784_v28  ;;  %v8368_v24 = vadd.f32 %v8116_v5, %v8247_v26 }
 0xb3d   :  { %v3121_v7 = vsel %vm702_vm11, %v8368_v24, -inf }
 0xb3f   :  { %v3723_v11 = vpop.f32.mrf.mxu3 }
 0xb40   :  { %v8305_v4 = vadd.f32 %v8210_v49, %v3723_v11  ;;  %v8375_v11 = vadd.f32 %v8116_v5, %v3071_v9 }
 0xb41   :  { %v3093_v56 = vpop.xlane.xlu0 %3092 }
 0xb42   :  { %v3155_v14 = vsub.f32 %v8172_v8, %v3093_v56  ;;  %v3787_v39 = vsel %vm702_vm11, %v8305_v4, -inf  ;;  %v3074_v56 = vpop.f32.mrf.mxu2  ;;  %v3142_v26 = vsel %vm702_vm11, %v8375_v11, -inf }
 0xb43   :  { %3128 = vmax.xlane.f32.xlu2 %v3127_v38  ;;  %3788 = vmax.xlane.f32.xlu0 %v3787_v39 }
 0xb44   :  { %v3183_v25 = vmul.f32 1.442695, %v3155_v14 }
 0xb46   :  { %5586 = vpow2.f32 %v3183_v25  ;;  %v8390_v25 = vadd.f32 %v8116_v5, %v3074_v56 }
 0xb47   :  { %v3725_v10 = vpop.f32.mrf.mxu3 }
 0xb48   :  { %v8381_v14 = vadd.f32 %v8210_v49, %v3725_v10  ;;  %v3145_v41 = vsel %vm702_vm11, %v8390_v25, -inf }
 0xb49   :  { %v3099_v8 = vpop.xlane.xlu0 %3098 }
 0xb4a   :  { %v3157_v17 = vsub.f32 %v8181_v15, %v3099_v8  ;;  %v3189_v15 = vmul.f32 1.442695, %v3158_v37  ;;  %v3790_v39 = vsel %vm702_vm11, %v8381_v14, -inf }
 0xb4b   :  { %3131 = vmax.xlane.f32.xlu0 %v3130_v21 }
 0xb4c   :  { %v8325_v22 = vpop.eup %5586  ;;  %v3187_v57 = vmul.f32 1.442695, %v3157_v17 }
 0xb4d   :  { %v3321_v23 = vpack.c.bf16 %v8321_v1, %v8325_v22 }
 0xb4e   :  { %3770 = vmax.xlane.f32.xlu1 %v3769_v29  ;;  %5588 = vpow2.f32 %v3187_v57  ;;  %v3076_v29 = vpop.f32.mrf.mxu2 }
 0xb4f   :  { %5104 = vmatmul.msk.bf16.gmra.mxu1 %vm702_vm11, %v3321_v23  ;;  %v3728_v13 = vpop.f32.mrf.mxu3  ;;  %5590 = vpow2.f32 %v3189_v15  ;;  %v8405_v37 = vadd.f32 %v8116_v5, %v3076_v29 }
 0xb50   :  { %v8396_v10 = vadd.f32 %v8210_v49, %v3728_v13  ;;  %v3108_v13 = vpop.xlane.xlu2 %3107 }
 0xb52   :  { %v3793_v23 = vsel %vm702_vm11, %v8396_v10, -inf }
 0xb53   :  { %3134 = vmax.xlane.f32.xlu0 %v3133_v2  ;;  %v8409_v2 = vadd.f32 %v8116_v5, %v8323_v50 }
 0xb54   :  { %v8352_v52 = vpop.eup %5588 }
 0xb55   :  { %v8356_v58 = vpop.eup %5590 }
 0xb56   :  { %3776 = vmax.xlane.f32.xlu1 %v3775_v18  ;;  %v3322_v60 = vpack.c.bf16 %v8356_v58, %v8352_v52  ;;  %v3148_v18 = vsel %vm702_vm11, %v8405_v37, -inf }
 0xb57   :  { %v3730_v0 = vpop.f32.mrf.mxu3 }
 0xb58   :  { %v8346_v46 = vadd.f32 %v8210_v49, %v3730_v0  ;;  %v3160_v0 = vsub.f32 %v8184_v44, %v3108_v13  ;;  %v3223_v13 = vsel %vm702_vm11, %v8231_v42, 0.0 }
 0xb5a   :  { %v3796_v33 = vsel %vm702_vm11, %v8346_v46, -inf }
 0xb5b   :  { %3797 = vmax.xlane.f32.xlu2 %v3796_v33  ;;  %v3136_v33 = vsel %vm702_vm11, %v8409_v2, -inf }
 0xb5e   :  { %3119 = vmax.xlane.f32.xlu1 %v3118_v32 }
 0xb5f   :  { %5105 = vmatmul.msk.bf16.gmra.mxu1 %vm702_vm11, %v3322_v60  ;;  %v3733_v6 = vpop.f32.mrf.mxu3  ;;  %v3193_v60 = vmul.f32 1.442695, %v3160_v0 }
 0xb60   :  { %v8364_v59 = vadd.f32 %v8210_v49, %v3733_v6 }
 0xb61   :  { %5592 = vpow2.f32 %v3193_v60 }
 0xb62   :  { %v3799_v28 = vsel %vm702_vm11, %v8364_v59, -inf }
 0xb63   :  { %3800 = vmax.xlane.f32.xlu2 %v3799_v28  ;;  %v8418_v28 = vadd.f32 %v8116_v5, %v3069_v12 }
 0xb65   :  { %v3139_v44 = vsel %vm702_vm11, %v8418_v28, -inf }
 0xb66   :  { %3122 = vmax.xlane.f32.xlu1 %v3121_v7 }
 0xb67   :  { %v3735_v54 = vpop.f32.mrf.mxu3 }
 0xb68   :  { %v8378_v34 = vadd.f32 %v8210_v49, %v3735_v54 }
 0xb6a   :  { %v3802_v38 = vsel %vm702_vm11, %v8378_v34, -inf }
 0xb6b   :  { %3143 = vmax.xlane.f32.xlu2 %v3142_v26  ;;  %3803 = vmax.xlane.f32.xlu0 %v3802_v38  ;;  %v8426_v38 = vpop.eup %5592 }
 0xb6e   :  { %3791 = vmax.xlane.f32.xlu1 %v3790_v39 }
 0xb6f   :  { %v3738_v8 = vpop.f32.mrf.mxu3 }
 0xb70   :  { %v8393_v21 = vadd.f32 %v8210_v49, %v3738_v8 }
 0xb72   :  { %v3805_v17 = vsel %vm702_vm11, %v8393_v21, -inf }
 0xb73   :  { %3146 = vmax.xlane.f32.xlu2 %v3145_v41  ;;  %3806 = vmax.xlane.f32.xlu0 %v3805_v17 }
 0xb76   :  { %3794 = vmax.xlane.f32.xlu1 %v3793_v23  ;;  %v3765_v57 = vpop.xlane.xlu0 %3764  ;;  %v3111_v23 = vpop.xlane.xlu2 %3110 }
 0xb77   :  { %v3740_v15 = vpop.f32.mrf.mxu3  ;;  %v3161_v0 = vsub.f32 %v8191_v63, %v3111_v23 }
 0xb78   :  { %v8430_v5 = vadd.f32 %v8210_v49, %v3740_v15 }
 0xb7a   :  { %v3808_v17 = vsel %vm702_vm11, %v8430_v5, -inf }
 0xb7b   :  { %3149 = vmax.xlane.f32.xlu0 %v3148_v18 }
 0xb7e   :  { %3137 = vmax.xlane.f32.xlu1 %v3136_v33  ;;  %v3105_v32 = vpop.xlane.xlu0 %3104  ;;  %v3768_v7 = vpop.xlane.xlu1 %3767 }
 0xb7f   :  { %v3159_v9 = vsub.f32 %v8218_v19, %v3105_v32  ;;  %v3743_v6 = vpop.f32.mrf.mxu3  ;;  %v3836_v54 = vsub.f32 %v8221_v36, %v3768_v7  ;;  %v3835_v19 = vsub.f32 %v8213_v48, %v3765_v57 }
 0xb80   :  { %v8444_v15 = vadd.f32 %v8210_v49, %v3743_v6  ;;  %v3195_v6 = vmul.f32 1.442695, %v3161_v0 }
 0xb81   :  { %v3191_v50 = vmul.f32 1.442695, %v3159_v9  ;;  %v3861_v8 = vmul.f32 1.442695, %v3836_v54  ;;  %v3859_v36 = vmul.f32 1.442695, %v3835_v19 }
 0xb82   :  { %v3811_v32 = vsel %vm702_vm11, %v8444_v15, -inf  ;;  %v3226_v19 = vsel %vm702_vm11, %v8233_v53, 0.0  ;;  %v3232_v53 = vsel %vm702_vm11, %v8257_v47, 0.0  ;;  %v3229_v47 = vsel %vm702_vm11, %v8255_v61, 0.0 }
 0xb83   :  { %5594 = vpow2.f32 %v3191_v50 }
 0xb84   :  { %5596 = vpow2.f32 %v3861_v8 }
 0xb85   :  { %5598 = vpow2.f32 %v3859_v36 }
 0xb86   :  { %3140 = vmax.xlane.f32.xlu1 %v3139_v44  ;;  %5600 = vpow2.f32 %v3195_v6  ;;  %v3250_v6 = vsel %vm702_vm11, %v8426_v38, 0.0 }
 0xb87   :  { %v3745_v56 = vpop.f32.mrf.mxu3 }
 0xb88   :  { %v8424_v26 = vadd.f32 %v8210_v49, %v3745_v56  ;;  %v3244_v56 = vsel %vm702_vm11, %v8356_v58, 0.0 }
 0xb89   :  { %v5595_v12 = vpop.eup %5594 }
 0xb8a   :  { %v3814_v39 = vsel %vm702_vm11, %v8424_v26, -inf  ;;  %v3323_v41 = vpack.c.bf16 %v8426_v38, %v5595_v12  ;;  %v8451_v33 = vpop.eup %5596 }
 0xb8b   :  { %3815 = vmax.xlane.f32.xlu2 %v3814_v39  ;;  %v8455_v9 = vpop.eup %5598 }
 0xb8c   :  { %5106 = vmatmul.msk.bf16.gmra.mxu1 %vm702_vm11, %v3323_v41  ;;  %v4003_v42 = vpack.c.bf16 %v8451_v33, %v8455_v9  ;;  %v8471_v36 = vpop.eup %5600 }
 0xb8e   :  { %3809 = vmax.xlane.f32.xlu1 %v3808_v17  ;;  %v8438_v29 = vpop.xlane.xlu0 %3773 }
 0xb8f   :  { %v3748_v48 = vpop.f32.mrf.mxu3  ;;  %v3838_v61 = vsub.f32 %v8245_v35, %v8438_v29 }
 0xb90   :  { %v8441_v57 = vadd.f32 %v8210_v49, %v3748_v48  ;;  %v3247_v48 = vsel %vm702_vm11, %v5595_v12, 0.0 }
 0xb92   :  { %v3817_v18 = vsel %vm702_vm11, %v8441_v57, -inf }
 0xb93   :  { %3224 = vadd.xlane.f32.xlu2 %v3223_v13  ;;  %3818 = vmax.xlane.f32.xlu0 %v3817_v18 }
 0xb96   :  { %3812 = vmax.xlane.f32.xlu1 %v3811_v32  ;;  %v4016_v60 = vpop.permute.xlu1 %4015  ;;  %v3114_v50 = vpop.xlane.xlu0 %3113 }
 0xb97   :  { %v3750_v7 = vpop.f32.mrf.mxu3  ;;  %4067 = vmatpush.bf16.msrb.mxu0 %v4016_v60  ;;  %v3162_v63 = vsub.f32 %v8260_v51, %v3114_v50 }
 0xb98   :  { %v8461_v44 = vadd.f32 %v8210_v49, %v3750_v7 }
 0xb99   :  { %v3197_v54 = vmul.f32 1.442695, %v3162_v63 }
 0xb9a   :  { %5126 = vmatmul.msk.bf16.vlgmr.msrb.gmra.mxu0 %vm702_vm11, %v4003_v42  ;;  %v3820_v39 = vsel %vm702_vm11, %v8461_v44, -inf  ;;  %v3865_v42 = vmul.f32 1.442695, %v3838_v61 }
 0xb9b   :  { %3245 = vadd.xlane.f32.xlu2 %v3244_v56  ;;  %3227 = vadd.xlane.f32.xlu0 %v3226_v19  ;;  %5602 = vpow2.f32 %v3197_v54 }
 0xb9e   :  { %v3780_v51 = vpop.xlane.xlu2 %3779  ;;  %3821 = vmax.xlane.f32.xlu1 %v3820_v39  ;;  %v3117_v8 = vpop.xlane.xlu0 %3116 }
 0xb9f   :  { %v3163_v41 = vsub.f32 %v8272_v45, %v3117_v8  ;;  %v3241_v45 = vsel %vm702_vm11, %v8352_v52, 0.0 }
 0xba1   :  { %v8473_v17 = vpop.eup %5602  ;;  %v3199_v58 = vmul.f32 1.442695, %v3163_v41 }
 0xba2   :  { %v3324_v23 = vpack.c.bf16 %v8473_v17, %v8471_v36 }
 0xba3   :  { %3233 = vadd.xlane.f32.xlu2 %v3232_v53  ;;  %3248 = vadd.xlane.f32.xlu0 %v3247_v48  ;;  %5604 = vpow2.f32 %v3199_v58  ;;  %v3840_v58 = vsub.f32 %v8275_v40, %v3780_v51 }
 0xba4   :  { %5107 = vmatmul.msk.bf16.gmra.mxu1 %vm702_vm11, %v3324_v23 }
 0xba5   :  { %v3869_v53 = vmul.f32 1.442695, %v3840_v58 }
 0xba6   :  { %v8483_v13 = vpop.xlane.xlu2 %3782  ;;  %3242 = vadd.xlane.f32.xlu1 %v3241_v45 }
 0xba9   :  { %v5605_v18 = vpop.eup %5604 }
 0xbaa   :  { %v3259_v0 = vsel %vm702_vm11, %v5605_v18, 0.0 }
 0xbab   :  { %3260 = vadd.xlane.f32.xlu0 %v3259_v0 }
 0xbae   :  { %v3126_v12 = vpop.xlane.xlu2 %3125  ;;  %3230 = vadd.xlane.f32.xlu1 %v3229_v47  ;;  %v3786_v7 = vpop.xlane.xlu0 %3785 }
 0xbaf   :  { %v3166_v32 = vsub.f32 %v8291_v20, %v3126_v12 }
 0xbb1   :  { %v3205_v60 = vmul.f32 1.442695, %v3166_v32  ;;  %v3842_v32 = vsub.f32 %v8294_v30, %v3786_v7 }
 0xbb3   :  { %5606 = vpow2.f32 %v3205_v60 }
 0xbb4   :  { %5608 = vpow2.f32 %v3865_v42 }
 0xbb6   :  { %3251 = vadd.xlane.f32.xlu1 %v3250_v6  ;;  %v8498_v56 = vpop.xlane.xlu0 %3788  ;;  %v3129_v8 = vpop.xlane.xlu2 %3128 }
 0xbb9   :  { %v8491_v52 = vpop.eup %5606 }
 0xbba   :  { %v3268_v50 = vsel %vm702_vm11, %v8491_v52, 0.0  ;;  %v8500_v19 = vpop.eup %5608 }
 0xbbb   :  { %3269 = vadd.xlane.f32.xlu0 %v3268_v50  ;;  %9417 = vst [vmem:[#allocation13_spill] sm:$0xff] %v8500_v19 }
 0xbbe   :  { %v3132_v29 = vpop.xlane.xlu0 %3131 }
 0xbc1   :  { %v3771_v63 = vpop.xlane.xlu1 %3770 }
 0xbc2   :  { %v3837_v20 = vsub.f32 %v8317_v62, %v3771_v63  ;;  %v3841_v63 = vsub.f32 %v8286_v31, %v8483_v13  ;;  %v3238_v31 = vsel %vm702_vm11, %v8321_v1, 0.0  ;;  %v3843_v1 = vsub.f32 %v8305_v4, %v8498_v56 }
 0xbc4   :  { %v3863_v54 = vmul.f32 1.442695, %v3837_v20  ;;  %v3871_v7 = vmul.f32 1.442695, %v3841_v63 }
 0xbc6   :  { %5610 = vpow2.f32 %v3863_v54 }
 0xbc9   :  { %v3777_v38 = vpop.xlane.xlu1 %3776 }
 0xbca   :  { %v3839_v41 = vsub.f32 %v8339_v55, %v3777_v38  ;;  %v3135_v55 = vpop.xlane.xlu0 %3134 }
 0xbcb   :  { %v3169_v6 = vsub.f32 %v8333_v43, %v3135_v55 }
 0xbcc   :  { %v8502_v39 = vpop.eup %5610  ;;  %v3867_v62 = vmul.f32 1.442695, %v3839_v41  ;;  %v3167_v41 = vsub.f32 %v8302_v27, %v3129_v8 }
 0xbcd   :  { %9418 = vst [vmem:[#allocation15_spill] sm:$0xff] %v8502_v39  ;;  %v4004_v35 = vpack.c.bf16 %v8500_v19, %v8502_v39  ;;  %v3211_v30 = vmul.f32 1.442695, %v3169_v6 }
 0xbce   :  { %5612 = vpow2.f32 %v3867_v62  ;;  %v8510_v45 = vpop.xlane.xlu2 %3797  ;;  %v3168_v62 = vsub.f32 %v8313_v16, %v3132_v29  ;;  %v3207_v55 = vmul.f32 1.442695, %v3167_v41 }
 0xbcf   :  { %5127 = vmatmul.msk.bf16.gmra.mxu0 %vm702_vm11, %v4004_v35  ;;  %5614 = vpow2.f32 %v3869_v53 }
 0xbd1   :  { %v3120_v48 = vpop.xlane.xlu1 %3119 }
 0xbd2   :  { %v3164_v23 = vsub.f32 %v8350_v3, %v3120_v48 }
 0xbd4   :  { %v3201_v0 = vmul.f32 1.442695, %v3164_v23  ;;  %v8512_v40 = vpop.eup %5612  ;;  %v8540_v23 = vpop.f32.mrf.mxu1 }
 0xbd5   :  { %9419 = vst [vmem:[#allocation14_spill] sm:$0xff] %v8512_v40  ;;  %v8515_v12 = vpop.eup %5614 }
 0xbd6   :  { %5616 = vpow2.f32 %v3201_v0  ;;  %9420 = vst [vmem:[#allocation12_spill] sm:$0xff] %v8515_v12  ;;  %v4005_v42 = vpack.c.bf16 %v8515_v12, %v8512_v40  ;;  %v8524_v20 = vpop.xlane.xlu2 %3800 }
 0xbd9   :  { %v3123_v47 = vpop.xlane.xlu1 %3122 }
 0xbda   :  { %v3165_v51 = vsub.f32 %v8368_v24, %v3123_v47  ;;  %v3873_v24 = vmul.f32 1.442695, %v3842_v32  ;;  %v3253_v32 = vsel %vm702_vm11, %v8471_v36, 0.0 }
 0xbdc   :  { %v5617_v60 = vpop.eup %5616  ;;  %v3203_v3 = vmul.f32 1.442695, %v3165_v51 }
 0xbdd   :  { %v3262_v50 = vsel %vm702_vm11, %v5617_v60, 0.0  ;;  %v3325_v61 = vpack.c.bf16 %v5617_v60, %v5605_v18  ;;  %v8557_v60 = vpop.f32.mrf.mxu1 }
 0xbde   :  { %5618 = vpow2.f32 %v3203_v3  ;;  %3263 = vadd.xlane.f32.xlu1 %v3262_v50  ;;  %v3144_v13 = vpop.xlane.xlu2 %3143  ;;  %v8545_v47 = vpop.xlane.xlu0 %3803 }
 0xbdf   :  { %5108 = vmatmul.msk.bf16.gmra.mxu1 %vm702_vm11, %v3325_v61  ;;  %5128 = vmatmul.msk.bf16.gmra.mxu0 %vm702_vm11, %v4005_v42  ;;  %5620 = vpow2.f32 %v3873_v24  ;;  %v3172_v53 = vsub.f32 %v8375_v11, %v3144_v13  ;;  %v3209_v11 = vmul.f32 1.442695, %v3168_v62 }
 0xbe0   :  { %5622 = vpow2.f32 %v3211_v30 }
 0xbe1   :  { %v3792_v43 = vpop.xlane.xlu1 %3791  ;;  %5624 = vpow2.f32 %v3871_v7  ;;  %v3217_v29 = vmul.f32 1.442695, %v3172_v53 }
 0xbe2   :  { %v3844_v0 = vsub.f32 %v8381_v14, %v3792_v43  ;;  %5626 = vpow2.f32 %v3207_v55  ;;  %v3875_v14 = vmul.f32 1.442695, %v3843_v1 }
 0xbe3   :  { %5628 = vpow2.f32 %v3209_v11  ;;  %v3848_v11 = vsub.f32 %v8378_v34, %v8545_v47 }
 0xbe4   :  { %v5619_v18 = vpop.eup %5618  ;;  %v3877_v4 = vmul.f32 1.442695, %v3844_v0  ;;  %5630 = vpow2.f32 %v3217_v29 }
 0xbe5   :  { %v3265_v54 = vsel %vm702_vm11, %v5619_v18, 0.0  ;;  %v8531_v38 = vpop.eup %5620  ;;  %v3326_v8 = vpack.c.bf16 %v8491_v52, %v5619_v18  ;;  %v8578_v13 = vpop.f32.mrf.mxu1  ;;  %v3885_v47 = vmul.f32 1.442695, %v3848_v11 }
 0xbe6   :  { %3266 = vadd.xlane.f32.xlu2 %v3265_v54  ;;  %3239 = vadd.xlane.f32.xlu1 %v3238_v31  ;;  %v8534_v35 = vpop.eup %5622  ;;  %5632 = vpow2.f32 %v3877_v4  ;;  %v8559_v3 = vpop.xlane.xlu0 %3806 }
 0xbe7   :  { %v8538_v48 = vpop.eup %5624  ;;  %v3277_v27 = vsel %vm702_vm11, %v8534_v35, 0.0  ;;  %5634 = vpow2.f32 %v3875_v14 }
 0xbe8   :  { %v4006_v16 = vpack.c.bf16 %v8531_v38, %v8538_v48  ;;  %v5627_v6 = vpop.eup %5626 }
 0xbe9   :  { %v3795_v58 = vpop.xlane.xlu1 %3794  ;;  %v5629_v50 = vpop.eup %5628  ;;  %v3271_v14 = vsel %vm702_vm11, %v5627_v6, 0.0 }
 0xbea   :  { %v8561_v61 = vpop.eup %5630  ;;  %v3327_v36 = vpack.c.bf16 %v5629_v50, %v5627_v6  ;;  %v3845_v7 = vsub.f32 %v8396_v10, %v3795_v58 }
 0xbeb   :  { %v3286_v54 = vsel %vm702_vm11, %v8561_v61, 0.0 }
 0xbec   :  { %v8563_v63 = vpop.eup %5632  ;;  %v3879_v10 = vmul.f32 1.442695, %v3845_v7 }
 0xbed   :  { %9421 = vst [vmem:[#allocation28_spill] sm:$0xff] %v8563_v63  ;;  %v8566_v24 = vpop.eup %5634 }
 0xbee   :  { %3278 = vadd.xlane.f32.xlu2 %v3277_v27  ;;  %v4007_v31 = vpack.c.bf16 %v8563_v63, %v8566_v24  ;;  %v3150_v41 = vpop.xlane.xlu0 %3149  ;;  %v3147_v27 = vpop.xlane.xlu2 %3146 }
 0xbef   :  { %5109 = vmatmul.msk.bf16.gmra.mxu1 %vm702_vm11, %v3326_v8  ;;  %5129 = vmatmul.msk.bf16.gmra.mxu0 %vm702_vm11, %v4006_v16  ;;  %v3174_v53 = vsub.f32 %v8405_v37, %v3150_v41  ;;  %v8590_v8 = vpop.f32.mrf.mxu1  ;;  %v3173_v29 = vsub.f32 %v8390_v25, %v3147_v27  ;;  %v3847_v25 = vsub.f32 %v8364_v59, %v8524_v20  ;;  %v3910_v20 = vsel %vm702_vm11, %v8451_v33, 0.0 }
 0xbf1   :  { %v3138_v56 = vpop.xlane.xlu1 %3137  ;;  %v3221_v55 = vmul.f32 1.442695, %v3174_v53  ;;  %v3883_v59 = vmul.f32 1.442695, %v3847_v25 }
 0xbf2   :  { %v3170_v51 = vsub.f32 %v8409_v2, %v3138_v56  ;;  %v3256_v56 = vsel %vm702_vm11, %v8473_v17, 0.0  ;;  %v3753_v17 = vpop.f32.mrf.mxu3 }
 0xbf4   :  { %v3213_v52 = vmul.f32 1.442695, %v3170_v51 }
 0xbf6   :  { %5636 = vpow2.f32 %v3213_v52  ;;  %3254 = vadd.xlane.f32.xlu2 %v3253_v32  ;;  %v3907_v52 = vsel %vm702_vm11, %v8455_v9, 0.0  ;;  %v3219_v32 = vmul.f32 1.442695, %v3173_v29  ;;  %v5280_v9 = vld [vmem:[%s9245_s5 + $0x58] sm:$0xff] }
 0xbf7   :  { %4260 = vmatpush.bf16.msrb.mxu2 %v5280_v9 }
 0xbf9   :  { %v3141_v42 = vpop.xlane.xlu1 %3140 }
 0xbfa   :  { %v3171_v2 = vsub.f32 %v8418_v28, %v3141_v42  ;;  %v3846_v28 = vsub.f32 %v8346_v46, %v8510_v45  ;;  %v3235_v46 = vsel %vm702_vm11, %v8325_v22, 0.0  ;;  %v3274_v45 = vsel %vm702_vm11, %v5629_v50, 0.0  ;;  %v8619_v50 = vpop.f32.mrf.mxu1  ;;  %v3755_v7 = vpop.f32.mrf.mxu3 }
 0xbfc   :  { %v5637_v30 = vpop.eup %5636  ;;  %v3215_v43 = vmul.f32 1.442695, %v3171_v2  ;;  %v3881_v58 = vmul.f32 1.442695, %v3846_v28  ;;  %v3928_v2 = vsel %vm702_vm11, %v8531_v38, 0.0  ;;  %v3925_v38 = vsel %vm702_vm11, %v8538_v48, 0.0 }
 0xbfd   :  { %v3280_v18 = vsel %vm702_vm11, %v5637_v30, 0.0  ;;  %v3328_v51 = vpack.c.bf16 %v5637_v30, %v8534_v35  ;;  %v8646_v48 = vadd.f32 %v8210_v49, %v3755_v7 }
 0xbfe   :  { %5638 = vpow2.f32 %v3215_v43  ;;  %3281 = vadd.xlane.f32.xlu0 %v3280_v18  ;;  %3287 = vadd.xlane.f32.xlu2 %v3286_v54 }
 0xbff   :  { %5110 = vmatmul.msk.bf16.gmra.mxu1 %vm702_vm11, %v3327_v36  ;;  %5130 = vmatmul.msk.bf16.gmra.mxu0 %vm702_vm11, %v4007_v31  ;;  %5640 = vpow2.f32 %v3879_v10 }
 0xc00   :  { %5642 = vpow2.f32 %v3881_v58 }
 0xc01   :  { %v8583_v1 = vpop.xlane.xlu1 %3809  ;;  %5644 = vpow2.f32 %v3221_v55 }
 0xc02   :  { %5646 = vpow2.f32 %v3885_v47  ;;  %v8629_v54 = vpop.f32.mrf.mxu1  ;;  %v3850_v28 = vsub.f32 %v8430_v5, %v8583_v1 }
 0xc03   :  { %5648 = vpow2.f32 %v3219_v32 }
 0xc04   :  { %v8580_v62 = vpop.eup %5638  ;;  %v3889_v1 = vmul.f32 1.442695, %v3850_v28 }
 0xc05   :  { %v3283_v0 = vsel %vm702_vm11, %v8580_v62, 0.0  ;;  %v8592_v16 = vpop.eup %5640  ;;  %v3329_v41 = vpack.c.bf16 %v8561_v61, %v8580_v62  ;;  %v3758_v62 = vpop.f32.mrf.mxu3 }
 0xc06   :  { %3284 = vadd.xlane.f32.xlu1 %v3283_v0  ;;  %3236 = vadd.xlane.f32.xlu0 %v3235_v46  ;;  %v3819_v37 = vpop.xlane.xlu0 %3818  ;;  %9422 = vst [vmem:[#allocation29_spill] sm:$0xff] %v8592_v16  ;;  %v8597_v22 = vpop.eup %5642 }
 0xc07   :  { %3275 = vadd.xlane.f32.xlu2 %v3274_v45  ;;  %9423 = vst [vmem:[#allocation30_spill] sm:$0xff] %v8597_v22  ;;  %v3853_v4 = vsub.f32 %v8441_v57, %v3819_v37  ;;  %v4008_v34 = vpack.c.bf16 %v8597_v22, %v8592_v16  ;;  %v8617_v6 = vpop.eup %5644  ;;  %v3816_v37 = vpop.xlane.xlu2 %3815 }
 0xc08   :  { %v3292_v42 = vsel %vm702_vm11, %v8617_v6, 0.0  ;;  %v5647_v30 = vpop.eup %5646 }
 0xc09   :  { %v8610_v57 = vpop.xlane.xlu1 %3812  ;;  %v3895_v35 = vmul.f32 1.442695, %v3853_v4  ;;  %v5649_v36 = vpop.eup %5648  ;;  %v3946_v46 = vsel %vm702_vm11, %v5647_v30, 0.0 }
 0xc0a   :  { %v3289_v10 = vsel %vm702_vm11, %v5649_v36, 0.0  ;;  %v8650_v45 = vpop.f32.mrf.mxu1  ;;  %v3851_v29 = vsub.f32 %v8444_v15, %v8610_v57  ;;  %v8675_v15 = vadd.f32 %v8210_v49, %v3758_v62 }
 0xc0b   :  { %5650 = vpow2.f32 %v3895_v35 }
 0xc0c   :  { %5652 = vpow2.f32 %v3883_v59  ;;  %v3891_v57 = vmul.f32 1.442695, %v3851_v29  ;;  %v3829_v32 = vsel %vm702_vm11, %v8675_v15, -inf }
 0xc0e   :  { %3272 = vadd.xlane.f32.xlu1 %v3271_v14  ;;  %3257 = vadd.xlane.f32.xlu0 %v3256_v56  ;;  %v3330_v56 = vpack.c.bf16 %v8617_v6, %v5649_v36 }
 0xc0f   :  { %3908 = vadd.xlane.f32.xlu2 %v3907_v52  ;;  %5111 = vmatmul.msk.bf16.gmra.mxu1 %vm702_vm11, %v3328_v51  ;;  %v3760_v51 = vpop.f32.mrf.mxu3  ;;  %v3225_v59 = vpop.xlane.xlu2 %3224 }
 0xc10   :  { %5131 = vmatmul.msk.bf16.gmra.mxu0 %vm702_vm11, %v4008_v34  ;;  %v3852_v34 = vsub.f32 %v8424_v26, %v3816_v37  ;;  %v8678_v47 = vadd.f32 %v8210_v49, %v3760_v51  ;;  %v5279_v51 = vld [vmem:[%s9245_s5 + $0x50] sm:$0xff] }
 0xc11   :  { %v3822_v43 = vpop.xlane.xlu1 %3821  ;;  %v8627_v18 = vpop.eup %5650  ;;  %4261 = vmatpush.bf16.msrb.mxu2 %v5279_v51 }
 0xc12   :  { %v3854_v33 = vsub.f32 %v8461_v44, %v3822_v43  ;;  %v5653_v31 = vpop.eup %5652  ;;  %v3961_v58 = vsel %vm702_vm11, %v8627_v18, 0.0  ;;  %v3849_v44 = vsub.f32 %v8393_v21, %v8559_v3  ;;  %v3826_v21 = vsel %vm702_vm11, %v8646_v48, -inf  ;;  %v8671_v25 = vpop.f32.mrf.mxu1 }
 0xc13   :  { %v4009_v53 = vpack.c.bf16 %v5647_v30, %v5653_v31  ;;  %v3943_v0 = vsel %vm702_vm11, %v5653_v31, 0.0  ;;  %v8655_v3 = vadd.f32 %v8210_v49, %v3753_v17  ;;  %v3893_v17 = vmul.f32 1.442695, %v3852_v34 }
 0xc14   :  { %v3897_v5 = vmul.f32 1.442695, %v3854_v33  ;;  %v3887_v61 = vmul.f32 1.442695, %v3849_v44  ;;  %v3832_v26 = vsel %vm702_vm11, %v8678_v47, -inf  ;;  %v3228_v33 = vpop.xlane.xlu0 %3227 }
 0xc15   :  { %v3823_v14 = vsel %vm702_vm11, %v8655_v3, -inf }
 0xc16   :  { %3911 = vadd.xlane.f32.xlu0 %v3910_v20  ;;  %3293 = vadd.xlane.f32.xlu1 %v3292_v42  ;;  %5654 = vpow2.f32 %v3897_v5 }
 0xc17   :  { %3929 = vadd.xlane.f32.xlu2 %v3928_v2  ;;  %5656 = vpow2.f32 %v3889_v1  ;;  %v8686_v9 = vpop.f32.mrf.mxu0  ;;  %v3246_v30 = vpop.xlane.xlu2 %3245 }
 0xc18   :  { %5658 = vpow2.f32 %v3887_v61 }
 0xc19   :  { %5660 = vpow2.f32 %v3891_v57  ;;  %v3243_v43 = vpop.xlane.xlu1 %3242 }
 0xc1a   :  { %5662 = vpow2.f32 %v3893_v17  ;;  %v8684_v35 = vpop.f32.mrf.mxu1 }
 0xc1b   :  { %5664 = vrcp.f32 %v3243_v43 }
 0xc1c   :  { %v5655_v55 = vpop.eup %5654  ;;  %5666 = vrcp.f32 %v3225_v59 }
 0xc1d   :  { %v8657_v27 = vpop.eup %5656  ;;  %v3964_v4 = vsel %vm702_vm11, %v5655_v55, 0.0  ;;  %v4012_v31 = vpack.c.bf16 %v5655_v55, %v8627_v18 }
 0xc1e   :  { %3290 = vadd.xlane.f32.xlu0 %v3289_v10  ;;  %3926 = vadd.xlane.f32.xlu1 %v3925_v38  ;;  %9424 = vst [vmem:[#allocation31_spill] sm:$0xff] %v8657_v27  ;;  %v8659_v11 = vpop.eup %5658 }
 0xc1f   :  { %3962 = vadd.xlane.f32.xlu2 %v3961_v58  ;;  %5112 = vmatmul.msk.bf16.gmra.mxu1 %vm702_vm11, %v3329_v41  ;;  %9425 = vst [vmem:[#allocation32_spill] sm:$0xff] %v8659_v11  ;;  %v4010_v52 = vpack.c.bf16 %v8657_v27, %v8659_v11  ;;  %v8688_v6 = vpop.eup %5660  ;;  %v8697_v2 = vpop.f32.mrf.mxu0 }
 0xc20   :  { %5132 = vmatmul.msk.bf16.gmra.mxu0 %vm702_vm11, %v4009_v53  ;;  %9426 = vst [vmem:[#allocation33_spill] sm:$0xff] %v8688_v6  ;;  %v8690_v49 = vpop.eup %5662  ;;  %v8705_v28 = vpop.xlane.xlu2 %3233 }
 0xc21   :  { %9427 = vst [vmem:[#allocation34_spill] sm:$0xff] %v8690_v49  ;;  %v4011_v20 = vpack.c.bf16 %v8690_v49, %v8688_v6  ;;  %v3231_v10 = vpop.xlane.xlu1 %3230  ;;  %v3249_v58 = vpop.xlane.xlu0 %3248  ;;  %v9434_v49 = vld [vmem:[#allocation9_spill] sm:$0xff] }
 0xc22   :  { %v8695_v42 = vpop.f32.mrf.mxu1 }
 0xc26   :  { %3944 = vadd.xlane.f32.xlu0 %v3943_v0  ;;  %3947 = vadd.xlane.f32.xlu1 %v3946_v46 }
 0xc27   :  { %3827 = vmax.xlane.f32.xlu2 %v3826_v21 }
 0xc29   :  { %v8715_v1 = vpop.xlane.xlu1 %3251  ;;  %v3261_v61 = vpop.xlane.xlu0 %3260 }
 0xc2a   :  { %v8699_v36 = vpop.f32.mrf.mxu1  ;;  %5668 = vrcp.f32 %v3261_v61 }
 0xc2b   :  { %5670 = vrcp.f32 %v3246_v30 }
 0xc2c   :  { %5672 = vrcp.f32 %v3228_v33 }
 0xc2e   :  { %3965 = vadd.xlane.f32.xlu0 %v3964_v4  ;;  %3824 = vmax.xlane.f32.xlu1 %v3823_v14 }
 0xc2f   :  { %5113 = vmatmul.msk.bf16.gmra.mxu1 %vm702_vm11, %v3330_v56 }
 0xc30   :  { %5133 = vmatmul.msk.bf16.gmra.mxu0 %vm702_vm11, %v4010_v52 }
 0xc31   :  { %v8719_v21 = vpop.xlane.xlu0 %3269 }
 0xc32   :  { %v8707_v38 = vpop.f32.mrf.mxu1 }
 0xc36   :  { %3830 = vmax.xlane.f32.xlu0 %v3829_v32  ;;  %3833 = vmax.xlane.f32.xlu1 %v3832_v26 }
 0xc40   :  { %5134 = vmatmul.msk.bf16.gmra.mxu0 %vm702_vm11, %v4011_v20 }
 0xc4c   :  { %v8701_v7 = vpop.f32.mrf.mxu0 }
 0xc4d   :  { %9428 = vst [vmem:[#allocation35_spill] sm:$0xff] %v8701_v7 }
 0xc50   :  { %5135 = vmatmul.msk.bf16.gmra.mxu0 %vm702_vm11, %v4012_v31 }
 0xc51   :  { %v3264_v46 = vpop.xlane.xlu1 %3263 }
 0xc54   :  { %v8709_v41 = vpop.f32.mrf.mxu0 }
 0xc55   :  { %9429 = vst [vmem:[#allocation36_spill] sm:$0xff] %v8709_v41 }
 0xc59   :  { %v8711_v53 = vpop.xlane.xlu2 %3266  ;;  %v8727_v4 = vpop.xlane.xlu1 %3239 }
 0xc5c   :  { %v3415_v44 = vpop.f32.mrf.mxu1  ;;  %v8713_v5 = vpop.f32.mrf.mxu0 }
 0xc5d   :  { %9430 = vst [vmem:[#allocation37_spill] sm:$0xff] %v8713_v5 }
 0xc61   :  { %v3279_v62 = vpop.xlane.xlu2 %3278 }
 0xc62   :  { %5674 = vrcp.f32 %v3279_v62 }
 0xc63   :  { %5676 = vrcp.f32 %v3264_v46 }
 0xc64   :  { %v3417_v18 = vpop.f32.mrf.mxu1  ;;  %v8717_v0 = vpop.f32.mrf.mxu0  ;;  %5678 = vrcp.f32 %v3231_v10  ;;  %v9437_v10 = vld [vmem:[#allocation11_spill] sm:$0xff] }
 0xc65   :  { %9431 = vst [vmem:[#allocation38_spill] sm:$0xff] %v8717_v0  ;;  %v5665_v0 = vpop.eup %5664  ;;  %5680 = vrcp.f32 %v3249_v58 }
 0xc66   :  { %v5667_v51 = vpop.eup %5666  ;;  %v3451_v43 = vmul.f32 %v5665_v0, %v8650_v45  ;;  %v9436_v45 = vld [vmem:[#allocation10_spill] sm:$0xff] }
 0xc67   :  { %v5669_v40 = vpop.eup %5668  ;;  %v3445_v59 = vmul.f32 %v5667_v51, %v8540_v23 }
 0xc68   :  { %v3457_v61 = vmul.f32 %v5669_v40, %v3415_v44  ;;  %v3475_v16 = vmul.f32 %v3451_v43, %v9434_v49 }
 0xc69   :  { %v8721_v55 = vpop.xlane.xlu2 %3254 }
 0xc6a   :  { %v3487_v0 = vmul.f32 %v3457_v61, %v9436_v45 }
 0xc6c   :  { %v8723_v37 = vpop.f32.mrf.mxu1  ;;  %v8725_v29 = vpop.f32.mrf.mxu0 }
 0xc71   :  { %v8729_v14 = vpop.xlane.xlu2 %3287  ;;  %v3282_v56 = vpop.xlane.xlu0 %3281 }
 0xc72   :  { %5682 = vrcp.f32 %v3282_v56 }
 0xc73   :  { %5684 = vrcp.f32 %v8711_v53 }
 0xc74   :  { %v8734_v52 = vpop.f32.mrf.mxu1  ;;  %v8736_v34 = vpop.f32.mrf.mxu0  ;;  %5686 = vrcp.f32 %v8715_v1 }
 0xc75   :  { %5688 = vrcp.f32 %v8705_v28 }
 0xc79   :  { %v8738_v57 = vpop.xlane.xlu1 %3284  ;;  %v8740_v17 = vpop.xlane.xlu0 %3236 }
 0xc7a   :  { %v8742_v32 = vpop.xlane.xlu2 %3275  ;;  %5690 = vrcp.f32 %v8738_v57 }
 0xc7b   :  { %5692 = vrcp.f32 %v8719_v21 }
 0xc7c   :  { %v8744_v26 = vpop.f32.mrf.mxu1  ;;  %v8746_v20 = vpop.f32.mrf.mxu0  ;;  %5694 = vrcp.f32 %v8721_v55 }
 0xc7d   :  { %9432 = vst [vmem:[#allocation39_spill] sm:$0xff] %v8746_v20  ;;  %v5671_v20 = vpop.eup %5670  ;;  %5696 = vrcp.f32 %v8740_v17 }
 0xc7e   :  { %v5673_v33 = vpop.eup %5672  ;;  %v3452_v23 = vmul.f32 %v5671_v20, %v8671_v25  ;;  %5698 = vrcp.f32 %v8729_v14 }
 0xc7f   :  { %v5675_v62 = vpop.eup %5674  ;;  %v3446_v44 = vmul.f32 %v5673_v33, %v8557_v60 }
 0xc80   :  { %v5677_v27 = vpop.eup %5676  ;;  %v3476_v25 = vmul.f32 %v3452_v23, %v9434_v49 }
 0xc81   :  { %v8748_v31 = vpop.xlane.xlu1 %3272  ;;  %v8750_v5 = vpop.xlane.xlu0 %3257  ;;  %v3458_v19 = vmul.f32 %v5677_v27, %v3417_v18 }
 0xc82   :  { %v8752_v41 = vpop.xlane.xlu2 %3908  ;;  %5700 = vrcp.f32 %v8748_v31 }
 0xc83   :  { %v3488_v56 = vmul.f32 %v3458_v19, %v9436_v45  ;;  %5702 = vrcp.f32 %v8750_v5 }
 0xc84   :  { %v8754_v7 = vpop.f32.mrf.mxu1  ;;  %v8756_v22 = vpop.f32.mrf.mxu0  ;;  %5704 = vrcp.f32 %v8727_v4 }
 0xc85   :  { %9433 = vst [vmem:[#allocation40_spill] sm:$0xff] %v8756_v22  ;;  %v9435_v22 = vld [vmem:[#allocation8_spill] sm:$0xff] }
 0xc86   :  { %v3469_v63 = vmul.f32 %v3445_v59, %v9435_v22  ;;  %v5679_v59 = vpop.eup %5678  ;;  %v3470_v61 = vmul.f32 %v3446_v44, %v9435_v22 }
 0xc87   :  { %v5681_v58 = vpop.eup %5680  ;;  %v3447_v53 = vmul.f32 %v5679_v59, %v8578_v13 }
 0xc88   :  { %v3481_v46 = vadd.f32 %v3475_v16, %v3469_v63  ;;  %v5683_v27 = vpop.eup %5682 }
 0xc89   :  { %v8761_v6 = vpop.xlane.xlu1 %3293  ;;  %v8763_v30 = vpop.xlane.xlu0 %3911  ;;  %v3471_v13 = vmul.f32 %v3447_v53, %v9435_v22 }
 0xc8a   :  { %v8765_v12 = vpop.xlane.xlu2 %3929  ;;  %v3493_v11 = vadd.f32 %v3487_v0, %v3481_v46  ;;  %v5685_v0 = vpop.eup %5684 }
 0xc8b   :  { %v3459_v23 = vmul.f32 %v5685_v0, %v8723_v37  ;;  %v5687_v46 = vpop.eup %5686 }
 0xc8c   :  { %v3430_v40 = vpop.f32.mrf.mxu1  ;;  %v5689_v59 = vpop.eup %5688 }
 0xc8d   :  { %v3463_v51 = vmul.f32 %v5675_v62, %v3430_v40  ;;  %v8771_v43 = vpop.f32.mrf.mxu0  ;;  %v3453_v62 = vmul.f32 %v5681_v58, %v8684_v35  ;;  %v3489_v37 = vmul.f32 %v3459_v23, %v9436_v45  ;;  %v5691_v57 = vpop.eup %5690  ;;  %v3448_v55 = vmul.f32 %v5689_v59, %v8590_v8 }
 0xc8f   :  { %v3499_v39 = vmul.f32 %v3463_v51, %v9437_v10  ;;  %v3477_v51 = vmul.f32 %v3453_v62, %v9434_v49 }
 0xc91   :  { %v3505_v20 = vadd.f32 %v3499_v39, %v3493_v11  ;;  %v8777_v60 = vpop.xlane.xlu1 %3926  ;;  %v8779_v63 = vpop.xlane.xlu0 %3290  ;;  %v3482_v39 = vadd.f32 %v3476_v25, %v3470_v61  ;;  %v3483_v21 = vadd.f32 %v3477_v51, %v3471_v13  ;;  %v3454_v25 = vmul.f32 %v5687_v46, %v8695_v42 }
 0xc92   :  { %v8781_v16 = vpop.xlane.xlu2 %3962  ;;  %5706 = vrcp.f32 %v8779_v63 }
 0xc93   :  { %3511 = vst.msk [vmem:[#allocation2] sm:$0xff] %vm74_vm0, %v3505_v20  ;;  %v3494_v19 = vadd.f32 %v3488_v56, %v3482_v39  ;;  %v3495_v53 = vadd.f32 %v3489_v37, %v3483_v21  ;;  %v3478_v42 = vmul.f32 %v3454_v25, %v9434_v49 }
 0xc94   :  { %v3432_v18 = vpop.f32.mrf.mxu1 }
 0xc95   :  { %v3464_v11 = vmul.f32 %v5683_v27, %v3432_v18  ;;  %v8788_v33 = vpop.f32.mrf.mxu0  ;;  %v5693_v27 = vpop.eup %5692 }
 0xc96   :  { %v3460_v18 = vmul.f32 %v5693_v27, %v8734_v52  ;;  %v5695_v39 = vpop.eup %5694  ;;  %v3472_v52 = vmul.f32 %v3448_v55, %v9435_v22 }
 0xc97   :  { %v3500_v40 = vmul.f32 %v3464_v11, %v9437_v10  ;;  %v5697_v62 = vpop.eup %5696  ;;  %v3455_v4 = vmul.f32 %v5695_v39, %v8699_v36 }
 0xc98   :  { %v5699_v23 = vpop.eup %5698  ;;  %v3484_v5 = vadd.f32 %v3478_v42, %v3472_v52 }
 0xc99   :  { %v3506_v1 = vadd.f32 %v3500_v40, %v3494_v19  ;;  %v8796_v28 = vpop.xlane.xlu1 %3947  ;;  %v8798_v44 = vpop.xlane.xlu0 %3944  ;;  %v3490_v40 = vmul.f32 %v3460_v18, %v9436_v45 }
 0xc9a   :  { %v3828_v35 = vpop.xlane.xlu2 %3827  ;;  %v4201_v19 = vld [vmem:[#allocation2] sm:$0xff] }
 0xc9b   :  { %3512 = vst.msk [vmem:[#allocation2 + $0x8] sm:$0xff] %vm74_vm0, %v3506_v1  ;;  %v3856_v20 = vsub.f32 %v8646_v48, %v3828_v35  ;;  %v5701_v1 = vpop.eup %5700  ;;  %v3496_v37 = vadd.f32 %v3490_v40, %v3484_v5 }
 0xc9c   :  { %v3435_v61 = vpop.f32.mrf.mxu1  ;;  %v5703_v63 = vpop.eup %5702 }
 0xc9d   :  { %v3465_v58 = vmul.f32 %v5691_v57, %v3435_v61  ;;  %v8808_v56 = vpop.f32.mrf.mxu0  ;;  %v3901_v11 = vmul.f32 1.442695, %v3856_v20  ;;  %v3461_v57 = vmul.f32 %v5701_v1, %v8744_v26  ;;  %v5705_v61 = vpop.eup %5704  ;;  %v3456_v36 = vmul.f32 %v5703_v63, %v8707_v38 }
 0xc9e   :  { %v5707_v27 = vpop.eup %5706 }
 0xc9f   :  { %v3501_v17 = vmul.f32 %v3465_v58, %v9437_v10  ;;  %5708 = vpow2.f32 %v3901_v11  ;;  %v3491_v18 = vmul.f32 %v3461_v57, %v9436_v45  ;;  %v3450_v11 = vmul.f32 %v5705_v61, %v8629_v54 }
 0xca1   :  { %v3507_v14 = vadd.f32 %v3501_v17, %v3495_v53  ;;  %v3825_v0 = vpop.xlane.xlu1 %3824  ;;  %v8815_v48 = vpop.xlane.xlu0 %3965  ;;  %v3479_v53 = vmul.f32 %v3455_v4, %v9434_v49 }
 0xca2   :  { %v3855_v31 = vsub.f32 %v8655_v3, %v3825_v0  ;;  %v4202_v8 = vld [vmem:[#allocation2 + $0x8] sm:$0xff]  ;;  %v3449_v3 = vmul.f32 %v5697_v62, %v8619_v50 }
 0xca3   :  { %3513 = vst.msk [vmem:[#allocation2 + $0x10] sm:$0xff] %vm74_vm0, %v3507_v14  ;;  %v4213_v13 = vpack.c.bf16 %v4202_v8, %v4201_v19 }
 0xca4   :  { %v3899_v46 = vmul.f32 1.442695, %v3855_v31  ;;  %v3437_v51 = vpop.f32.mrf.mxu1  ;;  %v3473_v25 = vmul.f32 %v3449_v3, %v9435_v22 }
 0xca5   :  { %v3466_v35 = vmul.f32 %v5699_v23, %v3437_v51  ;;  %v8825_v59 = vpop.f32.mrf.mxu0  ;;  %5150 = vmatmul.msk.bf16.vlgmr.msrb.gmra.mxu2 %vm74_vm0, %v4213_v13  ;;  %v8833_v55 = vpop.eup %5708  ;;  %v3474_v23 = vmul.f32 %v3450_v11, %v9435_v22 }
 0xca6   :  { %5710 = vpow2.f32 %v3899_v46  ;;  %v3485_v14 = vadd.f32 %v3479_v53, %v3473_v25 }
 0xca7   :  { %v3502_v21 = vmul.f32 %v3466_v35, %v9437_v10  ;;  %5712 = vrcp.f32 %v8742_v32 }
 0xca8   :  { %5714 = vrcp.f32 %v8761_v6  ;;  %v3497_v31 = vadd.f32 %v3491_v18, %v3485_v14 }
 0xca9   :  { %v3508_v20 = vadd.f32 %v3502_v21, %v3496_v37  ;;  %v3834_v50 = vpop.xlane.xlu1 %3833  ;;  %v3831_v58 = vpop.xlane.xlu0 %3830 }
 0xcaa   :  { %v3858_v26 = vsub.f32 %v8678_v47, %v3834_v50  ;;  %v3857_v39 = vsub.f32 %v8675_v15, %v3831_v58  ;;  %v3480_v47 = vmul.f32 %v3456_v36, %v9434_v49  ;;  %v4203_v40 = vld [vmem:[#allocation2 + $0x10] sm:$0xff] }
 0xcab   :  { %3514 = vst.msk [vmem:[#allocation2 + $0x18] sm:$0xff] %vm74_vm0, %v3508_v20 }
 0xcac   :  { %v8840_v17 = vpop.eup %5710  ;;  %v3440_v42 = vpop.f32.mrf.mxu1  ;;  %v3905_v62 = vmul.f32 1.442695, %v3858_v26  ;;  %v3903_v8 = vmul.f32 1.442695, %v3857_v39  ;;  %v3486_v1 = vadd.f32 %v3480_v47, %v3474_v23 }
 0xcad   :  { %v3467_v32 = vmul.f32 %v5707_v27, %v3440_v42  ;;  %v8844_v0 = vpop.f32.mrf.mxu0  ;;  %v4013_v38 = vpack.c.bf16 %v8833_v55, %v8840_v17  ;;  %v5713_v15 = vpop.eup %5712 }
 0xcae   :  { %v3462_v54 = vmul.f32 %v5713_v15, %v8754_v7  ;;  %5716 = vpow2.f32 %v3905_v62  ;;  %v5715_v46 = vpop.eup %5714 }
 0xcaf   :  { %v3503_v19 = vmul.f32 %v3467_v32, %v9437_v10  ;;  %5136 = vmatmul.msk.bf16.gmra.mxu0 %vm702_vm11, %v4013_v38  ;;  %5718 = vpow2.f32 %v3903_v8 }
 0xcb0   :  { %v3492_v5 = vmul.f32 %v3462_v54, %v9436_v45  ;;  %5720 = vrcp.f32 %v8777_v60 }
 0xcb1   :  { %v3509_v52 = vadd.f32 %v3503_v19, %v3497_v31  ;;  %5722 = vrcp.f32 %v8752_v41 }
 0xcb2   :  { %v4204_v13 = vld [vmem:[#allocation2 + $0x18] sm:$0xff]  ;;  %v3498_v7 = vadd.f32 %v3492_v5, %v3486_v1  ;;  %5724 = vrcp.f32 %v8798_v44 }
 0xcb3   :  { %3515 = vst.msk [vmem:[#allocation2 + $0x20] sm:$0xff] %vm74_vm0, %v3509_v52  ;;  %v4214_v6 = vpack.c.bf16 %v4204_v13, %v4203_v40  ;;  %5726 = vrcp.f32 %v8765_v12  ;;  %v8901_v13 = vld [vmem:[%s9242_s2 + $0x8] sm:$0xff] }
 0xcb4   :  { %v3442_v51 = vpop.f32.mrf.mxu1  ;;  %v8860_v37 = vpop.eup %5716  ;;  %5728 = vrcp.f32 %v8763_v30  ;;  %v8904_v1 = vperm.slane %v8901_v13, 4 }
 0xcb5   :  { %v3468_v3 = vmul.f32 %v5715_v46, %v3442_v51  ;;  %v8856_v35 = vpop.f32.mrf.mxu0  ;;  %5151 = vmatmul.msk.bf16.gmra.mxu2 %vm74_vm0, %v4214_v6  ;;  %v8862_v21 = vpop.eup %5718  ;;  %5730 = vrcp.f32 %v8781_v16  ;;  %v9438_v46 = vld [vmem:[#allocation19_spill] sm:$0xff] }
 0xcb6   :  { %v4014_v61 = vpack.c.bf16 %v8860_v37, %v8862_v21  ;;  %v5721_v50 = vpop.eup %5720  ;;  %5732 = vrcp.f32 %v8796_v28 }
 0xcb7   :  { %v3504_v4 = vmul.f32 %v3468_v3, %v9437_v10  ;;  %v5723_v27 = vpop.eup %5722  ;;  %v4135_v41 = vmul.f32 %v5721_v50, %v8725_v29  ;;  %5734 = vrcp.f32 %v8815_v48  ;;  %v9440_v50 = vld [vmem:[#allocation18_spill] sm:$0xff] }
 0xcb8   :  { %v5725_v53 = vpop.eup %5724  ;;  %v4129_v44 = vmul.f32 %v5723_v27, %v8686_v9 }
 0xcb9   :  { %v3510_v57 = vadd.f32 %v3504_v4, %v3498_v7  ;;  %v4141_v36 = vmul.f32 %v5725_v53, %v8808_v56  ;;  %v5727_v26 = vpop.eup %5726  ;;  %v4159_v12 = vmul.f32 %v4135_v41, %v9434_v49  ;;  %v9439_v4 = vld [vmem:[#allocation20_spill] sm:$0xff] }
 0xcba   :  { %v4205_v25 = vld [vmem:[#allocation2 + $0x20] sm:$0xff]  ;;  %v5729_v18 = vpop.eup %5728  ;;  %v4153_v30 = vmul.f32 %v4129_v44, %v9435_v22  ;;  %v4136_v29 = vmul.f32 %v5727_v26, %v8736_v34  ;;  %v9441_v44 = vld [vmem:[#allocation21_spill] sm:$0xff] }
 0xcbb   :  { %3516 = vst.msk [vmem:[#allocation2 + $0x28] sm:$0xff] %vm74_vm0, %v3510_v57  ;;  %v4171_v39 = vmul.f32 %v4141_v36, %v9436_v45  ;;  %v5731_v42 = vpop.eup %5730  ;;  %v4130_v16 = vmul.f32 %v5729_v18, %v8697_v2 }
 0xcbc   :  { %v4165_v32 = vadd.f32 %v4159_v12, %v4153_v30  ;;  %v5733_v14 = vpop.eup %5732  ;;  %v4160_v62 = vmul.f32 %v4136_v29, %v9434_v49  ;;  %v9442_v30 = vld [vmem:[#allocation17_spill] sm:$0xff] }
 0xcbd   :  { %v8866_v63 = vpop.f32.mrf.mxu0  ;;  %v4142_v56 = vmul.f32 %v5733_v14, %v8825_v59  ;;  %v4154_v47 = vmul.f32 %v4130_v16, %v9435_v22  ;;  %v5735_v2 = vpop.eup %5734  ;;  %v9443_v16 = vld [vmem:[#allocation22_spill] sm:$0xff] }
 0xcbe   :  { %v4177_v28 = vadd.f32 %v4171_v39, %v4165_v32 }
 0xcbf   :  { %5137 = vmatmul.msk.bf16.gmra.mxu0 %vm702_vm11, %v4014_v61  ;;  %v4172_v19 = vmul.f32 %v4142_v56, %v9436_v45  ;;  %v4166_v15 = vadd.f32 %v4160_v62, %v4154_v47  ;;  %v9444_v56 = vld [vmem:[#allocation16_spill] sm:$0xff] }
 0xcc1   :  { %v4178_v54 = vadd.f32 %v4172_v19, %v4166_v15  ;;  %v9445_v19 = vld [vmem:[#allocation7_spill] sm:$0xff] }
 0xcc2   :  { %v4206_v20 = vld [vmem:[#allocation2 + $0x28] sm:$0xff] }
 0xcc3   :  { %v4215_v58 = vpack.c.bf16 %v4206_v20, %v4205_v25 }
 0xcc5   :  { %v8875_v60 = vpop.f32.mrf.mxu0  ;;  %5152 = vmatmul.msk.bf16.gmra.mxu2 %vm74_vm0, %v4215_v58 }
 0xccd   :  { %v4114_v11 = vpop.f32.mrf.mxu0 }
 0xcce   :  { %v4147_v9 = vmul.f32 %v5731_v42, %v4114_v11 }
 0xcd0   :  { %v4183_v38 = vmul.f32 %v4147_v9, %v9437_v10 }
 0xcd2   :  { %v4189_v31 = vadd.f32 %v4183_v38, %v4177_v28 }
 0xcd4   :  { %4195 = vst.msk [vmem:[#allocation2 + $0x30] sm:$0xff] %vm74_vm0, %v4189_v31 }
 0xcd5   :  { %v4116_v34 = vpop.f32.mrf.mxu0 }
 0xcd6   :  { %v4148_v8 = vmul.f32 %v5735_v2, %v4116_v34 }
 0xcd8   :  { %v4184_v48 = vmul.f32 %v4148_v8, %v9437_v10 }
 0xcda   :  { %v4190_v23 = vadd.f32 %v4184_v48, %v4178_v54  ;;  %v9446_v54 = vld [vmem:[#allocation23_spill] sm:$0xff] }
 0xcdb   :  { %v4207_v59 = vld [vmem:[#allocation2 + $0x30] sm:$0xff] }
 0xcdc   :  { %4196 = vst.msk [vmem:[#allocation2 + $0x38] sm:$0xff] %vm74_vm0, %v4190_v23 }
 0xce3   :  { %v4208_v52 = vld [vmem:[#allocation2 + $0x38] sm:$0xff] }
 0xce4   :  { %v4216_v40 = vpack.c.bf16 %v4208_v52, %v4207_v59 }
 0xce6   :  { %5153 = vmatmul.msk.bf16.gmra.mxu2 %vm74_vm0, %v4216_v40 }
 0xd28   :  { %v4263_v6 = vpop.f32.mrf.mxu2 }
 0xd29   :  { %v4293_v51 = vadd.f32 %v4263_v6, %v9438_v46 }
 0xd2b   :  { %v8908_v5 = vadd.f32 %v8904_v1, %v4293_v51 }
 0xd2d   :  { %v4318_v3 = vsel %vm74_vm0, %v8908_v5, 0.0 }
 0xd2e   :  { %4319 = vadd.xlane.f32.xlu2 %v4318_v3 }
 0xd30   :  { %v4265_v7 = vpop.f32.mrf.mxu2 }
 0xd31   :  { %v4294_v57 = vadd.f32 %v4265_v7, %v9439_v4 }
 0xd33   :  { %v4307_v61 = vadd.f32 %v8904_v1, %v4294_v57 }
 0xd35   :  { %v4321_v25 = vsel %vm74_vm0, %v4307_v61, 0.0 }
 0xd36   :  { %4322 = vadd.xlane.f32.xlu0 %v4321_v25 }
 0xd38   :  { %v4268_v20 = vpop.f32.mrf.mxu2 }
 0xd39   :  { %v4295_v58 = vadd.f32 %v4268_v20, %v9440_v50 }
 0xd3b   :  { %v4308_v27 = vadd.f32 %v8904_v1, %v4295_v58 }
 0xd3d   :  { %v4324_v53 = vsel %vm74_vm0, %v4308_v27, 0.0 }
 0xd3e   :  { %4325 = vadd.xlane.f32.xlu1 %v4324_v53 }
 0xd40   :  { %v4270_v41 = vpop.f32.mrf.mxu2 }
 0xd41   :  { %v4296_v36 = vadd.f32 %v4270_v41, %v9441_v44  ;;  %v9447_v44 = vld [vmem:[#allocation15_spill] sm:$0xff] }
 0xd43   :  { %v4309_v26 = vadd.f32 %v8904_v1, %v4296_v36  ;;  %v3913_v36 = vsel %vm702_vm11, %v9447_v44, 0.0 }
 0xd45   :  { %v4327_v12 = vsel %vm74_vm0, %v4309_v26, 0.0 }
 0xd46   :  { %4328 = vadd.xlane.f32.xlu2 %v4327_v12 }
 0xd48   :  { %v4273_v18 = vpop.f32.mrf.mxu2 }
 0xd49   :  { %v4297_v39 = vadd.f32 %v4273_v18, %v9442_v30 }
 0xd4b   :  { %v4310_v42 = vadd.f32 %v8904_v1, %v4297_v39 }
 0xd4d   :  { %v4330_v11 = vsel %vm74_vm0, %v4310_v42, 0.0 }
 0xd4e   :  { %4331 = vadd.xlane.f32.xlu0 %v4330_v11 }
 0xd50   :  { %v4275_v29 = vpop.f32.mrf.mxu2 }
 0xd51   :  { %v4298_v32 = vadd.f32 %v4275_v29, %v9443_v16 }
 0xd53   :  { %v4311_v9 = vadd.f32 %v8904_v1, %v4298_v32 }
 0xd55   :  { %v4333_v14 = vsel %vm74_vm0, %v4311_v9, 0.0 }
 0xd56   :  { %4334 = vadd.xlane.f32.xlu1 %v4333_v14 }
 0xd69   :  { %v4278_v28 = vpop.f32.mrf.mxu2 }
 0xd6a   :  { %v4299_v38 = vadd.f32 %v4278_v28, %v9444_v56 }
 0xd6c   :  { %v8929_v47 = vadd.f32 %v8904_v1, %v4299_v38  ;;  %v9450_v38 = vld [vmem:[#allocation31_spill] sm:$0xff] }
 0xd6e   :  { %v4336_v62 = vsel %vm74_vm0, %v8929_v47, 0.0 }
 0xd6f   :  { %4337 = vadd.xlane.f32.xlu1 %v4336_v62  ;;  %v3952_v62 = vsel %vm702_vm11, %v9450_v38, 0.0 }
 0xd71   :  { %v4280_v15 = vpop.f32.mrf.mxu2 }
 0xd72   :  { %v4300_v48 = vadd.f32 %v4280_v15, %v9446_v54 }
 0xd74   :  { %v8943_v40 = vadd.f32 %v8904_v1, %v4300_v48 }
 0xd76   :  { %v4339_v51 = vsel %vm74_vm0, %v8943_v40, 0.0 }
 0xda1   :  { %v4320_v31 = vpop.xlane.xlu2 %4319 }
 0xda2   :  { %v4354_v2 = vmul.f32 %v4320_v31, %v9445_v19  ;;  %v9451_v31 = vld [vmem:[#allocation28_spill] sm:$0xff] }
 0xda4   :  { %v8935_v34 = vsub.f32 %v8908_v5, %v4354_v2  ;;  %v3934_v2 = vsel %vm702_vm11, %v9451_v31, 0.0 }
 0xda6   :  { %v4378_v8 = vmul.f32 %v8935_v34, %v8935_v34 }
 0xda8   :  { %v4390_v23 = vsel %vm74_vm0, %v4378_v8, 0.0 }
 0xda9   :  { %4391 = vadd.xlane.f32.xlu2 %v4390_v23  ;;  %v4323_v59 = vpop.xlane.xlu0 %4322  ;;  %v9452_v23 = vld [vmem:[#allocation12_spill] sm:$0xff] }
 0xdaa   :  { %v4355_v52 = vmul.f32 %v4323_v59, %v9445_v19  ;;  %v3922_v59 = vsel %vm702_vm11, %v9452_v23, 0.0 }
 0xdac   :  { %v8945_v6 = vsub.f32 %v4307_v61, %v4355_v52  ;;  %v3931_v61 = vsel %vm702_vm11, %v8566_v24, 0.0 }
 0xdae   :  { %v4379_v46 = vmul.f32 %v8945_v6, %v8945_v6 }
 0xdb0   :  { %v4393_v3 = vsel %vm74_vm0, %v4379_v46, 0.0  ;;  %v9453_v46 = vld [vmem:[#allocation33_spill] sm:$0xff] }
 0xdb1   :  { %v4326_v7 = vpop.xlane.xlu1 %4325  ;;  %4340 = vadd.xlane.f32.xlu2 %v4339_v51  ;;  %4394 = vadd.xlane.f32.xlu0 %v4393_v3  ;;  %v3970_v51 = vsel %vm702_vm11, %v8833_v55, 0.0  ;;  %v3976_v3 = vsel %vm702_vm11, %v8860_v37, 0.0  ;;  %v5281_v37 = vld [vmem:[%s9244_s4 + $0x30] sm:$0xff] }
 0xdb2   :  { %v4356_v4 = vmul.f32 %v4326_v7, %v9445_v19  ;;  %v9454_v7 = vld [vmem:[#allocation29_spill] sm:$0xff] }
 0xdb4   :  { %v8953_v57 = vsub.f32 %v4308_v27, %v4356_v4  ;;  %v3937_v4 = vsel %vm702_vm11, %v9454_v7, 0.0 }
 0xdb6   :  { %v4380_v25 = vmul.f32 %v8953_v57, %v8953_v57 }
 0xdb8   :  { %v4396_v20 = vsel %vm74_vm0, %v4380_v25, 0.0  ;;  %v9455_v25 = vld [vmem:[#allocation34_spill] sm:$0xff] }
 0xdb9   :  { %v4329_v50 = vpop.xlane.xlu2 %4328  ;;  %3932 = vadd.xlane.f32.xlu2 %v3931_v61  ;;  %4397 = vadd.xlane.f32.xlu0 %v4396_v20  ;;  %v3958_v61 = vsel %vm702_vm11, %v9455_v25, 0.0 }
 0xdba   :  { %v4357_v58 = vmul.f32 %v4329_v50, %v9445_v19  ;;  %v5282_v50 = vld [vmem:[%s9244_s4 + $0x38] sm:$0xff] }
 0xdbb   :  { %4656 = vmatpush.bf16.msrb.mxu1 %v5282_v50 }
 0xdbc   :  { %v8961_v53 = vsub.f32 %v4309_v26, %v4357_v58  ;;  %v9448_v26 = vld [vmem:[#allocation13_spill] sm:$0xff] }
 0xdbd   :  { %v3916_v39 = vsel %vm702_vm11, %v9448_v26, 0.0 }
 0xdbe   :  { %v4381_v41 = vmul.f32 %v8961_v53, %v8961_v53 }
 0xdbf   :  { %4657 = vmatpush.bf16.msrb.mxu1 %v5281_v37 }
 0xdc0   :  { %v4399_v27 = vsel %vm74_vm0, %v4381_v41, 0.0 }
 0xdc1   :  { %4400 = vadd.xlane.f32.xlu1 %v4399_v27  ;;  %3914 = vadd.xlane.f32.xlu0 %v3913_v36  ;;  %v4332_v24 = vpop.xlane.xlu0 %4331 }
 0xdc2   :  { %v4358_v12 = vmul.f32 %v4332_v24, %v9445_v19 }
 0xdc4   :  { %v8969_v18 = vsub.f32 %v4310_v42, %v4358_v12  ;;  %v9449_v42 = vld [vmem:[#allocation32_spill] sm:$0xff] }
 0xdc5   :  { %v3949_v28 = vsel %vm702_vm11, %v9449_v42, 0.0 }
 0xdc6   :  { %v4382_v30 = vmul.f32 %v8969_v18, %v8969_v18 }
 0xdc8   :  { %v4402_v11 = vsel %vm74_vm0, %v4382_v30, 0.0 }
 0xdc9   :  { %v4335_v29 = vpop.xlane.xlu1 %4334  ;;  %3917 = vadd.xlane.f32.xlu1 %v3916_v39  ;;  %4403 = vadd.xlane.f32.xlu2 %v4402_v11 }
 0xdca   :  { %v4359_v16 = vmul.f32 %v4335_v29, %v9445_v19 }
 0xdcc   :  { %v8977_v32 = vsub.f32 %v4311_v9, %v4359_v16  ;;  %v3967_v9 = vsel %vm702_vm11, %v8840_v17, 0.0  ;;  %v3955_v17 = vsel %vm702_vm11, %v9453_v46, 0.0 }
 0xdce   :  { %v4383_v14 = vmul.f32 %v8977_v32, %v8977_v32 }
 0xdd0   :  { %v4405_v56 = vsel %vm74_vm0, %v4383_v14, 0.0 }
 0xdd1   :  { %3950 = vadd.xlane.f32.xlu1 %v3949_v28  ;;  %4406 = vadd.xlane.f32.xlu0 %v4405_v56 }
 0xdd2   :  { %3953 = vadd.xlane.f32.xlu2 %v3952_v62 }
 0xdd9   :  { %3935 = vadd.xlane.f32.xlu0 %v3934_v2  ;;  %v9456_v2 = vld [vmem:[#allocation14_spill] sm:$0xff] }
 0xde1   :  { %3968 = vadd.xlane.f32.xlu0 %v3967_v9  ;;  %v3919_v9 = vsel %vm702_vm11, %v9456_v2, 0.0 }
 0xde2   :  { %v4338_v15 = vpop.xlane.xlu1 %4337 }
 0xde3   :  { %v4360_v8 = vmul.f32 %v4338_v15, %v9445_v19 }
 0xde5   :  { %v8992_v54 = vsub.f32 %v8929_v47, %v4360_v8 }
 0xde7   :  { %v4384_v48 = vmul.f32 %v8992_v54, %v8992_v54 }
 0xde9   :  { %v4408_v52 = vsel %vm74_vm0, %v4384_v48, 0.0  ;;  %3923 = vadd.xlane.f32.xlu0 %v3922_v59 }
 0xdea   :  { %4409 = vadd.xlane.f32.xlu1 %v4408_v52 }
 0xdf1   :  { %3956 = vadd.xlane.f32.xlu0 %v3955_v17  ;;  %v9031_v17 = vperm.slane %v8901_v13, 2 }
 0xdf2   :  { %3971 = vadd.xlane.f32.xlu1 %v3970_v51 }
 0xdf9   :  { %3977 = vadd.xlane.f32.xlu0 %v3976_v3 }
 0xdfa   :  { %3938 = vadd.xlane.f32.xlu1 %v3937_v4 }
 0xe02   :  { %3959 = vadd.xlane.f32.xlu1 %v3958_v61 }
 0xe1c   :  { %v4392_v20 = vpop.xlane.xlu2 %4391 }
 0xe1d   :  { %v4426_v55 = vmul.f32 %v4392_v20, %v9445_v19  ;;  %v9035_v20 = vperm.slane %v8901_v13, 3 }
 0xe1f   :  { %v4438_v58 = vadd.f32 1e-05, %v4426_v55 }
 0xe21   :  { %5736 = vrsqrt.f32 %v4438_v58  ;;  %vm4456_vm15 = vweird.f32 %v4438_v58 }
 0xe24   :  { %v4341_v41 = vpop.xlane.xlu2 %4340  ;;  %v4395_v27 = vpop.xlane.xlu0 %4394 }
 0xe25   :  { %v4361_v44 = vmul.f32 %v4341_v41, %v9445_v19  ;;  %v4427_v36 = vmul.f32 %v4395_v27, %v9445_v19 }
 0xe27   :  { %v5737_v24 = vpop.eup %5736  ;;  %v9019_v12 = vsub.f32 %v8943_v40, %v4361_v44  ;;  %v4439_v30 = vadd.f32 1e-05, %v4427_v36 }
 0xe28   :  { %v4451_v26 = vmul.f32 %v5737_v24, %v4438_v58  ;;  %vm4457_vm14 = vweird.f32 %v5737_v24  ;;  %v9457_v58 = vld [vmem:[#allocation30_spill] sm:$0xff] }
 0xe29   :  { %5738 = vrsqrt.f32 %v4439_v30  ;;  %v4385_v39 = vmul.f32 %v9019_v12, %v9019_v12  ;;  %vm4458_vm1 = vmor %vm4456_vm15, %vm4457_vm14  ;;  %vm4466_vm3 = vweird.f32 %v4439_v30  ;;  %v3940_v37 = vsel %vm702_vm11, %v9457_v58, 0.0 }
 0xe2a   :  { %v4452_v11 = vmul.f32 %v5737_v24, %v4451_v26 }
 0xe2b   :  { %v4411_v29 = vsel %vm74_vm0, %v4385_v39, 0.0 }
 0xe2c   :  { %v4453_v16 = vmul.f32 0.5, %v4452_v11  ;;  %4412 = vadd.xlane.f32.xlu2 %v4411_v29  ;;  %v4398_v14 = vpop.xlane.xlu0 %4397  ;;  %v9027_v48 = vpop.xlane.xlu2 %3932 }
 0xe2d   :  { %v4428_v42 = vmul.f32 %v4398_v14, %v9445_v19 }
 0xe2e   :  { %v4454_v28 = vsub.f32 1.5, %v4453_v16 }
 0xe2f   :  { %v5739_v56 = vpop.eup %5738  ;;  %v4440_v38 = vadd.f32 1e-05, %v4428_v42 }
 0xe30   :  { %v4455_v62 = vmul.f32 %v5737_v24, %v4454_v28  ;;  %v4461_v40 = vmul.f32 %v5739_v56, %v4439_v30  ;;  %vm4467_vm2 = vweird.f32 %v5739_v56  ;;  %v3973_v28 = vsel %vm702_vm11, %v8862_v21, 0.0 }
 0xe31   :  { %5740 = vrsqrt.f32 %v4440_v38  ;;  %vm4468_vm4 = vmor %vm4466_vm3, %vm4467_vm2  ;;  %vm4476_vm6 = vweird.f32 %v4440_v38 }
 0xe32   :  { %v4462_v31 = vmul.f32 %v5739_v56, %v4461_v40  ;;  %v4459_v15 = vsel %vm4458_vm1, %v5737_v24, %v4455_v62 }
 0xe33   :  { %v4570_v51 = vmul.f32 %v4459_v15, %v8935_v34 }
 0xe34   :  { %v4463_v8 = vmul.f32 0.5, %v4462_v31  ;;  %v4401_v23 = vpop.xlane.xlu1 %4400  ;;  %3920 = vadd.xlane.f32.xlu2 %v3919_v9  ;;  %v3915_v34 = vpop.xlane.xlu0 %3914 }
 0xe35   :  { %v4429_v59 = vmul.f32 %v4401_v23, %v9445_v19  ;;  %v4583_v50 = vmul.f32 %v9031_v17, %v4570_v51 }
 0xe36   :  { %v4464_v52 = vsub.f32 1.5, %v4463_v8 }
 0xe37   :  { %v5741_v46 = vpop.eup %5740  ;;  %v4441_v3 = vadd.f32 1e-05, %v4429_v59  ;;  %v4596_v26 = vadd.f32 %v9035_v20, %v4583_v50 }
 0xe38   :  { %v4465_v7 = vmul.f32 %v5739_v56, %v4464_v52  ;;  %v4471_v4 = vmul.f32 %v5741_v46, %v4440_v38  ;;  %vm4477_vm5 = vweird.f32 %v5741_v46 }
 0xe39   :  { %5742 = vrsqrt.f32 %v4441_v3  ;;  %vm4478_vm7 = vmor %vm4476_vm6, %vm4477_vm5  ;;  %vm4486_vm9 = vweird.f32 %v4441_v3 }
 0xe3a   :  { %v4469_v25 = vsel %vm4468_vm4, %v5739_v56, %v4465_v7  ;;  %v4472_v61 = vmul.f32 %v5741_v46, %v4471_v4 }
 0xe3b   :  { %v4571_v55 = vmul.f32 %v4469_v25, %v8945_v6 }
 0xe3c   :  { %v4473_v41 = vmul.f32 0.5, %v4472_v61  ;;  %3941 = vadd.xlane.f32.xlu2 %v3940_v37  ;;  %v4404_v27 = vpop.xlane.xlu2 %4403  ;;  %v9045_v16 = vpop.xlane.xlu1 %3917 }
 0xe3d   :  { %v4584_v44 = vmul.f32 %v9031_v17, %v4571_v55  ;;  %v4430_v36 = vmul.f32 %v4404_v27, %v9445_v19  ;;  %v9458_v27 = vld [vmem:[#allocation35_spill] sm:$0xff] }
 0xe3e   :  { %v4474_v24 = vsub.f32 1.5, %v4473_v41 }
 0xe3f   :  { %v5743_v30 = vpop.eup %5742  ;;  %v4597_v39 = vadd.f32 %v9035_v20, %v4584_v44  ;;  %v4442_v11 = vadd.f32 1e-05, %v4430_v36 }
 0xe40   :  { %v4475_v29 = vmul.f32 %v5741_v46, %v4474_v24  ;;  %v4481_v6 = vmul.f32 %v5743_v30, %v4441_v3  ;;  %vm4487_vm8 = vweird.f32 %v5743_v30 }
 0xe41   :  { %v4608_v14 = vpack.c.bf16 %v4597_v39, %v4596_v26  ;;  %5744 = vrsqrt.f32 %v4442_v11  ;;  %vm4488_vm10 = vmor %vm4486_vm9, %vm4487_vm8  ;;  %vm4496_vm12 = vweird.f32 %v4442_v11  ;;  %v9459_v26 = vld [vmem:[#allocation39_spill] sm:$0xff]  ;;  %vm4805_vm8 = vcmask 253952  }
 0xe42   :  { %v4482_v42 = vmul.f32 %v5743_v30, %v4481_v6  ;;  %v4479_v56 = vsel %vm4478_vm7, %v5741_v46, %v4475_v29 }
 0xe43   :  { %5168 = vmatmul.msk.bf16.vlgmr.msrb.gmra.mxu1 %vm74_vm0, %v4608_v14  ;;  %v4572_v15 = vmul.f32 %v4479_v56, %v8953_v57 }
 0xe44   :  { %v4483_v62 = vmul.f32 0.5, %v4482_v42  ;;  %3974 = vadd.xlane.f32.xlu2 %v3973_v28  ;;  %v4407_v40 = vpop.xlane.xlu0 %4406  ;;  %v3951_v21 = vpop.xlane.xlu1 %3950 }
 0xe45   :  { %v4431_v31 = vmul.f32 %v4407_v40, %v9445_v19  ;;  %v4585_v51 = vmul.f32 %v9031_v17, %v4572_v15  ;;  %v3954_v15 = vpop.xlane.xlu2 %3953 }
 0xe46   :  { %v4484_v2 = vsub.f32 1.5, %v4483_v62 }
 0xe47   :  { %v5745_v9 = vpop.eup %5744  ;;  %v4443_v8 = vadd.f32 1e-05, %v4431_v31  ;;  %v4598_v61 = vadd.f32 %v9035_v20, %v4585_v51  ;;  %v4119_v31 = vpop.f32.mrf.mxu0 }
 0xe48   :  { %v4485_v38 = vmul.f32 %v5743_v30, %v4484_v2  ;;  %v4491_v23 = vmul.f32 %v5745_v9, %v4442_v11  ;;  %vm4497_vm11 = vweird.f32 %v5745_v9 }
 0xe49   :  { %5746 = vrsqrt.f32 %v4443_v8  ;;  %vm4498_vm13 = vmor %vm4496_vm12, %vm4497_vm11  ;;  %vm4506_vm15 = vweird.f32 %v4443_v8 }
 0xe4a   :  { %v4489_v59 = vsel %vm4488_vm10, %v5743_v30, %v4485_v38  ;;  %v4492_v52 = vmul.f32 %v5745_v9, %v4491_v23  ;;  %5748 = vrcp.f32 %v3915_v34 }
 0xe4b   :  { %v4573_v46 = vmul.f32 %v4489_v59, %v8961_v53  ;;  %5750 = vrcp.f32 %v9027_v48 }
 0xe4c   :  { %v4493_v7 = vmul.f32 0.5, %v4492_v52  ;;  %v3936_v4 = vpop.xlane.xlu0 %3935  ;;  %5752 = vrcp.f32 %v3951_v21 }
 0xe4d   :  { %v4586_v57 = vmul.f32 %v9031_v17, %v4573_v46 }
 0xe4e   :  { %v4494_v25 = vsub.f32 1.5, %v4493_v7 }
 0xe4f   :  { %v5747_v3 = vpop.eup %5746  ;;  %v4599_v50 = vadd.f32 %v9035_v20, %v4586_v57  ;;  %v9461_v57 = vld [vmem:[#allocation36_spill] sm:$0xff] }
 0xe50   :  { %v4495_v55 = vmul.f32 %v5745_v9, %v4494_v25  ;;  %v4501_v58 = vmul.f32 %v5747_v3, %v4443_v8  ;;  %v5749_v53 = vpop.eup %5748  ;;  %vm4507_vm14 = vweird.f32 %v5747_v3 }
 0xe51   :  { %v4609_v37 = vpack.c.bf16 %v4599_v50, %v4598_v61  ;;  %v5751_v41 = vpop.eup %5750  ;;  %v4131_v44 = vmul.f32 %v5749_v53, %v9458_v27  ;;  %vm4508_vm1 = vmor %vm4506_vm15, %vm4507_vm14 }
 0xe52   :  { %v4502_v34 = vmul.f32 %v5747_v3, %v4501_v58  ;;  %v5753_v48 = vpop.eup %5752  ;;  %v4499_v36 = vsel %vm4498_vm13, %v5745_v9, %v4495_v55  ;;  %v4137_v39 = vmul.f32 %v5751_v41, %v9459_v26  ;;  %v4121_v41 = vpop.f32.mrf.mxu0 }
 0xe53   :  { %5169 = vmatmul.msk.bf16.gmra.mxu1 %vm74_vm0, %v4609_v37  ;;  %v4143_v29 = vmul.f32 %v5753_v48, %v8844_v0  ;;  %v4574_v14 = vmul.f32 %v4499_v36, %v8969_v18  ;;  %v4155_v11 = vmul.f32 %v4131_v44, %v9435_v22 }
 0xe54   :  { %v4503_v24 = vmul.f32 0.5, %v4502_v34  ;;  %v3969_v30 = vpop.xlane.xlu0 %3968  ;;  %v4161_v28 = vmul.f32 %v4137_v39, %v9434_v49 }
 0xe55   :  { %5754 = vrcp.f32 %v3969_v30  ;;  %v4173_v56 = vmul.f32 %v4143_v29, %v9436_v45  ;;  %v4587_v0 = vmul.f32 %v9031_v17, %v4574_v14  ;;  %v5290_v29 = vld [vmem:[%s9245_s5 + $0x98] sm:$0xff] }
 0xe56   :  { %v4504_v6 = vsub.f32 1.5, %v4503_v24  ;;  %5756 = vrcp.f32 %v3936_v4  ;;  %v4167_v9 = vadd.f32 %v4161_v28, %v4155_v11  ;;  %4771 = vmatpush.bf16.msrb.mxu3 %v5290_v29 }
 0xe57   :  { %5758 = vrcp.f32 %v9045_v16  ;;  %v4600_v52 = vadd.f32 %v9035_v20, %v4587_v0  ;;  %v9460_v16 = vld [vmem:[#allocation40_spill] sm:$0xff] }
 0xe58   :  { %v4505_v42 = vmul.f32 %v5747_v3, %v4504_v6  ;;  %v4179_v23 = vadd.f32 %v4173_v56, %v4167_v9  ;;  %5760 = vrcp.f32 %v3954_v15  ;;  %v5289_v6 = vld [vmem:[%s9245_s5 + $0x90] sm:$0xff]  ;;  %v5287_v56 = vld [vmem:[%s9245_s5 + $0x80] sm:$0xff] }
 0xe5a   :  { %v4509_v62 = vsel %vm4508_vm1, %v5747_v3, %v4505_v42  ;;  %4772 = vmatpush.bf16.msrb.mxu3 %v5289_v6  ;;  %v5288_v42 = vld [vmem:[%s9245_s5 + $0x88] sm:$0xff] }
 0xe5b   :  { %v5755_v40 = vpop.eup %5754  ;;  %v4575_v2 = vmul.f32 %v4509_v62, %v8977_v32 }
 0xe5c   :  { %v4149_v18 = vmul.f32 %v5755_v40, %v4119_v31  ;;  %v5757_v46 = vpop.eup %5756  ;;  %v3924_v11 = vpop.xlane.xlu0 %3923 }
 0xe5d   :  { %v4410_v38 = vpop.xlane.xlu1 %4409  ;;  %v4588_v8 = vmul.f32 %v9031_v17, %v4575_v2  ;;  %v5759_v7 = vpop.eup %5758  ;;  %v4138_v4 = vmul.f32 %v5757_v46, %v9460_v16  ;;  %v5286_v2 = vld [vmem:[%s9245_s5 + $0x78] sm:$0xff] }
 0xe5e   :  { %v4185_v59 = vmul.f32 %v4149_v18, %v9437_v10  ;;  %v4132_v25 = vmul.f32 %v5759_v7, %v9461_v57  ;;  %v5761_v61 = vpop.eup %5760  ;;  %v4432_v39 = vmul.f32 %v4410_v38, %v9445_v19  ;;  %4773 = vmatpush.bf16.msrb.mxu3 %v5288_v42  ;;  %v5285_v38 = vld [vmem:[%s9245_s5 + $0x70] sm:$0xff]  ;;  %v5283_v7 = vld [vmem:[%s9245_s5 + $0x60] sm:$0xff] }
 0xe5f   :  { %v4601_v21 = vadd.f32 %v9035_v20, %v4588_v8  ;;  %v4162_v50 = vmul.f32 %v4138_v4, %v9434_v49  ;;  %v4144_v58 = vmul.f32 %v5761_v61, %v8856_v35  ;;  %v4124_v4 = vpop.f32.mrf.mxu0 }
 0xe60   :  { %v4191_v32 = vadd.f32 %v4185_v59, %v4179_v23  ;;  %v4156_v55 = vmul.f32 %v4132_v25, %v9435_v22  ;;  %v4444_v35 = vadd.f32 1e-05, %v4432_v39  ;;  %v5284_v59 = vld [vmem:[%s9245_s5 + $0x68] sm:$0xff] }
 0xe61   :  { %v4610_v51 = vpack.c.bf16 %v4601_v21, %v4600_v52  ;;  %v4174_v34 = vmul.f32 %v4144_v58, %v9436_v45 }
 0xe62   :  { %4197 = vst.msk [vmem:[#allocation2 + $0x40] sm:$0xff] %vm74_vm0, %v4191_v32  ;;  %v4168_v53 = vadd.f32 %v4162_v50, %v4156_v55  ;;  %4774 = vmatpush.bf16.msrb.mxu3 %v5287_v56  ;;  %vm4516_vm3 = vweird.f32 %v4444_v35 }
 0xe63   :  { %5170 = vmatmul.msk.bf16.gmra.mxu1 %vm74_vm0, %v4610_v51 }
 0xe64   :  { %v4180_v27 = vadd.f32 %v4174_v34, %v4168_v53  ;;  %v3957_v9 = vpop.xlane.xlu0 %3956 }
 0xe65   :  { %v3972_v3 = vpop.xlane.xlu1 %3971 }
 0xe66   :  { %5762 = vrcp.f32 %v3972_v3  ;;  %4775 = vmatpush.bf16.msrb.mxu3 %v5286_v2 }
 0xe67   :  { %5764 = vrsqrt.f32 %v4444_v35 }
 0xe69   :  { %v4209_v24 = vld [vmem:[#allocation2 + $0x40] sm:$0xff] }
 0xe6a   :  { %4776 = vmatpush.bf16.msrb.mxu3 %v5285_v38 }
 0xe6c   :  { %v5763_v37 = vpop.eup %5762  ;;  %v3978_v51 = vpop.xlane.xlu0 %3977 }
 0xe6d   :  { %v4150_v48 = vmul.f32 %v5763_v37, %v4121_v41  ;;  %v5765_v14 = vpop.eup %5764  ;;  %v3939_v0 = vpop.xlane.xlu1 %3938 }
 0xe6e   :  { %v4511_v28 = vmul.f32 %v5765_v14, %v4444_v35  ;;  %4777 = vmatpush.bf16.msrb.mxu3 %v5284_v59  ;;  %vm4517_vm2 = vweird.f32 %v5765_v14 }
 0xe6f   :  { %v4186_v44 = vmul.f32 %v4150_v48, %v9437_v10  ;;  %vm4518_vm4 = vmor %vm4516_vm3, %vm4517_vm2  ;;  %v9462_v48 = vld [vmem:[#allocation38_spill] sm:$0xff] }
 0xe70   :  { %v4512_v62 = vmul.f32 %v5765_v14, %v4511_v28 }
 0xe71   :  { %v4192_v36 = vadd.f32 %v4186_v44, %v4180_v27 }
 0xe72   :  { %v4513_v15 = vmul.f32 0.5, %v4512_v62  ;;  %4778 = vmatpush.bf16.msrb.mxu3 %v5283_v7 }
 0xe73   :  { %4198 = vst.msk [vmem:[#allocation2 + $0x48] sm:$0xff] %vm74_vm0, %v4192_v36  ;;  %v9463_v36 = vld [vmem:[#allocation37_spill] sm:$0xff] }
 0xe74   :  { %v4514_v8 = vsub.f32 1.5, %v4513_v15 }
 0xe75   :  { %v3960_v46 = vpop.xlane.xlu1 %3959 }
 0xe76   :  { %v4515_v21 = vmul.f32 %v5765_v14, %v4514_v8 }
 0xe78   :  { %v4519_v57 = vsel %vm4518_vm4, %v5765_v14, %v4515_v21  ;;  %v5809_v21 = vld [vmem:[%s9243_s3 + $0x2] sm:$0x3] }
 0xe79   :  { %v4576_v58 = vmul.f32 %v4519_v57, %v8992_v54 }
 0xe7a   :  { %v4210_v30 = vld [vmem:[#allocation2 + $0x48] sm:$0xff] }
 0xe7b   :  { %v4217_v26 = vpack.c.bf16 %v4210_v30, %v4209_v24  ;;  %v4589_v39 = vmul.f32 %v9031_v17, %v4576_v58 }
 0xe7d   :  { %5154 = vmatmul.msk.bf16.gmra.mxu2 %vm74_vm0, %v4217_v26 }
 0xe9f   :  { %v4413_v40 = vpop.xlane.xlu2 %4412 }
 0xea0   :  { %v4433_v31 = vmul.f32 %v4413_v40, %v9445_v19  ;;  %v4602_v40 = vadd.f32 %v9035_v20, %v4589_v39 }
 0xea2   :  { %v4445_v18 = vadd.f32 1e-05, %v4433_v31 }
 0xea4   :  { %5766 = vrsqrt.f32 %v4445_v18  ;;  %vm4526_vm6 = vweird.f32 %v4445_v18 }
 0xea5   :  { %5768 = vrcp.f32 %v3924_v11  ;;  %v4126_v11 = vpop.f32.mrf.mxu0 }
 0xea7   :  { %v3921_v23 = vpop.xlane.xlu2 %3920 }
 0xea8   :  { %5770 = vrcp.f32 %v3921_v23 }
 0xea9   :  { %5772 = vrcp.f32 %v3939_v0 }
 0xeaa   :  { %v5767_v52 = vpop.eup %5766  ;;  %5774 = vrcp.f32 %v3960_v46  ;;  %v9135_v46 = vperm.slane %v5809_v21, 1 }
 0xeab   :  { %v4521_v32 = vmul.f32 %v5767_v52, %v4445_v18  ;;  %5776 = vrcp.f32 %v3978_v51  ;;  %v5769_v61 = vpop.eup %5768  ;;  %vm4527_vm5 = vweird.f32 %v5767_v52 }
 0xeac   :  { %vm4528_vm7 = vmor %vm4526_vm6, %vm4527_vm5  ;;  %v4134_v27 = vmul.f32 %v5769_v61, %v9462_v48 }
 0xead   :  { %v4522_v16 = vmul.f32 %v5767_v52, %v4521_v32 }
 0xeae   :  { %v5771_v55 = vpop.eup %5770  ;;  %v4158_v28 = vmul.f32 %v4134_v27, %v9435_v22 }
 0xeaf   :  { %v4523_v25 = vmul.f32 0.5, %v4522_v16  ;;  %v3942_v3 = vpop.xlane.xlu2 %3941  ;;  %v5773_v53 = vpop.eup %5772  ;;  %v4133_v24 = vmul.f32 %v5771_v55, %v9463_v36 }
 0xeb0   :  { %5778 = vrcp.f32 %v3942_v3  ;;  %v5775_v41 = vpop.eup %5774  ;;  %v4139_v35 = vmul.f32 %v5773_v53, %v8771_v43 }
 0xeb1   :  { %v4524_v50 = vsub.f32 1.5, %v4523_v25  ;;  %5780 = vrcp.f32 %v3957_v9  ;;  %v5777_v34 = vpop.eup %5776  ;;  %v4146_v54 = vmul.f32 %v5775_v41, %v8875_v60  ;;  %v4157_v62 = vmul.f32 %v4133_v24, %v9435_v22 }
 0xeb2   :  { %v4152_v56 = vmul.f32 %v5777_v34, %v4126_v11 }
 0xeb3   :  { %v4525_v37 = vmul.f32 %v5767_v52, %v4524_v50  ;;  %v4176_v31 = vmul.f32 %v4146_v54, %v9436_v45 }
 0xeb4   :  { %v4188_v9 = vmul.f32 %v4152_v56, %v9437_v10 }
 0xeb5   :  { %v4529_v44 = vsel %vm4528_vm7, %v5767_v52, %v4525_v37 }
 0xeb6   :  { %v5779_v30 = vpop.eup %5778  ;;  %v4577_v26 = vmul.f32 %v4529_v44, %v9019_v12 }
 0xeb7   :  { %v4140_v29 = vmul.f32 %v5779_v30, %v8788_v33  ;;  %v3975_v6 = vpop.xlane.xlu2 %3974  ;;  %v5781_v14 = vpop.eup %5780  ;;  %v4163_v33 = vmul.f32 %v4139_v35, %v9434_v49 }
 0xeb8   :  { %5782 = vrcp.f32 %v3975_v6  ;;  %v4590_v42 = vmul.f32 %v9031_v17, %v4577_v26  ;;  %v4145_v60 = vmul.f32 %v5781_v14, %v8866_v63  ;;  %v9464_v26 = vld [vmem:[#allocation24_spill] sm:$0xff]  ;;  %v9465_v6 = vld [vmem:[#allocation25_spill] sm:$0xff] }
 0xeb9   :  { %v4164_v12 = vmul.f32 %v4140_v29, %v9434_v49  ;;  %v4169_v18 = vadd.f32 %v4163_v33, %v4157_v62  ;;  %v4802_v33 = vperm.slane %v8901_v13, 5 }
 0xeba   :  { %v4603_v43 = vadd.f32 %v9035_v20, %v4590_v42  ;;  %v4175_v22 = vmul.f32 %v4145_v60, %v9436_v45 }
 0xebb   :  { %v4170_v2 = vadd.f32 %v4164_v12, %v4158_v28 }
 0xebc   :  { %v4611_v0 = vpack.c.bf16 %v4603_v43, %v4602_v40  ;;  %v4181_v63 = vadd.f32 %v4175_v22, %v4169_v18 }
 0xebd   :  { %v4182_v15 = vadd.f32 %v4176_v31, %v4170_v2 }
 0xebe   :  { %v5783_v38 = vpop.eup %5782  ;;  %5171 = vmatmul.msk.bf16.gmra.mxu1 %vm74_vm0, %v4611_v0  ;;  %v9466_v0 = vld [vmem:[#allocation26_spill] sm:$0xff] }
 0xebf   :  { %v4194_v8 = vadd.f32 %v4188_v9, %v4182_v15  ;;  %v4151_v23 = vmul.f32 %v5783_v38, %v4124_v4 }
 0xec0   :  { %v4659_v59 = vpop.f32.mrf.mxu1 }
 0xec1   :  { %4200 = vst.msk [vmem:[#allocation2 + $0x58] sm:$0xff] %vm74_vm0, %v4194_v8  ;;  %v4187_v49 = vmul.f32 %v4151_v23, %v9437_v10  ;;  %v4660_v32 = vadd.f32 %v4659_v59, %v9135_v46  ;;  %v9467_v59 = vld [vmem:[#allocation27_spill] sm:$0xff] }
 0xec3   :  { %v4193_v52 = vadd.f32 %v4187_v49, %v4181_v63  ;;  %v4689_v7 = vmax.f32 %v4660_v32, 0.0 }
 0xec5   :  { %4199 = vst.msk [vmem:[#allocation2 + $0x50] sm:$0xff] %vm74_vm0, %v4193_v52 }
 0xec8   :  { %v4661_v45 = vpop.f32.mrf.mxu1  ;;  %v4212_v57 = vld [vmem:[#allocation2 + $0x58] sm:$0xff] }
 0xec9   :  { %v4662_v51 = vadd.f32 %v4661_v45, %v9135_v46 }
 0xecb   :  { %v4690_v16 = vmax.f32 %v4662_v51, 0.0 }
 0xecc   :  { %v4211_v4 = vld [vmem:[#allocation2 + $0x50] sm:$0xff] }
 0xecd   :  { %v4701_v25 = vpack.c.bf16 %v4690_v16, %v4689_v7  ;;  %v4218_v10 = vpack.c.bf16 %v4212_v57, %v4211_v4 }
 0xecf   :  { %5155 = vmatmul.msk.bf16.gmra.mxu2 %vm74_vm0, %v4218_v10  ;;  %4779 = vmatmul.bf16.vlgmr.msrb.gmra.mxu3 %v4701_v25 }
 0xed0   :  { %v4664_v3 = vpop.f32.mrf.mxu1 }
 0xed1   :  { %v4665_v61 = vadd.f32 %v4664_v3, %v9135_v46 }
 0xed3   :  { %v4691_v58 = vmax.f32 %v4665_v61, 0.0  ;;  %v5292_v61 = vld [vmem:[%s9246_s6 + $0x8] sm:$0xff] }
 0xed4   :  { %4837 = vmatpush.bf16.msra.mxu0 %v5292_v61 }
 0xed8   :  { %v4666_v50 = vpop.f32.mrf.mxu1 }
 0xed9   :  { %v4667_v55 = vadd.f32 %v4666_v50, %v9135_v46  ;;  %v5291_v50 = vld [vmem:[%s9246_s6] sm:$0xff] }
 0xeda   :  { %4838 = vmatpush.bf16.msra.mxu0 %v5291_v50 }
 0xedb   :  { %v4692_v53 = vmax.f32 %v4667_v55, 0.0 }
 0xedd   :  { %v4702_v37 = vpack.c.bf16 %v4692_v53, %v4691_v58 }
 0xedf   :  { %4783 = vmatmul.bf16.gmra.mxu3 %v4702_v37 }
 0xee0   :  { %v4669_v41 = vpop.f32.mrf.mxu1 }
 0xee1   :  { %v4670_v34 = vadd.f32 %v4669_v41, %v9135_v46 }
 0xee3   :  { %v4693_v44 = vmax.f32 %v4670_v34, 0.0 }
 0xee8   :  { %v4671_v48 = vpop.f32.mrf.mxu1 }
 0xee9   :  { %v4672_v27 = vadd.f32 %v4671_v48, %v9135_v46 }
 0xeeb   :  { %v4694_v36 = vmax.f32 %v4672_v27, 0.0 }
 0xeed   :  { %v4703_v24 = vpack.c.bf16 %v4694_v36, %v4693_v44 }
 0xeef   :  { %4786 = vmatmul.bf16.gmra.mxu3 %v4703_v24 }
 0xf00   :  { %v4283_v30 = vpop.f32.mrf.mxu2 }
 0xf01   :  { %v4301_v39 = vadd.f32 %v4283_v30, %v9464_v26 }
 0xf03   :  { %v4314_v35 = vadd.f32 %v8904_v1, %v4301_v39 }
 0xf05   :  { %v4342_v54 = vsel %vm74_vm0, %v4314_v35, 0.0 }
 0xf06   :  { %4343 = vadd.xlane.f32.xlu1 %v4342_v54 }
 0xf08   :  { %v4285_v29 = vpop.f32.mrf.mxu2 }
 0xf09   :  { %v4302_v14 = vadd.f32 %v4285_v29, %v9465_v6 }
 0xf0b   :  { %v4315_v11 = vadd.f32 %v8904_v1, %v4302_v14  ;;  %v5300_v14 = vld [vmem:[%s9246_s6 + $0x48] sm:$0xff] }
 0xf0c   :  { %4912 = vmatpush.bf16.msra.mxu2 %v5300_v14 }
 0xf0d   :  { %v4345_v42 = vsel %vm74_vm0, %v4315_v11, 0.0 }
 0xf0e   :  { %4346 = vadd.xlane.f32.xlu2 %v4345_v42 }
 0xf3b   :  { %v4674_v28 = vpop.f32.mrf.mxu1 }
 0xf3c   :  { %v4675_v56 = vadd.f32 %v4674_v28, %v9135_v46  ;;  %v5299_v28 = vld [vmem:[%s9246_s6 + $0x40] sm:$0xff] }
 0xf3d   :  { %4913 = vmatpush.bf16.msra.mxu2 %v5299_v28 }
 0xf3e   :  { %v4695_v40 = vmax.f32 %v4675_v56, 0.0 }
 0xf43   :  { %v4676_v62 = vpop.f32.mrf.mxu1 }
 0xf44   :  { %v4677_v12 = vadd.f32 %v4676_v62, %v9135_v46 }
 0xf46   :  { %v4696_v43 = vmax.f32 %v4677_v12, 0.0 }
 0xf48   :  { %v4704_v60 = vpack.c.bf16 %v4696_v43, %v4695_v40 }
 0xf4a   :  { %4789 = vmatmul.bf16.gmra.mxu3 %v4704_v60 }
 0xf52   :  { %v4288_v31 = vpop.f32.mrf.mxu2  ;;  %v4780_v2 = vpop.f32.mrf.mxu3 }
 0xf53   :  { %v4303_v9 = vadd.f32 %v4288_v31, %v9466_v0  ;;  %v4800_v18 = vadd.f32 %v4780_v2, %v8908_v5 }
 0xf55   :  { %v4316_v15 = vadd.f32 %v8904_v1, %v4303_v9  ;;  %v4803_v38 = vadd.f32 %v4802_v33, %v4800_v18 }
 0xf57   :  { %4806 = vst.msk [vmem:[#allocation3] sm:$0x1] %vm4805_vm8, %v4803_v38  ;;  %v4348_v22 = vsel %vm74_vm0, %v4316_v15, 0.0 }
 0xf58   :  { %4349 = vadd.xlane.f32.xlu0 %v4348_v22 }
 0xf5a   :  { %v4290_v8 = vpop.f32.mrf.mxu2  ;;  %v4782_v23 = vpop.f32.mrf.mxu3 }
 0xf5b   :  { %v4304_v63 = vadd.f32 %v4290_v8, %v9467_v59 }
 0xf5d   :  { %v4317_v13 = vadd.f32 %v8904_v1, %v4304_v63 }
 0xf5f   :  { %v4351_v49 = vsel %vm74_vm0, %v4317_v13, 0.0 }
 0xf60   :  { %4352 = vadd.xlane.f32.xlu1 %v4351_v49 }
 0xf62   :  { %v4784_v52 = vpop.f32.mrf.mxu3 }
 0xf6a   :  { %v4785_v5 = vpop.f32.mrf.mxu3 }
 0xf6b   :  { %v5298_v5 = vld [vmem:[%s9246_s6 + $0x38] sm:$0xff] }
 0xf6c   :  { %4914 = vmatpush.bf16.msra.mxu2 %v5298_v5 }
 0xf72   :  { %v4787_v21 = vpop.f32.mrf.mxu3 }
 0xf73   :  { %v5297_v21 = vld [vmem:[%s9246_s6 + $0x30] sm:$0xff] }
 0xf74   :  { %4915 = vmatpush.bf16.msra.mxu2 %v5297_v21 }
 0xf79   :  { %v4344_v32 = vpop.xlane.xlu1 %4343 }
 0xf7a   :  { %v4362_v45 = vmul.f32 %v4344_v32, %v9445_v19  ;;  %v4788_v51 = vpop.f32.mrf.mxu3  ;;  %v5296_v32 = vld [vmem:[%s9246_s6 + $0x28] sm:$0xff] }
 0xf7b   :  { %4916 = vmatpush.bf16.msra.mxu2 %v5296_v32  ;;  %v5294_v51 = vld [vmem:[%s9246_s6 + $0x18] sm:$0xff] }
 0xf7c   :  { %v4374_v7 = vsub.f32 %v4314_v35, %v4362_v45  ;;  %v5295_v45 = vld [vmem:[%s9246_s6 + $0x20] sm:$0xff] }
 0xf7e   :  { %v4386_v16 = vmul.f32 %v4374_v7, %v4374_v7 }
 0xf7f   :  { %4917 = vmatpush.bf16.msra.mxu2 %v5295_v45 }
 0xf80   :  { %v4414_v4 = vsel %vm74_vm0, %v4386_v16, 0.0 }
 0xf81   :  { %4415 = vadd.xlane.f32.xlu2 %v4414_v4  ;;  %v4347_v57 = vpop.xlane.xlu2 %4346 }
 0xf82   :  { %v4363_v25 = vmul.f32 %v4347_v57, %v9445_v19 }
 0xf83   :  { %4918 = vmatpush.bf16.msra.mxu2 %v5294_v51 }
 0xf84   :  { %v4375_v10 = vsub.f32 %v4315_v11, %v4363_v25 }
 0xf86   :  { %v4387_v1 = vmul.f32 %v4375_v10, %v4375_v10 }
 0xf88   :  { %v4417_v3 = vsel %vm74_vm0, %v4387_v1, 0.0 }
 0xf89   :  { %4418 = vadd.xlane.f32.xlu0 %v4417_v3 }
 0xfcb   :  { %v4350_v55 = vpop.xlane.xlu0 %4349 }
 0xfcc   :  { %v4364_v58 = vmul.f32 %v4350_v55, %v9445_v19 }
 0xfcd   :  { %v4790_v53 = vpop.f32.mrf.mxu3 }
 0xfce   :  { %v9173_v37 = vsub.f32 %v4316_v15, %v4364_v58  ;;  %v4801_v41 = vadd.f32 %v4790_v53, %v8929_v47  ;;  %v5308_v58 = vld [vmem:[%s9247_s7] ss:$0 sm:$0xff] }
 0xfd0   :  { %v4804_v34 = vadd.f32 %v4802_v33, %v4801_v41  ;;  %v4388_v48 = vmul.f32 %v9173_v37, %v9173_v37 }
 0xfd2   :  { %4807 = vst.msk [vmem:[#allocation3 + $0x1] sm:$0x1] %vm4805_vm8, %v4804_v34  ;;  %v4420_v27 = vsel %vm74_vm0, %v4388_v48, 0.0 }
 0xfd3   :  { %4421 = vadd.xlane.f32.xlu1 %v4420_v27  ;;  %v4353_v44 = vpop.xlane.xlu1 %4352 }
 0xfd4   :  { %v4365_v36 = vmul.f32 %v4353_v44, %v9445_v19 }
 0xfd5   :  { %v4792_v24 = vpop.f32.mrf.mxu3 }
 0xfd6   :  { %v9181_v30 = vsub.f32 %v4317_v13, %v4365_v36 }
 0xfd8   :  { %v4389_v26 = vmul.f32 %v9181_v30, %v9181_v30 }
 0xfd9   :  { %v4808_v39 = vld [vmem:[#allocation3] sm:$0x3] }
 0xfda   :  { %v4423_v47 = vsel %vm74_vm0, %v4389_v26, 0.0  ;;  %v4809_v35 = vpack.c.bf16 %v4808_v39, %v4808_v39 }
 0xfdb   :  { %4424 = vadd.xlane.f32.xlu2 %v4423_v47 }
 0xfdc   :  { %5230 = vmatmul.msk.bf16.vlgmr.msra.gmra.mxu0 %vm74_vm0, %v4809_v35 }
 0xff4   :  { %v4416_v54 = vpop.xlane.xlu2 %4415 }
 0xff5   :  { %v4434_v29 = vmul.f32 %v4416_v54, %v9445_v19 }
 0xff7   :  { %v4446_v6 = vadd.f32 1e-05, %v4434_v29 }
 0xff9   :  { %5784 = vrsqrt.f32 %v4446_v6  ;;  %vm4536_vm10 = vweird.f32 %v4446_v6 }
 0xffc   :  { %v4419_v11 = vpop.xlane.xlu0 %4418 }
 0xffd   :  { %v4435_v42 = vmul.f32 %v4419_v11, %v9445_v19 }
 0xfff   :  { %v5785_v56 = vpop.eup %5784  ;;  %v4447_v62 = vadd.f32 1e-05, %v4435_v42 }
0x1000   :  { %v4531_v12 = vmul.f32 %v5785_v56, %v4446_v6  ;;  %vm4537_vm9 = vweird.f32 %v5785_v56 }
0x1001   :  { %5786 = vrsqrt.f32 %v4447_v62  ;;  %vm4538_vm11 = vmor %vm4536_vm10, %vm4537_vm9  ;;  %vm4546_vm13 = vweird.f32 %v4447_v62 }
0x1002   :  { %v4532_v40 = vmul.f32 %v5785_v56, %v4531_v12 }
0x1004   :  { %v4533_v43 = vmul.f32 0.5, %v4532_v40 }
0x1006   :  { %v4534_v60 = vsub.f32 1.5, %v4533_v43 }
0x1007   :  { %v5787_v33 = vpop.eup %5786 }
0x1008   :  { %v4535_v31 = vmul.f32 %v5785_v56, %v4534_v60  ;;  %v4541_v2 = vmul.f32 %v5787_v33, %v4447_v62  ;;  %vm4547_vm12 = vweird.f32 %v5787_v33 }
0x1009   :  { %vm4548_vm14 = vmor %vm4546_vm13, %vm4547_vm12 }
0x100a   :  { %v4542_v0 = vmul.f32 %v5787_v33, %v4541_v2  ;;  %v4539_v9 = vsel %vm4538_vm11, %v5785_v56, %v4535_v31 }
0x100b   :  { %v4578_v38 = vmul.f32 %v4539_v9, %v4374_v7  ;;  %v5293_v7 = vld [vmem:[%s9246_s6 + $0x10] sm:$0xff] }
0x100c   :  { %v4543_v18 = vmul.f32 0.5, %v4542_v0  ;;  %4919 = vmatpush.bf16.msra.mxu2 %v5293_v7 }
0x100d   :  { %v4591_v59 = vmul.f32 %v9031_v17, %v4578_v38 }
0x100e   :  { %v4544_v15 = vsub.f32 1.5, %v4543_v18 }
0x100f   :  { %v4604_v13 = vadd.f32 %v9035_v20, %v4591_v59 }
0x1010   :  { %v4545_v22 = vmul.f32 %v5787_v33, %v4544_v15 }
0x1012   :  { %v4549_v8 = vsel %vm4548_vm14, %v5787_v33, %v4545_v22 }
0x1013   :  { %v4579_v23 = vmul.f32 %v4549_v8, %v4375_v10 }
0x1015   :  { %v4592_v63 = vmul.f32 %v9031_v17, %v4579_v23 }
0x1017   :  { %v4605_v49 = vadd.f32 %v9035_v20, %v4592_v63 }
0x1019   :  { %v4612_v52 = vpack.c.bf16 %v4605_v49, %v4604_v13 }
0x101b   :  { %5172 = vmatmul.msk.bf16.gmra.mxu1 %vm74_vm0, %v4612_v52 }
0x1046   :  { %v4422_v16 = vpop.xlane.xlu1 %4421 }
0x1047   :  { %v4436_v4 = vmul.f32 %v4422_v16, %v9445_v19 }
0x1049   :  { %v4448_v57 = vadd.f32 1e-05, %v4436_v4 }
0x104b   :  { %5788 = vrsqrt.f32 %v4448_v57  ;;  %vm4556_vm1 = vweird.f32 %v4448_v57 }
0x104e   :  { %v4425_v25 = vpop.xlane.xlu2 %4424 }
0x104f   :  { %v4437_v10 = vmul.f32 %v4425_v25, %v9445_v19 }
0x1051   :  { %v5789_v1 = vpop.eup %5788  ;;  %v4449_v3 = vadd.f32 1e-05, %v4437_v10 }
0x1052   :  { %v4551_v61 = vmul.f32 %v5789_v1, %v4448_v57  ;;  %vm4557_vm15 = vweird.f32 %v5789_v1 }
0x1053   :  { %5790 = vrsqrt.f32 %v4449_v3  ;;  %vm4558_vm2 = vmor %vm4556_vm1, %vm4557_vm15  ;;  %vm4566_vm4 = vweird.f32 %v4449_v3 }
0x1054   :  { %v4552_v50 = vmul.f32 %v5789_v1, %v4551_v61 }
0x1056   :  { %v4553_v55 = vmul.f32 0.5, %v4552_v50 }
0x1058   :  { %v4554_v53 = vsub.f32 1.5, %v4553_v55 }
0x1059   :  { %v5791_v41 = vpop.eup %5790  ;;  %v4840_v34 = vpop.f32.mrf.mxu0 }
0x105a   :  { %v4555_v48 = vmul.f32 %v5789_v1, %v4554_v53  ;;  %v4561_v27 = vmul.f32 %v5791_v41, %v4449_v3  ;;  %v4841_v44 = vadd.f32 %v5308_v58, %v4840_v34  ;;  %vm4567_vm3 = vweird.f32 %v5791_v41 }
0x105b   :  { %vm4568_vm5 = vmor %vm4566_vm4, %vm4567_vm3 }
0x105c   :  { %v4562_v36 = vmul.f32 %v5791_v41, %v4561_v27  ;;  %v4844_v19 = vmax.f32 %v4841_v44, 0.0  ;;  %v4559_v24 = vsel %vm4558_vm2, %v5789_v1, %v4555_v48 }
0x105d   :  { %v4580_v35 = vmul.f32 %v4559_v24, %v9173_v37 }
0x105e   :  { %v4563_v26 = vmul.f32 0.5, %v4562_v36  ;;  %v4845_v39 = vpack.c.bf16 %v4844_v19, %v4844_v19 }
0x105f   :  { %v4593_v11 = vmul.f32 %v9031_v17, %v4580_v35 }
0x1060   :  { %v4564_v47 = vsub.f32 1.5, %v4563_v26  ;;  %4920 = vmatmul.bf16.vlgmr.msra.gmra.mxu2 %v4845_v39 }
0x1061   :  { %v4842_v54 = vpop.f32.mrf.mxu0  ;;  %v4606_v28 = vadd.f32 %v9035_v20, %v4593_v11 }
0x1062   :  { %v4565_v29 = vmul.f32 %v5791_v41, %v4564_v47 }
0x1064   :  { %v4569_v6 = vsel %vm4568_vm5, %v5791_v41, %v4565_v29 }
0x1065   :  { %v4581_v14 = vmul.f32 %v4569_v6, %v9181_v30 }
0x1067   :  { %v4594_v42 = vmul.f32 %v9031_v17, %v4581_v14  ;;  %v5309_v17 = vld [vmem:[%s9247_s7 + $0x1] ss:$0 sm:$0xff]  ;;  %s4933_s7 = sshll.u32 %s9248_s8, 4  ;;  %s4934_s7 = int_to_ptr.hbm [resolvable:$true] %s4933_s7 }
0x1069   :  { %v4607_v56 = vadd.f32 %v9035_v20, %v4594_v42 }
0x106b   :  { %v4613_v62 = vpack.c.bf16 %v4607_v56, %v4606_v28 }
0x106d   :  { %5173 = vmatmul.msk.bf16.gmra.mxu1 %vm74_vm0, %v4613_v62 }
0x1098   :  { %v4679_v12 = vpop.f32.mrf.mxu1 }
0x1099   :  { %v4680_v37 = vadd.f32 %v4679_v12, %v9135_v46 }
0x109b   :  { %v4697_v60 = vmax.f32 %v4680_v37, 0.0 }
0x10a0   :  { %v4681_v40 = vpop.f32.mrf.mxu1 }
0x10a1   :  { %v4682_v43 = vadd.f32 %v4681_v40, %v9135_v46 }
0x10a3   :  { %v4698_v33 = vmax.f32 %v4682_v43, 0.0 }
0x10a5   :  { %v4705_v30 = vpack.c.bf16 %v4698_v33, %v4697_v60 }
0x10a7   :  { %4793 = vmatmul.bf16.gmra.mxu3 %v4705_v30 }
0x10e3   :  { %v4921_v31 = vpop.f32.mrf.mxu2 }
0x10e4   :  { %v4922_v2 = vadd.f32 %v5309_v17, %v4921_v31 }
0x10e6   :  { %4925 = vst [vmem:[#allocation4] sm:$0x3] %v4922_v2 }
0x10e7   :  { %4936 = dma.vmem_to_hbm [thread:$0]  %s4932_s20, 32, %s4934_s7, [#allocation5]  }
0x10ea   :  { %v4684_v20 = vpop.f32.mrf.mxu1 }
0x10eb   :  { %v4923_v0 = vpop.f32.mrf.mxu2  ;;  %v4685_v9 = vadd.f32 %v4684_v20, %v9135_v46 }
0x10ed   :  { %v4699_v38 = vmax.f32 %v4685_v9, 0.0 }
0x10f2   :  { %v4686_v18 = vpop.f32.mrf.mxu1 }
0x10f3   :  { %v4687_v15 = vadd.f32 %v4686_v18, %v9135_v46 }
0x10f5   :  { %v4700_v22 = vmax.f32 %v4687_v15, 0.0 }
0x10f7   :  { %v4706_v8 = vpack.c.bf16 %v4700_v22, %v4699_v38 }
0x10f9   :  { %4796 = vmatmul.bf16.gmra.mxu3 %v4706_v8 }
0x112a   :  { %v4794_v23 = vpop.f32.mrf.mxu3 }
0x1132   :  { %v4795_v59 = vpop.f32.mrf.mxu3 }
0x117c   :  { %v4797_v63 = vpop.f32.mrf.mxu3 }
0x1184   :  { %v4798_v13 = vpop.f32.mrf.mxu3 }
0x1185   :  { %5834 = dma.done.wait [#allocation5], 32  }
0x1186   :  { %5835 = vsyncadd [#allocation5], 4294967264 }
0x1187   :  { %4941 = vsyncpa [#allocation5], 1 }

</bundles_post_ra>
